<compile_context>
chip_gen: v7x
topology: tpu7x:2x2x1
jax: 0.10.0
libtpu: 0.0.40
codegen_flags: <defaults>
</compile_context>

<pallas_src>
import jax
import jax.numpy as jnp
from jax.experimental import pallas as pl
from jax.experimental.pallas import tpu as pltpu

IN_DIM = 64600    # fc1 in_features
HID_DIM = 256     # fc1 out_features / fc2 in_features
OUT_DIM = 1024    # fc2 out_features (feature_dim)

TK = 8192         # K tile (multiple of 128): 8 MiB of f32 W1 per tile
NUM_K_SPLITS = 2  # leading parallel grid axis (shards W1 stream on v7x megacore)
# Pad the contraction dim once to a multiple of NUM_K_SPLITS*TK (zero padding
# is exact for a matmul). 64600 -> 65536.
K_PAD = ((IN_DIM + NUM_K_SPLITS * TK - 1) // (NUM_K_SPLITS * TK)) * (NUM_K_SPLITS * TK)


def _fc1_partial_kernel(x_ref, w1_ref, p_ref):
    """Accumulate one K-split of fc1 (x @ W1) into an f32 partial (B, 256).

    Grid = (split, k_tile). The output block index depends only on `split`,
    so p_ref stays resident in VMEM across the k axis (accumulator)."""
    @pl.when(pl.program_id(1) == 0)
    def _():
        p_ref[...] = jnp.zeros_like(p_ref)

    p_ref[...] += jnp.dot(x_ref[...], w1_ref[...],
                          preferred_element_type=jnp.float32)


def _mlp_epilogue_kernel(p_ref, b1_ref, w2_ref, b2_ref, o_ref):
    """Combine the K-split partials, apply fc1 bias + ReLU, then fc2 + bias."""
    p = p_ref[...]                                   # (NUM_K_SPLITS, B, 256) f32
    h = jnp.maximum(p[0] + p[1] + b1_ref[...], 0.0)  # (B, 256)
    o_ref[...] = (jnp.dot(h, w2_ref[...], preferred_element_type=jnp.float32)
                  + b2_ref[...]).astype(o_ref.dtype)


def prepare_params(w1, b1, w2, b2):
    """One-time parameter prep: pad W1 to K_PAD (the ~66 MB copy happens HERE,
    not per forward call) and reshape biases to row vectors."""
    assert w1.shape == (IN_DIM, HID_DIM) and w2.shape == (HID_DIM, OUT_DIM)
    w1_padded = jnp.pad(w1, ((0, K_PAD - IN_DIM), (0, 0)))
    return w1_padded, b1.reshape(1, HID_DIM), w2, b2.reshape(1, OUT_DIM)


def contrastive_mlp_forward(x, w1_padded, b1_row, w2, b2_row):
    """x: (B, 64600) f32; w1_padded: (K_PAD, 256); b1_row: (1, 256);
    w2: (256, 1024); b2_row: (1, 1024). Returns (B, 1024) f32."""
    B, K = x.shape
    assert K == IN_DIM and w1_padded.shape == (K_PAD, HID_DIM)

    # Only x is padded per call (tiny compared with the W1 stream).
    x_p = jnp.pad(x, ((0, 0), (0, K_PAD - IN_DIM)))
    nk_half = K_PAD // (NUM_K_SPLITS * TK)  # K tiles per split

    # Stage 1: K-split fc1 partial sums, streaming W1 once from HBM.
    partials = pl.pallas_call(
        _fc1_partial_kernel,
        out_shape=jax.ShapeDtypeStruct((NUM_K_SPLITS, B, HID_DIM), jnp.float32),
        grid_spec=pltpu.PrefetchScalarGridSpec(
            num_scalar_prefetch=0,
            grid=(NUM_K_SPLITS, nk_half),            # (parallel split, K reduction)
            in_specs=[
                pl.BlockSpec((B, TK),
                             lambda c, k: (0, c * nk_half + k)),        # x tile
                pl.BlockSpec((TK, HID_DIM),
                             lambda c, k: (c * nk_half + k, 0)),        # W1 tile
            ],
            out_specs=pl.BlockSpec((None, B, HID_DIM),
                                   lambda c, k: (c, 0, 0)),             # partial acc
        ),
        compiler_params=pltpu.CompilerParams(
            dimension_semantics=("parallel", "arbitrary"),
            vmem_limit_bytes=48 * 1024 * 1024,
        ),
        cost_estimate=pl.CostEstimate(
            flops=2 * B * K_PAD * HID_DIM,
            transcendentals=0,
            bytes_accessed=4 * (B * K_PAD + K_PAD * HID_DIM
                                + NUM_K_SPLITS * B * HID_DIM),
        ),
    )(x_p, w1_padded)

    # Stage 2: tiny fused epilogue (combine partials + bias + ReLU + fc2 + bias).
    out = pl.pallas_call(
        _mlp_epilogue_kernel,
        out_shape=jax.ShapeDtypeStruct((B, OUT_DIM), x.dtype),
        grid_spec=pltpu.PrefetchScalarGridSpec(
            num_scalar_prefetch=0,
            grid=(1,),
            in_specs=[
                pl.BlockSpec((NUM_K_SPLITS, B, HID_DIM), lambda i: (0, 0, 0)),
                pl.BlockSpec((1, HID_DIM), lambda i: (0, 0)),
                pl.BlockSpec((HID_DIM, OUT_DIM), lambda i: (0, 0)),
                pl.BlockSpec((1, OUT_DIM), lambda i: (0, 0)),
            ],
            out_specs=pl.BlockSpec((B, OUT_DIM), lambda i: (0, 0)),
        ),
        compiler_params=pltpu.CompilerParams(
            dimension_semantics=("arbitrary",),
        ),
        cost_estimate=pl.CostEstimate(
            flops=2 * B * HID_DIM * OUT_DIM,
            transcendentals=0,
            bytes_accessed=4 * (NUM_K_SPLITS * B * HID_DIM
                                + HID_DIM * OUT_DIM + B * OUT_DIM),
        ),
    )(partials, b1_row, w2, b2_row)
    return out


if __name__ == "__main__":
    key = jax.random.PRNGKey(0)
    k_x, k_w1, k_b1, k_w2, k_b2 = jax.random.split(key, 5)

    B = 2  # small batch; feature dims are fixed by the module definition
    x = jax.random.normal(k_x, (B, IN_DIM), dtype=jnp.float32)

    # Deterministic parameter init mimicking nn.Linear's U(-1/sqrt(in), 1/sqrt(in)).
    lim1 = 1.0 / (IN_DIM ** 0.5)
    w1 = jax.random.uniform(k_w1, (IN_DIM, HID_DIM), jnp.float32, -lim1, lim1)
    b1 = jax.random.uniform(k_b1, (HID_DIM,), jnp.float32, -lim1, lim1)
    lim2 = 1.0 / (HID_DIM ** 0.5)
    w2 = jax.random.uniform(k_w2, (HID_DIM, OUT_DIM), jnp.float32, -lim2, lim2)
    b2 = jax.random.uniform(k_b2, (OUT_DIM,), jnp.float32, -lim2, lim2)

    # One-time parameter prep (the 66 MB W1 pad happens here, outside the
    # per-call forward path).
    w1_p, b1_row, w2_p, b2_row = prepare_params(w1, b1, w2, b2)

    fwd = jax.jit(contrastive_mlp_forward)
    out = jax.block_until_ready(fwd(x, w1_p, b1_row, w2_p, b2_row))

    # Pure-JAX reference check.
    ref = jnp.maximum(x @ w1 + b1, 0.0) @ w2 + b2
    assert out.shape == (B, OUT_DIM)
    assert jnp.allclose(out, ref, atol=1e-3, rtol=1e-3)
    print("KERNEL_OK")
</pallas_src>

<mosaic_0001>
module attributes {stable_mosaic.version = 11 : i64} {
  func.func @_mlp_epilogue_kernel(%arg0: i32, %arg1: memref<2x2x256xf32, #tpu.memory_space<vmem>>, %arg2: memref<1x256xf32, #tpu.memory_space<vmem>>, %arg3: memref<256x1024xf32, #tpu.memory_space<vmem>>, %arg4: memref<1x1024xf32, #tpu.memory_space<vmem>>, %arg5: memref<2x1024xf32, #tpu.memory_space<vmem>>) attributes {dimension_semantics = [#tpu.dimension_semantics<arbitrary>], iteration_bounds = array<i64: 1>, scalar_prefetch = 0 : i64, scratch_operands = 0 : i64, tpu.core_type = #tpu.core_type<tc>, window_params = [{pipeline_mode = #tpu.pipeline_mode<synchronous>, transform_indices = @transform_0, window_bounds = array<i64: 2, 2, 256>}, {pipeline_mode = #tpu.pipeline_mode<synchronous>, transform_indices = @transform_1, window_bounds = array<i64: 1, 256>}, {pipeline_mode = #tpu.pipeline_mode<synchronous>, transform_indices = @transform_2, window_bounds = array<i64: 256, 1024>}, {pipeline_mode = #tpu.pipeline_mode<synchronous>, transform_indices = @transform_3, window_bounds = array<i64: 1, 1024>}, {pipeline_mode = #tpu.pipeline_mode<synchronous>, transform_indices = @transform_4, window_bounds = array<i64: 2, 1024>}]} {
    %c0 = arith.constant 0 : index
    %c0_0 = arith.constant 0 : index
    %c0_1 = arith.constant 0 : index
    %0 = vector.load %arg1[%c0, %c0_0, %c0_1] : memref<2x2x256xf32, #tpu.memory_space<vmem>>, vector<2x2x256xf32>
    %1 = vector.extract_strided_slice %0 {offsets = [0, 0, 0], sizes = [1, 2, 256], strides = [1, 1, 1]} : vector<2x2x256xf32> to vector<1x2x256xf32>
    %2 = vector.shape_cast %1 : vector<1x2x256xf32> to vector<2x256xf32>
    %3 = vector.extract_strided_slice %0 {offsets = [1, 0, 0], sizes = [1, 2, 256], strides = [1, 1, 1]} : vector<2x2x256xf32> to vector<1x2x256xf32>
    %4 = vector.shape_cast %3 : vector<1x2x256xf32> to vector<2x256xf32>
    %5 = arith.addf %2, %4 : vector<2x256xf32>
    %c0_2 = arith.constant 0 : index
    %c0_3 = arith.constant 0 : index
    %6 = vector.load %arg2[%c0_2, %c0_3] : memref<1x256xf32, #tpu.memory_space<vmem>>, vector<1x256xf32>
    %7 = vector.broadcast %6 : vector<1x256xf32> to vector<2x256xf32>
    %8 = arith.addf %5, %7 : vector<2x256xf32>
    %cst = arith.constant 0.000000e+00 : f32
    %9 = vector.broadcast %cst : f32 to vector<2x256xf32>
    %10 = arith.maximumf %8, %9 : vector<2x256xf32>
    %c0_4 = arith.constant 0 : index
    %c0_5 = arith.constant 0 : index
    %11 = vector.load %arg3[%c0_4, %c0_5] : memref<256x1024xf32, #tpu.memory_space<vmem>>, vector<256x1024xf32>
    %cst_6 = arith.constant dense<0.000000e+00> : vector<2x1024xf32>
    %12 = tpu.matmul %10, %11, %cst_6 {dimension_numbers = #tpu.dot_dimension_numbers<[1], [0], [0], [1], [0, 0, 1, 1], [], []>} : vector<2x256xf32>, vector<256x1024xf32>, vector<2x1024xf32> -> vector<2x1024xf32>
    %c0_7 = arith.constant 0 : index
    %c0_8 = arith.constant 0 : index
    %13 = vector.load %arg4[%c0_7, %c0_8] : memref<1x1024xf32, #tpu.memory_space<vmem>>, vector<1x1024xf32>
    %14 = vector.broadcast %13 : vector<1x1024xf32> to vector<2x1024xf32>
    %15 = arith.addf %12, %14 : vector<2x1024xf32>
    %c0_9 = arith.constant 0 : index
    %c0_10 = arith.constant 0 : index
    %16 = vector.load %arg5[%c0_9, %c0_10] : memref<2x1024xf32, #tpu.memory_space<vmem>>, vector<2x1024xf32>
    tpu.vector_store %arg5[%c0_9, %c0_10], %15 {strides = array<i32>} : memref<2x1024xf32, #tpu.memory_space<vmem>>, vector<2x1024xf32>,
    return
  }
  func.func @transform_0(%arg0: i32) -> (i32, i32, i32) {
    %c0_i32 = arith.constant 0 : i32
    %c0_i32_0 = arith.constant 0 : i32
    %c0_i32_1 = arith.constant 0 : i32
    %c0_i32_2 = arith.constant 0 : i32
    return %c0_i32, %c0_i32_0, %c0_i32_1 : i32, i32, i32
  }
  func.func @transform_1(%arg0: i32) -> (i32, i32) {
    %c0_i32 = arith.constant 0 : i32
    %c0_i32_0 = arith.constant 0 : i32
    %c0_i32_1 = arith.constant 0 : i32
    return %c0_i32, %c0_i32_0 : i32, i32
  }
  func.func @transform_2(%arg0: i32) -> (i32, i32) {
    %c0_i32 = arith.constant 0 : i32
    %c0_i32_0 = arith.constant 0 : i32
    %c0_i32_1 = arith.constant 0 : i32
    return %c0_i32, %c0_i32_0 : i32, i32
  }
  func.func @transform_3(%arg0: i32) -> (i32, i32) {
    %c0_i32 = arith.constant 0 : i32
    %c0_i32_0 = arith.constant 0 : i32
    %c0_i32_1 = arith.constant 0 : i32
    return %c0_i32, %c0_i32_0 : i32, i32
  }
  func.func @transform_4(%arg0: i32) -> (i32, i32) {
    %c0_i32 = arith.constant 0 : i32
    %c0_i32_0 = arith.constant 0 : i32
    %c0_i32_1 = arith.constant 0 : i32
    return %c0_i32, %c0_i32_0 : i32, i32
  }
}

module attributes {stable_mosaic.version = 11 : i64} {
  func.func @_fc1_partial_kernel(%arg0: i32, %arg1: i32, %arg2: memref<2x8192xf32, #tpu.memory_space<vmem>>, %arg3: memref<8192x256xf32, #tpu.memory_space<vmem>>, %arg4: memref<1x2x256xf32, #tpu.memory_space<vmem>>) attributes {dimension_semantics = [#tpu.dimension_semantics<parallel>, #tpu.dimension_semantics<arbitrary>], iteration_bounds = array<i64: 2, 4>, scalar_prefetch = 0 : i64, scratch_operands = 0 : i64, tpu.core_type = #tpu.core_type<tc>, window_params = [{transform_indices = @transform_0, window_bounds = array<i64: 2, 8192>}, {transform_indices = @transform_1, window_bounds = array<i64: 8192, 256>}, {transform_indices = @transform_2, window_bounds = array<i64: 1, 2, 256>}]} {
    %c0_i32 = arith.constant 0 : i32
    %0 = arith.cmpi eq, %arg1, %c0_i32 : i32
    %1 = arith.extui %0 : i1 to i32
    %c0_i32_0 = arith.constant 0 : i32
    %2 = arith.cmpi ne, %1, %c0_i32_0 : i32
    scf.if %2 {
      %cst_10 = arith.constant 0.000000e+00 : f32
      %12 = vector.broadcast %cst_10 : f32 to vector<2x256xf32>
      %c0_11 = arith.constant 0 : index
      %c0_12 = arith.constant 0 : index
      %c0_13 = arith.constant 0 : index
      %13 = vector.load %arg4[%c0_11, %c0_12, %c0_13] : memref<1x2x256xf32, #tpu.memory_space<vmem>>, vector<1x2x256xf32>
      %14 = vector.shape_cast %13 : vector<1x2x256xf32> to vector<2x256xf32>
      %15 = vector.shape_cast %12 : vector<2x256xf32> to vector<1x2x256xf32>
      tpu.vector_store %arg4[%c0_11, %c0_12, %c0_13], %15 {strides = array<i32>} : memref<1x2x256xf32, #tpu.memory_space<vmem>>, vector<1x2x256xf32>,
    } else {
    }
    %c0 = arith.constant 0 : index
    %c0_1 = arith.constant 0 : index
    %c0_2 = arith.constant 0 : index
    %3 = vector.load %arg4[%c0, %c0_1, %c0_2] : memref<1x2x256xf32, #tpu.memory_space<vmem>>, vector<1x2x256xf32>
    %4 = vector.shape_cast %3 : vector<1x2x256xf32> to vector<2x256xf32>
    %c0_3 = arith.constant 0 : index
    %c0_4 = arith.constant 0 : index
    %5 = vector.load %arg2[%c0_3, %c0_4] : memref<2x8192xf32, #tpu.memory_space<vmem>>, vector<2x8192xf32>
    %c0_5 = arith.constant 0 : index
    %c0_6 = arith.constant 0 : index
    %6 = vector.load %arg3[%c0_5, %c0_6] : memref<8192x256xf32, #tpu.memory_space<vmem>>, vector<8192x256xf32>
    %cst = arith.constant dense<0.000000e+00> : vector<2x256xf32>
    %7 = tpu.matmul %5, %6, %cst {dimension_numbers = #tpu.dot_dimension_numbers<[1], [0], [0], [1], [0, 0, 1, 1], [], []>} : vector<2x8192xf32>, vector<8192x256xf32>, vector<2x256xf32> -> vector<2x256xf32>
    %8 = arith.addf %4, %7 : vector<2x256xf32>
    %c0_7 = arith.constant 0 : index
    %c0_8 = arith.constant 0 : index
    %c0_9 = arith.constant 0 : index
    %9 = vector.load %arg4[%c0_7, %c0_8, %c0_9] : memref<1x2x256xf32, #tpu.memory_space<vmem>>, vector<1x2x256xf32>
    %10 = vector.shape_cast %9 : vector<1x2x256xf32> to vector<2x256xf32>
    %11 = vector.shape_cast %8 : vector<2x256xf32> to vector<1x2x256xf32>
    tpu.vector_store %arg4[%c0_7, %c0_8, %c0_9], %11 {strides = array<i32>} : memref<1x2x256xf32, #tpu.memory_space<vmem>>, vector<1x2x256xf32>,
    return
  }
  func.func @transform_0(%arg0: i32, %arg1: i32) -> (i32, i32) {
    %c4_i32 = arith.constant 4 : i32
    %0 = arith.muli %arg0, %c4_i32 : i32
    %1 = arith.addi %0, %arg1 : i32
    %c0_i32 = arith.constant 0 : i32
    %c0_i32_0 = arith.constant 0 : i32
    return %c0_i32, %1 : i32, i32
  }
  func.func @transform_1(%arg0: i32, %arg1: i32) -> (i32, i32) {
    %c4_i32 = arith.constant 4 : i32
    %0 = arith.muli %arg0, %c4_i32 : i32
    %1 = arith.addi %0, %arg1 : i32
    %c0_i32 = arith.constant 0 : i32
    %c0_i32_0 = arith.constant 0 : i32
    return %1, %c0_i32 : i32, i32
  }
  func.func @transform_2(%arg0: i32, %arg1: i32) -> (i32, i32, i32) {
    %c0_i32 = arith.constant 0 : i32
    %c0_i32_0 = arith.constant 0 : i32
    %c0_i32_1 = arith.constant 0 : i32
    return %arg0, %c0_i32, %c0_i32_0 : i32, i32, i32
  }
}

</mosaic_0001>

<bundles_post_ra>
// kernel: contrastive_mlp_forward.3
= control target key start
LH: loop header
LB: loop body
LE: loop exit
PB: predicated region body
PF: predicated region fallthrough
CT: control target
= control target key end

     0   :  { %s1837_s0 = inlined_call_operand.vmem [shape: f32[2,2,256], index: 0, kind: input, shape index: {}]   ;;  %s1838_s1 = inlined_call_operand.vmem [shape: f32[1,256], index: 1, kind: input, shape index: {}]   ;;  %s1839_s2 = inlined_call_operand.vmem [shape: f32[256,1024], index: 2, kind: input, shape index: {}]   ;;  %s1840_s3 = inlined_call_operand.vmem [shape: f32[1,1024], index: 3, kind: input, shape index: {}]   ;;  %s1841_s4 = inlined_call_operand.hbm [shape: f32[2,1024], index: 4, kind: output, shape index: {}]  }
   0x1   :  { %v43_v0 = vld [vmem:[%s1839_s2 + $0x8] sm:$0xff]  ;;  %v45_v2 = vld [vmem:[%s1839_s2 + $0x18] sm:$0xff]  ;;  %v42_v5 = vld [vmem:[%s1839_s2] sm:$0xff] }
   0x2   :  { %v51_v1 = vld [vmem:[%s1839_s2 + $0x48] sm:$0xff]  ;;  %v53_v4 = vld [vmem:[%s1839_s2 + $0x58] sm:$0xff]  ;;  %v50_v6 = vld [vmem:[%s1839_s2 + $0x40] sm:$0xff] }
   0x3   :  { %v695_v3 = vpack.c.bf16 %v51_v1, %v43_v0  ;;  %v759_v7 = vpack.c.bf16 %v53_v4, %v45_v2  ;;  %v697_v8 = vpack.c.bf16 %v50_v6, %v42_v5  ;;  %v44_v9 = vld [vmem:[%s1839_s2 + $0x10] sm:$0xff]  ;;  %v59_v11 = vld [vmem:[%s1839_s2 + $0x88] sm:$0xff]  ;;  %v61_v14 = vld [vmem:[%s1839_s2 + $0x98] sm:$0xff] }
   0x4   :  { %v52_v10 = vld [vmem:[%s1839_s2 + $0x50] sm:$0xff]  ;;  %v67_v13 = vld [vmem:[%s1839_s2 + $0xc8] sm:$0xff]  ;;  %v69_v15 = vld [vmem:[%s1839_s2 + $0xd8] sm:$0xff] }
   0x5   :  { %696 = vmatprep.subr.bf16.mxu0 %v695_v3  ;;  %v761_v12 = vpack.c.bf16 %v52_v10, %v44_v9  ;;  %760 = vmatprep.subr.bf16.mxu1 %v759_v7  ;;  %v699_v16 = vpack.c.bf16 %v67_v13, %v59_v11  ;;  %v763_v17 = vpack.c.bf16 %v69_v15, %v61_v14  ;;  %v58_v18 = vld [vmem:[%s1839_s2 + $0x80] sm:$0xff]  ;;  %v60_v20 = vld [vmem:[%s1839_s2 + $0x90] sm:$0xff]  ;;  %v75_v23 = vld [vmem:[%s1839_s2 + $0x108] sm:$0xff] }
   0x6   :  { %698 = vmatpush1.bf16.msra.mxu0 %v697_v8  ;;  %v66_v19 = vld [vmem:[%s1839_s2 + $0xc0] sm:$0xff]  ;;  %v68_v22 = vld [vmem:[%s1839_s2 + $0xd0] sm:$0xff]  ;;  %v83_v24 = vld [vmem:[%s1839_s2 + $0x148] sm:$0xff] }
   0x7   :  { %762 = vmatpush1.bf16.msra.mxu1 %v761_v12  ;;  %v701_v21 = vpack.c.bf16 %v66_v19, %v58_v18  ;;  %700 = vmatprep.subr.bf16.mxu0 %v699_v16  ;;  %v765_v25 = vpack.c.bf16 %v68_v22, %v60_v20  ;;  %v703_v26 = vpack.c.bf16 %v83_v24, %v75_v23  ;;  %v77_v27 = vld [vmem:[%s1839_s2 + $0x118] sm:$0xff]  ;;  %v74_v29 = vld [vmem:[%s1839_s2 + $0x100] sm:$0xff]  ;;  %v76_v32 = vld [vmem:[%s1839_s2 + $0x110] sm:$0xff] }
   0x8   :  { %764 = vmatprep.subr.bf16.mxu1 %v763_v17  ;;  %v85_v28 = vld [vmem:[%s1839_s2 + $0x158] sm:$0xff]  ;;  %v82_v31 = vld [vmem:[%s1839_s2 + $0x140] sm:$0xff]  ;;  %v84_v33 = vld [vmem:[%s1839_s2 + $0x150] sm:$0xff] }
   0x9   :  { %v767_v30 = vpack.c.bf16 %v85_v28, %v77_v27  ;;  %v705_v34 = vpack.c.bf16 %v82_v31, %v74_v29  ;;  %v91_v35 = vld [vmem:[%s1839_s2 + $0x188] sm:$0xff]  ;;  %v93_v37 = vld [vmem:[%s1839_s2 + $0x198] sm:$0xff]  ;;  %v769_v38 = vpack.c.bf16 %v84_v33, %v76_v32  ;;  %v90_v41 = vld [vmem:[%s1839_s2 + $0x180] sm:$0xff] }
   0xa   :  { %702 = vmatpush1.bf16.msra.mxu0 %v701_v21  ;;  %v99_v36 = vld [vmem:[%s1839_s2 + $0x1c8] sm:$0xff]  ;;  %v101_v40 = vld [vmem:[%s1839_s2 + $0x1d8] sm:$0xff]  ;;  %v98_v42 = vld [vmem:[%s1839_s2 + $0x1c0] sm:$0xff] }
   0xb   :  { %766 = vmatpush1.bf16.msra.mxu1 %v765_v25  ;;  %704 = vmatprep.subr.bf16.mxu0 %v703_v26  ;;  %v707_v39 = vpack.c.bf16 %v99_v36, %v91_v35  ;;  %v771_v43 = vpack.c.bf16 %v101_v40, %v93_v37  ;;  %v92_v44 = vld [vmem:[%s1839_s2 + $0x190] sm:$0xff]  ;;  %v107_v46 = vld [vmem:[%s1839_s2 + $0x208] sm:$0xff]  ;;  %v109_v48 = vld [vmem:[%s1839_s2 + $0x218] sm:$0xff]  ;;  %v709_v50 = vpack.c.bf16 %v98_v42, %v90_v41 }
   0xc   :  { %768 = vmatprep.subr.bf16.mxu1 %v767_v30  ;;  %v100_v45 = vld [vmem:[%s1839_s2 + $0x1d0] sm:$0xff]  ;;  %v115_v47 = vld [vmem:[%s1839_s2 + $0x248] sm:$0xff]  ;;  %v117_v49 = vld [vmem:[%s1839_s2 + $0x258] sm:$0xff] }
   0xd   :  { %v773_v51 = vpack.c.bf16 %v100_v45, %v92_v44  ;;  %v711_v52 = vpack.c.bf16 %v115_v47, %v107_v46  ;;  %v106_v53 = vld [vmem:[%s1839_s2 + $0x200] sm:$0xff]  ;;  %v108_v55 = vld [vmem:[%s1839_s2 + $0x210] sm:$0xff]  ;;  %v775_v56 = vpack.c.bf16 %v117_v49, %v109_v48  ;;  %v123_v58 = vld [vmem:[%s1839_s2 + $0x288] sm:$0xff]  ;;  %v23_v47 = vlaneseq }
   0xe   :  { %706 = vmatpush1.bf16.msra.mxu0 %v705_v34  ;;  %v114_v54 = vld [vmem:[%s1839_s2 + $0x240] sm:$0xff]  ;;  %v116_v57 = vld [vmem:[%s1839_s2 + $0x250] sm:$0xff]  ;;  %v131_v59 = vld [vmem:[%s1839_s2 + $0x2c8] sm:$0xff] }
   0xf   :  { %770 = vmatpush1.bf16.msra.mxu1 %v769_v38  ;;  %708 = vmatprep.subr.bf16.mxu0 %v707_v39  ;;  %v125_v60 = vld [vmem:[%s1839_s2 + $0x298] sm:$0xff]  ;;  %v713_v62 = vpack.c.bf16 %v114_v54, %v106_v53  ;;  %v777_v63 = vpack.c.bf16 %v116_v57, %v108_v55  ;;  %v715_v0 = vpack.c.bf16 %v131_v59, %v123_v58  ;;  %v122_v1 = vld [vmem:[%s1839_s2 + $0x280] sm:$0xff]  ;;  %v124_v3 = vld [vmem:[%s1839_s2 + $0x290] sm:$0xff] }
  0x10   :  { %772 = vmatprep.subr.bf16.mxu1 %v771_v43  ;;  %v133_v61 = vld [vmem:[%s1839_s2 + $0x2d8] sm:$0xff]  ;;  %v130_v2 = vld [vmem:[%s1839_s2 + $0x2c0] sm:$0xff]  ;;  %v132_v5 = vld [vmem:[%s1839_s2 + $0x2d0] sm:$0xff] }
  0x11   :  { %v779_v4 = vpack.c.bf16 %v133_v61, %v125_v60  ;;  %v139_v6 = vld [vmem:[%s1839_s2 + $0x308] sm:$0xff]  ;;  %v141_v8 = vld [vmem:[%s1839_s2 + $0x318] sm:$0xff]  ;;  %v717_v10 = vpack.c.bf16 %v130_v2, %v122_v1  ;;  %v781_v11 = vpack.c.bf16 %v132_v5, %v124_v3  ;;  %v138_v13 = vld [vmem:[%s1839_s2 + $0x300] sm:$0xff]  ;;  %v1256_v60 = vshrl.u32 %v23_v47, 7 }
  0x12   :  { %710 = vmatpush1.bf16.msra.mxu0 %v709_v50  ;;  %v147_v7 = vld [vmem:[%s1839_s2 + $0x348] sm:$0xff]  ;;  %v149_v9 = vld [vmem:[%s1839_s2 + $0x358] sm:$0xff]  ;;  %v146_v14 = vld [vmem:[%s1839_s2 + $0x340] sm:$0xff]  ;;  %v977_v61 = vmov 1983009808  }
  0x13   :  { %774 = vmatpush1.bf16.msra.mxu1 %v773_v51  ;;  %712 = vmatprep.subr.bf16.mxu0 %v711_v52  ;;  %v719_v12 = vpack.c.bf16 %v147_v7, %v139_v6  ;;  %v140_v15 = vld [vmem:[%s1839_s2 + $0x310] sm:$0xff]  ;;  %v783_v16 = vpack.c.bf16 %v149_v9, %v141_v8  ;;  %v155_v18 = vld [vmem:[%s1839_s2 + $0x388] sm:$0xff]  ;;  %v157_v20 = vld [vmem:[%s1839_s2 + $0x398] sm:$0xff]  ;;  %v721_v22 = vpack.c.bf16 %v146_v14, %v138_v13  ;;  %v25_v13 = vsub.s32 0, %v1256_v60 }
  0x14   :  { %776 = vmatprep.subr.bf16.mxu1 %v775_v56  ;;  %v148_v17 = vld [vmem:[%s1839_s2 + $0x350] sm:$0xff]  ;;  %v163_v19 = vld [vmem:[%s1839_s2 + $0x3c8] sm:$0xff]  ;;  %v165_v21 = vld [vmem:[%s1839_s2 + $0x3d8] sm:$0xff]  ;;  %v29_v14 = vsub.s32 1, %v1256_v60 }
  0x15   :  { %v785_v23 = vpack.c.bf16 %v148_v17, %v140_v15  ;;  %v723_v24 = vpack.c.bf16 %v163_v19, %v155_v18  ;;  %v154_v25 = vld [vmem:[%s1839_s2 + $0x380] sm:$0xff]  ;;  %v156_v27 = vld [vmem:[%s1839_s2 + $0x390] sm:$0xff]  ;;  %v787_v28 = vpack.c.bf16 %v165_v21, %v157_v20  ;;  %v171_v30 = vld [vmem:[%s1839_s2 + $0x408] sm:$0xff] }
  0x16   :  { %714 = vmatpush1.bf16.msra.mxu0 %v713_v62  ;;  %v162_v26 = vld [vmem:[%s1839_s2 + $0x3c0] sm:$0xff]  ;;  %v164_v29 = vld [vmem:[%s1839_s2 + $0x3d0] sm:$0xff]  ;;  %v179_v31 = vld [vmem:[%s1839_s2 + $0x448] sm:$0xff]  ;;  %v33_v62 = vunpack.c.l.s4 %v977_v61 }
  0x17   :  { %778 = vmatpush1.bf16.msra.mxu1 %v777_v63  ;;  %716 = vmatprep.subr.bf16.mxu0 %v715_v0  ;;  %v173_v32 = vld [vmem:[%s1839_s2 + $0x418] sm:$0xff]  ;;  %v725_v34 = vpack.c.bf16 %v162_v26, %v154_v25  ;;  %v789_v35 = vpack.c.bf16 %v164_v29, %v156_v27  ;;  %v727_v36 = vpack.c.bf16 %v179_v31, %v171_v30  ;;  %v170_v37 = vld [vmem:[%s1839_s2 + $0x400] sm:$0xff]  ;;  %v172_v39 = vld [vmem:[%s1839_s2 + $0x410] sm:$0xff] }
  0x18   :  { %780 = vmatprep.subr.bf16.mxu1 %v779_v4  ;;  %v181_v33 = vld [vmem:[%s1839_s2 + $0x458] sm:$0xff]  ;;  %v178_v38 = vld [vmem:[%s1839_s2 + $0x440] sm:$0xff]  ;;  %v180_v41 = vld [vmem:[%s1839_s2 + $0x450] sm:$0xff]  ;;  %v34_v15 = vunpack.c.0.s8 %v33_v62 }
  0x19   :  { %v791_v40 = vpack.c.bf16 %v181_v33, %v173_v32  ;;  %v187_v42 = vld [vmem:[%s1839_s2 + $0x488] sm:$0xff]  ;;  %v189_v44 = vld [vmem:[%s1839_s2 + $0x498] sm:$0xff]  ;;  %v729_v46 = vpack.c.bf16 %v178_v38, %v170_v37  ;;  %v793_v48 = vpack.c.bf16 %v180_v41, %v172_v39  ;;  %v186_v50 = vld [vmem:[%s1839_s2 + $0x480] sm:$0xff] }
  0x1a   :  { %718 = vmatpush1.bf16.msra.mxu0 %v717_v10  ;;  %v195_v43 = vld [vmem:[%s1839_s2 + $0x4c8] sm:$0xff]  ;;  %v197_v45 = vld [vmem:[%s1839_s2 + $0x4d8] sm:$0xff]  ;;  %v194_v51 = vld [vmem:[%s1839_s2 + $0x4c0] sm:$0xff]  ;;  %v1322_v31 = vsub.s32 %v34_v15, %v1256_v60 }
  0x1b   :  { %782 = vmatpush1.bf16.msra.mxu1 %v781_v11  ;;  %720 = vmatprep.subr.bf16.mxu0 %v719_v12  ;;  %v731_v49 = vpack.c.bf16 %v195_v43, %v187_v42  ;;  %v188_v52 = vld [vmem:[%s1839_s2 + $0x490] sm:$0xff]  ;;  %v795_v53 = vpack.c.bf16 %v197_v45, %v189_v44  ;;  %v203_v55 = vld [vmem:[%s1839_s2 + $0x508] sm:$0xff]  ;;  %v205_v57 = vld [vmem:[%s1839_s2 + $0x518] sm:$0xff]  ;;  %v733_v59 = vpack.c.bf16 %v194_v51, %v186_v50 }
  0x1c   :  { %784 = vmatprep.subr.bf16.mxu1 %v783_v16  ;;  %v196_v54 = vld [vmem:[%s1839_s2 + $0x4d0] sm:$0xff]  ;;  %v211_v56 = vld [vmem:[%s1839_s2 + $0x548] sm:$0xff]  ;;  %v213_v58 = vld [vmem:[%s1839_s2 + $0x558] sm:$0xff] }
  0x1d   :  { %v797_v63 = vpack.c.bf16 %v196_v54, %v188_v52  ;;  %v735_v0 = vpack.c.bf16 %v211_v56, %v203_v55  ;;  %v202_v1 = vld [vmem:[%s1839_s2 + $0x500] sm:$0xff]  ;;  %v204_v3 = vld [vmem:[%s1839_s2 + $0x510] sm:$0xff]  ;;  %v799_v4 = vpack.c.bf16 %v213_v58, %v205_v57  ;;  %v219_v6 = vld [vmem:[%s1839_s2 + $0x588] sm:$0xff] }
  0x1e   :  { %722 = vmatpush1.bf16.msra.mxu0 %v721_v22  ;;  %v210_v2 = vld [vmem:[%s1839_s2 + $0x540] sm:$0xff]  ;;  %v212_v5 = vld [vmem:[%s1839_s2 + $0x550] sm:$0xff]  ;;  %v227_v7 = vld [vmem:[%s1839_s2 + $0x5c8] sm:$0xff] }
  0x1f   :  { %786 = vmatpush1.bf16.msra.mxu1 %v785_v23  ;;  %724 = vmatprep.subr.bf16.mxu0 %v723_v24  ;;  %v221_v8 = vld [vmem:[%s1839_s2 + $0x598] sm:$0xff]  ;;  %v737_v10 = vpack.c.bf16 %v210_v2, %v202_v1  ;;  %v218_v11 = vld [vmem:[%s1839_s2 + $0x580] sm:$0xff]  ;;  %v801_v16 = vpack.c.bf16 %v212_v5, %v204_v3  ;;  %v739_v17 = vpack.c.bf16 %v227_v7, %v219_v6  ;;  %v220_v18 = vld [vmem:[%s1839_s2 + $0x590] sm:$0xff] }
  0x20   :  { %788 = vmatprep.subr.bf16.mxu1 %v787_v28  ;;  %v229_v9 = vld [vmem:[%s1839_s2 + $0x5d8] sm:$0xff]  ;;  %v226_v12 = vld [vmem:[%s1839_s2 + $0x5c0] sm:$0xff]  ;;  %v228_v19 = vld [vmem:[%s1839_s2 + $0x5d0] sm:$0xff] }
  0x21   :  { %v235_v20 = vld [vmem:[%s1839_s2 + $0x608] sm:$0xff]  ;;  %v803_v21 = vpack.c.bf16 %v229_v9, %v221_v8  ;;  %v237_v23 = vld [vmem:[%s1839_s2 + $0x618] sm:$0xff]  ;;  %v18_v25 = vld [vmem:[%s1837_s0] sm:$0xf]  ;;  %v741_v28 = vpack.c.bf16 %v226_v12, %v218_v11  ;;  %v805_v32 = vpack.c.bf16 %v228_v19, %v220_v18 }
  0x22   :  { %726 = vmatpush1.bf16.msra.mxu0 %v725_v34  ;;  %v243_v22 = vld [vmem:[%s1839_s2 + $0x648] sm:$0xff]  ;;  %v245_v24 = vld [vmem:[%s1839_s2 + $0x658] sm:$0xff]  ;;  %v19_v26 = vld [vmem:[%s1837_s0 + $0x4] sm:$0xf] }
  0x23   :  { %790 = vmatpush1.bf16.msra.mxu1 %v789_v35  ;;  %728 = vmatprep.subr.bf16.mxu0 %v727_v36  ;;  %v21_v27 = vld [vmem:[%s1838_s1] sm:$0x3]  ;;  %v743_v33 = vpack.c.bf16 %v243_v22, %v235_v20  ;;  %v236_v36 = vld [vmem:[%s1839_s2 + $0x610] sm:$0xff]  ;;  %v807_v37 = vpack.c.bf16 %v245_v24, %v237_v23  ;;  %v251_v39 = vld [vmem:[%s1839_s2 + $0x688] sm:$0xff]  ;;  %v20_v41 = vadd.f32 %v19_v26, %v18_v25 }
  0x24   :  { %792 = vmatprep.subr.bf16.mxu1 %v791_v40  ;;  %v26_v29 = vrot.slane %v21_v27, %v25_v13  ;;  %v30_v30 = vrot.slane %v21_v27, %v29_v14  ;;  %v234_v34 = vld [vmem:[%s1839_s2 + $0x600] sm:$0xff]  ;;  %v244_v38 = vld [vmem:[%s1839_s2 + $0x650] sm:$0xff]  ;;  %v259_v40 = vld [vmem:[%s1839_s2 + $0x6c8] sm:$0xff] }
  0x25   :  { %v242_v35 = vld [vmem:[%s1839_s2 + $0x640] sm:$0xff]  ;;  %v253_v43 = vld [vmem:[%s1839_s2 + $0x698] sm:$0xff]  ;;  %v809_v47 = vpack.c.bf16 %v244_v38, %v236_v36  ;;  %v252_v51 = vld [vmem:[%s1839_s2 + $0x690] sm:$0xff] }
  0x26   :  { %730 = vmatpush1.bf16.msra.mxu0 %v729_v46  ;;  %v31_v42 = vcombine.low %v26_v29, %v30_v30  ;;  %v261_v44 = vld [vmem:[%s1839_s2 + $0x6d8] sm:$0xff]  ;;  %v745_v45 = vpack.c.bf16 %v242_v35, %v234_v34  ;;  %v258_v50 = vld [vmem:[%s1839_s2 + $0x6c0] sm:$0xff]  ;;  %v267_v54 = vld [vmem:[%s1839_s2 + $0x708] sm:$0xff] }
  0x27   :  { %794 = vmatpush1.bf16.msra.mxu1 %v793_v48  ;;  %732 = vmatprep.subr.bf16.mxu0 %v731_v49  ;;  %v747_v48 = vpack.c.bf16 %v259_v40, %v251_v39  ;;  %v250_v49 = vld [vmem:[%s1839_s2 + $0x680] sm:$0xff]  ;;  %v811_v52 = vpack.c.bf16 %v261_v44, %v253_v43  ;;  %v275_v55 = vld [vmem:[%s1839_s2 + $0x748] sm:$0xff]  ;;  %v269_v57 = vld [vmem:[%s1839_s2 + $0x718] sm:$0xff] }
  0x28   :  { %796 = vmatprep.subr.bf16.mxu1 %v795_v53  ;;  %v38_v46 = vrot.slane %v31_v42, %v1322_v31  ;;  %v260_v53 = vld [vmem:[%s1839_s2 + $0x6d0] sm:$0xff]  ;;  %v277_v58 = vld [vmem:[%s1839_s2 + $0x758] sm:$0xff]  ;;  %v274_v1 = vld [vmem:[%s1839_s2 + $0x740] sm:$0xff] }
  0x29   :  { %v813_v62 = vpack.c.bf16 %v260_v53, %v252_v51  ;;  %v268_v2 = vld [vmem:[%s1839_s2 + $0x710] sm:$0xff]  ;;  %v815_v3 = vpack.c.bf16 %v277_v58, %v269_v57  ;;  %v283_v5 = vld [vmem:[%s1839_s2 + $0x788] sm:$0xff]  ;;  %v285_v8 = vld [vmem:[%s1839_s2 + $0x798] sm:$0xff] }
  0x2a   :  { %734 = vmatpush1.bf16.msra.mxu0 %v733_v59  ;;  %v40_v56 = vadd.f32 %v38_v46, %v20_v41  ;;  %v749_v59 = vpack.c.bf16 %v258_v50, %v250_v49  ;;  %v291_v6 = vld [vmem:[%s1839_s2 + $0x7c8] sm:$0xff]  ;;  %v293_v9 = vld [vmem:[%s1839_s2 + $0x7d8] sm:$0xff]  ;;  %v284_v18 = vld [vmem:[%s1839_s2 + $0x790] sm:$0xff] }
  0x2b   :  { %798 = vmatpush1.bf16.msra.mxu1 %v797_v63  ;;  %736 = vmatprep.subr.bf16.mxu0 %v735_v0  ;;  %v751_v63 = vpack.c.bf16 %v275_v55, %v267_v54  ;;  %v266_v0 = vld [vmem:[%s1839_s2 + $0x700] sm:$0xff]  ;;  %v755_v15 = vpack.c.bf16 %v291_v6, %v283_v5  ;;  %v819_v19 = vpack.c.bf16 %v293_v9, %v285_v8  ;;  %v292_v20 = vld [vmem:[%s1839_s2 + $0x7d0] sm:$0xff]  ;;  %v55_v22 = vld [vmem:[%s1839_s2 + $0x68] sm:$0xff] }
  0x2c   :  { %800 = vmatprep.subr.bf16.mxu1 %v799_v4  ;;  %v41_v61 = vmax.f32 %v40_v56, 0.0  ;;  %v276_v4 = vld [vmem:[%s1839_s2 + $0x750] sm:$0xff]  ;;  %v49_v23 = vld [vmem:[%s1839_s2 + $0x38] sm:$0xff]  ;;  %v821_v26 = vpack.c.bf16 %v292_v20, %v284_v18  ;;  %v54_v29 = vld [vmem:[%s1839_s2 + $0x60] sm:$0xff] }
  0x2d   :  { %v817_v12 = vpack.c.bf16 %v276_v4, %v268_v2  ;;  %v57_v24 = vld [vmem:[%s1839_s2 + $0x78] sm:$0xff]  ;;  %v48_v30 = vld [vmem:[%s1839_s2 + $0x30] sm:$0xff]  ;;  %v63_v34 = vld [vmem:[%s1839_s2 + $0xa8] sm:$0xff] }
  0x2e   :  { %738 = vmatpush1.bf16.msra.mxu0 %v737_v10  ;;  %v1392_v7 = vrot.slane %v41_v61, %v1322_v31  ;;  %v753_v10 = vpack.c.bf16 %v274_v1, %v266_v0  ;;  %v71_v35 = vld [vmem:[%s1839_s2 + $0xe8] sm:$0xff]  ;;  %v65_v36 = vld [vmem:[%s1839_s2 + $0xb8] sm:$0xff]  ;;  %v62_v41 = vld [vmem:[%s1839_s2 + $0xa0] sm:$0xff] }
  0x2f   :  { %802 = vmatpush1.bf16.msra.mxu1 %v801_v16  ;;  %740 = vmatprep.subr.bf16.mxu0 %v739_v17  ;;  %v282_v16 = vld [vmem:[%s1839_s2 + $0x780] sm:$0xff]  ;;  %v827_v40 = vpack.c.bf16 %v71_v35, %v63_v34  ;;  %v64_v43 = vld [vmem:[%s1839_s2 + $0xb0] sm:$0xff]  ;;  %v79_v46 = vld [vmem:[%s1839_s2 + $0x128] sm:$0xff] }
  0x30   :  { %804 = vmatprep.subr.bf16.mxu1 %v803_v21  ;;  %v1402_v11 = vcombine.high %v1392_v7, %v1392_v7  ;;  %v290_v17 = vld [vmem:[%s1839_s2 + $0x7c0] sm:$0xff]  ;;  %v47_v21 = vld [vmem:[%s1839_s2 + $0x28] sm:$0xff]  ;;  %v89_v49 = vld [vmem:[%s1839_s2 + $0x178] sm:$0xff] }
  0x31   :  { %v757_v25 = vpack.c.bf16 %v290_v17, %v282_v16  ;;  %v823_v27 = vpack.c.bf16 %v55_v22, %v47_v21  ;;  %v70_v42 = vld [vmem:[%s1839_s2 + $0xe0] sm:$0xff]  ;;  %v80_v55 = vld [vmem:[%s1839_s2 + $0x130] sm:$0xff]  ;;  %v95_v58 = vld [vmem:[%s1839_s2 + $0x1a8] sm:$0xff] }
  0x32   :  { %742 = vmatpush1.bf16.msra.mxu0 %v741_v28  ;;  %415 = vmatprep.mubr.f32.mxu0 %v1402_v11  ;;  %v46_v28 = vld [vmem:[%s1839_s2 + $0x20] sm:$0xff]  ;;  %v829_v50 = vpack.c.bf16 %v70_v42, %v62_v41  ;;  %v88_v57 = vld [vmem:[%s1839_s2 + $0x170] sm:$0xff]  ;;  %v97_v61 = vld [vmem:[%s1839_s2 + $0x1b8] sm:$0xff] }
  0x33   :  { %806 = vmatpush1.bf16.msra.mxu1 %v805_v32  ;;  %744 = vmatprep.subr.bf16.mxu0 %v743_v33  ;;  %v887_v32 = vpack.c.bf16 %v57_v24, %v49_v23  ;;  %v56_v33 = vld [vmem:[%s1839_s2 + $0x70] sm:$0xff]  ;;  %v825_v38 = vpack.c.bf16 %v54_v29, %v46_v28  ;;  %v78_v53 = vld [vmem:[%s1839_s2 + $0x120] sm:$0xff]  ;;  %v897_v0 = vpack.c.bf16 %v88_v57, %v80_v55  ;;  %v111_v8 = vld [vmem:[%s1839_s2 + $0x228] sm:$0xff] }
  0x34   :  { %808 = vmatprep.subr.bf16.mxu1 %v807_v37  ;;  %486 = vmatprep.mubr.f32.mxu1 %v1402_v11  ;;  %v73_v37 = vld [vmem:[%s1839_s2 + $0xf8] sm:$0xff]  ;;  %v889_v39 = vpack.c.bf16 %v56_v33, %v48_v30  ;;  %v86_v54 = vld [vmem:[%s1839_s2 + $0x160] sm:$0xff]  ;;  %v96_v4 = vld [vmem:[%s1839_s2 + $0x1b0] sm:$0xff] }
  0x35   :  { %v891_v44 = vpack.c.bf16 %v73_v37, %v65_v36  ;;  %v94_v2 = vld [vmem:[%s1839_s2 + $0x1a0] sm:$0xff]  ;;  %v104_v6 = vld [vmem:[%s1839_s2 + $0x1f0] sm:$0xff]  ;;  %v119_v9 = vld [vmem:[%s1839_s2 + $0x268] sm:$0xff] }
  0x36   :  { %746 = vmatpush1.bf16.msra.mxu0 %v745_v45  ;;  %v72_v45 = vld [vmem:[%s1839_s2 + $0xf0] sm:$0xff]  ;;  %v839_v16 = vpack.c.bf16 %v119_v9, %v111_v8  ;;  %v110_v17 = vld [vmem:[%s1839_s2 + $0x220] sm:$0xff]  ;;  %v127_v22 = vld [vmem:[%s1839_s2 + $0x2a8] sm:$0xff] }
  0x37   :  { %810 = vmatpush1.bf16.msra.mxu1 %v809_v47  ;;  %748 = vmatprep.subr.bf16.mxu0 %v747_v48  ;;  %v87_v47 = vld [vmem:[%s1839_s2 + $0x168] sm:$0xff]  ;;  %v81_v48 = vld [vmem:[%s1839_s2 + $0x138] sm:$0xff]  ;;  %v893_v51 = vpack.c.bf16 %v72_v45, %v64_v43  ;;  %v118_v18 = vld [vmem:[%s1839_s2 + $0x260] sm:$0xff] }
  0x38   :  { %812 = vmatprep.subr.bf16.mxu1 %v811_v52  ;;  %v831_v52 = vpack.c.bf16 %v87_v47, %v79_v46  ;;  %v895_v56 = vpack.c.bf16 %v89_v49, %v81_v48  ;;  %v120_v21 = vld [vmem:[%s1839_s2 + $0x270] sm:$0xff]  ;;  %v135_v23 = vld [vmem:[%s1839_s2 + $0x2e8] sm:$0xff]  ;;  %v129_v24 = vld [vmem:[%s1839_s2 + $0x2b8] sm:$0xff] }
  0x39   :  { %v843_v28 = vpack.c.bf16 %v135_v23, %v127_v22  ;;  %v126_v29 = vld [vmem:[%s1839_s2 + $0x2a0] sm:$0xff]  ;;  %v136_v34 = vld [vmem:[%s1839_s2 + $0x2f0] sm:$0xff]  ;;  %v143_v35 = vld [vmem:[%s1839_s2 + $0x328] sm:$0xff] }
  0x3a   :  { %750 = vmatpush1.bf16.msra.mxu0 %v749_v59  ;;  %v103_v59 = vld [vmem:[%s1839_s2 + $0x1e8] sm:$0xff]  ;;  %v134_v30 = vld [vmem:[%s1839_s2 + $0x2e0] sm:$0xff]  ;;  %v145_v37 = vld [vmem:[%s1839_s2 + $0x338] sm:$0xff] }
  0x3b   :  { %814 = vmatpush1.bf16.msra.mxu1 %v813_v62  ;;  %752 = vmatprep.subr.bf16.mxu0 %v751_v63  ;;  %v105_v62 = vld [vmem:[%s1839_s2 + $0x1f8] sm:$0xff]  ;;  %v833_v63 = vpack.c.bf16 %v86_v54, %v78_v53  ;;  %v835_v1 = vpack.c.bf16 %v103_v59, %v95_v58  ;;  %v151_v36 = vld [vmem:[%s1839_s2 + $0x368] sm:$0xff]  ;;  %v150_v43 = vld [vmem:[%s1839_s2 + $0x360] sm:$0xff] }
  0x3c   :  { %816 = vmatprep.subr.bf16.mxu1 %v815_v3  ;;  %v102_v3 = vld [vmem:[%s1839_s2 + $0x1e0] sm:$0xff]  ;;  %v899_v5 = vpack.c.bf16 %v105_v62, %v97_v61  ;;  %v847_v42 = vpack.c.bf16 %v151_v36, %v143_v35  ;;  %v152_v45 = vld [vmem:[%s1839_s2 + $0x370] sm:$0xff]  ;;  %v159_v47 = vld [vmem:[%s1839_s2 + $0x3a8] sm:$0xff] }
  0x3d   :  { %v167_v48 = vld [vmem:[%s1839_s2 + $0x3e8] sm:$0xff] }
  0x3e   :  { %754 = vmatpush1.bf16.msra.mxu0 %v753_v10  ;;  %v113_v10 = vld [vmem:[%s1839_s2 + $0x238] sm:$0xff] }
  0x3f   :  { %818 = vmatpush1.bf16.msra.mxu1 %v817_v12  ;;  %756 = vmatprep.subr.bf16.mxu0 %v755_v15  ;;  %v837_v12 = vpack.c.bf16 %v102_v3, %v94_v2  ;;  %v901_v15 = vpack.c.bf16 %v104_v6, %v96_v4 }
  0x40   :  { %820 = vmatprep.subr.bf16.mxu1 %v819_v19  ;;  %v112_v19 = vld [vmem:[%s1839_s2 + $0x230] sm:$0xff] }
  0x42   :  { %758 = vmatpush1.bf16.msra.mxu0 %v757_v25  ;;  %v137_v25 = vld [vmem:[%s1839_s2 + $0x2f8] sm:$0xff] }
  0x43   :  { %822 = vmatpush1.bf16.msra.mxu1 %v821_v26  ;;  %824 = vmatprep.subr.bf16.mxu0 %v823_v27  ;;  %v841_v26 = vpack.c.bf16 %v118_v18, %v110_v17  ;;  %v905_v27 = vpack.c.bf16 %v120_v21, %v112_v19  ;;  %v907_v33 = vpack.c.bf16 %v137_v25, %v129_v24 }
  0x44   :  { %888 = vmatprep.subr.bf16.mxu1 %v887_v32  ;;  %v128_v32 = vld [vmem:[%s1839_s2 + $0x2b0] sm:$0xff] }
  0x45   :  { %416 = vmatmul.mubr.f32.vlgmr.msra.gmra.mrb[0].mxu0 %v1392_v7  ;;  %v909_v41 = vpack.c.bf16 %v136_v34, %v128_v32 }
  0x46   :  { %487 = vmatmul.mubr.f32.vlgmr.msra.gmra.mrb[0].mxu1 %v1392_v7  ;;  %826 = vmatpush1.bf16.msra.mxu0 %v825_v38  ;;  %v153_v38 = vld [vmem:[%s1839_s2 + $0x378] sm:$0xff] }
  0x47   :  { %890 = vmatpush1.bf16.msra.mxu1 %v889_v39  ;;  %828 = vmatprep.subr.bf16.mxu0 %v827_v40  ;;  %v845_v39 = vpack.c.bf16 %v134_v30, %v126_v29  ;;  %v142_v40 = vld [vmem:[%s1839_s2 + $0x320] sm:$0xff]  ;;  %v911_v46 = vpack.c.bf16 %v153_v38, %v145_v37 }
  0x48   :  { %892 = vmatprep.subr.bf16.mxu1 %v891_v44  ;;  %557 = vmatprep.mubr.f32.mxu0 %v1402_v11  ;;  %v144_v44 = vld [vmem:[%s1839_s2 + $0x330] sm:$0xff] }
  0x49   :  { %628 = vmatprep.mubr.f32.mxu1 %v1402_v11  ;;  %v121_v11 = vld [vmem:[%s1839_s2 + $0x278] sm:$0xff] }
  0x4a   :  { %830 = vmatpush1.bf16.msra.mxu0 %v829_v50  ;;  %v903_v20 = vpack.c.bf16 %v121_v11, %v113_v10 }
  0x4b   :  { %894 = vmatpush1.bf16.msra.mxu1 %v893_v51  ;;  %832 = vmatprep.subr.bf16.mxu0 %v831_v52 }
  0x4c   :  { %896 = vmatprep.subr.bf16.mxu1 %v895_v56 }
  0x4e   :  { %834 = vmatpush1.bf16.msra.mxu0 %v833_v63 }
  0x4f   :  { %898 = vmatpush1.bf16.msra.mxu1 %v897_v0  ;;  %836 = vmatprep.subr.bf16.mxu0 %v835_v1 }
  0x50   :  { %900 = vmatprep.subr.bf16.mxu1 %v899_v5 }
  0x52   :  { %838 = vmatpush1.bf16.msra.mxu0 %v837_v12 }
  0x53   :  { %902 = vmatpush1.bf16.msra.mxu1 %v901_v15  ;;  %840 = vmatprep.subr.bf16.mxu0 %v839_v16 }
  0x54   :  { %904 = vmatprep.subr.bf16.mxu1 %v903_v20 }
  0x56   :  { %842 = vmatpush1.bf16.msra.mxu0 %v841_v26 }
  0x57   :  { %906 = vmatpush1.bf16.msra.mxu1 %v905_v27  ;;  %844 = vmatprep.subr.bf16.mxu0 %v843_v28 }
  0x58   :  { %908 = vmatprep.subr.bf16.mxu1 %v907_v33 }
  0x59   :  { %9 = vsyncpa [#allocation3], 0  ;;  %v161_v49 = vld [vmem:[%s1839_s2 + $0x3b8] sm:$0xff]  ;;  %v849_v51 = vpack.c.bf16 %v150_v43, %v142_v40  ;;  %v913_v52 = vpack.c.bf16 %v152_v45, %v144_v44  ;;  %v851_v53 = vpack.c.bf16 %v167_v48, %v159_v47  ;;  %v158_v54 = vld [vmem:[%s1839_s2 + $0x3a0] sm:$0xff] }
  0x5a   :  { %v169_v50 = vld [vmem:[%s1839_s2 + $0x3f8] sm:$0xff]  ;;  %846 = vmatpush1.bf16.msra.mxu0 %v845_v39  ;;  %v166_v55 = vld [vmem:[%s1839_s2 + $0x3e0] sm:$0xff]  ;;  %v160_v56 = vld [vmem:[%s1839_s2 + $0x3b0] sm:$0xff] }
  0x5b   :  { %910 = vmatpush1.bf16.msra.mxu1 %v909_v41  ;;  %848 = vmatprep.subr.bf16.mxu0 %v847_v42  ;;  %v915_v57 = vpack.c.bf16 %v169_v50, %v161_v49  ;;  %v168_v58 = vld [vmem:[%s1839_s2 + $0x3f0] sm:$0xff]  ;;  %v175_v59 = vld [vmem:[%s1839_s2 + $0x428] sm:$0xff]  ;;  %v177_v62 = vld [vmem:[%s1839_s2 + $0x438] sm:$0xff]  ;;  %v853_v0 = vpack.c.bf16 %v166_v55, %v158_v54 }
  0x5c   :  { %912 = vmatprep.subr.bf16.mxu1 %v911_v46  ;;  %v183_v61 = vld [vmem:[%s1839_s2 + $0x468] sm:$0xff]  ;;  %v185_v63 = vld [vmem:[%s1839_s2 + $0x478] sm:$0xff]  ;;  %v917_v1 = vpack.c.bf16 %v168_v58, %v160_v56  ;;  %v174_v3 = vld [vmem:[%s1839_s2 + $0x420] sm:$0xff] }
  0x5d   :  { %v855_v2 = vpack.c.bf16 %v183_v61, %v175_v59  ;;  %v182_v4 = vld [vmem:[%s1839_s2 + $0x460] sm:$0xff]  ;;  %v176_v5 = vld [vmem:[%s1839_s2 + $0x430] sm:$0xff]  ;;  %v919_v6 = vpack.c.bf16 %v185_v63, %v177_v62  ;;  %v191_v9 = vld [vmem:[%s1839_s2 + $0x4a8] sm:$0xff] }
  0x5e   :  { %850 = vmatpush1.bf16.msra.mxu0 %v849_v51  ;;  %v184_v8 = vld [vmem:[%s1839_s2 + $0x470] sm:$0xff]  ;;  %v199_v10 = vld [vmem:[%s1839_s2 + $0x4e8] sm:$0xff]  ;;  %v193_v11 = vld [vmem:[%s1839_s2 + $0x4b8] sm:$0xff]  ;;  %v857_v15 = vpack.c.bf16 %v182_v4, %v174_v3 }
  0x5f   :  { %914 = vmatpush1.bf16.msra.mxu1 %v913_v52  ;;  %852 = vmatprep.subr.bf16.mxu0 %v851_v53  ;;  %v201_v12 = vld [vmem:[%s1839_s2 + $0x4f8] sm:$0xff]  ;;  %v921_v16 = vpack.c.bf16 %v184_v8, %v176_v5  ;;  %v859_v17 = vpack.c.bf16 %v199_v10, %v191_v9  ;;  %v190_v18 = vld [vmem:[%s1839_s2 + $0x4a0] sm:$0xff]  ;;  %v192_v20 = vld [vmem:[%s1839_s2 + $0x4b0] sm:$0xff] }
  0x60   :  { %916 = vmatprep.subr.bf16.mxu1 %v915_v57  ;;  %v198_v19 = vld [vmem:[%s1839_s2 + $0x4e0] sm:$0xff]  ;;  %v923_v21 = vpack.c.bf16 %v201_v12, %v193_v11  ;;  %v200_v22 = vld [vmem:[%s1839_s2 + $0x4f0] sm:$0xff]  ;;  %v207_v23 = vld [vmem:[%s1839_s2 + $0x528] sm:$0xff] }
  0x61   :  { %v215_v24 = vld [vmem:[%s1839_s2 + $0x568] sm:$0xff]  ;;  %v209_v25 = vld [vmem:[%s1839_s2 + $0x538] sm:$0xff]  ;;  %v861_v27 = vpack.c.bf16 %v198_v19, %v190_v18  ;;  %v925_v28 = vpack.c.bf16 %v200_v22, %v192_v20  ;;  %v206_v30 = vld [vmem:[%s1839_s2 + $0x520] sm:$0xff] }
  0x62   :  { %854 = vmatpush1.bf16.msra.mxu0 %v853_v0  ;;  %v217_v26 = vld [vmem:[%s1839_s2 + $0x578] sm:$0xff]  ;;  %v863_v29 = vpack.c.bf16 %v215_v24, %v207_v23  ;;  %v214_v32 = vld [vmem:[%s1839_s2 + $0x560] sm:$0xff]  ;;  %v208_v33 = vld [vmem:[%s1839_s2 + $0x530] sm:$0xff] }
  0x63   :  { %918 = vmatpush1.bf16.msra.mxu1 %v917_v1  ;;  %856 = vmatprep.subr.bf16.mxu0 %v855_v2  ;;  %v927_v34 = vpack.c.bf16 %v217_v26, %v209_v25  ;;  %v216_v35 = vld [vmem:[%s1839_s2 + $0x570] sm:$0xff]  ;;  %v223_v36 = vld [vmem:[%s1839_s2 + $0x5a8] sm:$0xff]  ;;  %v225_v38 = vld [vmem:[%s1839_s2 + $0x5b8] sm:$0xff]  ;;  %v865_v40 = vpack.c.bf16 %v214_v32, %v206_v30 }
  0x64   :  { %920 = vmatprep.subr.bf16.mxu1 %v919_v6  ;;  %v231_v37 = vld [vmem:[%s1839_s2 + $0x5e8] sm:$0xff]  ;;  %v233_v39 = vld [vmem:[%s1839_s2 + $0x5f8] sm:$0xff]  ;;  %v929_v41 = vpack.c.bf16 %v216_v35, %v208_v33  ;;  %v222_v43 = vld [vmem:[%s1839_s2 + $0x5a0] sm:$0xff] }
  0x65   :  { %v867_v42 = vpack.c.bf16 %v231_v37, %v223_v36  ;;  %v230_v44 = vld [vmem:[%s1839_s2 + $0x5e0] sm:$0xff]  ;;  %v224_v45 = vld [vmem:[%s1839_s2 + $0x5b0] sm:$0xff]  ;;  %v931_v46 = vpack.c.bf16 %v233_v39, %v225_v38  ;;  %v239_v48 = vld [vmem:[%s1839_s2 + $0x628] sm:$0xff] }
  0x66   :  { %858 = vmatpush1.bf16.msra.mxu0 %v857_v15  ;;  %v232_v47 = vld [vmem:[%s1839_s2 + $0x5f0] sm:$0xff]  ;;  %v247_v49 = vld [vmem:[%s1839_s2 + $0x668] sm:$0xff]  ;;  %v241_v50 = vld [vmem:[%s1839_s2 + $0x638] sm:$0xff]  ;;  %v869_v52 = vpack.c.bf16 %v230_v44, %v222_v43 }
  0x67   :  { %922 = vmatpush1.bf16.msra.mxu1 %v921_v16  ;;  %860 = vmatprep.subr.bf16.mxu0 %v859_v17  ;;  %v249_v51 = vld [vmem:[%s1839_s2 + $0x678] sm:$0xff]  ;;  %v933_v53 = vpack.c.bf16 %v232_v47, %v224_v45  ;;  %v871_v54 = vpack.c.bf16 %v247_v49, %v239_v48  ;;  %v238_v55 = vld [vmem:[%s1839_s2 + $0x620] sm:$0xff]  ;;  %v240_v57 = vld [vmem:[%s1839_s2 + $0x630] sm:$0xff] }
  0x68   :  { %924 = vmatprep.subr.bf16.mxu1 %v923_v21  ;;  %v246_v56 = vld [vmem:[%s1839_s2 + $0x660] sm:$0xff]  ;;  %v935_v58 = vpack.c.bf16 %v249_v51, %v241_v50  ;;  %v248_v59 = vld [vmem:[%s1839_s2 + $0x670] sm:$0xff]  ;;  %v255_v61 = vld [vmem:[%s1839_s2 + $0x6a8] sm:$0xff] }
  0x69   :  { %v263_v62 = vld [vmem:[%s1839_s2 + $0x6e8] sm:$0xff]  ;;  %v257_v63 = vld [vmem:[%s1839_s2 + $0x6b8] sm:$0xff]  ;;  %v873_v1 = vpack.c.bf16 %v246_v56, %v238_v55  ;;  %v937_v2 = vpack.c.bf16 %v248_v59, %v240_v57  ;;  %v254_v4 = vld [vmem:[%s1839_s2 + $0x6a0] sm:$0xff]  ;;  %v318_v57 = vsub.s32 4, %v1256_v60  ;;  %v330_v59 = vsub.s32 7, %v1256_v60 }
  0x6a   :  { %862 = vmatpush1.bf16.msra.mxu0 %v861_v27  ;;  %v265_v0 = vld [vmem:[%s1839_s2 + $0x6f8] sm:$0xff]  ;;  %v875_v3 = vpack.c.bf16 %v263_v62, %v255_v61  ;;  %v262_v5 = vld [vmem:[%s1839_s2 + $0x6e0] sm:$0xff]  ;;  %v256_v6 = vld [vmem:[%s1839_s2 + $0x6b0] sm:$0xff] }
  0x6b   :  { %926 = vmatpush1.bf16.msra.mxu1 %v925_v28  ;;  %864 = vmatprep.subr.bf16.mxu0 %v863_v29  ;;  %v939_v8 = vpack.c.bf16 %v265_v0, %v257_v63  ;;  %v264_v9 = vld [vmem:[%s1839_s2 + $0x6f0] sm:$0xff]  ;;  %v271_v10 = vld [vmem:[%s1839_s2 + $0x728] sm:$0xff]  ;;  %v273_v12 = vld [vmem:[%s1839_s2 + $0x738] sm:$0xff]  ;;  %v877_v16 = vpack.c.bf16 %v262_v5, %v254_v4 }
  0x6c   :  { %928 = vmatprep.subr.bf16.mxu1 %v927_v34  ;;  %v279_v11 = vld [vmem:[%s1839_s2 + $0x768] sm:$0xff]  ;;  %v281_v15 = vld [vmem:[%s1839_s2 + $0x778] sm:$0xff]  ;;  %v941_v17 = vpack.c.bf16 %v264_v9, %v256_v6  ;;  %v270_v19 = vld [vmem:[%s1839_s2 + $0x720] sm:$0xff] }
  0x6d   :  { %v879_v18 = vpack.c.bf16 %v279_v11, %v271_v10  ;;  %v278_v20 = vld [vmem:[%s1839_s2 + $0x760] sm:$0xff]  ;;  %v272_v21 = vld [vmem:[%s1839_s2 + $0x730] sm:$0xff]  ;;  %v943_v22 = vpack.c.bf16 %v281_v15, %v273_v12  ;;  %v287_v24 = vld [vmem:[%s1839_s2 + $0x7a8] sm:$0xff] }
  0x6e   :  { %866 = vmatpush1.bf16.msra.mxu0 %v865_v40  ;;  %v280_v23 = vld [vmem:[%s1839_s2 + $0x770] sm:$0xff]  ;;  %v295_v25 = vld [vmem:[%s1839_s2 + $0x7e8] sm:$0xff]  ;;  %v289_v26 = vld [vmem:[%s1839_s2 + $0x7b8] sm:$0xff]  ;;  %v881_v28 = vpack.c.bf16 %v278_v20, %v270_v19  ;;  %v310_v40 = vsub.s32 2, %v1256_v60 }
  0x6f   :  { %930 = vmatpush1.bf16.msra.mxu1 %v929_v41  ;;  %868 = vmatprep.subr.bf16.mxu0 %v867_v42  ;;  %v297_v27 = vld [vmem:[%s1839_s2 + $0x7f8] sm:$0xff]  ;;  %v945_v29 = vpack.c.bf16 %v280_v23, %v272_v21  ;;  %v883_v30 = vpack.c.bf16 %v295_v25, %v287_v24  ;;  %v286_v32 = vld [vmem:[%s1839_s2 + $0x7a0] sm:$0xff]  ;;  %v288_v35 = vld [vmem:[%s1839_s2 + $0x7b0] sm:$0xff]  ;;  %v314_v41 = vsub.s32 3, %v1256_v60 }
  0x70   :  { %932 = vmatprep.subr.bf16.mxu1 %v931_v46  ;;  %v294_v33 = vld [vmem:[%s1839_s2 + $0x7e0] sm:$0xff]  ;;  %v947_v34 = vpack.c.bf16 %v297_v27, %v289_v26  ;;  %v296_v36 = vld [vmem:[%s1839_s2 + $0x7f0] sm:$0xff]  ;;  %s978_s2 = smov [#allocation2]  }
  0x71   :  { %v885_v37 = vpack.c.bf16 %v294_v33, %v286_v32  ;;  %v949_v38 = vpack.c.bf16 %v296_v36, %v288_v35  ;;  %v298_v39 = vld [vmem:[%s1840_s3] sm:$0xff]  ;;  %s687_s3 = sshll.u32 %s978_s2, 4  ;;  %s688_s3 = int_to_ptr.vmem [resolvable:$true] %s687_s3 }
  0x72   :  { %870 = vmatpush1.bf16.msra.mxu0 %v869_v52  ;;  %v303_v42 = vrot.slane %v298_v39, %v25_v13  ;;  %v311_v43 = vrot.slane %v298_v39, %v310_v40  ;;  %v307_v44 = vrot.slane %v298_v39, %v29_v14  ;;  %v315_v45 = vrot.slane %v298_v39, %v314_v41  ;;  %s953_s17 = scalar_lea.vmem %s688_s3, 256  ;;  %p958_p1 = scmp.lt.s32.totalorder %s688_s3, %s688_s3 }
  0x73   :  { %934 = vmatpush1.bf16.msra.mxu1 %v933_v53  ;;  %872 = vmatprep.subr.bf16.mxu0 %v871_v54  ;;  %v326_v14 = vsub.s32 6, %v1256_v60  ;;  %v319_v61 = vrot.slane %v298_v39, %v318_v57  ;;  %v331_v0 = vrot.slane %v298_v39, %v330_v59  ;;  %p954_p0 = scmp.ne.s32.totalorder %s688_s3, %s953_s17  ;;  %p959_p2 = scmp.lt.s32.totalorder %s953_s17, %s953_s17 }
  0x74   :  { %936 = vmatprep.subr.bf16.mxu1 %v935_v58  ;;  %v322_v58 = vsub.s32 5, %v1256_v60 }
  0x75   :  { %v327_v62 = vrot.slane %v298_v39, %v326_v14  ;;  %p960_p3 = por %p959_p2, %p958_p1 }
  0x76   :  { %874 = vmatpush1.bf16.msra.mxu0 %v873_v1  ;;  %v323_v63 = vrot.slane %v298_v39, %v322_v58 }
  0x77   :  { %938 = vmatpush1.bf16.msra.mxu1 %v937_v2  ;;  %876 = vmatprep.subr.bf16.mxu0 %v875_v3  ;;  %p961_p4 = pnand %p960_p3, %p954_p0 }
  0x78   :  { %940 = vmatprep.subr.bf16.mxu1 %v939_v8 }
  0x7a   :  { %878 = vmatpush1.bf16.msra.mxu0 %v877_v16 }
  0x7b   :  { %942 = vmatpush1.bf16.msra.mxu1 %v941_v17  ;;  %880 = vmatprep.subr.bf16.mxu0 %v879_v18 }
  0x7c   :  { %944 = vmatprep.subr.bf16.mxu1 %v943_v22 }
  0x7e   :  { %882 = vmatpush1.bf16.msra.mxu0 %v881_v28 }
  0x7f   :  { %946 = vmatpush1.bf16.msra.mxu1 %v945_v29  ;;  %884 = vmatprep.subr.bf16.mxu0 %v883_v30 }
  0x80   :  { %948 = vmatprep.subr.bf16.mxu1 %v947_v34 }
  0x82   :  { %886 = vmatpush1.bf16.msra.mxu0 %v885_v37 }
  0x83   :  { %950 = vmatpush1.bf16.msra.mxu1 %v949_v38 }
  0x85   :  { %558 = vmatmul.mubr.f32.vlgmr.msra.gmra.mrb[2].mxu0 %v1392_v7 }
  0x86   :  { %629 = vmatmul.mubr.f32.vlgmr.msra.gmra.mrb[2].mxu1 %v1392_v7 }
 0x118   :  { %v417_v46 = vpop.f32.mrb[0].mxu0 }
 0x119   :  { %v418_v47 = vadd.f32 %v417_v46, %v303_v42  ;;  %v488_v48 = vpop.f32.mrb[0].mxu1  ;;  %v419_v7 = vpop.f32.mrb[1].mxu0 }
 0x11a   :  { %v489_v49 = vadd.f32 %v488_v48, %v311_v43  ;;  %v420_v50 = vadd.f32 %v419_v7, %v307_v44  ;;  %v490_v51 = vpop.f32.mrb[1].mxu1 }
 0x11b   :  { %v491_v52 = vadd.f32 %v490_v51, %v315_v45 }
 0x11c   :  { %v643_v53 = vcombine.low %v418_v47, %v420_v50 }
 0x11d   :  { %v644_v54 = vcombine.low %v489_v49, %v491_v52 }
 0x11e   :  { %v651_v55 = vrot.slane %v643_v53, %v1322_v31 }
 0x11f   :  { %v658_v56 = vrot.slane %v644_v54, %v1322_v31 }
 0x121   :  { %v659_v13 = vcombine.low %v651_v55, %v658_v56 }
 0x123   :  { %679 = vst [vmem:[#allocation2] sm:$0xff] %v659_v13 }
 0x158   :  { %v559_v1 = vpop.f32.mrb[2].mxu0 }
 0x159   :  { %v560_v2 = vadd.f32 %v559_v1, %v319_v61  ;;  %v630_v3 = vpop.f32.mrb[2].mxu1  ;;  %v561_v4 = vpop.f32.mrb[3].mxu0 }
 0x15a   :  { %v631_v5 = vadd.f32 %v630_v3, %v327_v62  ;;  %v562_v6 = vadd.f32 %v561_v4, %v323_v63  ;;  %v632_v8 = vpop.f32.mrb[3].mxu1 }
 0x15b   :  { %v633_v9 = vadd.f32 %v632_v8, %v331_v0 }
 0x15c   :  { %v660_v10 = vcombine.low %v560_v2, %v562_v6 }
 0x15d   :  { %v661_v11 = vcombine.low %v631_v5, %v633_v9 }
 0x15e   :  { %v668_v12 = vrot.slane %v660_v10, %v1322_v31 }
 0x15f   :  { %v675_v60 = vrot.slane %v661_v11, %v1322_v31 }
 0x161   :  { %v676_v15 = vcombine.low %v668_v12, %v675_v60 }
 0x163   :  { %680 = vst [vmem:[#allocation2 + $0x8] sm:$0xff] %v676_v15 }
 0x164   :  { %964 = shalt.err (!%p961_p4)
}
 0x165   :  { %s965_s20 = scalar_lea.hbm %s1841_s4, 256 }
 0x166   :  { %p966_p5 = scmp.ne.s32.totalorder %s1841_s4, %s965_s20  ;;  %p969_p6 = scmp.lt.u32.totalorder %s965_s20, %s1841_s4 }
 0x168   :  { %p971_p7 = pnand %p969_p6, %p966_p5 }
 0x16a   :  { %974 = shalt.err (!%p971_p7)
}
 0x16b   :  { %690 = dma.vmem_to_hbm [thread:$0]  %s688_s3, 256, %s1841_s4, [#allocation3]  }
 0x16c   :  { %975 = dma.done.wait [#allocation3], 256  }
 0x16d   :  { %976 = vsyncadd [#allocation3], 4294967040 }
 0x16e   :  { %694 = vsyncpa [#allocation3], 1 }

// kernel: contrastive_mlp_forward.2
= control target key start
LH: loop header
LB: loop body
LE: loop exit
PB: predicated region body
PF: predicated region fallthrough
CT: control target
= control target key end

     0   :  { %7 = vsyncpa [#allocation3], 0  ;;  %s9865_s0 = inlined_call_operand.vmem [shape: f32[2,65536], index: 0, kind: input, shape index: {}]   ;;  %s9866_s1 = inlined_call_operand.hbm [shape: f32[65536,256], index: 1, kind: input, shape index: {}]   ;;  %s9867_s2 = inlined_call_operand.vmem [shape: f32[2,2,256], index: 2, kind: output, shape index: {}]  }
   0x1   :  { %9 = vsyncpa [#allocation3 + $0x1], 0  ;;  %s7366_s9 = smov 0   ;;  %s7368_s10 = smov 0  }
   0x2   :  { %s7370_s11 = smov 0   ;;  %s7372_s12 = smov 0  }
   0x3   :  { %s7374_s13 = smov 0   ;;  %s7376_s14 = smov 0  }
   0x4   :  { %s7378_s15 = smov 0   ;;  %s7380_s16 = smov 0  }
   0x5 LB: > { %s5021_s17 = sadd.s32 4294967295, %s7344_s16   ;;  %s24_s18 = sadd.s32 1, %s7336_s14  ;;  %s7344_s16 = sphi %s7380_s16, %s15_s16   ;;  %s7340_s15 = sphi %s7378_s15, %s9877_s15   ;;  %s7336_s14 = sphi %s7376_s14, %s9876_s14   ;;  %s7332_s13 = sphi %s7374_s13, %s9875_s13   ;;  %s7328_s12 = sphi %s7372_s12, %s9874_s12   ;;  %s7324_s11 = sphi %s7370_s11, %s9873_s11   ;;  %s7320_s10 = sphi %s7368_s10, %s9872_s10   ;;  %s7316_s9 = sphi %s7366_s9, %s9871_s9  }
   0x6   : > { %p25_p0 = scmp.ge.s32.totalorder %s24_s18, 4  ;;  %s27_s19 = sadd.s32 1, %s7340_s15 }
   0x7   : > { %s5025_s20 = sshll.u32 %s7340_s15, 2  ;;  %s68_s21 = sadd.s32 1, %s7324_s11 }
   0x8   : > { %s9879_s18 = smov (%p25_p0, %s24_s18), 0  ;;  %s9881_s19 = smov (!%p25_p0, %s27_s19), %s7340_s15 }
   0x9   : > { %s62_s22 = sadd.s32 %s7336_s14, %s5025_s20  ;;  %p75_p1 = scmp.ne.s32.totalorder %s7324_s11, %s7320_s10 }
   0xa   : > { %p29_p2 = scmp.ge.s32.totalorder %s9881_s19, 2  ;;  %p76_p3 = scmp.eq.s32.totalorder %s7344_s16, 0 }
   0xb   : > { %p81_p4 = scmp.ne.s32.totalorder %s7320_s10, %s7316_s9  ;;  %p82_p5 = scmp.eq.s32.totalorder %s5021_s17, 0 }
   0xc   : > { %s9883_s19 = smov (%p29_p2, %s9881_s19), 0  ;;  %p7419_p6 = por %p76_p3, %p75_p1 }
   0xd   : > { %p7423_p7 = por %p82_p5, %p81_p4  ;;  %s5026_s25 = sshll.u32 %s9883_s19, 2 }
   0xe   : > { %s64_s26 = sadd.s32 %s5026_s25, %s9879_s18  ;;  %p7163_p8 = scmp.lt.s32.totalorder %s7344_s16, 8 }
   0xf   : > { %s65_s27 = ssub.s32 %s62_s22, %s64_s26  ;;  %s144_s28 = sand.u32 1, %s7324_s11  }
  0x10   : > { %p66_p9 = scmp.eq.s32.totalorder %s65_s27, 0  ;;  %s5029_s29 = sshll.u32 %s144_s28, 14 }
  0x11   : > { %s5045_s30 = sshll.u32 %s62_s22, 18  ;;  %s148_s7 = scalar_lea.vmem [#allocation2], %s5029_s29 }
  0x12   : > { %s7432_s3 = scalar_select %p66_p9, %s7324_s11, %s68_s21  }
  0x13   : > { %s7437_s6 = scalar_lea.hbm %s9866_s1, %s5045_s30  ;;  %s158_s8 = sshll.u32 %s148_s7, 4  ;;  %s7445_s8 = int_to_ptr.vmem [resolvable:$true] %s158_s8 }
  0x14   : > { %p7441_p10 = pnand %p7163_p8, %p7419_p6  ;;  %s7447_s17 = scalar_lea.sflag [#allocation3], %s144_s28 }
  0x15   : > { %s7248_s20 = scalar_lea.hbm %s7437_s6, 262144  ;;  %s7253_s23 = scalar_lea.hbm %s9866_s1, 2097152 }
  0x16   : > { %p7249_p11 = scmp.ne.s32.totalorder %s7437_s6, %s7248_s20  ;;  %p7250_p12 = pneg %p7441_p10 }
  0x17   : > { %p7254_p1 = scmp.lt.u32.totalorder %s7437_s6, %s9866_s1  ;;  %p7255_p2 = scmp.lt.u32.totalorder %s7253_s23, %s7248_s20 }
  0x18   : > { %p7251_p13 = pnand %p7250_p12, %p7249_p11  ;;  %p7257_p4 = scmp.lt.u32.totalorder %s7248_s20, %s7437_s6 }
  0x19   : > { %p7256_p3 = por %p7255_p2, %p7254_p1 }
  0x1a   : > { %p7252_p0 = pneg %p7251_p13 }
  0x1b   : > { %p7258_p5 = por %p7257_p4, %p7256_p3 }
  0x1d   : > { %p7259_p6 = pnand %p7258_p5, %p7252_p0 }
  0x1f   : > { %7262 = shalt.err (!%p7259_p6)
}
  0x20   : > { %s7263_s27 = scalar_lea.vmem %s7445_s8, 262144  ;;  %s7346_s28 = smov [#allocation2]  }
  0x21   : > { %p7264_p8 = scmp.ne.s32.totalorder %s7445_s8, %s7263_s27  ;;  %s7268_s29 = sshll.u32 %s7346_s28, 4  ;;  %s7269_s29 = int_to_ptr.vmem [resolvable:$false] %s7268_s29 }
  0x22   : > { %s7270_s30 = scalar_lea.vmem %s7269_s29, 524288  ;;  %p7271_p13 = scmp.lt.s32.totalorder %s7445_s8, %s7269_s29 }
  0x23   : > { %p7266_p9 = pnand %p7264_p8, %p7250_p12  ;;  %p7272_p1 = scmp.lt.s32.totalorder %s7270_s30, %s7263_s27 }
  0x25   : > { %p7267_p11 = pneg %p7266_p9  ;;  %p7273_p2 = por %p7272_p1, %p7271_p13 }
  0x27   : > { %p7274_p3 = pnand %p7273_p2, %p7267_p11 }
  0x29   : > { %7277 = shalt.err (!%p7274_p3)
}
  0x2a   : > { %s7347_s4 = smov 256   ;;  %s7348_s5 = smov 16  }
  0x2b   : > { %7162 = dma.hbm_to_vmem [thread:$0]  (!%p7441_p10), %s7437_s6, 262144, %s7445_s8, %s7447_s17, %s7347_s4, %s7347_s4, %s7348_s5  }
  0x2c   : > { %p5034_p12 = scmp.ge.s32.totalorder %s7344_s16, 1  ;;  %p166_p0 = scmp.lt.s32.totalorder %s7344_s16, 9 }
  0x2e   : > { %p167_p4 = pnand %p5034_p12, %p166_p0 }
  0x2f   : > { %s172_s7 = sand.u32 (!%p167_p4), 1, %s7320_s10  }
  0x30   : > { %170 = sbr.rel (%p167_p4) target bundleno = 1317 (0x525), region = 28  ;;  %s5035_s20 = sshll.u32 (!%p167_p4), %s172_s7, 14 }
  0x31   : > { %s173_s21 = scalar_lea.sflag (!%p167_p4), [#allocation3], %s172_s7  ;;  %s7478_s22 = scalar_lea.vmem (!%p167_p4), [#allocation2], %s5035_s20 }
  0x37   : > { %7311 = dma.done.wait (%p7423_p7), %s173_s21, 262144  }
  0x38   : > { %7313 = vsyncadd (%p7423_p7), %s173_s21, 4294705152  ;;  %s5036_s6 = sshll.u32 %s7332_s13, 2  ;;  %p217_p10 = scmp.lt.s32.totalorder %s7332_s13, 1 }
  0x39   : > { %s205_s8 = sadd.s32 %s7328_s12, %s5036_s6  ;;  %p5041_p7 = scmp.ne.s32.totalorder %s7328_s12, 0 }
  0x3a   : > { %s5037_s9 = sshll.u32 %s205_s8, 6  ;;  %s9885_s13 = smov (!%p217_p10, %s7332_s13), 1  ;;  %v7349_v0 = vmov (!%p5041_p7), 0.0  }
  0x3b   : > { %p207_p5 = scmp.lt.s32.totalorder %s5037_s9, 511  ;;  %s5046_s17 = sshll.u32 %s9885_s13, 2 }
  0x3c   : > { %s7491_s27 = scalar_lea.vmem %s9867_s2, %s5046_s17  ;;  %225 = sbr.rel (%p5041_p7) target bundleno = 67 (0x43), region = 36 }
  0x3d   : > { %s9887_s9 = smov (!%p207_p5, %s5037_s9), 511  ;;  %226 = vst [vmem:[%s7491_s27] sm:$0xf] (!%p5041_p7), %v7349_v0 }
  0x3e   : > { %s5038_s23 = sshll.u32 %s9887_s9, 1 }
  0x3f   : > { %s7496_s29 = scalar_lea.vmem %s9865_s0, %s5038_s23 }
  0x43 PF: > { %v245_v1 = vld [vmem:[%s7478_s22 + $0x8] sm:$0xff]  ;;  %v247_v2 = vld [vmem:[%s7478_s22 + $0x18] sm:$0xff]  ;;  %v244_v6 = vld [vmem:[%s7478_s22] sm:$0xff] }
  0x44   : > { %v1269_v3 = vld [vmem:[%s7478_s22 + $0x2008] sm:$0xff]  ;;  %v5047_v4 = vpack.c.bf16 %v247_v2, %v245_v1  ;;  %v1271_v5 = vld [vmem:[%s7478_s22 + $0x2018] sm:$0xff]  ;;  %v246_v7 = vld [vmem:[%s7478_s22 + $0x10] sm:$0xff] }
  0x45   : > { %v6071_v8 = vpack.c.bf16 %v1271_v5, %v1269_v3  ;;  %v5049_v9 = vpack.c.bf16 %v246_v7, %v244_v6  ;;  %v1268_v10 = vld [vmem:[%s7478_s22 + $0x2000] sm:$0xff]  ;;  %v1270_v11 = vld [vmem:[%s7478_s22 + $0x2010] sm:$0xff]  ;;  %v249_v12 = vld [vmem:[%s7478_s22 + $0x28] sm:$0xff] }
  0x46   : > { %5048 = vmatprep.subr.bf16.mxu1 %v5047_v4  ;;  %v6073_v13 = vpack.c.bf16 %v1270_v11, %v1268_v10  ;;  %v251_v14 = vld [vmem:[%s7478_s22 + $0x38] sm:$0xff]  ;;  %v1273_v15 = vld [vmem:[%s7478_s22 + $0x2028] sm:$0xff]  ;;  %v248_v19 = vld [vmem:[%s7478_s22 + $0x20] sm:$0xff] }
  0x47   : > { %v1275_v16 = vld [vmem:[%s7478_s22 + $0x2038] sm:$0xff]  ;;  %6072 = vmatprep.subr.bf16.mxu0 %v6071_v8  ;;  %5050 = vmatpush1.bf16.msra.mxu1 %v5049_v9  ;;  %v5051_v17 = vpack.c.bf16 %v251_v14, %v249_v12  ;;  %v250_v20 = vld [vmem:[%s7478_s22 + $0x30] sm:$0xff]  ;;  %v1272_v21 = vld [vmem:[%s7478_s22 + $0x2020] sm:$0xff] }
  0x48   : > { %v6075_v18 = vpack.c.bf16 %v1275_v16, %v1273_v15  ;;  %6074 = vmatpush1.bf16.msra.mxu0 %v6073_v13  ;;  %v5053_v22 = vpack.c.bf16 %v250_v20, %v248_v19  ;;  %v1274_v23 = vld [vmem:[%s7478_s22 + $0x2030] sm:$0xff]  ;;  %v253_v24 = vld [vmem:[%s7478_s22 + $0x48] sm:$0xff]  ;;  %v255_v25 = vld [vmem:[%s7478_s22 + $0x58] sm:$0xff] }
  0x49   : > { %5052 = vmatprep.subr.bf16.mxu1 %v5051_v17  ;;  %v6077_v26 = vpack.c.bf16 %v1274_v23, %v1272_v21  ;;  %v5055_v27 = vpack.c.bf16 %v255_v25, %v253_v24  ;;  %v1277_v28 = vld [vmem:[%s7478_s22 + $0x2048] sm:$0xff]  ;;  %v1279_v29 = vld [vmem:[%s7478_s22 + $0x2058] sm:$0xff]  ;;  %v252_v30 = vld [vmem:[%s7478_s22 + $0x40] sm:$0xff] }
  0x4a   : > { %6076 = vmatprep.subr.bf16.mxu0 %v6075_v18  ;;  %v6079_v31 = vpack.c.bf16 %v1279_v29, %v1277_v28  ;;  %v254_v32 = vld [vmem:[%s7478_s22 + $0x50] sm:$0xff]  ;;  %v1276_v33 = vld [vmem:[%s7478_s22 + $0x2040] sm:$0xff]  ;;  %v257_v36 = vld [vmem:[%s7478_s22 + $0x68] sm:$0xff] }
  0x4b   : > { %v1278_v34 = vld [vmem:[%s7478_s22 + $0x2050] sm:$0xff]  ;;  %5054 = vmatpush1.bf16.msra.mxu1 %v5053_v22  ;;  %v5057_v35 = vpack.c.bf16 %v254_v32, %v252_v30  ;;  %v259_v37 = vld [vmem:[%s7478_s22 + $0x78] sm:$0xff]  ;;  %v1281_v38 = vld [vmem:[%s7478_s22 + $0x2068] sm:$0xff] }
  0x4c   : > { %6078 = vmatpush1.bf16.msra.mxu0 %v6077_v26  ;;  %5056 = vmatprep.subr.bf16.mxu1 %v5055_v27  ;;  %v6081_v39 = vpack.c.bf16 %v1278_v34, %v1276_v33  ;;  %v5059_v40 = vpack.c.bf16 %v259_v37, %v257_v36  ;;  %v1283_v41 = vld [vmem:[%s7478_s22 + $0x2078] sm:$0xff]  ;;  %v256_v42 = vld [vmem:[%s7478_s22 + $0x60] sm:$0xff]  ;;  %v258_v43 = vld [vmem:[%s7478_s22 + $0x70] sm:$0xff] }
  0x4d   : > { %6080 = vmatprep.subr.bf16.mxu0 %v6079_v31  ;;  %v6083_v44 = vpack.c.bf16 %v1283_v41, %v1281_v38  ;;  %v1280_v45 = vld [vmem:[%s7478_s22 + $0x2060] sm:$0xff]  ;;  %v1282_v46 = vld [vmem:[%s7478_s22 + $0x2070] sm:$0xff]  ;;  %v261_v47 = vld [vmem:[%s7478_s22 + $0x88] sm:$0xff]  ;;  %v5061_v51 = vpack.c.bf16 %v258_v43, %v256_v42 }
  0x4e   : > { %v263_v48 = vld [vmem:[%s7478_s22 + $0x98] sm:$0xff]  ;;  %v1285_v49 = vld [vmem:[%s7478_s22 + $0x2088] sm:$0xff]  ;;  %v6085_v52 = vpack.c.bf16 %v1282_v46, %v1280_v45  ;;  %v260_v54 = vld [vmem:[%s7478_s22 + $0x80] sm:$0xff] }
  0x4f   : > { %v1287_v50 = vld [vmem:[%s7478_s22 + $0x2098] sm:$0xff]  ;;  %5058 = vmatpush1.bf16.msra.mxu1 %v5057_v35  ;;  %v5063_v53 = vpack.c.bf16 %v263_v48, %v261_v47  ;;  %v262_v55 = vld [vmem:[%s7478_s22 + $0x90] sm:$0xff]  ;;  %v1284_v56 = vld [vmem:[%s7478_s22 + $0x2080] sm:$0xff]  ;;  %v7350_v47 = vmov 1983009808  }
  0x50   : > { %6082 = vmatpush1.bf16.msra.mxu0 %v6081_v39  ;;  %5060 = vmatprep.subr.bf16.mxu1 %v5059_v40  ;;  %v6087_v57 = vpack.c.bf16 %v1287_v50, %v1285_v49  ;;  %v1286_v58 = vld [vmem:[%s7478_s22 + $0x2090] sm:$0xff]  ;;  %v265_v59 = vld [vmem:[%s7478_s22 + $0xa8] sm:$0xff]  ;;  %v267_v60 = vld [vmem:[%s7478_s22 + $0xb8] sm:$0xff]  ;;  %v5065_v63 = vpack.c.bf16 %v262_v55, %v260_v54  ;;  %v2310_v48 = vunpack.c.l.s4 %v7350_v47  ;;  %v2312_v49 = vlaneseq }
  0x51   : > { %6084 = vmatprep.subr.bf16.mxu0 %v6083_v44  ;;  %v1289_v61 = vld [vmem:[%s7478_s22 + $0x20a8] sm:$0xff]  ;;  %v1291_v62 = vld [vmem:[%s7478_s22 + $0x20b8] sm:$0xff]  ;;  %v6089_v0 = vpack.c.bf16 %v1286_v58, %v1284_v56  ;;  %v5067_v1 = vpack.c.bf16 %v267_v60, %v265_v59  ;;  %v264_v2 = vld [vmem:[%s7478_s22 + $0xa0] sm:$0xff] }
  0x52   : > { %v266_v3 = vld [vmem:[%s7478_s22 + $0xb0] sm:$0xff]  ;;  %v1288_v4 = vld [vmem:[%s7478_s22 + $0x20a0] sm:$0xff]  ;;  %v6091_v5 = vpack.c.bf16 %v1291_v62, %v1289_v61  ;;  %v269_v7 = vld [vmem:[%s7478_s22 + $0xc8] sm:$0xff]  ;;  %v2311_v62 = vunpack.c.0.s8 %v2310_v48 }
  0x53   : > { %5062 = vmatpush1.bf16.msra.mxu1 %v5061_v51  ;;  %v1290_v6 = vld [vmem:[%s7478_s22 + $0x20b0] sm:$0xff]  ;;  %v271_v8 = vld [vmem:[%s7478_s22 + $0xd8] sm:$0xff]  ;;  %v1293_v9 = vld [vmem:[%s7478_s22 + $0x20c8] sm:$0xff]  ;;  %v5069_v11 = vpack.c.bf16 %v266_v3, %v264_v2 }
  0x54   : > { %6086 = vmatpush1.bf16.msra.mxu0 %v6085_v52  ;;  %5064 = vmatprep.subr.bf16.mxu1 %v5063_v53  ;;  %v1295_v10 = vld [vmem:[%s7478_s22 + $0x20d8] sm:$0xff]  ;;  %v6093_v12 = vpack.c.bf16 %v1290_v6, %v1288_v4  ;;  %v5071_v13 = vpack.c.bf16 %v271_v8, %v269_v7  ;;  %v268_v14 = vld [vmem:[%s7478_s22 + $0xc0] sm:$0xff]  ;;  %v270_v15 = vld [vmem:[%s7478_s22 + $0xd0] sm:$0xff] }
  0x55   : > { %6088 = vmatprep.subr.bf16.mxu0 %v6087_v57  ;;  %v1292_v16 = vld [vmem:[%s7478_s22 + $0x20c0] sm:$0xff]  ;;  %v6095_v17 = vpack.c.bf16 %v1295_v10, %v1293_v9  ;;  %v1294_v18 = vld [vmem:[%s7478_s22 + $0x20d0] sm:$0xff]  ;;  %v273_v19 = vld [vmem:[%s7478_s22 + $0xe8] sm:$0xff]  ;;  %v5073_v23 = vpack.c.bf16 %v270_v15, %v268_v14 }
  0x56   : > { %v275_v20 = vld [vmem:[%s7478_s22 + $0xf8] sm:$0xff]  ;;  %v1297_v21 = vld [vmem:[%s7478_s22 + $0x20e8] sm:$0xff]  ;;  %v6097_v24 = vpack.c.bf16 %v1294_v18, %v1292_v16  ;;  %v272_v26 = vld [vmem:[%s7478_s22 + $0xe0] sm:$0xff] }
  0x57   : > { %5066 = vmatpush1.bf16.msra.mxu1 %v5065_v63  ;;  %v1299_v22 = vld [vmem:[%s7478_s22 + $0x20f8] sm:$0xff]  ;;  %v5075_v25 = vpack.c.bf16 %v275_v20, %v273_v19  ;;  %v274_v27 = vld [vmem:[%s7478_s22 + $0xf0] sm:$0xff]  ;;  %v1296_v28 = vld [vmem:[%s7478_s22 + $0x20e0] sm:$0xff]  ;;  %v2313_v63 = vshrl.u32 %v2312_v49, 7 }
  0x58   : > { %6090 = vmatpush1.bf16.msra.mxu0 %v6089_v0  ;;  %5068 = vmatprep.subr.bf16.mxu1 %v5067_v1  ;;  %v6099_v29 = vpack.c.bf16 %v1299_v22, %v1297_v21  ;;  %v1298_v30 = vld [vmem:[%s7478_s22 + $0x20f0] sm:$0xff]  ;;  %v277_v31 = vld [vmem:[%s7478_s22 + $0x108] sm:$0xff]  ;;  %v279_v32 = vld [vmem:[%s7478_s22 + $0x118] sm:$0xff]  ;;  %v5077_v35 = vpack.c.bf16 %v274_v27, %v272_v26 }
  0x59   : > { %6092 = vmatprep.subr.bf16.mxu0 %v6091_v5  ;;  %v1301_v33 = vld [vmem:[%s7478_s22 + $0x2108] sm:$0xff]  ;;  %v1303_v34 = vld [vmem:[%s7478_s22 + $0x2118] sm:$0xff]  ;;  %v6101_v36 = vpack.c.bf16 %v1298_v30, %v1296_v28  ;;  %v5079_v37 = vpack.c.bf16 %v279_v32, %v277_v31  ;;  %v276_v38 = vld [vmem:[%s7478_s22 + $0x100] sm:$0xff] }
  0x5a   : > { %v278_v39 = vld [vmem:[%s7478_s22 + $0x110] sm:$0xff]  ;;  %v1300_v40 = vld [vmem:[%s7478_s22 + $0x2100] sm:$0xff]  ;;  %v6103_v41 = vpack.c.bf16 %v1303_v34, %v1301_v33  ;;  %v281_v43 = vld [vmem:[%s7478_s22 + $0x128] sm:$0xff] }
  0x5b   : > { %5070 = vmatpush1.bf16.msra.mxu1 %v5069_v11  ;;  %v1302_v42 = vld [vmem:[%s7478_s22 + $0x2110] sm:$0xff]  ;;  %v283_v44 = vld [vmem:[%s7478_s22 + $0x138] sm:$0xff]  ;;  %v1305_v45 = vld [vmem:[%s7478_s22 + $0x2128] sm:$0xff]  ;;  %v5081_v50 = vpack.c.bf16 %v278_v39, %v276_v38 }
  0x5c   : > { %6094 = vmatpush1.bf16.msra.mxu0 %v6093_v12  ;;  %5072 = vmatprep.subr.bf16.mxu1 %v5071_v13  ;;  %v1307_v46 = vld [vmem:[%s7478_s22 + $0x2138] sm:$0xff]  ;;  %v6105_v51 = vpack.c.bf16 %v1302_v42, %v1300_v40  ;;  %v5083_v52 = vpack.c.bf16 %v283_v44, %v281_v43  ;;  %v280_v53 = vld [vmem:[%s7478_s22 + $0x120] sm:$0xff]  ;;  %v282_v54 = vld [vmem:[%s7478_s22 + $0x130] sm:$0xff]  ;;  %v7592_v12 = vsub.s32 %v2311_v62, %v2313_v63 }
  0x5d   : > { %6096 = vmatprep.subr.bf16.mxu0 %v6095_v17  ;;  %v1304_v55 = vld [vmem:[%s7478_s22 + $0x2120] sm:$0xff]  ;;  %v6107_v56 = vpack.c.bf16 %v1307_v46, %v1305_v45  ;;  %v1306_v57 = vld [vmem:[%s7478_s22 + $0x2130] sm:$0xff]  ;;  %v285_v58 = vld [vmem:[%s7478_s22 + $0x148] sm:$0xff]  ;;  %v5085_v0 = vpack.c.bf16 %v282_v54, %v280_v53 }
  0x5e   : > { %v287_v59 = vld [vmem:[%s7478_s22 + $0x158] sm:$0xff]  ;;  %v1309_v60 = vld [vmem:[%s7478_s22 + $0x2148] sm:$0xff]  ;;  %v6109_v1 = vpack.c.bf16 %v1306_v57, %v1304_v55  ;;  %v284_v3 = vld [vmem:[%s7478_s22 + $0x140] sm:$0xff] }
  0x5f   : > { %5074 = vmatpush1.bf16.msra.mxu1 %v5073_v23  ;;  %v1311_v61 = vld [vmem:[%s7478_s22 + $0x2158] sm:$0xff]  ;;  %v5087_v2 = vpack.c.bf16 %v287_v59, %v285_v58  ;;  %v286_v4 = vld [vmem:[%s7478_s22 + $0x150] sm:$0xff]  ;;  %v1308_v5 = vld [vmem:[%s7478_s22 + $0x2140] sm:$0xff] }
  0x60   : > { %6098 = vmatpush1.bf16.msra.mxu0 %v6097_v24  ;;  %5076 = vmatprep.subr.bf16.mxu1 %v5075_v25  ;;  %v6111_v6 = vpack.c.bf16 %v1311_v61, %v1309_v60  ;;  %v1310_v7 = vld [vmem:[%s7478_s22 + $0x2150] sm:$0xff]  ;;  %v289_v8 = vld [vmem:[%s7478_s22 + $0x168] sm:$0xff]  ;;  %v291_v9 = vld [vmem:[%s7478_s22 + $0x178] sm:$0xff]  ;;  %v5089_v13 = vpack.c.bf16 %v286_v4, %v284_v3 }
  0x61   : > { %6100 = vmatprep.subr.bf16.mxu0 %v6099_v29  ;;  %v1313_v10 = vld [vmem:[%s7478_s22 + $0x2168] sm:$0xff]  ;;  %v1315_v11 = vld [vmem:[%s7478_s22 + $0x2178] sm:$0xff]  ;;  %v288_v14 = vld [vmem:[%s7478_s22 + $0x160] sm:$0xff]  ;;  %v6113_v15 = vpack.c.bf16 %v1310_v7, %v1308_v5  ;;  %v5091_v16 = vpack.c.bf16 %v291_v9, %v289_v8 }
  0x62   : > { %v290_v17 = vld [vmem:[%s7478_s22 + $0x170] sm:$0xff]  ;;  %v1312_v18 = vld [vmem:[%s7478_s22 + $0x2160] sm:$0xff]  ;;  %v6115_v20 = vpack.c.bf16 %v1315_v11, %v1313_v10  ;;  %v293_v21 = vld [vmem:[%s7478_s22 + $0x188] sm:$0xff] }
  0x63   : > { %5078 = vmatpush1.bf16.msra.mxu1 %v5077_v35  ;;  %v1314_v19 = vld [vmem:[%s7478_s22 + $0x2170] sm:$0xff]  ;;  %v295_v22 = vld [vmem:[%s7478_s22 + $0x198] sm:$0xff]  ;;  %v7601_v23 = vld [vmem:[%s7496_s29] sm:$0xff]  ;;  %v5093_v28 = vpack.c.bf16 %v290_v17, %v288_v14 }
  0x64   : > { %6102 = vmatpush1.bf16.msra.mxu0 %v6101_v36  ;;  %5080 = vmatprep.subr.bf16.mxu1 %v5079_v37  ;;  %v1317_v24 = vld [vmem:[%s7478_s22 + $0x2188] sm:$0xff]  ;;  %v1319_v25 = vld [vmem:[%s7478_s22 + $0x2198] sm:$0xff]  ;;  %v7607_v26 = vrot.slane %v7601_v23, %v7592_v12  ;;  %v7610_v27 = vld [vmem:[%s7496_s29 + $0x40] sm:$0xff]  ;;  %v6117_v30 = vpack.c.bf16 %v1314_v19, %v1312_v18  ;;  %v5095_v31 = vpack.c.bf16 %v295_v22, %v293_v21 }
  0x65   : > { %6104 = vmatprep.subr.bf16.mxu0 %v6103_v41  ;;  %v7614_v29 = vrot.slane %v7610_v27, %v7592_v12  ;;  %v292_v32 = vld [vmem:[%s7478_s22 + $0x180] sm:$0xff]  ;;  %v294_v33 = vld [vmem:[%s7478_s22 + $0x190] sm:$0xff]  ;;  %v6119_v36 = vpack.c.bf16 %v1319_v25, %v1317_v24  ;;  %v297_v38 = vld [vmem:[%s7478_s22 + $0x1a8] sm:$0xff]  ;;  %v2308_v11 = vcombine.high %v7601_v23, %v7601_v23 }
  0x66   : > { %v1316_v34 = vld [vmem:[%s7478_s22 + $0x2180] sm:$0xff]  ;;  %v2323_v35 = vcombine.high %v7607_v26, %v7607_v26  ;;  %v1318_v37 = vld [vmem:[%s7478_s22 + $0x2190] sm:$0xff]  ;;  %v299_v39 = vld [vmem:[%s7478_s22 + $0x1b8] sm:$0xff]  ;;  %v5097_v43 = vpack.c.bf16 %v294_v33, %v292_v32 }
  0x67   : > { %5082 = vmatpush1.bf16.msra.mxu1 %v5081_v50  ;;  %v2459_v40 = vcombine.high %v7614_v29, %v7614_v29  ;;  %v1321_v41 = vld [vmem:[%s7478_s22 + $0x21a8] sm:$0xff]  ;;  %v1323_v42 = vld [vmem:[%s7478_s22 + $0x21b8] sm:$0xff]  ;;  %v6121_v44 = vpack.c.bf16 %v1318_v37, %v1316_v34  ;;  %v5099_v45 = vpack.c.bf16 %v299_v39, %v297_v38  ;;  %v296_v46 = vld [vmem:[%s7478_s22 + $0x1a0] sm:$0xff] }
  0x68   : > { %6106 = vmatpush1.bf16.msra.mxu0 %v6105_v51  ;;  %5084 = vmatprep.subr.bf16.mxu1 %v5083_v52  ;;  %v298_v47 = vld [vmem:[%s7478_s22 + $0x1b0] sm:$0xff]  ;;  %v1320_v48 = vld [vmem:[%s7478_s22 + $0x21a0] sm:$0xff]  ;;  %v6123_v49 = vpack.c.bf16 %v1323_v42, %v1321_v41  ;;  %v301_v51 = vld [vmem:[%s7478_s22 + $0x1c8] sm:$0xff] }
  0x69   : > { %6108 = vmatprep.subr.bf16.mxu0 %v6107_v56  ;;  %2708 = vmatprep.mubr.f32.mxu1 %v2323_v35  ;;  %v1322_v50 = vld [vmem:[%s7478_s22 + $0x21b0] sm:$0xff]  ;;  %v303_v52 = vld [vmem:[%s7478_s22 + $0x1d8] sm:$0xff]  ;;  %v1325_v53 = vld [vmem:[%s7478_s22 + $0x21c8] sm:$0xff]  ;;  %v5101_v55 = vpack.c.bf16 %v298_v47, %v296_v46 }
  0x6a   : > { %3844 = vmatprep.mubr.f32.mxu0 %v2459_v40  ;;  %v1327_v54 = vld [vmem:[%s7478_s22 + $0x21d8] sm:$0xff]  ;;  %v6125_v56 = vpack.c.bf16 %v1322_v50, %v1320_v48  ;;  %v5103_v57 = vpack.c.bf16 %v303_v52, %v301_v51  ;;  %v300_v58 = vld [vmem:[%s7478_s22 + $0x1c0] sm:$0xff]  ;;  %v302_v59 = vld [vmem:[%s7478_s22 + $0x1d0] sm:$0xff] }
  0x6b   : > { %5086 = vmatpush1.bf16.msra.mxu1 %v5085_v0  ;;  %v1324_v60 = vld [vmem:[%s7478_s22 + $0x21c0] sm:$0xff]  ;;  %v6127_v61 = vpack.c.bf16 %v1327_v54, %v1325_v53  ;;  %v1326_v62 = vld [vmem:[%s7478_s22 + $0x21d0] sm:$0xff]  ;;  %v305_v63 = vld [vmem:[%s7478_s22 + $0x1e8] sm:$0xff]  ;;  %v5105_v3 = vpack.c.bf16 %v302_v59, %v300_v58 }
  0x6c   : > { %6110 = vmatpush1.bf16.msra.mxu0 %v6109_v1  ;;  %5088 = vmatprep.subr.bf16.mxu1 %v5087_v2  ;;  %v307_v0 = vld [vmem:[%s7478_s22 + $0x1f8] sm:$0xff]  ;;  %v1329_v1 = vld [vmem:[%s7478_s22 + $0x21e8] sm:$0xff]  ;;  %v6129_v4 = vpack.c.bf16 %v1326_v62, %v1324_v60  ;;  %v306_v7 = vld [vmem:[%s7478_s22 + $0x1f0] sm:$0xff] }
  0x6d   : > { %6112 = vmatprep.subr.bf16.mxu0 %v6111_v6  ;;  %v1331_v2 = vld [vmem:[%s7478_s22 + $0x21f8] sm:$0xff]  ;;  %v5107_v5 = vpack.c.bf16 %v307_v0, %v305_v63  ;;  %v304_v6 = vld [vmem:[%s7478_s22 + $0x1e0] sm:$0xff]  ;;  %v1330_v10 = vld [vmem:[%s7478_s22 + $0x21f0] sm:$0xff] }
  0x6e   : > { %v1328_v8 = vld [vmem:[%s7478_s22 + $0x21e0] sm:$0xff]  ;;  %v6131_v9 = vpack.c.bf16 %v1331_v2, %v1329_v1  ;;  %v311_v14 = vld [vmem:[%s7478_s22 + $0x218] sm:$0xff]  ;;  %v5109_v18 = vpack.c.bf16 %v306_v7, %v304_v6  ;;  %v310_v22 = vld [vmem:[%s7478_s22 + $0x210] sm:$0xff] }
  0x6f   : > { %5090 = vmatpush1.bf16.msra.mxu1 %v5089_v13  ;;  %v309_v13 = vld [vmem:[%s7478_s22 + $0x208] sm:$0xff]  ;;  %v1335_v17 = vld [vmem:[%s7478_s22 + $0x2218] sm:$0xff]  ;;  %v6133_v19 = vpack.c.bf16 %v1330_v10, %v1328_v8  ;;  %v308_v21 = vld [vmem:[%s7478_s22 + $0x200] sm:$0xff] }
  0x70   : > { %6114 = vmatpush1.bf16.msra.mxu0 %v6113_v15  ;;  %5092 = vmatprep.subr.bf16.mxu1 %v5091_v16  ;;  %v2444_v15 = vcombine.high %v7610_v27, %v7610_v27  ;;  %v1333_v16 = vld [vmem:[%s7478_s22 + $0x2208] sm:$0xff]  ;;  %v1332_v23 = vld [vmem:[%s7478_s22 + $0x2200] sm:$0xff]  ;;  %v1334_v25 = vld [vmem:[%s7478_s22 + $0x2210] sm:$0xff]  ;;  %v5113_v34 = vpack.c.bf16 %v310_v22, %v308_v21 }
  0x71   : > { %6116 = vmatprep.subr.bf16.mxu0 %v6115_v20  ;;  %v5111_v20 = vpack.c.bf16 %v311_v14, %v309_v13  ;;  %v6135_v24 = vpack.c.bf16 %v1335_v17, %v1333_v16  ;;  %v313_v27 = vld [vmem:[%s7478_s22 + $0x228] sm:$0xff]  ;;  %v1339_v32 = vld [vmem:[%s7478_s22 + $0x2238] sm:$0xff]  ;;  %v6137_v35 = vpack.c.bf16 %v1334_v25, %v1332_v23  ;;  %v312_v37 = vld [vmem:[%s7478_s22 + $0x220] sm:$0xff] }
  0x72   : > { %v7668_v33 = vrot.slane %v2444_v15, %v7592_v12  ;;  %v314_v38 = vld [vmem:[%s7478_s22 + $0x230] sm:$0xff]  ;;  %v1336_v39 = vld [vmem:[%s7478_s22 + $0x2220] sm:$0xff]  ;;  %v317_v42 = vld [vmem:[%s7478_s22 + $0x248] sm:$0xff] }
  0x73   : > { %5094 = vmatpush1.bf16.msra.mxu1 %v5093_v28  ;;  %v315_v28 = vld [vmem:[%s7478_s22 + $0x238] sm:$0xff]  ;;  %v1338_v41 = vld [vmem:[%s7478_s22 + $0x2230] sm:$0xff]  ;;  %v5117_v48 = vpack.c.bf16 %v314_v38, %v312_v37  ;;  %v316_v51 = vld [vmem:[%s7478_s22 + $0x240] sm:$0xff] }
  0x74   : > { %6118 = vmatpush1.bf16.msra.mxu0 %v6117_v30  ;;  %5096 = vmatprep.subr.bf16.mxu1 %v5095_v31  ;;  %v7663_v30 = vrot.slane %v2308_v11, %v7592_v12  ;;  %v1337_v31 = vld [vmem:[%s7478_s22 + $0x2228] sm:$0xff]  ;;  %v1343_v46 = vld [vmem:[%s7478_s22 + $0x2258] sm:$0xff]  ;;  %v2460_v47 = vcombine.high %v7668_v33, %v7668_v33  ;;  %v1340_v52 = vld [vmem:[%s7478_s22 + $0x2240] sm:$0xff] }
  0x75   : > { %6120 = vmatprep.subr.bf16.mxu0 %v6119_v36  ;;  %v5115_v36 = vpack.c.bf16 %v315_v28, %v313_v27  ;;  %v6139_v40 = vpack.c.bf16 %v1339_v32, %v1337_v31  ;;  %v1342_v54 = vld [vmem:[%s7478_s22 + $0x2250] sm:$0xff]  ;;  %v1344_v63 = vld [vmem:[%s7478_s22 + $0x2260] sm:$0xff]  ;;  %v325_v2 = vld [vmem:[%s7478_s22 + $0x288] sm:$0xff] }
  0x76   : > { %v6145_v59 = vpack.c.bf16 %v1342_v54, %v1340_v52  ;;  %v322_v62 = vld [vmem:[%s7478_s22 + $0x270] sm:$0xff]  ;;  %v1348_v11 = vld [vmem:[%s7478_s22 + $0x2280] sm:$0xff]  ;;  %v329_v15 = vld [vmem:[%s7478_s22 + $0x2a8] sm:$0xff] }
  0x77   : > { %5098 = vmatpush1.bf16.msra.mxu1 %v5097_v43  ;;  %v319_v43 = vld [vmem:[%s7478_s22 + $0x258] sm:$0xff]  ;;  %v1346_v1 = vld [vmem:[%s7478_s22 + $0x2270] sm:$0xff]  ;;  %v1353_v17 = vld [vmem:[%s7478_s22 + $0x22a8] sm:$0xff] }
  0x78   : > { %6122 = vmatpush1.bf16.msra.mxu0 %v6121_v44  ;;  %5100 = vmatprep.subr.bf16.mxu1 %v5099_v45  ;;  %v2324_v44 = vcombine.high %v7663_v30, %v7663_v30  ;;  %v1341_v45 = vld [vmem:[%s7478_s22 + $0x2248] sm:$0xff]  ;;  %v5119_v50 = vpack.c.bf16 %v319_v43, %v317_v42  ;;  %v6149_v7 = vpack.c.bf16 %v1346_v1, %v1344_v63  ;;  %v326_v10 = vld [vmem:[%s7478_s22 + $0x290] sm:$0xff]  ;;  %v331_v16 = vld [vmem:[%s7478_s22 + $0x2b8] sm:$0xff] }
  0x79   : > { %6124 = vmatprep.subr.bf16.mxu0 %v6123_v49  ;;  %v6141_v49 = vpack.c.bf16 %v1338_v41, %v1336_v39  ;;  %v6143_v53 = vpack.c.bf16 %v1343_v46, %v1341_v45  ;;  %v1350_v14 = vld [vmem:[%s7478_s22 + $0x2290] sm:$0xff]  ;;  %v5131_v21 = vpack.c.bf16 %v331_v16, %v329_v15  ;;  %v328_v22 = vld [vmem:[%s7478_s22 + $0x2a0] sm:$0xff]  ;;  %v333_v28 = vld [vmem:[%s7478_s22 + $0x2c8] sm:$0xff] }
  0x7a   : > { %v330_v23 = vld [vmem:[%s7478_s22 + $0x2b0] sm:$0xff]  ;;  %v335_v31 = vld [vmem:[%s7478_s22 + $0x2d8] sm:$0xff]  ;;  %v1357_v32 = vld [vmem:[%s7478_s22 + $0x22c8] sm:$0xff] }
  0x7b   : > { %5102 = vmatpush1.bf16.msra.mxu1 %v5101_v55  ;;  %v321_v55 = vld [vmem:[%s7478_s22 + $0x268] sm:$0xff]  ;;  %v1354_v27 = vld [vmem:[%s7478_s22 + $0x22b0] sm:$0xff]  ;;  %v5135_v37 = vpack.c.bf16 %v335_v31, %v333_v28  ;;  %v332_v38 = vld [vmem:[%s7478_s22 + $0x2c0] sm:$0xff] }
  0x7c   : > { %6126 = vmatpush1.bf16.msra.mxu0 %v6125_v56  ;;  %5104 = vmatprep.subr.bf16.mxu1 %v5103_v57  ;;  %v323_v56 = vld [vmem:[%s7478_s22 + $0x278] sm:$0xff]  ;;  %v334_v39 = vld [vmem:[%s7478_s22 + $0x2d0] sm:$0xff]  ;;  %v337_v43 = vld [vmem:[%s7478_s22 + $0x2e8] sm:$0xff] }
  0x7d   : > { %6128 = vmatprep.subr.bf16.mxu0 %v6127_v61  ;;  %v1347_v57 = vld [vmem:[%s7478_s22 + $0x2278] sm:$0xff]  ;;  %v5123_v60 = vpack.c.bf16 %v323_v56, %v321_v55  ;;  %v320_v61 = vld [vmem:[%s7478_s22 + $0x260] sm:$0xff]  ;;  %v1358_v42 = vld [vmem:[%s7478_s22 + $0x22d0] sm:$0xff] }
  0x7e   : > { %v5125_v6 = vpack.c.bf16 %v322_v62, %v320_v61  ;;  %v1361_v45 = vld [vmem:[%s7478_s22 + $0x22e8] sm:$0xff]  ;;  %v1363_v46 = vld [vmem:[%s7478_s22 + $0x22f8] sm:$0xff]  ;;  %v342_v61 = vld [vmem:[%s7478_s22 + $0x310] sm:$0xff] }
  0x7f   : > { %5106 = vmatpush1.bf16.msra.mxu1 %v5105_v3  ;;  %v327_v3 = vld [vmem:[%s7478_s22 + $0x298] sm:$0xff]  ;;  %v6163_v52 = vpack.c.bf16 %v1363_v46, %v1361_v45  ;;  %v341_v54 = vld [vmem:[%s7478_s22 + $0x308] sm:$0xff]  ;;  %v1364_v62 = vld [vmem:[%s7478_s22 + $0x2300] sm:$0xff] }
  0x80   : > { %6130 = vmatpush1.bf16.msra.mxu0 %v6129_v4  ;;  %5108 = vmatprep.subr.bf16.mxu1 %v5107_v5  ;;  %v1349_v4 = vld [vmem:[%s7478_s22 + $0x2288] sm:$0xff]  ;;  %v1351_v5 = vld [vmem:[%s7478_s22 + $0x2298] sm:$0xff]  ;;  %v5127_v8 = vpack.c.bf16 %v327_v3, %v325_v2 }
  0x81   : > { %6132 = vmatprep.subr.bf16.mxu0 %v6131_v9  ;;  %v324_v9 = vld [vmem:[%s7478_s22 + $0x280] sm:$0xff]  ;;  %v6151_v13 = vpack.c.bf16 %v1351_v5, %v1349_v4  ;;  %v343_v55 = vld [vmem:[%s7478_s22 + $0x318] sm:$0xff]  ;;  %v1365_v56 = vld [vmem:[%s7478_s22 + $0x2308] sm:$0xff] }
  0x82   : > { %v345_v1 = vld [vmem:[%s7478_s22 + $0x328] sm:$0xff]  ;;  %v347_v2 = vld [vmem:[%s7478_s22 + $0x338] sm:$0xff] }
  0x83   : > { %5110 = vmatpush1.bf16.msra.mxu1 %v5109_v18  ;;  %v1355_v18 = vld [vmem:[%s7478_s22 + $0x22b8] sm:$0xff]  ;;  %v1369_v3 = vld [vmem:[%s7478_s22 + $0x2328] sm:$0xff] }
  0x84   : > { %6134 = vmatpush1.bf16.msra.mxu0 %v6133_v19  ;;  %5112 = vmatprep.subr.bf16.mxu1 %v5111_v20  ;;  %v5129_v19 = vpack.c.bf16 %v326_v10, %v324_v9  ;;  %v6153_v20 = vpack.c.bf16 %v1350_v14, %v1348_v11  ;;  %v6155_v25 = vpack.c.bf16 %v1355_v18, %v1353_v17  ;;  %v1371_v4 = vld [vmem:[%s7478_s22 + $0x2338] sm:$0xff]  ;;  %v346_v9 = vld [vmem:[%s7478_s22 + $0x330] sm:$0xff]  ;;  %v1368_v10 = vld [vmem:[%s7478_s22 + $0x2320] sm:$0xff] }
  0x85   : > { %6136 = vmatprep.subr.bf16.mxu0 %v6135_v24  ;;  %v1352_v24 = vld [vmem:[%s7478_s22 + $0x22a0] sm:$0xff]  ;;  %v6171_v11 = vpack.c.bf16 %v1371_v4, %v1369_v3  ;;  %v349_v14 = vld [vmem:[%s7478_s22 + $0x348] sm:$0xff]  ;;  %v351_v15 = vld [vmem:[%s7478_s22 + $0x358] sm:$0xff] }
  0x86   : > { %2709 = vmatmul.mubr.f32.vlgmr.msra.gmra.mrb[0].mxu1 %v7607_v26  ;;  %v318_v26 = vld [vmem:[%s7478_s22 + $0x250] sm:$0xff]  ;;  %v1373_v16 = vld [vmem:[%s7478_s22 + $0x2348] sm:$0xff]  ;;  %v1375_v17 = vld [vmem:[%s7478_s22 + $0x2358] sm:$0xff] }
  0x87   : > { %5114 = vmatpush1.bf16.msra.mxu1 %v5113_v34  ;;  %3845 = vmatmul.mubr.f32.vlgmr.msra.gmra.mrb[0].mxu0 %v7614_v29  ;;  %v1345_v29 = vld [vmem:[%s7478_s22 + $0x2268] sm:$0xff]  ;;  %v5121_v58 = vpack.c.bf16 %v318_v26, %v316_v51  ;;  %v1359_v34 = vld [vmem:[%s7478_s22 + $0x22d8] sm:$0xff]  ;;  %v338_v51 = vld [vmem:[%s7478_s22 + $0x2f0] sm:$0xff] }
  0x88   : > { %6138 = vmatpush1.bf16.msra.mxu0 %v6137_v35  ;;  %5116 = vmatprep.subr.bf16.mxu1 %v5115_v36  ;;  %v6147_v0 = vpack.c.bf16 %v1347_v57, %v1345_v29  ;;  %v5133_v35 = vpack.c.bf16 %v330_v23, %v328_v22  ;;  %v6157_v36 = vpack.c.bf16 %v1354_v27, %v1352_v24  ;;  %v1360_v26 = vld [vmem:[%s7478_s22 + $0x22e0] sm:$0xff]  ;;  %v1367_v29 = vld [vmem:[%s7478_s22 + $0x2318] sm:$0xff]  ;;  %v350_v22 = vld [vmem:[%s7478_s22 + $0x350] sm:$0xff] }
  0x89   : > { %6140 = vmatprep.subr.bf16.mxu0 %v6139_v40  ;;  %2779 = vmatprep.mubr.f32.mxu1 %v2324_v44  ;;  %v1356_v40 = vld [vmem:[%s7478_s22 + $0x22c0] sm:$0xff]  ;;  %v6159_v41 = vpack.c.bf16 %v1359_v34, %v1357_v32  ;;  %v339_v44 = vld [vmem:[%s7478_s22 + $0x2f8] sm:$0xff]  ;;  %v6167_v63 = vpack.c.bf16 %v1367_v29, %v1365_v56  ;;  %v6175_v24 = vpack.c.bf16 %v1375_v17, %v1373_v16  ;;  %v353_v27 = vld [vmem:[%s7478_s22 + $0x368] sm:$0xff] }
  0x8a   : > { %3915 = vmatprep.mubr.f32.mxu0 %v2460_v47  ;;  %v5137_v47 = vpack.c.bf16 %v334_v39, %v332_v38  ;;  %v1372_v23 = vld [vmem:[%s7478_s22 + $0x2340] sm:$0xff]  ;;  %v355_v28 = vld [vmem:[%s7478_s22 + $0x378] sm:$0xff]  ;;  %v1377_v31 = vld [vmem:[%s7478_s22 + $0x2368] sm:$0xff] }
  0x8b   : > { %5118 = vmatpush1.bf16.msra.mxu1 %v5117_v48  ;;  %v6161_v48 = vpack.c.bf16 %v1358_v42, %v1356_v40  ;;  %v1379_v32 = vld [vmem:[%s7478_s22 + $0x2378] sm:$0xff]  ;;  %v354_v38 = vld [vmem:[%s7478_s22 + $0x370] sm:$0xff]  ;;  %v1376_v39 = vld [vmem:[%s7478_s22 + $0x2360] sm:$0xff] }
  0x8c   : > { %6142 = vmatpush1.bf16.msra.mxu0 %v6141_v49  ;;  %5120 = vmatprep.subr.bf16.mxu1 %v5119_v50  ;;  %v5139_v49 = vpack.c.bf16 %v339_v44, %v337_v43  ;;  %v336_v50 = vld [vmem:[%s7478_s22 + $0x2e0] sm:$0xff]  ;;  %v6179_v40 = vpack.c.bf16 %v1379_v32, %v1377_v31  ;;  %v357_v42 = vld [vmem:[%s7478_s22 + $0x388] sm:$0xff]  ;;  %v359_v43 = vld [vmem:[%s7478_s22 + $0x398] sm:$0xff] }
  0x8d   : > { %6144 = vmatprep.subr.bf16.mxu0 %v6143_v53  ;;  %v1362_v53 = vld [vmem:[%s7478_s22 + $0x22f0] sm:$0xff]  ;;  %v5141_v57 = vpack.c.bf16 %v338_v51, %v336_v50  ;;  %v1381_v44 = vld [vmem:[%s7478_s22 + $0x2388] sm:$0xff]  ;;  %v1383_v45 = vld [vmem:[%s7478_s22 + $0x2398] sm:$0xff] }
  0x8e   : > { %v358_v50 = vld [vmem:[%s7478_s22 + $0x390] sm:$0xff]  ;;  %v1380_v51 = vld [vmem:[%s7478_s22 + $0x2380] sm:$0xff]  ;;  %v1387_v56 = vld [vmem:[%s7478_s22 + $0x23b8] sm:$0xff] }
  0x8f   : > { %5122 = vmatpush1.bf16.msra.mxu1 %v5121_v58  ;;  %v6165_v58 = vpack.c.bf16 %v1362_v53, %v1360_v26  ;;  %v6183_v26 = vpack.c.bf16 %v1383_v45, %v1381_v44  ;;  %v361_v53 = vld [vmem:[%s7478_s22 + $0x3a8] sm:$0xff]  ;;  %v1391_v3 = vld [vmem:[%s7478_s22 + $0x23d8] sm:$0xff] }
  0x90   : > { %6146 = vmatpush1.bf16.msra.mxu0 %v6145_v59  ;;  %5124 = vmatprep.subr.bf16.mxu1 %v5123_v60  ;;  %v5143_v59 = vpack.c.bf16 %v343_v55, %v341_v54  ;;  %v340_v60 = vld [vmem:[%s7478_s22 + $0x300] sm:$0xff]  ;;  %v363_v54 = vld [vmem:[%s7478_s22 + $0x3b8] sm:$0xff]  ;;  %v1385_v55 = vld [vmem:[%s7478_s22 + $0x23a8] sm:$0xff] }
  0x91   : > { %6148 = vmatprep.subr.bf16.mxu0 %v6147_v0  ;;  %v1366_v0 = vld [vmem:[%s7478_s22 + $0x2310] sm:$0xff]  ;;  %v5145_v5 = vpack.c.bf16 %v342_v61, %v340_v60  ;;  %v1384_v61 = vld [vmem:[%s7478_s22 + $0x23a0] sm:$0xff]  ;;  %v1395_v16 = vld [vmem:[%s7478_s22 + $0x23f8] sm:$0xff] }
  0x92   : > { %v362_v60 = vld [vmem:[%s7478_s22 + $0x3b0] sm:$0xff]  ;;  %v1399_v31 = vld [vmem:[%s7478_s22 + $0x2418] sm:$0xff] }
  0x93   : > { %5126 = vmatpush1.bf16.msra.mxu1 %v5125_v6  ;;  %v6169_v6 = vpack.c.bf16 %v1366_v0, %v1364_v62  ;;  %v6187_v62 = vpack.c.bf16 %v1387_v56, %v1385_v55  ;;  %v365_v0 = vld [vmem:[%s7478_s22 + $0x3c8] sm:$0xff]  ;;  %v1403_v44 = vld [vmem:[%s7478_s22 + $0x2438] sm:$0xff] }
  0x94   : > { %6150 = vmatpush1.bf16.msra.mxu0 %v6149_v7  ;;  %5128 = vmatprep.subr.bf16.mxu1 %v5127_v8  ;;  %v5147_v7 = vpack.c.bf16 %v347_v2, %v345_v1  ;;  %v344_v8 = vld [vmem:[%s7478_s22 + $0x320] sm:$0xff]  ;;  %v367_v1 = vld [vmem:[%s7478_s22 + $0x3d8] sm:$0xff]  ;;  %v1389_v2 = vld [vmem:[%s7478_s22 + $0x23c8] sm:$0xff] }
  0x95   : > { %6152 = vmatprep.subr.bf16.mxu0 %v6151_v13  ;;  %v1370_v13 = vld [vmem:[%s7478_s22 + $0x2330] sm:$0xff]  ;;  %v5149_v18 = vpack.c.bf16 %v346_v9, %v344_v8  ;;  %v1388_v9 = vld [vmem:[%s7478_s22 + $0x23c0] sm:$0xff]  ;;  %v381_v55 = vld [vmem:[%s7478_s22 + $0x448] sm:$0xff] }
  0x96   : > { %v366_v8 = vld [vmem:[%s7478_s22 + $0x3d0] sm:$0xff]  ;;  %v383_v56 = vld [vmem:[%s7478_s22 + $0x458] sm:$0xff] }
  0x97   : > { %5130 = vmatpush1.bf16.msra.mxu1 %v5129_v19  ;;  %v6173_v19 = vpack.c.bf16 %v1370_v13, %v1368_v10  ;;  %v6191_v10 = vpack.c.bf16 %v1391_v3, %v1389_v2  ;;  %v369_v13 = vld [vmem:[%s7478_s22 + $0x3e8] sm:$0xff]  ;;  %v1406_v3 = vld [vmem:[%s7478_s22 + $0x2450] sm:$0xff] }
  0x98   : > { %6154 = vmatpush1.bf16.msra.mxu0 %v6153_v20  ;;  %5132 = vmatprep.subr.bf16.mxu1 %v5131_v21  ;;  %v5151_v20 = vpack.c.bf16 %v351_v15, %v349_v14  ;;  %v348_v21 = vld [vmem:[%s7478_s22 + $0x340] sm:$0xff]  ;;  %v371_v14 = vld [vmem:[%s7478_s22 + $0x3f8] sm:$0xff]  ;;  %v1393_v15 = vld [vmem:[%s7478_s22 + $0x23e8] sm:$0xff] }
  0x99   : > { %6156 = vmatprep.subr.bf16.mxu0 %v6155_v25  ;;  %v1374_v25 = vld [vmem:[%s7478_s22 + $0x2350] sm:$0xff]  ;;  %v5153_v34 = vpack.c.bf16 %v350_v22, %v348_v21  ;;  %v1392_v22 = vld [vmem:[%s7478_s22 + $0x23e0] sm:$0xff] }
  0x9a   : > { %v370_v21 = vld [vmem:[%s7478_s22 + $0x3f0] sm:$0xff] }
  0x9b   : > { %5134 = vmatpush1.bf16.msra.mxu1 %v5133_v35  ;;  %v6177_v35 = vpack.c.bf16 %v1374_v25, %v1372_v23  ;;  %v6195_v23 = vpack.c.bf16 %v1395_v16, %v1393_v15  ;;  %v373_v25 = vld [vmem:[%s7478_s22 + $0x408] sm:$0xff]  ;;  %v1410_v15 = vld [vmem:[%s7478_s22 + $0x2470] sm:$0xff] }
  0x9c   : > { %6158 = vmatpush1.bf16.msra.mxu0 %v6157_v36  ;;  %5136 = vmatprep.subr.bf16.mxu1 %v5135_v37  ;;  %v5155_v36 = vpack.c.bf16 %v355_v28, %v353_v27  ;;  %v352_v37 = vld [vmem:[%s7478_s22 + $0x360] sm:$0xff]  ;;  %v375_v27 = vld [vmem:[%s7478_s22 + $0x418] sm:$0xff]  ;;  %v1397_v28 = vld [vmem:[%s7478_s22 + $0x2408] sm:$0xff] }
  0x9d   : > { %6160 = vmatprep.subr.bf16.mxu0 %v6159_v41  ;;  %v1378_v41 = vld [vmem:[%s7478_s22 + $0x2370] sm:$0xff]  ;;  %v5157_v46 = vpack.c.bf16 %v354_v38, %v352_v37  ;;  %v1396_v38 = vld [vmem:[%s7478_s22 + $0x2400] sm:$0xff]  ;;  %v389_v16 = vld [vmem:[%s7478_s22 + $0x488] sm:$0xff] }
  0x9e   : > { %v374_v37 = vld [vmem:[%s7478_s22 + $0x410] sm:$0xff] }
  0x9f   : > { %5138 = vmatpush1.bf16.msra.mxu1 %v5137_v47  ;;  %v6181_v47 = vpack.c.bf16 %v1378_v41, %v1376_v39  ;;  %v6199_v39 = vpack.c.bf16 %v1399_v31, %v1397_v28  ;;  %v377_v41 = vld [vmem:[%s7478_s22 + $0x428] sm:$0xff]  ;;  %v1414_v28 = vld [vmem:[%s7478_s22 + $0x2490] sm:$0xff] }
  0xa0   : > { %6162 = vmatpush1.bf16.msra.mxu0 %v6161_v48  ;;  %5140 = vmatprep.subr.bf16.mxu1 %v5139_v49  ;;  %v5159_v48 = vpack.c.bf16 %v359_v43, %v357_v42  ;;  %v356_v49 = vld [vmem:[%s7478_s22 + $0x380] sm:$0xff]  ;;  %v379_v42 = vld [vmem:[%s7478_s22 + $0x438] sm:$0xff]  ;;  %v1401_v43 = vld [vmem:[%s7478_s22 + $0x2428] sm:$0xff] }
  0xa1   : > { %6164 = vmatprep.subr.bf16.mxu0 %v6163_v52  ;;  %v1382_v52 = vld [vmem:[%s7478_s22 + $0x2390] sm:$0xff]  ;;  %v5161_v29 = vpack.c.bf16 %v358_v50, %v356_v49  ;;  %v5179_v49 = vpack.c.bf16 %v379_v42, %v377_v41  ;;  %v393_v31 = vld [vmem:[%s7478_s22 + $0x4a8] sm:$0xff]  ;;  %v1416_v41 = vld [vmem:[%s7478_s22 + $0x24a0] sm:$0xff] }
  0xa2   : > { %v378_v50 = vld [vmem:[%s7478_s22 + $0x430] sm:$0xff] }
  0xa3   : > { %5142 = vmatpush1.bf16.msra.mxu1 %v5141_v57  ;;  %v6185_v57 = vpack.c.bf16 %v1382_v52, %v1380_v51  ;;  %v1400_v51 = vld [vmem:[%s7478_s22 + $0x2420] sm:$0xff]  ;;  %v7815_v52 = vld [vmem:[%s7496_s29 + $0x48] sm:$0xff] }
  0xa4   : > { %6166 = vmatpush1.bf16.msra.mxu0 %v6165_v58  ;;  %5144 = vmatprep.subr.bf16.mxu1 %v5143_v59  ;;  %v5163_v58 = vpack.c.bf16 %v363_v54, %v361_v53  ;;  %v360_v59 = vld [vmem:[%s7478_s22 + $0x3a0] sm:$0xff]  ;;  %v6203_v53 = vpack.c.bf16 %v1403_v44, %v1401_v43  ;;  %v1402_v54 = vld [vmem:[%s7478_s22 + $0x2430] sm:$0xff]  ;;  %v397_v44 = vld [vmem:[%s7478_s22 + $0x4c8] sm:$0xff] }
  0xa5   : > { %6168 = vmatprep.subr.bf16.mxu0 %v6167_v63  ;;  %v1386_v63 = vld [vmem:[%s7478_s22 + $0x23b0] sm:$0xff]  ;;  %v5165_v4 = vpack.c.bf16 %v362_v60, %v360_v59 }
  0xa6   : > { %v1418_v43 = vld [vmem:[%s7478_s22 + $0x24b0] sm:$0xff] }
  0xa7   : > { %5146 = vmatpush1.bf16.msra.mxu1 %v5145_v5  ;;  %v6189_v5 = vpack.c.bf16 %v1386_v63, %v1384_v61  ;;  %v380_v63 = vld [vmem:[%s7478_s22 + $0x440] sm:$0xff] }
  0xa8   : > { %6170 = vmatpush1.bf16.msra.mxu0 %v6169_v6  ;;  %5148 = vmatprep.subr.bf16.mxu1 %v5147_v7  ;;  %v5167_v6 = vpack.c.bf16 %v367_v1, %v365_v0  ;;  %v364_v7 = vld [vmem:[%s7478_s22 + $0x3c0] sm:$0xff]  ;;  %v382_v0 = vld [vmem:[%s7478_s22 + $0x450] sm:$0xff] }
  0xa9   : > { %6172 = vmatprep.subr.bf16.mxu0 %v6171_v11  ;;  %v1390_v11 = vld [vmem:[%s7478_s22 + $0x23d0] sm:$0xff]  ;;  %v5169_v17 = vpack.c.bf16 %v366_v8, %v364_v7  ;;  %v1404_v1 = vld [vmem:[%s7478_s22 + $0x2440] sm:$0xff]  ;;  %v5185_v7 = vpack.c.bf16 %v382_v0, %v380_v63 }
  0xaa   : > { %v6209_v8 = vpack.c.bf16 %v1406_v3, %v1404_v1  ;;  %v400_v0 = vld [vmem:[%s7478_s22 + $0x4e0] sm:$0xff]  ;;  %v402_v1 = vld [vmem:[%s7478_s22 + $0x4f0] sm:$0xff] }
  0xab   : > { %5150 = vmatpush1.bf16.msra.mxu1 %v5149_v18  ;;  %v6193_v18 = vpack.c.bf16 %v1390_v11, %v1388_v9  ;;  %v386_v11 = vld [vmem:[%s7478_s22 + $0x470] sm:$0xff] }
  0xac   : > { %6174 = vmatpush1.bf16.msra.mxu0 %v6173_v19  ;;  %5152 = vmatprep.subr.bf16.mxu1 %v5151_v20  ;;  %v5171_v19 = vpack.c.bf16 %v371_v14, %v369_v13  ;;  %v368_v20 = vld [vmem:[%s7478_s22 + $0x3e0] sm:$0xff] }
  0xad   : > { %6176 = vmatprep.subr.bf16.mxu0 %v6175_v24  ;;  %v1394_v24 = vld [vmem:[%s7478_s22 + $0x23f0] sm:$0xff]  ;;  %v5173_v32 = vpack.c.bf16 %v370_v21, %v368_v20  ;;  %v1408_v13 = vld [vmem:[%s7478_s22 + $0x2460] sm:$0xff] }
  0xae   : > { %v6213_v21 = vpack.c.bf16 %v1410_v15, %v1408_v13  ;;  %v406_v13 = vld [vmem:[%s7478_s22 + $0x510] sm:$0xff] }
  0xaf   : > { %5154 = vmatpush1.bf16.msra.mxu1 %v5153_v34  ;;  %v6197_v34 = vpack.c.bf16 %v1394_v24, %v1392_v22  ;;  %v390_v24 = vld [vmem:[%s7478_s22 + $0x490] sm:$0xff] }
  0xb0   : > { %6178 = vmatpush1.bf16.msra.mxu0 %v6177_v35  ;;  %5156 = vmatprep.subr.bf16.mxu1 %v5155_v36  ;;  %v5175_v35 = vpack.c.bf16 %v375_v27, %v373_v25  ;;  %v372_v36 = vld [vmem:[%s7478_s22 + $0x400] sm:$0xff] }
  0xb1   : > { %6180 = vmatprep.subr.bf16.mxu0 %v6179_v40  ;;  %v1398_v40 = vld [vmem:[%s7478_s22 + $0x2410] sm:$0xff]  ;;  %v5177_v45 = vpack.c.bf16 %v374_v37, %v372_v36  ;;  %v1412_v25 = vld [vmem:[%s7478_s22 + $0x2480] sm:$0xff] }
  0xb2   : > { %v6217_v37 = vpack.c.bf16 %v1414_v28, %v1412_v25  ;;  %v410_v25 = vld [vmem:[%s7478_s22 + $0x530] sm:$0xff] }
  0xb3   : > { %5158 = vmatpush1.bf16.msra.mxu1 %v5157_v46  ;;  %v376_v46 = vld [vmem:[%s7478_s22 + $0x420] sm:$0xff] }
  0xb4   : > { %6182 = vmatpush1.bf16.msra.mxu0 %v6181_v47  ;;  %5160 = vmatprep.subr.bf16.mxu1 %v5159_v48  ;;  %v7806_v47 = vld [vmem:[%s7496_s29 + $0x8] sm:$0xff]  ;;  %v6201_v48 = vpack.c.bf16 %v1398_v40, %v1396_v38  ;;  %v5181_v60 = vpack.c.bf16 %v378_v50, %v376_v46  ;;  %v394_v40 = vld [vmem:[%s7478_s22 + $0x4b0] sm:$0xff]  ;;  %v6221_v50 = vpack.c.bf16 %v1418_v43, %v1416_v41 }
  0xb5   : > { %6184 = vmatprep.subr.bf16.mxu0 %v6183_v26  ;;  %v7812_v26 = vrot.slane %v7806_v47, %v7592_v12  ;;  %v1421_v46 = vld [vmem:[%s7478_s22 + $0x24c8] sm:$0xff]  ;;  %v414_v41 = vld [vmem:[%s7478_s22 + $0x550] sm:$0xff] }
  0xb7   : > { %5162 = vmatpush1.bf16.msra.mxu1 %v5161_v29  ;;  %v7822_v29 = vrot.slane %v7815_v52, %v7592_v12  ;;  %v2340_v59 = vcombine.high %v7812_v26, %v7812_v26 }
  0xb8   : > { %6186 = vmatpush1.bf16.msra.mxu0 %v6185_v57  ;;  %5164 = vmatprep.subr.bf16.mxu1 %v5163_v58  ;;  %v1405_v57 = vld [vmem:[%s7478_s22 + $0x2448] sm:$0xff]  ;;  %v1407_v58 = vld [vmem:[%s7478_s22 + $0x2458] sm:$0xff] }
  0xb9   : > { %6188 = vmatprep.subr.bf16.mxu0 %v6187_v62  ;;  %v2476_v61 = vcombine.high %v7822_v29, %v7822_v29  ;;  %v5183_v62 = vpack.c.bf16 %v383_v56, %v381_v55  ;;  %v6207_v2 = vpack.c.bf16 %v1407_v58, %v1405_v57  ;;  %v1420_v55 = vld [vmem:[%s7478_s22 + $0x24c0] sm:$0xff]  ;;  %v1422_v57 = vld [vmem:[%s7478_s22 + $0x24d0] sm:$0xff]  ;;  %v401_v58 = vld [vmem:[%s7478_s22 + $0x4e8] sm:$0xff] }
  0xbb   : > { %5166 = vmatpush1.bf16.msra.mxu1 %v5165_v4  ;;  %v387_v4 = vld [vmem:[%s7478_s22 + $0x478] sm:$0xff] }
  0xbc   : > { %6190 = vmatpush1.bf16.msra.mxu0 %v6189_v5  ;;  %5168 = vmatprep.subr.bf16.mxu1 %v5167_v6  ;;  %v1409_v5 = vld [vmem:[%s7478_s22 + $0x2468] sm:$0xff]  ;;  %v1411_v6 = vld [vmem:[%s7478_s22 + $0x2478] sm:$0xff] }
  0xbd   : > { %6192 = vmatprep.subr.bf16.mxu0 %v6191_v10  ;;  %v384_v10 = vld [vmem:[%s7478_s22 + $0x460] sm:$0xff]  ;;  %v6211_v14 = vpack.c.bf16 %v1411_v6, %v1409_v5  ;;  %v407_v5 = vld [vmem:[%s7478_s22 + $0x518] sm:$0xff]  ;;  %v1429_v6 = vld [vmem:[%s7478_s22 + $0x2508] sm:$0xff] }
  0xbe   : > { %v5189_v20 = vpack.c.bf16 %v386_v11, %v384_v10  ;;  %v404_v11 = vld [vmem:[%s7478_s22 + $0x500] sm:$0xff] }
  0xbf   : > { %5170 = vmatpush1.bf16.msra.mxu1 %v5169_v17  ;;  %v391_v17 = vld [vmem:[%s7478_s22 + $0x498] sm:$0xff] }
  0xc0   : > { %6194 = vmatpush1.bf16.msra.mxu0 %v6193_v18  ;;  %5172 = vmatprep.subr.bf16.mxu1 %v5171_v19  ;;  %v1413_v18 = vld [vmem:[%s7478_s22 + $0x2488] sm:$0xff]  ;;  %v1415_v19 = vld [vmem:[%s7478_s22 + $0x2498] sm:$0xff]  ;;  %v5191_v22 = vpack.c.bf16 %v391_v17, %v389_v16  ;;  %v1430_v16 = vld [vmem:[%s7478_s22 + $0x2510] sm:$0xff] }
  0xc1   : > { %6196 = vmatprep.subr.bf16.mxu0 %v6195_v23  ;;  %v388_v23 = vld [vmem:[%s7478_s22 + $0x480] sm:$0xff]  ;;  %v6215_v27 = vpack.c.bf16 %v1415_v19, %v1413_v18  ;;  %v409_v17 = vld [vmem:[%s7478_s22 + $0x528] sm:$0xff]  ;;  %v411_v18 = vld [vmem:[%s7478_s22 + $0x538] sm:$0xff] }
  0xc2   : > { %v5193_v36 = vpack.c.bf16 %v390_v24, %v388_v23  ;;  %v1433_v19 = vld [vmem:[%s7478_s22 + $0x2528] sm:$0xff]  ;;  %v5211_v23 = vpack.c.bf16 %v411_v18, %v409_v17  ;;  %v408_v24 = vld [vmem:[%s7478_s22 + $0x520] sm:$0xff]  ;;  %v1450_v17 = vld [vmem:[%s7478_s22 + $0x25b0] sm:$0xff] }
  0xc3   : > { %5174 = vmatpush1.bf16.msra.mxu1 %v5173_v32  ;;  %v395_v32 = vld [vmem:[%s7478_s22 + $0x4b8] sm:$0xff]  ;;  %v429_v18 = vld [vmem:[%s7478_s22 + $0x5c8] sm:$0xff] }
  0xc4   : > { %6198 = vmatpush1.bf16.msra.mxu0 %v6197_v34  ;;  %5176 = vmatprep.subr.bf16.mxu1 %v5175_v35  ;;  %v1417_v34 = vld [vmem:[%s7478_s22 + $0x24a8] sm:$0xff]  ;;  %v1419_v35 = vld [vmem:[%s7478_s22 + $0x24b8] sm:$0xff]  ;;  %v5195_v38 = vpack.c.bf16 %v395_v32, %v393_v31  ;;  %v1434_v31 = vld [vmem:[%s7478_s22 + $0x2530] sm:$0xff] }
  0xc5   : > { %6200 = vmatprep.subr.bf16.mxu0 %v6199_v39  ;;  %v392_v39 = vld [vmem:[%s7478_s22 + $0x4a0] sm:$0xff]  ;;  %v6219_v42 = vpack.c.bf16 %v1419_v35, %v1417_v34  ;;  %v413_v32 = vld [vmem:[%s7478_s22 + $0x548] sm:$0xff]  ;;  %v415_v34 = vld [vmem:[%s7478_s22 + $0x558] sm:$0xff] }
  0xc6   : > { %2780 = vmatmul.mubr.f32.vlgmr.msra.gmra.mrb[0].mxu1 %v7663_v30  ;;  %v6205_v30 = vpack.c.bf16 %v1402_v54, %v1400_v51  ;;  %v398_v54 = vld [vmem:[%s7478_s22 + $0x4d0] sm:$0xff]  ;;  %v1437_v35 = vld [vmem:[%s7478_s22 + $0x2548] sm:$0xff] }
  0xc7   : > { %5178 = vmatpush1.bf16.msra.mxu1 %v5177_v45  ;;  %3916 = vmatmul.mubr.f32.vlgmr.msra.gmra.mrb[0].mxu0 %v7668_v33  ;;  %v385_v33 = vld [vmem:[%s7478_s22 + $0x468] sm:$0xff]  ;;  %v399_v45 = vld [vmem:[%s7478_s22 + $0x4d8] sm:$0xff] }
  0xc8   : > { %6202 = vmatpush1.bf16.msra.mxu0 %v6201_v48  ;;  %5180 = vmatprep.subr.bf16.mxu1 %v5179_v49  ;;  %v5187_v9 = vpack.c.bf16 %v387_v4, %v385_v33  ;;  %v1423_v48 = vld [vmem:[%s7478_s22 + $0x24d8] sm:$0xff]  ;;  %v5197_v49 = vpack.c.bf16 %v394_v40, %v392_v39  ;;  %v5199_v51 = vpack.c.bf16 %v399_v45, %v397_v44  ;;  %v1426_v33 = vld [vmem:[%s7478_s22 + $0x24f0] sm:$0xff]  ;;  %v405_v4 = vld [vmem:[%s7478_s22 + $0x508] sm:$0xff] }
  0xc9   : > { %6204 = vmatprep.subr.bf16.mxu0 %v6203_v53  ;;  %2850 = vmatprep.mubr.f32.mxu1 %v2340_v59  ;;  %v396_v53 = vld [vmem:[%s7478_s22 + $0x4c0] sm:$0xff]  ;;  %v6223_v56 = vpack.c.bf16 %v1423_v48, %v1421_v46  ;;  %v403_v59 = vld [vmem:[%s7478_s22 + $0x4f8] sm:$0xff]  ;;  %v5207_v10 = vpack.c.bf16 %v407_v5, %v405_v4  ;;  %v5215_v39 = vpack.c.bf16 %v415_v34, %v413_v32  ;;  %v1438_v44 = vld [vmem:[%s7478_s22 + $0x2550] sm:$0xff] }
  0xca   : > { %3986 = vmatprep.mubr.f32.mxu0 %v2476_v61  ;;  %v1427_v61 = vld [vmem:[%s7478_s22 + $0x24f8] sm:$0xff]  ;;  %v5203_v63 = vpack.c.bf16 %v403_v59, %v401_v58  ;;  %v412_v40 = vld [vmem:[%s7478_s22 + $0x540] sm:$0xff]  ;;  %v417_v45 = vld [vmem:[%s7478_s22 + $0x568] sm:$0xff] }
  0xcb   : > { %5182 = vmatpush1.bf16.msra.mxu1 %v5181_v60  ;;  %v1425_v60 = vld [vmem:[%s7478_s22 + $0x24e8] sm:$0xff]  ;;  %v419_v46 = vld [vmem:[%s7478_s22 + $0x578] sm:$0xff]  ;;  %v1442_v58 = vld [vmem:[%s7478_s22 + $0x2570] sm:$0xff] }
  0xcc   : > { %6206 = vmatpush1.bf16.msra.mxu0 %v6205_v30  ;;  %5184 = vmatprep.subr.bf16.mxu1 %v5183_v62  ;;  %v5201_v30 = vpack.c.bf16 %v398_v54, %v396_v53  ;;  %v6225_v62 = vpack.c.bf16 %v1422_v57, %v1420_v55  ;;  %v6227_v3 = vpack.c.bf16 %v1427_v61, %v1425_v60  ;;  %v1441_v48 = vld [vmem:[%s7478_s22 + $0x2568] sm:$0xff]  ;;  %v416_v54 = vld [vmem:[%s7478_s22 + $0x560] sm:$0xff]  ;;  %v418_v55 = vld [vmem:[%s7478_s22 + $0x570] sm:$0xff] }
  0xcd   : > { %6208 = vmatprep.subr.bf16.mxu0 %v6207_v2  ;;  %v1424_v2 = vld [vmem:[%s7478_s22 + $0x24e0] sm:$0xff]  ;;  %v5219_v53 = vpack.c.bf16 %v419_v46, %v417_v45  ;;  %v421_v59 = vld [vmem:[%s7478_s22 + $0x588] sm:$0xff]  ;;  %v423_v60 = vld [vmem:[%s7478_s22 + $0x598] sm:$0xff] }
  0xce   : > { %v1445_v61 = vld [vmem:[%s7478_s22 + $0x2588] sm:$0xff]  ;;  %v1446_v4 = vld [vmem:[%s7478_s22 + $0x2590] sm:$0xff] }
  0xcf   : > { %5186 = vmatpush1.bf16.msra.mxu1 %v5185_v7  ;;  %v1431_v7 = vld [vmem:[%s7478_s22 + $0x2518] sm:$0xff]  ;;  %v425_v5 = vld [vmem:[%s7478_s22 + $0x5a8] sm:$0xff]  ;;  %v1454_v32 = vld [vmem:[%s7478_s22 + $0x25d0] sm:$0xff] }
  0xd0   : > { %6210 = vmatpush1.bf16.msra.mxu0 %v6209_v8  ;;  %5188 = vmatprep.subr.bf16.mxu1 %v5187_v9  ;;  %v5205_v8 = vpack.c.bf16 %v402_v1, %v400_v0  ;;  %v6229_v9 = vpack.c.bf16 %v1426_v33, %v1424_v2  ;;  %v6231_v15 = vpack.c.bf16 %v1431_v7, %v1429_v6  ;;  %v420_v1 = vld [vmem:[%s7478_s22 + $0x580] sm:$0xff]  ;;  %v422_v2 = vld [vmem:[%s7478_s22 + $0x590] sm:$0xff]  ;;  %v427_v6 = vld [vmem:[%s7478_s22 + $0x5b8] sm:$0xff] }
  0xd1   : > { %6212 = vmatprep.subr.bf16.mxu0 %v6211_v14  ;;  %v1428_v14 = vld [vmem:[%s7478_s22 + $0x2500] sm:$0xff]  ;;  %v5223_v0 = vpack.c.bf16 %v423_v60, %v421_v59  ;;  %v1449_v7 = vld [vmem:[%s7478_s22 + $0x25a8] sm:$0xff]  ;;  %v1458_v45 = vld [vmem:[%s7478_s22 + $0x25f0] sm:$0xff] }
  0xd2   : > { %v433_v34 = vld [vmem:[%s7478_s22 + $0x5e8] sm:$0xff]  ;;  %v1460_v59 = vld [vmem:[%s7478_s22 + $0x2600] sm:$0xff]  ;;  %v1462_v60 = vld [vmem:[%s7478_s22 + $0x2610] sm:$0xff] }
  0xd3   : > { %5190 = vmatpush1.bf16.msra.mxu1 %v5189_v20  ;;  %v1435_v20 = vld [vmem:[%s7478_s22 + $0x2538] sm:$0xff]  ;;  %v437_v46 = vld [vmem:[%s7478_s22 + $0x608] sm:$0xff] }
  0xd4   : > { %6214 = vmatpush1.bf16.msra.mxu0 %v6213_v21  ;;  %5192 = vmatprep.subr.bf16.mxu1 %v5191_v22  ;;  %v5209_v21 = vpack.c.bf16 %v406_v13, %v404_v11  ;;  %v6233_v22 = vpack.c.bf16 %v1430_v16, %v1428_v14  ;;  %v6235_v28 = vpack.c.bf16 %v1435_v20, %v1433_v19  ;;  %v424_v13 = vld [vmem:[%s7478_s22 + $0x5a0] sm:$0xff]  ;;  %v426_v14 = vld [vmem:[%s7478_s22 + $0x5b0] sm:$0xff]  ;;  %v431_v19 = vld [vmem:[%s7478_s22 + $0x5d8] sm:$0xff] }
  0xd5   : > { %6216 = vmatprep.subr.bf16.mxu0 %v6215_v27  ;;  %v1432_v27 = vld [vmem:[%s7478_s22 + $0x2520] sm:$0xff]  ;;  %v5227_v11 = vpack.c.bf16 %v427_v6, %v425_v5  ;;  %v1453_v20 = vld [vmem:[%s7478_s22 + $0x25c8] sm:$0xff] }
  0xd6   : > { %v1464_v5 = vld [vmem:[%s7478_s22 + $0x2620] sm:$0xff] }
  0xd7   : > { %5194 = vmatpush1.bf16.msra.mxu1 %v5193_v36  ;;  %v1439_v36 = vld [vmem:[%s7478_s22 + $0x2558] sm:$0xff] }
  0xd8   : > { %6218 = vmatpush1.bf16.msra.mxu0 %v6217_v37  ;;  %5196 = vmatprep.subr.bf16.mxu1 %v5195_v38  ;;  %v5213_v37 = vpack.c.bf16 %v410_v25, %v408_v24  ;;  %v6237_v38 = vpack.c.bf16 %v1434_v31, %v1432_v27  ;;  %v6239_v43 = vpack.c.bf16 %v1439_v36, %v1437_v35  ;;  %v428_v25 = vld [vmem:[%s7478_s22 + $0x5c0] sm:$0xff]  ;;  %v430_v27 = vld [vmem:[%s7478_s22 + $0x5d0] sm:$0xff]  ;;  %v435_v35 = vld [vmem:[%s7478_s22 + $0x5f8] sm:$0xff] }
  0xd9   : > { %6220 = vmatprep.subr.bf16.mxu0 %v6219_v42  ;;  %v1436_v42 = vld [vmem:[%s7478_s22 + $0x2540] sm:$0xff]  ;;  %v5231_v24 = vpack.c.bf16 %v431_v19, %v429_v18  ;;  %v1457_v36 = vld [vmem:[%s7478_s22 + $0x25e8] sm:$0xff] }
  0xda   : > { %v444_v18 = vld [vmem:[%s7478_s22 + $0x640] sm:$0xff] }
  0xdb   : > { %5198 = vmatpush1.bf16.msra.mxu1 %v5197_v49  ;;  %v1443_v49 = vld [vmem:[%s7478_s22 + $0x2578] sm:$0xff]  ;;  %v1468_v19 = vld [vmem:[%s7478_s22 + $0x2640] sm:$0xff] }
  0xdc   : > { %6222 = vmatpush1.bf16.msra.mxu0 %v6221_v50  ;;  %5200 = vmatprep.subr.bf16.mxu1 %v5199_v51  ;;  %v5217_v50 = vpack.c.bf16 %v414_v41, %v412_v40  ;;  %v6241_v51 = vpack.c.bf16 %v1438_v44, %v1436_v42  ;;  %v6243_v57 = vpack.c.bf16 %v1443_v49, %v1441_v48  ;;  %v432_v41 = vld [vmem:[%s7478_s22 + $0x5e0] sm:$0xff]  ;;  %v434_v42 = vld [vmem:[%s7478_s22 + $0x5f0] sm:$0xff]  ;;  %v439_v48 = vld [vmem:[%s7478_s22 + $0x618] sm:$0xff] }
  0xdd   : > { %6224 = vmatprep.subr.bf16.mxu0 %v6223_v56  ;;  %v1440_v56 = vld [vmem:[%s7478_s22 + $0x2560] sm:$0xff]  ;;  %v5235_v40 = vpack.c.bf16 %v435_v35, %v433_v34  ;;  %v2325_v49 = vcombine.high %v7806_v47, %v7806_v47 }
  0xde   : > { %v1472_v34 = vld [vmem:[%s7478_s22 + $0x2660] sm:$0xff] }
  0xdf   : > { %5202 = vmatpush1.bf16.msra.mxu1 %v5201_v30  ;;  %v1447_v30 = vld [vmem:[%s7478_s22 + $0x2598] sm:$0xff] }
  0xe0   : > { %6226 = vmatpush1.bf16.msra.mxu0 %v6225_v62  ;;  %5204 = vmatprep.subr.bf16.mxu1 %v5203_v63  ;;  %v5221_v62 = vpack.c.bf16 %v418_v55, %v416_v54  ;;  %v6245_v63 = vpack.c.bf16 %v1442_v58, %v1440_v56  ;;  %v6247_v33 = vpack.c.bf16 %v1447_v30, %v1445_v61  ;;  %v438_v58 = vld [vmem:[%s7478_s22 + $0x610] sm:$0xff]  ;;  %v441_v61 = vld [vmem:[%s7478_s22 + $0x628] sm:$0xff]  ;;  %v443_v30 = vld [vmem:[%s7478_s22 + $0x638] sm:$0xff] }
  0xe1   : > { %6228 = vmatprep.subr.bf16.mxu0 %v6227_v3  ;;  %v1444_v3 = vld [vmem:[%s7478_s22 + $0x2580] sm:$0xff]  ;;  %v5237_v54 = vpack.c.bf16 %v434_v42, %v432_v41  ;;  %v5239_v56 = vpack.c.bf16 %v439_v48, %v437_v46 }
  0xe2   : > { %v1476_v46 = vld [vmem:[%s7478_s22 + $0x2680] sm:$0xff] }
  0xe3   : > { %5206 = vmatpush1.bf16.msra.mxu1 %v5205_v8  ;;  %v1451_v8 = vld [vmem:[%s7478_s22 + $0x25b8] sm:$0xff] }
  0xe4   : > { %6230 = vmatpush1.bf16.msra.mxu0 %v6229_v9  ;;  %5208 = vmatprep.subr.bf16.mxu1 %v5207_v10  ;;  %v5225_v9 = vpack.c.bf16 %v422_v2, %v420_v1  ;;  %v6249_v10 = vpack.c.bf16 %v1446_v4, %v1444_v3  ;;  %v6251_v16 = vpack.c.bf16 %v1451_v8, %v1449_v7  ;;  %v442_v4 = vld [vmem:[%s7478_s22 + $0x630] sm:$0xff]  ;;  %v445_v8 = vld [vmem:[%s7478_s22 + $0x648] sm:$0xff] }
  0xe5   : > { %6232 = vmatprep.subr.bf16.mxu0 %v6231_v15  ;;  %v1448_v15 = vld [vmem:[%s7478_s22 + $0x25a0] sm:$0xff]  ;;  %v6265_v2 = vpack.c.bf16 %v1462_v60, %v1460_v59  ;;  %v5243_v3 = vpack.c.bf16 %v443_v30, %v441_v61  ;;  %v1466_v7 = vld [vmem:[%s7478_s22 + $0x2630] sm:$0xff]  ;;  %v461_v30 = vld [vmem:[%s7478_s22 + $0x6c8] sm:$0xff] }
  0xe6   : > { %v458_v59 = vld [vmem:[%s7478_s22 + $0x6b0] sm:$0xff] }
  0xe7   : > { %5210 = vmatpush1.bf16.msra.mxu1 %v5209_v21  ;;  %v1455_v21 = vld [vmem:[%s7478_s22 + $0x25d8] sm:$0xff]  ;;  %v1482_v61 = vld [vmem:[%s7478_s22 + $0x26b0] sm:$0xff] }
  0xe8   : > { %6234 = vmatpush1.bf16.msra.mxu0 %v6233_v22  ;;  %5212 = vmatprep.subr.bf16.mxu1 %v5211_v23  ;;  %v5229_v22 = vpack.c.bf16 %v426_v14, %v424_v13  ;;  %v6253_v23 = vpack.c.bf16 %v1450_v17, %v1448_v15  ;;  %v6255_v31 = vpack.c.bf16 %v1455_v21, %v1453_v20  ;;  %v1471_v13 = vld [vmem:[%s7478_s22 + $0x2658] sm:$0xff]  ;;  %v1470_v21 = vld [vmem:[%s7478_s22 + $0x2650] sm:$0xff] }
  0xe9   : > { %6236 = vmatprep.subr.bf16.mxu0 %v6235_v28  ;;  %v1452_v28 = vld [vmem:[%s7478_s22 + $0x25c0] sm:$0xff] }
  0xeb   : > { %5214 = vmatpush1.bf16.msra.mxu1 %v5213_v37  ;;  %v1459_v37 = vld [vmem:[%s7478_s22 + $0x25f8] sm:$0xff] }
  0xec   : > { %6238 = vmatpush1.bf16.msra.mxu0 %v6237_v38  ;;  %5216 = vmatprep.subr.bf16.mxu1 %v5215_v39  ;;  %v5233_v38 = vpack.c.bf16 %v430_v27, %v428_v25  ;;  %v6257_v39 = vpack.c.bf16 %v1454_v32, %v1452_v28  ;;  %v6259_v44 = vpack.c.bf16 %v1459_v37, %v1457_v36  ;;  %v450_v32 = vld [vmem:[%s7478_s22 + $0x670] sm:$0xff]  ;;  %v453_v37 = vld [vmem:[%s7478_s22 + $0x688] sm:$0xff] }
  0xed   : > { %6240 = vmatprep.subr.bf16.mxu0 %v6239_v43  ;;  %v1456_v43 = vld [vmem:[%s7478_s22 + $0x25e0] sm:$0xff]  ;;  %v6273_v27 = vpack.c.bf16 %v1470_v21, %v1468_v19  ;;  %v1474_v36 = vld [vmem:[%s7478_s22 + $0x2670] sm:$0xff]  ;;  %v469_v21 = vld [vmem:[%s7478_s22 + $0x708] sm:$0xff] }
  0xee   : > { %v6261_v55 = vpack.c.bf16 %v1458_v45, %v1456_v43  ;;  %v6277_v42 = vpack.c.bf16 %v1474_v36, %v1472_v34  ;;  %v454_v45 = vld [vmem:[%s7478_s22 + $0x690] sm:$0xff]  ;;  %v473_v36 = vld [vmem:[%s7478_s22 + $0x728] sm:$0xff] }
  0xef   : > { %5218 = vmatpush1.bf16.msra.mxu1 %v5217_v50  ;;  %v1461_v50 = vld [vmem:[%s7478_s22 + $0x2608] sm:$0xff] }
  0xf0   : > { %6242 = vmatpush1.bf16.msra.mxu0 %v6241_v51  ;;  %5220 = vmatprep.subr.bf16.mxu1 %v5219_v53  ;;  %v1463_v51 = vld [vmem:[%s7478_s22 + $0x2618] sm:$0xff]  ;;  %v2461_v53 = vcombine.high %v7815_v52, %v7815_v52  ;;  %v7955_v52 = vrot.slane %v2325_v49, %v7592_v12  ;;  %v1478_v49 = vld [vmem:[%s7478_s22 + $0x2690] sm:$0xff] }
  0xf1   : > { %6244 = vmatprep.subr.bf16.mxu0 %v6243_v57  ;;  %v436_v57 = vld [vmem:[%s7478_s22 + $0x600] sm:$0xff]  ;;  %v6263_v47 = vpack.c.bf16 %v1463_v51, %v1461_v50  ;;  %v457_v50 = vld [vmem:[%s7478_s22 + $0x6a8] sm:$0xff]  ;;  %v459_v51 = vld [vmem:[%s7478_s22 + $0x6b8] sm:$0xff] }
  0xf2   : > { %v5241_v1 = vpack.c.bf16 %v438_v58, %v436_v57  ;;  %v5259_v57 = vpack.c.bf16 %v459_v51, %v457_v50  ;;  %v456_v58 = vld [vmem:[%s7478_s22 + $0x6a0] sm:$0xff]  ;;  %v479_v50 = vld [vmem:[%s7478_s22 + $0x758] sm:$0xff]  ;;  %v1501_v51 = vld [vmem:[%s7478_s22 + $0x2748] sm:$0xff] }
  0xf3   : > { %5222 = vmatpush1.bf16.msra.mxu1 %v5221_v62  ;;  %v1465_v62 = vld [vmem:[%s7478_s22 + $0x2628] sm:$0xff] }
  0xf4   : > { %6246 = vmatpush1.bf16.msra.mxu0 %v6245_v63  ;;  %5224 = vmatprep.subr.bf16.mxu1 %v5223_v0  ;;  %v1467_v63 = vld [vmem:[%s7478_s22 + $0x2638] sm:$0xff]  ;;  %v7960_v0 = vrot.slane %v2461_v53, %v7592_v12  ;;  %v1481_v53 = vld [vmem:[%s7478_s22 + $0x26a8] sm:$0xff] }
  0xf5   : > { %6248 = vmatprep.subr.bf16.mxu0 %v6247_v33  ;;  %v440_v33 = vld [vmem:[%s7478_s22 + $0x620] sm:$0xff]  ;;  %v6267_v6 = vpack.c.bf16 %v1467_v63, %v1465_v62  ;;  %v463_v62 = vld [vmem:[%s7478_s22 + $0x6d8] sm:$0xff]  ;;  %v1485_v63 = vld [vmem:[%s7478_s22 + $0x26c8] sm:$0xff] }
  0xf6   : > { %v2477_v14 = vcombine.high %v7960_v0, %v7960_v0  ;;  %v5245_v15 = vpack.c.bf16 %v442_v4, %v440_v33  ;;  %v5263_v33 = vpack.c.bf16 %v463_v62, %v461_v30  ;;  %v460_v4 = vld [vmem:[%s7478_s22 + $0x6c0] sm:$0xff]  ;;  %v483_v30 = vld [vmem:[%s7478_s22 + $0x778] sm:$0xff]  ;;  %v1505_v62 = vld [vmem:[%s7478_s22 + $0x2768] sm:$0xff] }
  0xf7   : > { %5226 = vmatpush1.bf16.msra.mxu1 %v5225_v9  ;;  %v447_v9 = vld [vmem:[%s7478_s22 + $0x658] sm:$0xff] }
  0xf8   : > { %6250 = vmatpush1.bf16.msra.mxu0 %v6249_v10  ;;  %5228 = vmatprep.subr.bf16.mxu1 %v5227_v11  ;;  %v2341_v10 = vcombine.high %v7955_v52, %v7955_v52  ;;  %v1469_v11 = vld [vmem:[%s7478_s22 + $0x2648] sm:$0xff]  ;;  %v5247_v17 = vpack.c.bf16 %v447_v9, %v445_v8  ;;  %v1486_v8 = vld [vmem:[%s7478_s22 + $0x26d0] sm:$0xff] }
  0xf9   : > { %6252 = vmatprep.subr.bf16.mxu0 %v6251_v16  ;;  %v6269_v16 = vpack.c.bf16 %v1466_v7, %v1464_v5  ;;  %v6271_v20 = vpack.c.bf16 %v1471_v13, %v1469_v11  ;;  %v462_v5 = vld [vmem:[%s7478_s22 + $0x6d0] sm:$0xff]  ;;  %v465_v9 = vld [vmem:[%s7478_s22 + $0x6e8] sm:$0xff]  ;;  %v1491_v13 = vld [vmem:[%s7478_s22 + $0x26f8] sm:$0xff] }
  0xfa   : > { %v1489_v11 = vld [vmem:[%s7478_s22 + $0x26e8] sm:$0xff] }
  0xfb   : > { %5230 = vmatpush1.bf16.msra.mxu1 %v5229_v22  ;;  %v449_v22 = vld [vmem:[%s7478_s22 + $0x668] sm:$0xff]  ;;  %v6291_v19 = vpack.c.bf16 %v1491_v13, %v1489_v11  ;;  %v1511_v11 = vld [vmem:[%s7478_s22 + $0x2798] sm:$0xff] }
  0xfc   : > { %6254 = vmatpush1.bf16.msra.mxu0 %v6253_v23  ;;  %5232 = vmatprep.subr.bf16.mxu1 %v5231_v24  ;;  %v451_v23 = vld [vmem:[%s7478_s22 + $0x678] sm:$0xff] }
  0xfd   : > { %6256 = vmatprep.subr.bf16.mxu0 %v6255_v31  ;;  %v1475_v24 = vld [vmem:[%s7478_s22 + $0x2678] sm:$0xff]  ;;  %v5251_v28 = vpack.c.bf16 %v451_v23, %v449_v22  ;;  %v448_v31 = vld [vmem:[%s7478_s22 + $0x660] sm:$0xff]  ;;  %v1493_v23 = vld [vmem:[%s7478_s22 + $0x2708] sm:$0xff] }
  0xfe   : > { %v5253_v41 = vpack.c.bf16 %v450_v32, %v448_v31  ;;  %v471_v22 = vld [vmem:[%s7478_s22 + $0x718] sm:$0xff]  ;;  %v470_v31 = vld [vmem:[%s7478_s22 + $0x710] sm:$0xff]  ;;  %v1492_v32 = vld [vmem:[%s7478_s22 + $0x2700] sm:$0xff] }
  0xff   : > { %5234 = vmatpush1.bf16.msra.mxu1 %v5233_v38  ;;  %v455_v38 = vld [vmem:[%s7478_s22 + $0x698] sm:$0xff] }
 0x100   : > { %6258 = vmatpush1.bf16.msra.mxu0 %v6257_v39  ;;  %5236 = vmatprep.subr.bf16.mxu1 %v5235_v40  ;;  %v1477_v39 = vld [vmem:[%s7478_s22 + $0x2688] sm:$0xff]  ;;  %v1479_v40 = vld [vmem:[%s7478_s22 + $0x2698] sm:$0xff]  ;;  %v5255_v43 = vpack.c.bf16 %v455_v38, %v453_v37 }
 0x101   : > { %6260 = vmatprep.subr.bf16.mxu0 %v6259_v44  ;;  %v452_v44 = vld [vmem:[%s7478_s22 + $0x680] sm:$0xff]  ;;  %v6279_v48 = vpack.c.bf16 %v1479_v40, %v1477_v39  ;;  %v475_v37 = vld [vmem:[%s7478_s22 + $0x738] sm:$0xff]  ;;  %v1497_v38 = vld [vmem:[%s7478_s22 + $0x2728] sm:$0xff] }
 0x102   : > { %v1499_v39 = vld [vmem:[%s7478_s22 + $0x2738] sm:$0xff] }
 0x103   : > { %5238 = vmatpush1.bf16.msra.mxu1 %v5237_v54  ;;  %v1483_v54 = vld [vmem:[%s7478_s22 + $0x26b8] sm:$0xff] }
 0x104   : > { %6262 = vmatpush1.bf16.msra.mxu0 %v6261_v55  ;;  %5240 = vmatprep.subr.bf16.mxu1 %v5239_v56  ;;  %v5257_v55 = vpack.c.bf16 %v454_v45, %v452_v44  ;;  %v6281_v56 = vpack.c.bf16 %v1478_v49, %v1476_v46  ;;  %v6283_v60 = vpack.c.bf16 %v1483_v54, %v1481_v53  ;;  %v474_v44 = vld [vmem:[%s7478_s22 + $0x730] sm:$0xff]  ;;  %v1496_v45 = vld [vmem:[%s7478_s22 + $0x2720] sm:$0xff]  ;;  %v477_v49 = vld [vmem:[%s7478_s22 + $0x748] sm:$0xff] }
 0x105   : > { %6264 = vmatprep.subr.bf16.mxu0 %v6263_v47  ;;  %v1480_v47 = vld [vmem:[%s7478_s22 + $0x26a0] sm:$0xff]  ;;  %v6299_v46 = vpack.c.bf16 %v1499_v39, %v1497_v38  ;;  %v1503_v53 = vld [vmem:[%s7478_s22 + $0x2758] sm:$0xff] }
 0x106   : > { %2851 = vmatmul.mubr.f32.vlgmr.msra.gmra.mrb[0].mxu1 %v7812_v26  ;;  %v446_v26 = vld [vmem:[%s7478_s22 + $0x650] sm:$0xff]  ;;  %v1519_v38 = vld [vmem:[%s7478_s22 + $0x27d8] sm:$0xff] }
 0x107   : > { %5242 = vmatpush1.bf16.msra.mxu1 %v5241_v1  ;;  %3987 = vmatmul.mubr.f32.vlgmr.msra.gmra.mrb[0].mxu0 %v7822_v29  ;;  %v1473_v29 = vld [vmem:[%s7478_s22 + $0x2668] sm:$0xff]  ;;  %v5249_v25 = vpack.c.bf16 %v446_v26, %v444_v18  ;;  %v1487_v1 = vld [vmem:[%s7478_s22 + $0x26d8] sm:$0xff]  ;;  %v466_v18 = vld [vmem:[%s7478_s22 + $0x6f0] sm:$0xff] }
 0x108   : > { %6266 = vmatpush1.bf16.msra.mxu0 %v6265_v2  ;;  %5244 = vmatprep.subr.bf16.mxu1 %v5243_v3  ;;  %v6275_v35 = vpack.c.bf16 %v1475_v24, %v1473_v29  ;;  %v5261_v2 = vpack.c.bf16 %v458_v59, %v456_v58  ;;  %v6285_v3 = vpack.c.bf16 %v1482_v61, %v1480_v47  ;;  %v1488_v26 = vld [vmem:[%s7478_s22 + $0x26e0] sm:$0xff]  ;;  %v1495_v29 = vld [vmem:[%s7478_s22 + $0x2718] sm:$0xff]  ;;  %v478_v58 = vld [vmem:[%s7478_s22 + $0x750] sm:$0xff] }
 0x109   : > { %6268 = vmatprep.subr.bf16.mxu0 %v6267_v6  ;;  %2921 = vmatprep.mubr.f32.mxu1 %v2341_v10  ;;  %v1484_v6 = vld [vmem:[%s7478_s22 + $0x26c0] sm:$0xff]  ;;  %v6287_v7 = vpack.c.bf16 %v1487_v1, %v1485_v63  ;;  %v467_v10 = vld [vmem:[%s7478_s22 + $0x6f8] sm:$0xff]  ;;  %v6295_v34 = vpack.c.bf16 %v1495_v29, %v1493_v23  ;;  %v6303_v47 = vpack.c.bf16 %v1503_v53, %v1501_v51  ;;  %v481_v61 = vld [vmem:[%s7478_s22 + $0x768] sm:$0xff] }
 0x10a   : > { %4057 = vmatprep.mubr.f32.mxu0 %v2477_v14  ;;  %v5265_v14 = vpack.c.bf16 %v462_v5, %v460_v4  ;;  %v1500_v59 = vld [vmem:[%s7478_s22 + $0x2740] sm:$0xff]  ;;  %v1507_v63 = vld [vmem:[%s7478_s22 + $0x2778] sm:$0xff]  ;;  %v482_v4 = vld [vmem:[%s7478_s22 + $0x770] sm:$0xff] }
 0x10b   : > { %5246 = vmatpush1.bf16.msra.mxu1 %v5245_v15  ;;  %v6289_v15 = vpack.c.bf16 %v1486_v8, %v1484_v6  ;;  %v1504_v5 = vld [vmem:[%s7478_s22 + $0x2760] sm:$0xff]  ;;  %v6307_v6 = vpack.c.bf16 %v1507_v63, %v1505_v62  ;;  %v485_v8 = vld [vmem:[%s7478_s22 + $0x788] sm:$0xff]  ;;  %v1515_v23 = vld [vmem:[%s7478_s22 + $0x27b8] sm:$0xff] }
 0x10c   : > { %6270 = vmatpush1.bf16.msra.mxu0 %v6269_v16  ;;  %5248 = vmatprep.subr.bf16.mxu1 %v5247_v17  ;;  %v5267_v16 = vpack.c.bf16 %v467_v10, %v465_v9  ;;  %v464_v17 = vld [vmem:[%s7478_s22 + $0x6e0] sm:$0xff]  ;;  %v487_v9 = vld [vmem:[%s7478_s22 + $0x798] sm:$0xff]  ;;  %v1509_v10 = vld [vmem:[%s7478_s22 + $0x2788] sm:$0xff] }
 0x10d   : > { %6272 = vmatprep.subr.bf16.mxu0 %v6271_v20  ;;  %v1490_v20 = vld [vmem:[%s7478_s22 + $0x26f0] sm:$0xff]  ;;  %v5269_v24 = vpack.c.bf16 %v466_v18, %v464_v17  ;;  %v1508_v18 = vld [vmem:[%s7478_s22 + $0x2780] sm:$0xff]  ;;  %v1523_v51 = vld [vmem:[%s7478_s22 + $0x27f8] sm:$0xff] }
 0x10e   : > { %v486_v17 = vld [vmem:[%s7478_s22 + $0x790] sm:$0xff]  ;;  %v1527_v62 = vld [vmem:[%s7478_s22 + $0x2818] sm:$0xff] }
 0x10f   : > { %5250 = vmatpush1.bf16.msra.mxu1 %v5249_v25  ;;  %v6293_v25 = vpack.c.bf16 %v1490_v20, %v1488_v26  ;;  %v6311_v26 = vpack.c.bf16 %v1511_v11, %v1509_v10  ;;  %v489_v20 = vld [vmem:[%s7478_s22 + $0x7a8] sm:$0xff]  ;;  %v8089_v63 = vld [vmem:[%s7496_s29 + $0x10] sm:$0xff]  ;;  %v507_v10 = vld [vmem:[%s7478_s22 + $0x838] sm:$0xff] }
 0x110   : > { %6274 = vmatpush1.bf16.msra.mxu0 %v6273_v27  ;;  %5252 = vmatprep.subr.bf16.mxu1 %v5251_v28  ;;  %v5271_v27 = vpack.c.bf16 %v471_v22, %v469_v21  ;;  %v468_v28 = vld [vmem:[%s7478_s22 + $0x700] sm:$0xff]  ;;  %v491_v21 = vld [vmem:[%s7478_s22 + $0x7b8] sm:$0xff]  ;;  %v1513_v22 = vld [vmem:[%s7478_s22 + $0x27a8] sm:$0xff]  ;;  %v8102_v11 = vrot.slane %v8089_v63, %v7592_v12 }
 0x111   : > { %6276 = vmatprep.subr.bf16.mxu0 %v6275_v35  ;;  %v1494_v35 = vld [vmem:[%s7478_s22 + $0x2710] sm:$0xff]  ;;  %v5273_v40 = vpack.c.bf16 %v470_v31, %v468_v28  ;;  %v1512_v31 = vld [vmem:[%s7478_s22 + $0x27a0] sm:$0xff] }
 0x112   : > { %v490_v28 = vld [vmem:[%s7478_s22 + $0x7b0] sm:$0xff] }
 0x113   : > { %5254 = vmatpush1.bf16.msra.mxu1 %v5253_v41  ;;  %v6297_v41 = vpack.c.bf16 %v1494_v35, %v1492_v32  ;;  %v6315_v32 = vpack.c.bf16 %v1515_v23, %v1513_v22  ;;  %v493_v35 = vld [vmem:[%s7478_s22 + $0x7c8] sm:$0xff]  ;;  %v1530_v22 = vld [vmem:[%s7478_s22 + $0x2830] sm:$0xff] }
 0x114   : > { %6278 = vmatpush1.bf16.msra.mxu0 %v6277_v42  ;;  %5256 = vmatprep.subr.bf16.mxu1 %v5255_v43  ;;  %v5275_v42 = vpack.c.bf16 %v475_v37, %v473_v36  ;;  %v472_v43 = vld [vmem:[%s7478_s22 + $0x720] sm:$0xff]  ;;  %v495_v36 = vld [vmem:[%s7478_s22 + $0x7d8] sm:$0xff]  ;;  %v1517_v37 = vld [vmem:[%s7478_s22 + $0x27c8] sm:$0xff] }
 0x115   : > { %6280 = vmatprep.subr.bf16.mxu0 %v6279_v48  ;;  %v1498_v48 = vld [vmem:[%s7478_s22 + $0x2730] sm:$0xff]  ;;  %v5277_v54 = vpack.c.bf16 %v474_v44, %v472_v43  ;;  %v1516_v44 = vld [vmem:[%s7478_s22 + $0x27c0] sm:$0xff]  ;;  %v509_v23 = vld [vmem:[%s7478_s22 + $0x848] sm:$0xff] }
 0x116   : > { %v494_v43 = vld [vmem:[%s7478_s22 + $0x7d0] sm:$0xff] }
 0x117   : > { %5258 = vmatpush1.bf16.msra.mxu1 %v5257_v55  ;;  %v6301_v55 = vpack.c.bf16 %v1498_v48, %v1496_v45  ;;  %v6319_v45 = vpack.c.bf16 %v1519_v38, %v1517_v37  ;;  %v497_v48 = vld [vmem:[%s7478_s22 + $0x7e8] sm:$0xff]  ;;  %v1534_v38 = vld [vmem:[%s7478_s22 + $0x2850] sm:$0xff] }
 0x118   : > { %6282 = vmatpush1.bf16.msra.mxu0 %v6281_v56  ;;  %5260 = vmatprep.subr.bf16.mxu1 %v5259_v57  ;;  %v5279_v56 = vpack.c.bf16 %v479_v50, %v477_v49  ;;  %v476_v57 = vld [vmem:[%s7478_s22 + $0x740] sm:$0xff]  ;;  %v499_v49 = vld [vmem:[%s7478_s22 + $0x7f8] sm:$0xff]  ;;  %v1521_v50 = vld [vmem:[%s7478_s22 + $0x27e8] sm:$0xff] }
 0x119   : > { %6284 = vmatprep.subr.bf16.mxu0 %v6283_v60  ;;  %v1502_v60 = vld [vmem:[%s7478_s22 + $0x2750] sm:$0xff]  ;;  %v5281_v1 = vpack.c.bf16 %v478_v58, %v476_v57  ;;  %v1520_v58 = vld [vmem:[%s7478_s22 + $0x27e0] sm:$0xff] }
 0x11a   : > { %v498_v57 = vld [vmem:[%s7478_s22 + $0x7f0] sm:$0xff] }
 0x11b   : > { %5262 = vmatpush1.bf16.msra.mxu1 %v5261_v2  ;;  %v6305_v2 = vpack.c.bf16 %v1502_v60, %v1500_v59  ;;  %v6323_v59 = vpack.c.bf16 %v1523_v51, %v1521_v50  ;;  %v501_v60 = vld [vmem:[%s7478_s22 + $0x808] sm:$0xff]  ;;  %v1538_v50 = vld [vmem:[%s7478_s22 + $0x2870] sm:$0xff] }
 0x11c   : > { %6286 = vmatpush1.bf16.msra.mxu0 %v6285_v3  ;;  %5264 = vmatprep.subr.bf16.mxu1 %v5263_v33  ;;  %v5283_v3 = vpack.c.bf16 %v483_v30, %v481_v61  ;;  %v480_v33 = vld [vmem:[%s7478_s22 + $0x760] sm:$0xff]  ;;  %v503_v61 = vld [vmem:[%s7478_s22 + $0x818] sm:$0xff]  ;;  %v1525_v30 = vld [vmem:[%s7478_s22 + $0x2808] sm:$0xff] }
 0x11d   : > { %6288 = vmatprep.subr.bf16.mxu0 %v6287_v7  ;;  %v1506_v7 = vld [vmem:[%s7478_s22 + $0x2770] sm:$0xff]  ;;  %v5285_v13 = vpack.c.bf16 %v482_v4, %v480_v33  ;;  %v5303_v33 = vpack.c.bf16 %v503_v61, %v501_v60  ;;  %v500_v4 = vld [vmem:[%s7478_s22 + $0x800] sm:$0xff]  ;;  %v517_v51 = vld [vmem:[%s7478_s22 + $0x888] sm:$0xff] }
 0x11e   : > { %v1540_v60 = vld [vmem:[%s7478_s22 + $0x2880] sm:$0xff] }
 0x11f   : > { %5266 = vmatpush1.bf16.msra.mxu1 %v5265_v14  ;;  %v6309_v14 = vpack.c.bf16 %v1506_v7, %v1504_v5  ;;  %v502_v5 = vld [vmem:[%s7478_s22 + $0x810] sm:$0xff]  ;;  %v6327_v7 = vpack.c.bf16 %v1527_v62, %v1525_v30  ;;  %v521_v62 = vld [vmem:[%s7478_s22 + $0x8a8] sm:$0xff] }
 0x120   : > { %6290 = vmatpush1.bf16.msra.mxu0 %v6289_v15  ;;  %5268 = vmatprep.subr.bf16.mxu1 %v5267_v16  ;;  %v5287_v15 = vpack.c.bf16 %v487_v9, %v485_v8  ;;  %v484_v16 = vld [vmem:[%s7478_s22 + $0x780] sm:$0xff]  ;;  %v1526_v8 = vld [vmem:[%s7478_s22 + $0x2810] sm:$0xff]  ;;  %v505_v9 = vld [vmem:[%s7478_s22 + $0x828] sm:$0xff] }
 0x121   : > { %6292 = vmatprep.subr.bf16.mxu0 %v6291_v19  ;;  %v1510_v19 = vld [vmem:[%s7478_s22 + $0x2790] sm:$0xff]  ;;  %v5289_v29 = vpack.c.bf16 %v486_v17, %v484_v16  ;;  %v5305_v16 = vpack.c.bf16 %v502_v5, %v500_v4 }
 0x122   : > { %v1542_v30 = vld [vmem:[%s7478_s22 + $0x2890] sm:$0xff] }
 0x123   : > { %5270 = vmatpush1.bf16.msra.mxu1 %v5269_v24  ;;  %v6313_v24 = vpack.c.bf16 %v1510_v19, %v1508_v18  ;;  %v5307_v18 = vpack.c.bf16 %v507_v10, %v505_v9  ;;  %v506_v19 = vld [vmem:[%s7478_s22 + $0x830] sm:$0xff]  ;;  %v6345_v5 = vpack.c.bf16 %v1542_v30, %v1540_v60  ;;  %v1544_v9 = vld [vmem:[%s7478_s22 + $0x28a0] sm:$0xff] }
 0x124   : > { %6294 = vmatpush1.bf16.msra.mxu0 %v6293_v25  ;;  %5272 = vmatprep.subr.bf16.mxu1 %v5271_v27  ;;  %v5291_v25 = vpack.c.bf16 %v491_v21, %v489_v20  ;;  %v488_v27 = vld [vmem:[%s7478_s22 + $0x7a0] sm:$0xff]  ;;  %v538_v60 = vld [vmem:[%s7478_s22 + $0x930] sm:$0xff] }
 0x125   : > { %6296 = vmatprep.subr.bf16.mxu0 %v6295_v34  ;;  %v1514_v34 = vld [vmem:[%s7478_s22 + $0x27b0] sm:$0xff]  ;;  %v5293_v39 = vpack.c.bf16 %v490_v28, %v488_v27  ;;  %v1528_v20 = vld [vmem:[%s7478_s22 + $0x2820] sm:$0xff]  ;;  %v1535_v27 = vld [vmem:[%s7478_s22 + $0x2858] sm:$0xff] }
 0x127   : > { %5274 = vmatpush1.bf16.msra.mxu1 %v5273_v40  ;;  %v6317_v40 = vpack.c.bf16 %v1514_v34, %v1512_v31 }
 0x128   : > { %6298 = vmatpush1.bf16.msra.mxu0 %v6297_v41  ;;  %5276 = vmatprep.subr.bf16.mxu1 %v5275_v42  ;;  %v5295_v41 = vpack.c.bf16 %v495_v36, %v493_v35  ;;  %v492_v42 = vld [vmem:[%s7478_s22 + $0x7c0] sm:$0xff] }
 0x129   : > { %6300 = vmatprep.subr.bf16.mxu0 %v6299_v46  ;;  %v1518_v46 = vld [vmem:[%s7478_s22 + $0x27d0] sm:$0xff]  ;;  %v5297_v53 = vpack.c.bf16 %v494_v43, %v492_v42  ;;  %v508_v35 = vld [vmem:[%s7478_s22 + $0x840] sm:$0xff] }
 0x12a   : > { %v1532_v36 = vld [vmem:[%s7478_s22 + $0x2840] sm:$0xff] }
 0x12b   : > { %5278 = vmatpush1.bf16.msra.mxu1 %v5277_v54  ;;  %v6321_v54 = vpack.c.bf16 %v1518_v46, %v1516_v44  ;;  %v6337_v43 = vpack.c.bf16 %v1534_v38, %v1532_v36  ;;  %v514_v46 = vld [vmem:[%s7478_s22 + $0x870] sm:$0xff] }
 0x12c   : > { %6302 = vmatpush1.bf16.msra.mxu0 %v6301_v55  ;;  %5280 = vmatprep.subr.bf16.mxu1 %v5279_v56  ;;  %v5299_v55 = vpack.c.bf16 %v499_v49, %v497_v48  ;;  %v496_v56 = vld [vmem:[%s7478_s22 + $0x7e0] sm:$0xff]  ;;  %v530_v36 = vld [vmem:[%s7478_s22 + $0x8f0] sm:$0xff] }
 0x12d   : > { %6304 = vmatprep.subr.bf16.mxu0 %v6303_v47  ;;  %v1522_v47 = vld [vmem:[%s7478_s22 + $0x27f0] sm:$0xff]  ;;  %v1536_v48 = vld [vmem:[%s7478_s22 + $0x2860] sm:$0xff] }
 0x12f   : > { %5282 = vmatpush1.bf16.msra.mxu1 %v5281_v1  ;;  %v5301_v1 = vpack.c.bf16 %v498_v57, %v496_v56  ;;  %v6341_v57 = vpack.c.bf16 %v1538_v50, %v1536_v48  ;;  %v534_v48 = vld [vmem:[%s7478_s22 + $0x910] sm:$0xff] }
 0x130   : > { %6306 = vmatpush1.bf16.msra.mxu0 %v6305_v2  ;;  %5284 = vmatprep.subr.bf16.mxu1 %v5283_v3  ;;  %v8092_v2 = vld [vmem:[%s7496_s29 + $0x50] sm:$0xff]  ;;  %v6325_v3 = vpack.c.bf16 %v1522_v47, %v1520_v58 }
 0x131   : > { %6308 = vmatprep.subr.bf16.mxu0 %v6307_v6  ;;  %v1524_v6 = vld [vmem:[%s7478_s22 + $0x2800] sm:$0xff]  ;;  %v518_v47 = vld [vmem:[%s7478_s22 + $0x890] sm:$0xff] }
 0x132   : > { %v6329_v17 = vpack.c.bf16 %v1526_v8, %v1524_v6  ;;  %v522_v8 = vld [vmem:[%s7478_s22 + $0x8b0] sm:$0xff] }
 0x133   : > { %5286 = vmatpush1.bf16.msra.mxu1 %v5285_v13  ;;  %v1529_v13 = vld [vmem:[%s7478_s22 + $0x2828] sm:$0xff] }
 0x134   : > { %6310 = vmatpush1.bf16.msra.mxu0 %v6309_v14  ;;  %5288 = vmatprep.subr.bf16.mxu1 %v5287_v15  ;;  %v1531_v14 = vld [vmem:[%s7478_s22 + $0x2838] sm:$0xff]  ;;  %v8108_v15 = vrot.slane %v8092_v2, %v7592_v12 }
 0x135   : > { %6312 = vmatprep.subr.bf16.mxu0 %v6311_v26  ;;  %v504_v26 = vld [vmem:[%s7478_s22 + $0x820] sm:$0xff]  ;;  %v6331_v21 = vpack.c.bf16 %v1531_v14, %v1529_v13  ;;  %v1546_v13 = vld [vmem:[%s7478_s22 + $0x28b0] sm:$0xff]  ;;  %v525_v14 = vld [vmem:[%s7478_s22 + $0x8c8] sm:$0xff] }
 0x136   : > { %v2493_v28 = vcombine.high %v8108_v15, %v8108_v15  ;;  %v5309_v31 = vpack.c.bf16 %v506_v19, %v504_v26  ;;  %v6349_v19 = vpack.c.bf16 %v1546_v13, %v1544_v9  ;;  %v542_v9 = vld [vmem:[%s7478_s22 + $0x950] sm:$0xff] }
 0x137   : > { %5290 = vmatpush1.bf16.msra.mxu1 %v5289_v29  ;;  %v511_v29 = vld [vmem:[%s7478_s22 + $0x858] sm:$0xff] }
 0x138   : > { %6314 = vmatpush1.bf16.msra.mxu0 %v6313_v24  ;;  %5292 = vmatprep.subr.bf16.mxu1 %v5291_v25  ;;  %v2357_v24 = vcombine.high %v8102_v11, %v8102_v11  ;;  %v1533_v25 = vld [vmem:[%s7478_s22 + $0x2848] sm:$0xff]  ;;  %v5311_v34 = vpack.c.bf16 %v511_v29, %v509_v23  ;;  %v1548_v23 = vld [vmem:[%s7478_s22 + $0x28c0] sm:$0xff] }
 0x139   : > { %6316 = vmatprep.subr.bf16.mxu0 %v6315_v32  ;;  %v6333_v32 = vpack.c.bf16 %v1530_v22, %v1528_v20  ;;  %v6335_v37 = vpack.c.bf16 %v1535_v27, %v1533_v25  ;;  %v526_v22 = vld [vmem:[%s7478_s22 + $0x8d0] sm:$0xff]  ;;  %v529_v25 = vld [vmem:[%s7478_s22 + $0x8e8] sm:$0xff]  ;;  %v531_v27 = vld [vmem:[%s7478_s22 + $0x8f8] sm:$0xff] }
 0x13b   : > { %5294 = vmatpush1.bf16.msra.mxu1 %v5293_v39  ;;  %v513_v39 = vld [vmem:[%s7478_s22 + $0x868] sm:$0xff] }
 0x13c   : > { %6318 = vmatpush1.bf16.msra.mxu0 %v6317_v40  ;;  %5296 = vmatprep.subr.bf16.mxu1 %v5295_v41  ;;  %v515_v40 = vld [vmem:[%s7478_s22 + $0x878] sm:$0xff] }
 0x13d   : > { %6320 = vmatprep.subr.bf16.mxu0 %v6319_v45  ;;  %v1539_v41 = vld [vmem:[%s7478_s22 + $0x2878] sm:$0xff]  ;;  %v5315_v44 = vpack.c.bf16 %v515_v40, %v513_v39  ;;  %v512_v45 = vld [vmem:[%s7478_s22 + $0x860] sm:$0xff]  ;;  %v1554_v39 = vld [vmem:[%s7478_s22 + $0x28f0] sm:$0xff] }
 0x13e   : > { %v5317_v56 = vpack.c.bf16 %v514_v46, %v512_v45  ;;  %v533_v40 = vld [vmem:[%s7478_s22 + $0x908] sm:$0xff]  ;;  %v532_v46 = vld [vmem:[%s7478_s22 + $0x900] sm:$0xff] }
 0x13f   : > { %5298 = vmatpush1.bf16.msra.mxu1 %v5297_v53  ;;  %v519_v53 = vld [vmem:[%s7478_s22 + $0x898] sm:$0xff] }
 0x140   : > { %6322 = vmatpush1.bf16.msra.mxu0 %v6321_v54  ;;  %5300 = vmatprep.subr.bf16.mxu1 %v5299_v55  ;;  %v1541_v54 = vld [vmem:[%s7478_s22 + $0x2888] sm:$0xff]  ;;  %v1543_v55 = vld [vmem:[%s7478_s22 + $0x2898] sm:$0xff]  ;;  %v5319_v58 = vpack.c.bf16 %v519_v53, %v517_v51  ;;  %v1558_v51 = vld [vmem:[%s7478_s22 + $0x2910] sm:$0xff] }
 0x141   : > { %6324 = vmatprep.subr.bf16.mxu0 %v6323_v59  ;;  %v516_v59 = vld [vmem:[%s7478_s22 + $0x880] sm:$0xff]  ;;  %v6343_v61 = vpack.c.bf16 %v1543_v55, %v1541_v54  ;;  %v537_v53 = vld [vmem:[%s7478_s22 + $0x928] sm:$0xff]  ;;  %v539_v54 = vld [vmem:[%s7478_s22 + $0x938] sm:$0xff] }
 0x142   : > { %v5321_v4 = vpack.c.bf16 %v518_v47, %v516_v59  ;;  %v1561_v55 = vld [vmem:[%s7478_s22 + $0x2928] sm:$0xff]  ;;  %v5339_v59 = vpack.c.bf16 %v539_v54, %v537_v53  ;;  %v536_v47 = vld [vmem:[%s7478_s22 + $0x920] sm:$0xff]  ;;  %v1578_v53 = vld [vmem:[%s7478_s22 + $0x29b0] sm:$0xff] }
 0x143   : > { %5302 = vmatpush1.bf16.msra.mxu1 %v5301_v1  ;;  %v523_v1 = vld [vmem:[%s7478_s22 + $0x8b8] sm:$0xff]  ;;  %v557_v54 = vld [vmem:[%s7478_s22 + $0x9c8] sm:$0xff] }
 0x144   : > { %6326 = vmatpush1.bf16.msra.mxu0 %v6325_v3  ;;  %5304 = vmatprep.subr.bf16.mxu1 %v5303_v33  ;;  %v1545_v3 = vld [vmem:[%s7478_s22 + $0x28a8] sm:$0xff]  ;;  %v1547_v33 = vld [vmem:[%s7478_s22 + $0x28b8] sm:$0xff]  ;;  %v5323_v6 = vpack.c.bf16 %v523_v1, %v521_v62  ;;  %v1562_v62 = vld [vmem:[%s7478_s22 + $0x2930] sm:$0xff] }
 0x145   : > { %6328 = vmatprep.subr.bf16.mxu0 %v6327_v7  ;;  %v520_v7 = vld [vmem:[%s7478_s22 + $0x8a0] sm:$0xff]  ;;  %v6347_v10 = vpack.c.bf16 %v1547_v33, %v1545_v3  ;;  %v541_v1 = vld [vmem:[%s7478_s22 + $0x948] sm:$0xff]  ;;  %v543_v3 = vld [vmem:[%s7478_s22 + $0x958] sm:$0xff] }
 0x146   : > { %2922 = vmatmul.mubr.f32.vlgmr.msra.gmra.mrb[0].mxu1 %v7955_v52  ;;  %v510_v52 = vld [vmem:[%s7478_s22 + $0x850] sm:$0xff]  ;;  %v5325_v26 = vpack.c.bf16 %v522_v8, %v520_v7  ;;  %v1565_v33 = vld [vmem:[%s7478_s22 + $0x2948] sm:$0xff]  ;;  %v5343_v7 = vpack.c.bf16 %v543_v3, %v541_v1  ;;  %v540_v8 = vld [vmem:[%s7478_s22 + $0x940] sm:$0xff] }
 0x147   : > { %5306 = vmatpush1.bf16.msra.mxu1 %v5305_v16  ;;  %4058 = vmatmul.mubr.f32.vlgmr.msra.gmra.mrb[0].mxu0 %v7960_v0  ;;  %v1537_v0 = vld [vmem:[%s7478_s22 + $0x2868] sm:$0xff]  ;;  %v5313_v42 = vpack.c.bf16 %v510_v52, %v508_v35  ;;  %v527_v16 = vld [vmem:[%s7478_s22 + $0x8d8] sm:$0xff]  ;;  %v5331_v35 = vpack.c.bf16 %v531_v27, %v529_v25  ;;  %v528_v52 = vld [vmem:[%s7478_s22 + $0x8e0] sm:$0xff] }
 0x148   : > { %6330 = vmatpush1.bf16.msra.mxu0 %v6329_v17  ;;  %5308 = vmatprep.subr.bf16.mxu1 %v5307_v18  ;;  %v6339_v49 = vpack.c.bf16 %v1539_v41, %v1537_v0  ;;  %v1549_v17 = vld [vmem:[%s7478_s22 + $0x28c8] sm:$0xff]  ;;  %v1551_v18 = vld [vmem:[%s7478_s22 + $0x28d8] sm:$0xff]  ;;  %v5327_v20 = vpack.c.bf16 %v527_v16, %v525_v14  ;;  %v1566_v14 = vld [vmem:[%s7478_s22 + $0x2950] sm:$0xff] }
 0x149   : > { %6332 = vmatprep.subr.bf16.mxu0 %v6331_v21  ;;  %2992 = vmatprep.mubr.f32.mxu1 %v2357_v24  ;;  %v524_v21 = vld [vmem:[%s7478_s22 + $0x8c0] sm:$0xff]  ;;  %v6351_v29 = vpack.c.bf16 %v1551_v18, %v1549_v17  ;;  %v1550_v24 = vld [vmem:[%s7478_s22 + $0x28d0] sm:$0xff]  ;;  %v535_v0 = vld [vmem:[%s7478_s22 + $0x918] sm:$0xff] }
 0x14a   : > { %4128 = vmatprep.mubr.f32.mxu0 %v2493_v28  ;;  %v1553_v28 = vld [vmem:[%s7478_s22 + $0x28e8] sm:$0xff]  ;;  %v5335_v45 = vpack.c.bf16 %v535_v0, %v533_v40  ;;  %v547_v17 = vld [vmem:[%s7478_s22 + $0x978] sm:$0xff]  ;;  %v1570_v25 = vld [vmem:[%s7478_s22 + $0x2970] sm:$0xff] }
 0x14b   : > { %5310 = vmatpush1.bf16.msra.mxu1 %v5309_v31  ;;  %v1555_v31 = vld [vmem:[%s7478_s22 + $0x28f8] sm:$0xff]  ;;  %v1557_v41 = vld [vmem:[%s7478_s22 + $0x2908] sm:$0xff]  ;;  %v1574_v40 = vld [vmem:[%s7478_s22 + $0x2990] sm:$0xff] }
 0x14c   : > { %6334 = vmatpush1.bf16.msra.mxu0 %v6333_v32  ;;  %5312 = vmatprep.subr.bf16.mxu1 %v5311_v34  ;;  %v5329_v32 = vpack.c.bf16 %v526_v22, %v524_v21  ;;  %v6353_v34 = vpack.c.bf16 %v1550_v24, %v1548_v23  ;;  %v6355_v38 = vpack.c.bf16 %v1555_v31, %v1553_v28  ;;  %v545_v16 = vld [vmem:[%s7478_s22 + $0x968] sm:$0xff]  ;;  %v544_v22 = vld [vmem:[%s7478_s22 + $0x960] sm:$0xff]  ;;  %v546_v23 = vld [vmem:[%s7478_s22 + $0x970] sm:$0xff] }
 0x14d   : > { %6336 = vmatprep.subr.bf16.mxu0 %v6335_v37  ;;  %v1552_v37 = vld [vmem:[%s7478_s22 + $0x28e0] sm:$0xff]  ;;  %v1569_v18 = vld [vmem:[%s7478_s22 + $0x2968] sm:$0xff]  ;;  %v5347_v21 = vpack.c.bf16 %v547_v17, %v545_v16  ;;  %v551_v28 = vld [vmem:[%s7478_s22 + $0x998] sm:$0xff] }
 0x14e   : > { %v549_v27 = vld [vmem:[%s7478_s22 + $0x988] sm:$0xff]  ;;  %v1582_v1 = vld [vmem:[%s7478_s22 + $0x29d0] sm:$0xff] }
 0x14f   : > { %5314 = vmatpush1.bf16.msra.mxu1 %v5313_v42  ;;  %v1559_v42 = vld [vmem:[%s7478_s22 + $0x2918] sm:$0xff]  ;;  %v1573_v31 = vld [vmem:[%s7478_s22 + $0x2988] sm:$0xff]  ;;  %v1586_v16 = vld [vmem:[%s7478_s22 + $0x29f0] sm:$0xff] }
 0x150   : > { %6338 = vmatpush1.bf16.msra.mxu0 %v6337_v43  ;;  %5316 = vmatprep.subr.bf16.mxu1 %v5315_v44  ;;  %v5333_v43 = vpack.c.bf16 %v530_v36, %v528_v52  ;;  %v6357_v44 = vpack.c.bf16 %v1554_v39, %v1552_v37  ;;  %v6359_v50 = vpack.c.bf16 %v1559_v42, %v1557_v41  ;;  %v548_v36 = vld [vmem:[%s7478_s22 + $0x980] sm:$0xff]  ;;  %v550_v37 = vld [vmem:[%s7478_s22 + $0x990] sm:$0xff]  ;;  %v553_v0 = vld [vmem:[%s7478_s22 + $0x9a8] sm:$0xff] }
 0x151   : > { %6340 = vmatprep.subr.bf16.mxu0 %v6339_v49  ;;  %v1556_v49 = vld [vmem:[%s7478_s22 + $0x2900] sm:$0xff]  ;;  %v5351_v52 = vpack.c.bf16 %v551_v28, %v549_v27  ;;  %v555_v41 = vld [vmem:[%s7478_s22 + $0x9b8] sm:$0xff]  ;;  %v1577_v42 = vld [vmem:[%s7478_s22 + $0x29a8] sm:$0xff] }
 0x152   : > { %v561_v3 = vld [vmem:[%s7478_s22 + $0x9e8] sm:$0xff]  ;;  %v1588_v27 = vld [vmem:[%s7478_s22 + $0x2a00] sm:$0xff]  ;;  %v1590_v28 = vld [vmem:[%s7478_s22 + $0x2a10] sm:$0xff] }
 0x153   : > { %5318 = vmatpush1.bf16.msra.mxu1 %v5317_v56  ;;  %v1563_v56 = vld [vmem:[%s7478_s22 + $0x2938] sm:$0xff]  ;;  %v565_v17 = vld [vmem:[%s7478_s22 + $0xa08] sm:$0xff] }
 0x154   : > { %6342 = vmatpush1.bf16.msra.mxu0 %v6341_v57  ;;  %5320 = vmatprep.subr.bf16.mxu1 %v5319_v58  ;;  %v5337_v57 = vpack.c.bf16 %v534_v48, %v532_v46  ;;  %v6361_v58 = vpack.c.bf16 %v1558_v51, %v1556_v49  ;;  %v6363_v30 = vpack.c.bf16 %v1563_v56, %v1561_v55  ;;  %v552_v48 = vld [vmem:[%s7478_s22 + $0x9a0] sm:$0xff]  ;;  %v554_v49 = vld [vmem:[%s7478_s22 + $0x9b0] sm:$0xff]  ;;  %v559_v55 = vld [vmem:[%s7478_s22 + $0x9d8] sm:$0xff] }
 0x155   : > { %6344 = vmatprep.subr.bf16.mxu0 %v6343_v61  ;;  %v1560_v61 = vld [vmem:[%s7478_s22 + $0x2920] sm:$0xff]  ;;  %v5355_v46 = vpack.c.bf16 %v555_v41, %v553_v0  ;;  %v1581_v56 = vld [vmem:[%s7478_s22 + $0x29c8] sm:$0xff] }
 0x156   : > { %v1592_v0 = vld [vmem:[%s7478_s22 + $0x2a20] sm:$0xff] }
 0x157   : > { %5322 = vmatpush1.bf16.msra.mxu1 %v5321_v4  ;;  %v1567_v4 = vld [vmem:[%s7478_s22 + $0x2958] sm:$0xff] }
 0x158   : > { %6346 = vmatpush1.bf16.msra.mxu0 %v6345_v5  ;;  %5324 = vmatprep.subr.bf16.mxu1 %v5323_v6  ;;  %v5341_v5 = vpack.c.bf16 %v538_v60, %v536_v47  ;;  %v6365_v6 = vpack.c.bf16 %v1562_v62, %v1560_v61  ;;  %v6367_v13 = vpack.c.bf16 %v1567_v4, %v1565_v33  ;;  %v556_v60 = vld [vmem:[%s7478_s22 + $0x9c0] sm:$0xff]  ;;  %v558_v61 = vld [vmem:[%s7478_s22 + $0x9d0] sm:$0xff]  ;;  %v563_v33 = vld [vmem:[%s7478_s22 + $0x9f8] sm:$0xff] }
 0x159   : > { %6348 = vmatprep.subr.bf16.mxu0 %v6347_v10  ;;  %v1564_v10 = vld [vmem:[%s7478_s22 + $0x2940] sm:$0xff]  ;;  %v5359_v47 = vpack.c.bf16 %v559_v55, %v557_v54  ;;  %v1585_v4 = vld [vmem:[%s7478_s22 + $0x29e8] sm:$0xff] }
 0x15a   : > { %v572_v54 = vld [vmem:[%s7478_s22 + $0xa40] sm:$0xff] }
 0x15b   : > { %5326 = vmatpush1.bf16.msra.mxu1 %v5325_v26  ;;  %v1571_v26 = vld [vmem:[%s7478_s22 + $0x2978] sm:$0xff]  ;;  %v1596_v55 = vld [vmem:[%s7478_s22 + $0x2a40] sm:$0xff] }
 0x15c   : > { %6350 = vmatpush1.bf16.msra.mxu0 %v6349_v19  ;;  %5328 = vmatprep.subr.bf16.mxu1 %v5327_v20  ;;  %v5345_v19 = vpack.c.bf16 %v542_v9, %v540_v8  ;;  %v6369_v20 = vpack.c.bf16 %v1566_v14, %v1564_v10  ;;  %v6371_v24 = vpack.c.bf16 %v1571_v26, %v1569_v18  ;;  %v560_v9 = vld [vmem:[%s7478_s22 + $0x9e0] sm:$0xff]  ;;  %v562_v10 = vld [vmem:[%s7478_s22 + $0x9f0] sm:$0xff]  ;;  %v567_v18 = vld [vmem:[%s7478_s22 + $0xa18] sm:$0xff] }
 0x15d   : > { %6352 = vmatprep.subr.bf16.mxu0 %v6351_v29  ;;  %v1568_v29 = vld [vmem:[%s7478_s22 + $0x2960] sm:$0xff]  ;;  %v5363_v8 = vpack.c.bf16 %v563_v33, %v561_v3  ;;  %v2342_v26 = vcombine.high %v8089_v63, %v8089_v63 }
 0x15e   : > { %v1600_v3 = vld [vmem:[%s7478_s22 + $0x2a60] sm:$0xff] }
 0x15f   : > { %5330 = vmatpush1.bf16.msra.mxu1 %v5329_v32  ;;  %v1575_v32 = vld [vmem:[%s7478_s22 + $0x2998] sm:$0xff] }
 0x160   : > { %6354 = vmatpush1.bf16.msra.mxu0 %v6353_v34  ;;  %5332 = vmatprep.subr.bf16.mxu1 %v5331_v35  ;;  %v5349_v34 = vpack.c.bf16 %v546_v23, %v544_v22  ;;  %v6373_v35 = vpack.c.bf16 %v1570_v25, %v1568_v29  ;;  %v6375_v39 = vpack.c.bf16 %v1575_v32, %v1573_v31  ;;  %v566_v25 = vld [vmem:[%s7478_s22 + $0xa10] sm:$0xff]  ;;  %v569_v31 = vld [vmem:[%s7478_s22 + $0xa28] sm:$0xff]  ;;  %v571_v32 = vld [vmem:[%s7478_s22 + $0xa38] sm:$0xff] }
 0x161   : > { %6356 = vmatprep.subr.bf16.mxu0 %v6355_v38  ;;  %v1572_v38 = vld [vmem:[%s7478_s22 + $0x2980] sm:$0xff]  ;;  %v5365_v22 = vpack.c.bf16 %v562_v10, %v560_v9  ;;  %v5367_v29 = vpack.c.bf16 %v567_v18, %v565_v17 }
 0x162   : > { %v1604_v17 = vld [vmem:[%s7478_s22 + $0x2a80] sm:$0xff] }
 0x163   : > { %5334 = vmatpush1.bf16.msra.mxu1 %v5333_v43  ;;  %v1579_v43 = vld [vmem:[%s7478_s22 + $0x29b8] sm:$0xff] }
 0x164   : > { %6358 = vmatpush1.bf16.msra.mxu0 %v6357_v44  ;;  %5336 = vmatprep.subr.bf16.mxu1 %v5335_v45  ;;  %v5353_v44 = vpack.c.bf16 %v550_v37, %v548_v36  ;;  %v6377_v45 = vpack.c.bf16 %v1574_v40, %v1572_v38  ;;  %v6379_v51 = vpack.c.bf16 %v1579_v43, %v1577_v42  ;;  %v570_v40 = vld [vmem:[%s7478_s22 + $0xa30] sm:$0xff]  ;;  %v573_v43 = vld [vmem:[%s7478_s22 + $0xa48] sm:$0xff] }
 0x165   : > { %6360 = vmatprep.subr.bf16.mxu0 %v6359_v50  ;;  %v1576_v50 = vld [vmem:[%s7478_s22 + $0x29a0] sm:$0xff]  ;;  %v6393_v37 = vpack.c.bf16 %v1590_v28, %v1588_v27  ;;  %v5371_v38 = vpack.c.bf16 %v571_v32, %v569_v31  ;;  %v1594_v42 = vld [vmem:[%s7478_s22 + $0x2a30] sm:$0xff]  ;;  %v589_v32 = vld [vmem:[%s7478_s22 + $0xac8] sm:$0xff] }
 0x166   : > { %v586_v27 = vld [vmem:[%s7478_s22 + $0xab0] sm:$0xff] }
 0x167   : > { %5338 = vmatpush1.bf16.msra.mxu1 %v5337_v57  ;;  %v1583_v57 = vld [vmem:[%s7478_s22 + $0x29d8] sm:$0xff]  ;;  %v1610_v31 = vld [vmem:[%s7478_s22 + $0x2ab0] sm:$0xff] }
 0x168   : > { %6362 = vmatpush1.bf16.msra.mxu0 %v6361_v58  ;;  %5340 = vmatprep.subr.bf16.mxu1 %v5339_v59  ;;  %v5357_v58 = vpack.c.bf16 %v554_v49, %v552_v48  ;;  %v6381_v59 = vpack.c.bf16 %v1578_v53, %v1576_v50  ;;  %v6383_v62 = vpack.c.bf16 %v1583_v57, %v1581_v56  ;;  %v1599_v48 = vld [vmem:[%s7478_s22 + $0x2a58] sm:$0xff]  ;;  %v1598_v57 = vld [vmem:[%s7478_s22 + $0x2a50] sm:$0xff] }
 0x169   : > { %6364 = vmatprep.subr.bf16.mxu0 %v6363_v30  ;;  %v1580_v30 = vld [vmem:[%s7478_s22 + $0x29c0] sm:$0xff] }
 0x16b   : > { %5342 = vmatpush1.bf16.msra.mxu1 %v5341_v5  ;;  %v1587_v5 = vld [vmem:[%s7478_s22 + $0x29f8] sm:$0xff] }
 0x16c   : > { %6366 = vmatpush1.bf16.msra.mxu0 %v6365_v6  ;;  %5344 = vmatprep.subr.bf16.mxu1 %v5343_v7  ;;  %v5361_v6 = vpack.c.bf16 %v558_v61, %v556_v60  ;;  %v6385_v7 = vpack.c.bf16 %v1582_v1, %v1580_v30  ;;  %v6387_v14 = vpack.c.bf16 %v1587_v5, %v1585_v4  ;;  %v578_v1 = vld [vmem:[%s7478_s22 + $0xa70] sm:$0xff]  ;;  %v581_v5 = vld [vmem:[%s7478_s22 + $0xa88] sm:$0xff] }
 0x16d   : > { %6368 = vmatprep.subr.bf16.mxu0 %v6367_v13  ;;  %v1584_v13 = vld [vmem:[%s7478_s22 + $0x29e0] sm:$0xff]  ;;  %v6401_v61 = vpack.c.bf16 %v1598_v57, %v1596_v55  ;;  %v1602_v4 = vld [vmem:[%s7478_s22 + $0x2a70] sm:$0xff]  ;;  %v597_v57 = vld [vmem:[%s7478_s22 + $0xb08] sm:$0xff] }
 0x16e   : > { %v6389_v23 = vpack.c.bf16 %v1586_v16, %v1584_v13  ;;  %v6405_v10 = vpack.c.bf16 %v1602_v4, %v1600_v3  ;;  %v582_v16 = vld [vmem:[%s7478_s22 + $0xa90] sm:$0xff]  ;;  %v601_v4 = vld [vmem:[%s7478_s22 + $0xb28] sm:$0xff] }
 0x16f   : > { %5346 = vmatpush1.bf16.msra.mxu1 %v5345_v19  ;;  %v1589_v19 = vld [vmem:[%s7478_s22 + $0x2a08] sm:$0xff] }
 0x170   : > { %6370 = vmatpush1.bf16.msra.mxu0 %v6369_v20  ;;  %5348 = vmatprep.subr.bf16.mxu1 %v5347_v21  ;;  %v1591_v20 = vld [vmem:[%s7478_s22 + $0x2a18] sm:$0xff]  ;;  %v2478_v21 = vcombine.high %v8092_v2, %v8092_v2  ;;  %v8247_v2 = vrot.slane %v2342_v26, %v7592_v12  ;;  %v1606_v26 = vld [vmem:[%s7478_s22 + $0x2a90] sm:$0xff] }
 0x171   : > { %6372 = vmatprep.subr.bf16.mxu0 %v6371_v24  ;;  %v564_v24 = vld [vmem:[%s7478_s22 + $0xa00] sm:$0xff]  ;;  %v6391_v63 = vpack.c.bf16 %v1591_v20, %v1589_v19  ;;  %v585_v19 = vld [vmem:[%s7478_s22 + $0xaa8] sm:$0xff]  ;;  %v587_v20 = vld [vmem:[%s7478_s22 + $0xab8] sm:$0xff] }
 0x172   : > { %v5369_v36 = vpack.c.bf16 %v566_v25, %v564_v24  ;;  %v5387_v24 = vpack.c.bf16 %v587_v20, %v585_v19  ;;  %v584_v25 = vld [vmem:[%s7478_s22 + $0xaa0] sm:$0xff]  ;;  %v607_v19 = vld [vmem:[%s7478_s22 + $0xb58] sm:$0xff]  ;;  %v1629_v20 = vld [vmem:[%s7478_s22 + $0x2b48] sm:$0xff] }
 0x173   : > { %5350 = vmatpush1.bf16.msra.mxu1 %v5349_v34  ;;  %v1593_v34 = vld [vmem:[%s7478_s22 + $0x2a28] sm:$0xff] }
 0x174   : > { %6374 = vmatpush1.bf16.msra.mxu0 %v6373_v35  ;;  %5352 = vmatprep.subr.bf16.mxu1 %v5351_v52  ;;  %v1595_v35 = vld [vmem:[%s7478_s22 + $0x2a38] sm:$0xff]  ;;  %v8252_v52 = vrot.slane %v2478_v21, %v7592_v12  ;;  %v1609_v21 = vld [vmem:[%s7478_s22 + $0x2aa8] sm:$0xff] }
 0x175   : > { %6376 = vmatprep.subr.bf16.mxu0 %v6375_v39  ;;  %v568_v39 = vld [vmem:[%s7478_s22 + $0xa20] sm:$0xff]  ;;  %v6395_v41 = vpack.c.bf16 %v1595_v35, %v1593_v34  ;;  %v591_v34 = vld [vmem:[%s7478_s22 + $0xad8] sm:$0xff]  ;;  %v1613_v35 = vld [vmem:[%s7478_s22 + $0x2ac8] sm:$0xff] }
 0x176   : > { %v2494_v49 = vcombine.high %v8252_v52, %v8252_v52  ;;  %v5373_v50 = vpack.c.bf16 %v570_v40, %v568_v39  ;;  %v5391_v39 = vpack.c.bf16 %v591_v34, %v589_v32  ;;  %v588_v40 = vld [vmem:[%s7478_s22 + $0xac0] sm:$0xff]  ;;  %v611_v32 = vld [vmem:[%s7478_s22 + $0xb78] sm:$0xff]  ;;  %v1633_v34 = vld [vmem:[%s7478_s22 + $0x2b68] sm:$0xff] }
 0x177   : > { %5354 = vmatpush1.bf16.msra.mxu1 %v5353_v44  ;;  %v575_v44 = vld [vmem:[%s7478_s22 + $0xa58] sm:$0xff] }
 0x178   : > { %6378 = vmatpush1.bf16.msra.mxu0 %v6377_v45  ;;  %5356 = vmatprep.subr.bf16.mxu1 %v5355_v46  ;;  %v2358_v45 = vcombine.high %v8247_v2, %v8247_v2  ;;  %v1597_v46 = vld [vmem:[%s7478_s22 + $0x2a48] sm:$0xff]  ;;  %v5375_v53 = vpack.c.bf16 %v575_v44, %v573_v43  ;;  %v1614_v43 = vld [vmem:[%s7478_s22 + $0x2ad0] sm:$0xff] }
 0x179   : > { %6380 = vmatprep.subr.bf16.mxu0 %v6379_v51  ;;  %v6397_v51 = vpack.c.bf16 %v1594_v42, %v1592_v0  ;;  %v6399_v56 = vpack.c.bf16 %v1599_v48, %v1597_v46  ;;  %v590_v0 = vld [vmem:[%s7478_s22 + $0xad0] sm:$0xff]  ;;  %v593_v44 = vld [vmem:[%s7478_s22 + $0xae8] sm:$0xff]  ;;  %v1619_v48 = vld [vmem:[%s7478_s22 + $0x2af8] sm:$0xff] }
 0x17a   : > { %v1617_v46 = vld [vmem:[%s7478_s22 + $0x2ae8] sm:$0xff] }
 0x17b   : > { %5358 = vmatpush1.bf16.msra.mxu1 %v5357_v58  ;;  %v577_v58 = vld [vmem:[%s7478_s22 + $0xa68] sm:$0xff]  ;;  %v6419_v55 = vpack.c.bf16 %v1619_v48, %v1617_v46  ;;  %v1639_v46 = vld [vmem:[%s7478_s22 + $0x2b98] sm:$0xff] }
 0x17c   : > { %6382 = vmatpush1.bf16.msra.mxu0 %v6381_v59  ;;  %5360 = vmatprep.subr.bf16.mxu1 %v5359_v47  ;;  %v579_v59 = vld [vmem:[%s7478_s22 + $0xa78] sm:$0xff] }
 0x17d   : > { %6384 = vmatprep.subr.bf16.mxu0 %v6383_v62  ;;  %v1603_v47 = vld [vmem:[%s7478_s22 + $0x2a78] sm:$0xff]  ;;  %v5379_v30 = vpack.c.bf16 %v579_v59, %v577_v58  ;;  %v576_v62 = vld [vmem:[%s7478_s22 + $0xa60] sm:$0xff]  ;;  %v1621_v59 = vld [vmem:[%s7478_s22 + $0x2b08] sm:$0xff] }
 0x17e   : > { %v5381_v9 = vpack.c.bf16 %v578_v1, %v576_v62  ;;  %v599_v58 = vld [vmem:[%s7478_s22 + $0xb18] sm:$0xff]  ;;  %v598_v62 = vld [vmem:[%s7478_s22 + $0xb10] sm:$0xff]  ;;  %v1620_v1 = vld [vmem:[%s7478_s22 + $0x2b00] sm:$0xff] }
 0x17f   : > { %5362 = vmatpush1.bf16.msra.mxu1 %v5361_v6  ;;  %v583_v6 = vld [vmem:[%s7478_s22 + $0xa98] sm:$0xff] }
 0x180   : > { %6386 = vmatpush1.bf16.msra.mxu0 %v6385_v7  ;;  %5364 = vmatprep.subr.bf16.mxu1 %v5363_v8  ;;  %v1605_v7 = vld [vmem:[%s7478_s22 + $0x2a88] sm:$0xff]  ;;  %v1607_v8 = vld [vmem:[%s7478_s22 + $0x2a98] sm:$0xff]  ;;  %v5383_v13 = vpack.c.bf16 %v583_v6, %v581_v5 }
 0x181   : > { %6388 = vmatprep.subr.bf16.mxu0 %v6387_v14  ;;  %v580_v14 = vld [vmem:[%s7478_s22 + $0xa80] sm:$0xff]  ;;  %v6407_v18 = vpack.c.bf16 %v1607_v8, %v1605_v7  ;;  %v603_v5 = vld [vmem:[%s7478_s22 + $0xb38] sm:$0xff]  ;;  %v1625_v6 = vld [vmem:[%s7478_s22 + $0x2b28] sm:$0xff] }
 0x182   : > { %v1627_v7 = vld [vmem:[%s7478_s22 + $0x2b38] sm:$0xff] }
 0x183   : > { %5366 = vmatpush1.bf16.msra.mxu1 %v5365_v22  ;;  %v1611_v22 = vld [vmem:[%s7478_s22 + $0x2ab8] sm:$0xff] }
 0x184   : > { %6390 = vmatpush1.bf16.msra.mxu0 %v6389_v23  ;;  %5368 = vmatprep.subr.bf16.mxu1 %v5367_v29  ;;  %v5385_v23 = vpack.c.bf16 %v582_v16, %v580_v14  ;;  %v6409_v29 = vpack.c.bf16 %v1606_v26, %v1604_v17  ;;  %v6411_v28 = vpack.c.bf16 %v1611_v22, %v1609_v21  ;;  %v602_v14 = vld [vmem:[%s7478_s22 + $0xb30] sm:$0xff]  ;;  %v1624_v16 = vld [vmem:[%s7478_s22 + $0x2b20] sm:$0xff]  ;;  %v605_v26 = vld [vmem:[%s7478_s22 + $0xb48] sm:$0xff] }
 0x185   : > { %6392 = vmatprep.subr.bf16.mxu0 %v6391_v63  ;;  %v1608_v63 = vld [vmem:[%s7478_s22 + $0x2aa0] sm:$0xff]  ;;  %v6427_v17 = vpack.c.bf16 %v1627_v7, %v1625_v6  ;;  %v1631_v21 = vld [vmem:[%s7478_s22 + $0x2b58] sm:$0xff] }
 0x186   : > { %2993 = vmatmul.mubr.f32.vlgmr.msra.gmra.mrb[0].mxu1 %v8102_v11  ;;  %v574_v11 = vld [vmem:[%s7478_s22 + $0xa50] sm:$0xff]  ;;  %v1647_v6 = vld [vmem:[%s7478_s22 + $0x2bd8] sm:$0xff] }
 0x187   : > { %5370 = vmatpush1.bf16.msra.mxu1 %v5369_v36  ;;  %4129 = vmatmul.mubr.f32.vlgmr.msra.gmra.mrb[0].mxu0 %v8108_v15  ;;  %v1601_v15 = vld [vmem:[%s7478_s22 + $0x2a68] sm:$0xff]  ;;  %v5377_v60 = vpack.c.bf16 %v574_v11, %v572_v54  ;;  %v1615_v36 = vld [vmem:[%s7478_s22 + $0x2ad8] sm:$0xff]  ;;  %v594_v54 = vld [vmem:[%s7478_s22 + $0xaf0] sm:$0xff] }
 0x188   : > { %6394 = vmatpush1.bf16.msra.mxu0 %v6393_v37  ;;  %5372 = vmatprep.subr.bf16.mxu1 %v5371_v38  ;;  %v6403_v33 = vpack.c.bf16 %v1603_v47, %v1601_v15  ;;  %v5389_v37 = vpack.c.bf16 %v586_v27, %v584_v25  ;;  %v6413_v38 = vpack.c.bf16 %v1610_v31, %v1608_v63  ;;  %v1616_v11 = vld [vmem:[%s7478_s22 + $0x2ae0] sm:$0xff]  ;;  %v1623_v15 = vld [vmem:[%s7478_s22 + $0x2b18] sm:$0xff]  ;;  %v606_v25 = vld [vmem:[%s7478_s22 + $0xb50] sm:$0xff] }
 0x189   : > { %6396 = vmatprep.subr.bf16.mxu0 %v6395_v41  ;;  %3063 = vmatprep.mubr.f32.mxu1 %v2358_v45  ;;  %v1612_v41 = vld [vmem:[%s7478_s22 + $0x2ac0] sm:$0xff]  ;;  %v6415_v42 = vpack.c.bf16 %v1615_v36, %v1613_v35  ;;  %v595_v45 = vld [vmem:[%s7478_s22 + $0xaf8] sm:$0xff]  ;;  %v6423_v3 = vpack.c.bf16 %v1623_v15, %v1621_v59  ;;  %v6431_v63 = vpack.c.bf16 %v1631_v21, %v1629_v20  ;;  %v609_v31 = vld [vmem:[%s7478_s22 + $0xb68] sm:$0xff] }
 0x18a   : > { %4199 = vmatprep.mubr.f32.mxu0 %v2494_v49  ;;  %v5393_v49 = vpack.c.bf16 %v590_v0, %v588_v40  ;;  %v1628_v27 = vld [vmem:[%s7478_s22 + $0x2b40] sm:$0xff]  ;;  %v1635_v35 = vld [vmem:[%s7478_s22 + $0x2b78] sm:$0xff]  ;;  %v610_v40 = vld [vmem:[%s7478_s22 + $0xb70] sm:$0xff] }
 0x18b   : > { %5374 = vmatpush1.bf16.msra.mxu1 %v5373_v50  ;;  %v6417_v50 = vpack.c.bf16 %v1614_v43, %v1612_v41  ;;  %v1632_v0 = vld [vmem:[%s7478_s22 + $0x2b60] sm:$0xff]  ;;  %v6435_v41 = vpack.c.bf16 %v1635_v35, %v1633_v34  ;;  %v613_v43 = vld [vmem:[%s7478_s22 + $0xb88] sm:$0xff]  ;;  %v1643_v59 = vld [vmem:[%s7478_s22 + $0x2bb8] sm:$0xff] }
 0x18c   : > { %6398 = vmatpush1.bf16.msra.mxu0 %v6397_v51  ;;  %5376 = vmatprep.subr.bf16.mxu1 %v5375_v53  ;;  %v5395_v51 = vpack.c.bf16 %v595_v45, %v593_v44  ;;  %v592_v53 = vld [vmem:[%s7478_s22 + $0xae0] sm:$0xff]  ;;  %v615_v44 = vld [vmem:[%s7478_s22 + $0xb98] sm:$0xff]  ;;  %v1637_v45 = vld [vmem:[%s7478_s22 + $0x2b88] sm:$0xff] }
 0x18d   : > { %6400 = vmatprep.subr.bf16.mxu0 %v6399_v56  ;;  %v1618_v56 = vld [vmem:[%s7478_s22 + $0x2af0] sm:$0xff]  ;;  %v5397_v47 = vpack.c.bf16 %v594_v54, %v592_v53  ;;  %v1636_v54 = vld [vmem:[%s7478_s22 + $0x2b80] sm:$0xff]  ;;  %v1651_v20 = vld [vmem:[%s7478_s22 + $0x2bf8] sm:$0xff] }
 0x18e   : > { %v614_v53 = vld [vmem:[%s7478_s22 + $0xb90] sm:$0xff]  ;;  %v1655_v34 = vld [vmem:[%s7478_s22 + $0x2c18] sm:$0xff] }
 0x18f   : > { %5378 = vmatpush1.bf16.msra.mxu1 %v5377_v60  ;;  %v6421_v60 = vpack.c.bf16 %v1618_v56, %v1616_v11  ;;  %v6439_v11 = vpack.c.bf16 %v1639_v46, %v1637_v45  ;;  %v617_v56 = vld [vmem:[%s7478_s22 + $0xba8] sm:$0xff]  ;;  %v8381_v35 = vld [vmem:[%s7496_s29 + $0x18] sm:$0xff] }
 0x190   : > { %6402 = vmatpush1.bf16.msra.mxu0 %v6401_v61  ;;  %5380 = vmatprep.subr.bf16.mxu1 %v5379_v30  ;;  %v5399_v61 = vpack.c.bf16 %v599_v58, %v597_v57  ;;  %v596_v30 = vld [vmem:[%s7478_s22 + $0xb00] sm:$0xff]  ;;  %v619_v57 = vld [vmem:[%s7478_s22 + $0xbb8] sm:$0xff]  ;;  %v1641_v58 = vld [vmem:[%s7478_s22 + $0x2ba8] sm:$0xff]  ;;  %v8394_v46 = vrot.slane %v8381_v35, %v7592_v12 }
 0x191   : > { %6404 = vmatprep.subr.bf16.mxu0 %v6403_v33  ;;  %v1622_v33 = vld [vmem:[%s7478_s22 + $0x2b10] sm:$0xff]  ;;  %v5401_v8 = vpack.c.bf16 %v598_v62, %v596_v30  ;;  %v1640_v62 = vld [vmem:[%s7478_s22 + $0x2ba0] sm:$0xff]  ;;  %v635_v45 = vld [vmem:[%s7478_s22 + $0xc38] sm:$0xff] }
 0x192   : > { %v618_v30 = vld [vmem:[%s7478_s22 + $0xbb0] sm:$0xff] }
 0x193   : > { %5382 = vmatpush1.bf16.msra.mxu1 %v5381_v9  ;;  %v6425_v9 = vpack.c.bf16 %v1622_v33, %v1620_v1  ;;  %v6443_v1 = vpack.c.bf16 %v1643_v59, %v1641_v58  ;;  %v621_v33 = vld [vmem:[%s7478_s22 + $0xbc8] sm:$0xff]  ;;  %v1658_v58 = vld [vmem:[%s7478_s22 + $0x2c30] sm:$0xff] }
 0x194   : > { %6406 = vmatpush1.bf16.msra.mxu0 %v6405_v10  ;;  %5384 = vmatprep.subr.bf16.mxu1 %v5383_v13  ;;  %v5403_v10 = vpack.c.bf16 %v603_v5, %v601_v4  ;;  %v600_v13 = vld [vmem:[%s7478_s22 + $0xb20] sm:$0xff]  ;;  %v623_v4 = vld [vmem:[%s7478_s22 + $0xbd8] sm:$0xff]  ;;  %v1645_v5 = vld [vmem:[%s7478_s22 + $0x2bc8] sm:$0xff] }
 0x195   : > { %6408 = vmatprep.subr.bf16.mxu0 %v6407_v18  ;;  %v1626_v18 = vld [vmem:[%s7478_s22 + $0x2b30] sm:$0xff]  ;;  %v5405_v22 = vpack.c.bf16 %v602_v14, %v600_v13  ;;  %v1644_v14 = vld [vmem:[%s7478_s22 + $0x2bc0] sm:$0xff]  ;;  %v637_v59 = vld [vmem:[%s7478_s22 + $0xc48] sm:$0xff] }
 0x196   : > { %v622_v13 = vld [vmem:[%s7478_s22 + $0xbd0] sm:$0xff] }
 0x197   : > { %5386 = vmatpush1.bf16.msra.mxu1 %v5385_v23  ;;  %v6429_v23 = vpack.c.bf16 %v1626_v18, %v1624_v16  ;;  %v6447_v16 = vpack.c.bf16 %v1647_v6, %v1645_v5  ;;  %v625_v18 = vld [vmem:[%s7478_s22 + $0xbe8] sm:$0xff]  ;;  %v1662_v6 = vld [vmem:[%s7478_s22 + $0x2c50] sm:$0xff] }
 0x198   : > { %6410 = vmatpush1.bf16.msra.mxu0 %v6409_v29  ;;  %5388 = vmatprep.subr.bf16.mxu1 %v5387_v24  ;;  %v5407_v29 = vpack.c.bf16 %v607_v19, %v605_v26  ;;  %v604_v24 = vld [vmem:[%s7478_s22 + $0xb40] sm:$0xff]  ;;  %v627_v26 = vld [vmem:[%s7478_s22 + $0xbf8] sm:$0xff]  ;;  %v1649_v19 = vld [vmem:[%s7478_s22 + $0x2be8] sm:$0xff] }
 0x199   : > { %6412 = vmatprep.subr.bf16.mxu0 %v6411_v28  ;;  %v1630_v28 = vld [vmem:[%s7478_s22 + $0x2b50] sm:$0xff]  ;;  %v5409_v36 = vpack.c.bf16 %v606_v25, %v604_v24  ;;  %v1648_v25 = vld [vmem:[%s7478_s22 + $0x2be0] sm:$0xff] }
 0x19a   : > { %v626_v24 = vld [vmem:[%s7478_s22 + $0xbf0] sm:$0xff] }
 0x19b   : > { %5390 = vmatpush1.bf16.msra.mxu1 %v5389_v37  ;;  %v6433_v37 = vpack.c.bf16 %v1630_v28, %v1628_v27  ;;  %v6451_v27 = vpack.c.bf16 %v1651_v20, %v1649_v19  ;;  %v629_v28 = vld [vmem:[%s7478_s22 + $0xc08] sm:$0xff]  ;;  %v1666_v19 = vld [vmem:[%s7478_s22 + $0x2c70] sm:$0xff] }
 0x19c   : > { %6414 = vmatpush1.bf16.msra.mxu0 %v6413_v38  ;;  %5392 = vmatprep.subr.bf16.mxu1 %v5391_v39  ;;  %v5411_v38 = vpack.c.bf16 %v611_v32, %v609_v31  ;;  %v608_v39 = vld [vmem:[%s7478_s22 + $0xb60] sm:$0xff]  ;;  %v631_v31 = vld [vmem:[%s7478_s22 + $0xc18] sm:$0xff]  ;;  %v1653_v32 = vld [vmem:[%s7478_s22 + $0x2c08] sm:$0xff] }
 0x19d   : > { %6416 = vmatprep.subr.bf16.mxu0 %v6415_v42  ;;  %v1634_v42 = vld [vmem:[%s7478_s22 + $0x2b70] sm:$0xff]  ;;  %v5413_v48 = vpack.c.bf16 %v610_v40, %v608_v39  ;;  %v5431_v39 = vpack.c.bf16 %v631_v31, %v629_v28  ;;  %v628_v40 = vld [vmem:[%s7478_s22 + $0xc00] sm:$0xff]  ;;  %v645_v20 = vld [vmem:[%s7478_s22 + $0xc88] sm:$0xff] }
 0x19e   : > { %v1668_v28 = vld [vmem:[%s7478_s22 + $0x2c80] sm:$0xff] }
 0x19f   : > { %5394 = vmatpush1.bf16.msra.mxu1 %v5393_v49  ;;  %v6437_v49 = vpack.c.bf16 %v1634_v42, %v1632_v0  ;;  %v630_v0 = vld [vmem:[%s7478_s22 + $0xc10] sm:$0xff]  ;;  %v6455_v42 = vpack.c.bf16 %v1655_v34, %v1653_v32  ;;  %v649_v34 = vld [vmem:[%s7478_s22 + $0xca8] sm:$0xff] }
 0x1a0   : > { %6418 = vmatpush1.bf16.msra.mxu0 %v6417_v50  ;;  %5396 = vmatprep.subr.bf16.mxu1 %v5395_v51  ;;  %v5415_v50 = vpack.c.bf16 %v615_v44, %v613_v43  ;;  %v612_v51 = vld [vmem:[%s7478_s22 + $0xb80] sm:$0xff]  ;;  %v1654_v43 = vld [vmem:[%s7478_s22 + $0x2c10] sm:$0xff]  ;;  %v633_v44 = vld [vmem:[%s7478_s22 + $0xc28] sm:$0xff] }
 0x1a1   : > { %6420 = vmatprep.subr.bf16.mxu0 %v6419_v55  ;;  %v1638_v55 = vld [vmem:[%s7478_s22 + $0x2b90] sm:$0xff]  ;;  %v5417_v15 = vpack.c.bf16 %v614_v53, %v612_v51  ;;  %v5433_v51 = vpack.c.bf16 %v630_v0, %v628_v40 }
 0x1a2   : > { %v1670_v32 = vld [vmem:[%s7478_s22 + $0x2c90] sm:$0xff] }
 0x1a3   : > { %5398 = vmatpush1.bf16.msra.mxu1 %v5397_v47  ;;  %v6441_v47 = vpack.c.bf16 %v1638_v55, %v1636_v54  ;;  %v5435_v54 = vpack.c.bf16 %v635_v45, %v633_v44  ;;  %v634_v55 = vld [vmem:[%s7478_s22 + $0xc30] sm:$0xff]  ;;  %v6473_v0 = vpack.c.bf16 %v1670_v32, %v1668_v28  ;;  %v1672_v44 = vld [vmem:[%s7478_s22 + $0x2ca0] sm:$0xff] }
 0x1a4   : > { %6422 = vmatpush1.bf16.msra.mxu0 %v6421_v60  ;;  %5400 = vmatprep.subr.bf16.mxu1 %v5399_v61  ;;  %v5419_v60 = vpack.c.bf16 %v619_v57, %v617_v56  ;;  %v616_v61 = vld [vmem:[%s7478_s22 + $0xba0] sm:$0xff]  ;;  %v666_v28 = vld [vmem:[%s7478_s22 + $0xd30] sm:$0xff] }
 0x1a5   : > { %6424 = vmatprep.subr.bf16.mxu0 %v6423_v3  ;;  %v1642_v3 = vld [vmem:[%s7478_s22 + $0x2bb0] sm:$0xff]  ;;  %v5421_v7 = vpack.c.bf16 %v618_v30, %v616_v61  ;;  %v1656_v56 = vld [vmem:[%s7478_s22 + $0x2c20] sm:$0xff]  ;;  %v1663_v61 = vld [vmem:[%s7478_s22 + $0x2c58] sm:$0xff] }
 0x1a7   : > { %5402 = vmatpush1.bf16.msra.mxu1 %v5401_v8  ;;  %v6445_v8 = vpack.c.bf16 %v1642_v3, %v1640_v62 }
 0x1a8   : > { %6426 = vmatpush1.bf16.msra.mxu0 %v6425_v9  ;;  %5404 = vmatprep.subr.bf16.mxu1 %v5403_v10  ;;  %v5423_v9 = vpack.c.bf16 %v623_v4, %v621_v33  ;;  %v620_v10 = vld [vmem:[%s7478_s22 + $0xbc0] sm:$0xff] }
 0x1a9   : > { %6428 = vmatprep.subr.bf16.mxu0 %v6427_v17  ;;  %v1646_v17 = vld [vmem:[%s7478_s22 + $0x2bd0] sm:$0xff]  ;;  %v5425_v21 = vpack.c.bf16 %v622_v13, %v620_v10  ;;  %v636_v33 = vld [vmem:[%s7478_s22 + $0xc40] sm:$0xff] }
 0x1aa   : > { %v1660_v4 = vld [vmem:[%s7478_s22 + $0x2c40] sm:$0xff] }
 0x1ab   : > { %5406 = vmatpush1.bf16.msra.mxu1 %v5405_v22  ;;  %v6449_v22 = vpack.c.bf16 %v1646_v17, %v1644_v14  ;;  %v6465_v13 = vpack.c.bf16 %v1662_v6, %v1660_v4  ;;  %v642_v17 = vld [vmem:[%s7478_s22 + $0xc70] sm:$0xff] }
 0x1ac   : > { %6430 = vmatpush1.bf16.msra.mxu0 %v6429_v23  ;;  %5408 = vmatprep.subr.bf16.mxu1 %v5407_v29  ;;  %v5427_v23 = vpack.c.bf16 %v627_v26, %v625_v18  ;;  %v624_v29 = vld [vmem:[%s7478_s22 + $0xbe0] sm:$0xff]  ;;  %v658_v4 = vld [vmem:[%s7478_s22 + $0xcf0] sm:$0xff] }
 0x1ad   : > { %6432 = vmatprep.subr.bf16.mxu0 %v6431_v63  ;;  %v1650_v63 = vld [vmem:[%s7478_s22 + $0x2bf0] sm:$0xff]  ;;  %v1664_v18 = vld [vmem:[%s7478_s22 + $0x2c60] sm:$0xff] }
 0x1af   : > { %5410 = vmatpush1.bf16.msra.mxu1 %v5409_v36  ;;  %v5429_v36 = vpack.c.bf16 %v626_v24, %v624_v29  ;;  %v6469_v24 = vpack.c.bf16 %v1666_v19, %v1664_v18  ;;  %v662_v18 = vld [vmem:[%s7478_s22 + $0xd10] sm:$0xff] }
 0x1b0   : > { %6434 = vmatpush1.bf16.msra.mxu0 %v6433_v37  ;;  %5412 = vmatprep.subr.bf16.mxu1 %v5411_v38  ;;  %v8384_v37 = vld [vmem:[%s7496_s29 + $0x58] sm:$0xff]  ;;  %v6453_v38 = vpack.c.bf16 %v1650_v63, %v1648_v25  ;;  %v646_v63 = vld [vmem:[%s7478_s22 + $0xc90] sm:$0xff] }
 0x1b1   : > { %6436 = vmatprep.subr.bf16.mxu0 %v6435_v41  ;;  %v1652_v41 = vld [vmem:[%s7478_s22 + $0x2c00] sm:$0xff] }
 0x1b2   : > { %v6457_v53 = vpack.c.bf16 %v1654_v43, %v1652_v41  ;;  %v650_v43 = vld [vmem:[%s7478_s22 + $0xcb0] sm:$0xff] }
 0x1b3   : > { %5414 = vmatpush1.bf16.msra.mxu1 %v5413_v48  ;;  %v1657_v48 = vld [vmem:[%s7478_s22 + $0x2c28] sm:$0xff] }
 0x1b4   : > { %6438 = vmatpush1.bf16.msra.mxu0 %v6437_v49  ;;  %5416 = vmatprep.subr.bf16.mxu1 %v5415_v50  ;;  %v1659_v49 = vld [vmem:[%s7478_s22 + $0x2c38] sm:$0xff]  ;;  %v8400_v50 = vrot.slane %v8384_v37, %v7592_v12 }
 0x1b5   : > { %6440 = vmatprep.subr.bf16.mxu0 %v6439_v11  ;;  %v632_v11 = vld [vmem:[%s7478_s22 + $0xc20] sm:$0xff]  ;;  %v6459_v57 = vpack.c.bf16 %v1659_v49, %v1657_v48  ;;  %v1674_v48 = vld [vmem:[%s7478_s22 + $0x2cb0] sm:$0xff]  ;;  %v653_v49 = vld [vmem:[%s7478_s22 + $0xcc8] sm:$0xff] }
 0x1b6   : > { %v2510_v30 = vcombine.high %v8400_v50, %v8400_v50  ;;  %v5437_v62 = vpack.c.bf16 %v634_v55, %v632_v11  ;;  %v6477_v55 = vpack.c.bf16 %v1674_v48, %v1672_v44  ;;  %v670_v44 = vld [vmem:[%s7478_s22 + $0xd50] sm:$0xff] }
 0x1b7   : > { %5418 = vmatpush1.bf16.msra.mxu1 %v5417_v15  ;;  %v639_v15 = vld [vmem:[%s7478_s22 + $0xc58] sm:$0xff] }
 0x1b8   : > { %6442 = vmatpush1.bf16.msra.mxu0 %v6441_v47  ;;  %5420 = vmatprep.subr.bf16.mxu1 %v5419_v60  ;;  %v2374_v47 = vcombine.high %v8394_v46, %v8394_v46  ;;  %v1661_v60 = vld [vmem:[%s7478_s22 + $0x2c48] sm:$0xff]  ;;  %v5439_v3 = vpack.c.bf16 %v639_v15, %v637_v59  ;;  %v1676_v59 = vld [vmem:[%s7478_s22 + $0x2cc0] sm:$0xff] }
 0x1b9   : > { %6444 = vmatprep.subr.bf16.mxu0 %v6443_v1  ;;  %v6461_v1 = vpack.c.bf16 %v1658_v58, %v1656_v56  ;;  %v6463_v5 = vpack.c.bf16 %v1663_v61, %v1661_v60  ;;  %v654_v58 = vld [vmem:[%s7478_s22 + $0xcd0] sm:$0xff]  ;;  %v657_v60 = vld [vmem:[%s7478_s22 + $0xce8] sm:$0xff]  ;;  %v659_v61 = vld [vmem:[%s7478_s22 + $0xcf8] sm:$0xff] }
 0x1bb   : > { %5422 = vmatpush1.bf16.msra.mxu1 %v5421_v7  ;;  %v641_v7 = vld [vmem:[%s7478_s22 + $0xc68] sm:$0xff] }
 0x1bc   : > { %6446 = vmatpush1.bf16.msra.mxu0 %v6445_v8  ;;  %5424 = vmatprep.subr.bf16.mxu1 %v5423_v9  ;;  %v643_v8 = vld [vmem:[%s7478_s22 + $0xc78] sm:$0xff] }
 0x1bd   : > { %6448 = vmatprep.subr.bf16.mxu0 %v6447_v16  ;;  %v1667_v9 = vld [vmem:[%s7478_s22 + $0x2c78] sm:$0xff]  ;;  %v5443_v14 = vpack.c.bf16 %v643_v8, %v641_v7  ;;  %v640_v16 = vld [vmem:[%s7478_s22 + $0xc60] sm:$0xff]  ;;  %v1682_v7 = vld [vmem:[%s7478_s22 + $0x2cf0] sm:$0xff] }
 0x1be   : > { %v5445_v29 = vpack.c.bf16 %v642_v17, %v640_v16  ;;  %v661_v8 = vld [vmem:[%s7478_s22 + $0xd08] sm:$0xff]  ;;  %v660_v17 = vld [vmem:[%s7478_s22 + $0xd00] sm:$0xff] }
 0x1bf   : > { %5426 = vmatpush1.bf16.msra.mxu1 %v5425_v21  ;;  %v647_v21 = vld [vmem:[%s7478_s22 + $0xc98] sm:$0xff] }
 0x1c0   : > { %6450 = vmatpush1.bf16.msra.mxu0 %v6449_v22  ;;  %5428 = vmatprep.subr.bf16.mxu1 %v5427_v23  ;;  %v1669_v22 = vld [vmem:[%s7478_s22 + $0x2c88] sm:$0xff]  ;;  %v1671_v23 = vld [vmem:[%s7478_s22 + $0x2c98] sm:$0xff]  ;;  %v5447_v25 = vpack.c.bf16 %v647_v21, %v645_v20  ;;  %v1686_v20 = vld [vmem:[%s7478_s22 + $0x2d10] sm:$0xff] }
 0x1c1   : > { %6452 = vmatprep.subr.bf16.mxu0 %v6451_v27  ;;  %v644_v27 = vld [vmem:[%s7478_s22 + $0xc80] sm:$0xff]  ;;  %v6471_v31 = vpack.c.bf16 %v1671_v23, %v1669_v22  ;;  %v665_v21 = vld [vmem:[%s7478_s22 + $0xd28] sm:$0xff]  ;;  %v667_v22 = vld [vmem:[%s7478_s22 + $0xd38] sm:$0xff] }
 0x1c2   : > { %v5449_v40 = vpack.c.bf16 %v646_v63, %v644_v27  ;;  %v1689_v23 = vld [vmem:[%s7478_s22 + $0x2d28] sm:$0xff]  ;;  %v5467_v27 = vpack.c.bf16 %v667_v22, %v665_v21  ;;  %v664_v63 = vld [vmem:[%s7478_s22 + $0xd20] sm:$0xff]  ;;  %v1706_v21 = vld [vmem:[%s7478_s22 + $0x2db0] sm:$0xff] }
 0x1c3   : > { %5430 = vmatpush1.bf16.msra.mxu1 %v5429_v36  ;;  %v651_v36 = vld [vmem:[%s7478_s22 + $0xcb8] sm:$0xff]  ;;  %v685_v22 = vld [vmem:[%s7478_s22 + $0xdc8] sm:$0xff] }
 0x1c4   : > { %6454 = vmatpush1.bf16.msra.mxu0 %v6453_v38  ;;  %5432 = vmatprep.subr.bf16.mxu1 %v5431_v39  ;;  %v1673_v38 = vld [vmem:[%s7478_s22 + $0x2ca8] sm:$0xff]  ;;  %v1675_v39 = vld [vmem:[%s7478_s22 + $0x2cb8] sm:$0xff]  ;;  %v5451_v41 = vpack.c.bf16 %v651_v36, %v649_v34  ;;  %v1690_v34 = vld [vmem:[%s7478_s22 + $0x2d30] sm:$0xff] }
 0x1c5   : > { %6456 = vmatprep.subr.bf16.mxu0 %v6455_v42  ;;  %v648_v42 = vld [vmem:[%s7478_s22 + $0xca0] sm:$0xff]  ;;  %v6475_v45 = vpack.c.bf16 %v1675_v39, %v1673_v38  ;;  %v669_v36 = vld [vmem:[%s7478_s22 + $0xd48] sm:$0xff]  ;;  %v671_v38 = vld [vmem:[%s7478_s22 + $0xd58] sm:$0xff] }
 0x1c6   : > { %3064 = vmatmul.mubr.f32.vlgmr.msra.gmra.mrb[0].mxu1 %v8247_v2  ;;  %v638_v2 = vld [vmem:[%s7478_s22 + $0xc50] sm:$0xff]  ;;  %v5453_v11 = vpack.c.bf16 %v650_v43, %v648_v42  ;;  %v1693_v39 = vld [vmem:[%s7478_s22 + $0x2d48] sm:$0xff]  ;;  %v5471_v42 = vpack.c.bf16 %v671_v38, %v669_v36  ;;  %v668_v43 = vld [vmem:[%s7478_s22 + $0xd40] sm:$0xff] }
 0x1c7   : > { %5434 = vmatpush1.bf16.msra.mxu1 %v5433_v51  ;;  %4200 = vmatmul.mubr.f32.vlgmr.msra.gmra.mrb[0].mxu0 %v8252_v52  ;;  %v1665_v52 = vld [vmem:[%s7478_s22 + $0x2c68] sm:$0xff]  ;;  %v5441_v10 = vpack.c.bf16 %v638_v2, %v636_v33  ;;  %v655_v51 = vld [vmem:[%s7478_s22 + $0xcd8] sm:$0xff]  ;;  %v5459_v33 = vpack.c.bf16 %v659_v61, %v657_v60  ;;  %v656_v2 = vld [vmem:[%s7478_s22 + $0xce0] sm:$0xff] }
 0x1c8   : > { %6458 = vmatpush1.bf16.msra.mxu0 %v6457_v53  ;;  %5436 = vmatprep.subr.bf16.mxu1 %v5435_v54  ;;  %v6467_v26 = vpack.c.bf16 %v1667_v9, %v1665_v52  ;;  %v1677_v53 = vld [vmem:[%s7478_s22 + $0x2cc8] sm:$0xff]  ;;  %v1679_v54 = vld [vmem:[%s7478_s22 + $0x2cd8] sm:$0xff]  ;;  %v5455_v56 = vpack.c.bf16 %v655_v51, %v653_v49  ;;  %v1694_v49 = vld [vmem:[%s7478_s22 + $0x2d50] sm:$0xff] }
 0x1c9   : > { %6460 = vmatprep.subr.bf16.mxu0 %v6459_v57  ;;  %3134 = vmatprep.mubr.f32.mxu1 %v2374_v47  ;;  %v652_v57 = vld [vmem:[%s7478_s22 + $0xcc0] sm:$0xff]  ;;  %v6479_v15 = vpack.c.bf16 %v1679_v54, %v1677_v53  ;;  %v1678_v47 = vld [vmem:[%s7478_s22 + $0x2cd0] sm:$0xff]  ;;  %v663_v52 = vld [vmem:[%s7478_s22 + $0xd18] sm:$0xff] }
 0x1ca   : > { %4270 = vmatprep.mubr.f32.mxu0 %v2510_v30  ;;  %v1681_v30 = vld [vmem:[%s7478_s22 + $0x2ce8] sm:$0xff]  ;;  %v5463_v16 = vpack.c.bf16 %v663_v52, %v661_v8  ;;  %v675_v53 = vld [vmem:[%s7478_s22 + $0xd78] sm:$0xff]  ;;  %v1698_v60 = vld [vmem:[%s7478_s22 + $0x2d70] sm:$0xff] }
 0x1cb   : > { %5438 = vmatpush1.bf16.msra.mxu1 %v5437_v62  ;;  %v1683_v62 = vld [vmem:[%s7478_s22 + $0x2cf8] sm:$0xff]  ;;  %v1685_v9 = vld [vmem:[%s7478_s22 + $0x2d08] sm:$0xff]  ;;  %v1702_v8 = vld [vmem:[%s7478_s22 + $0x2d90] sm:$0xff] }
 0x1cc   : > { %6462 = vmatpush1.bf16.msra.mxu0 %v6461_v1  ;;  %5440 = vmatprep.subr.bf16.mxu1 %v5439_v3  ;;  %v5457_v1 = vpack.c.bf16 %v654_v58, %v652_v57  ;;  %v6481_v3 = vpack.c.bf16 %v1678_v47, %v1676_v59  ;;  %v6483_v6 = vpack.c.bf16 %v1683_v62, %v1681_v30  ;;  %v673_v51 = vld [vmem:[%s7478_s22 + $0xd68] sm:$0xff]  ;;  %v672_v58 = vld [vmem:[%s7478_s22 + $0xd60] sm:$0xff]  ;;  %v674_v59 = vld [vmem:[%s7478_s22 + $0xd70] sm:$0xff] }
 0x1cd   : > { %6464 = vmatprep.subr.bf16.mxu0 %v6463_v5  ;;  %v1680_v5 = vld [vmem:[%s7478_s22 + $0x2ce0] sm:$0xff]  ;;  %v1697_v54 = vld [vmem:[%s7478_s22 + $0x2d68] sm:$0xff]  ;;  %v5475_v57 = vpack.c.bf16 %v675_v53, %v673_v51  ;;  %v679_v30 = vld [vmem:[%s7478_s22 + $0xd98] sm:$0xff] }
 0x1ce   : > { %v677_v61 = vld [vmem:[%s7478_s22 + $0xd88] sm:$0xff]  ;;  %v1710_v36 = vld [vmem:[%s7478_s22 + $0x2dd0] sm:$0xff] }
 0x1cf   : > { %5442 = vmatpush1.bf16.msra.mxu1 %v5441_v10  ;;  %v1687_v10 = vld [vmem:[%s7478_s22 + $0x2d18] sm:$0xff]  ;;  %v1701_v62 = vld [vmem:[%s7478_s22 + $0x2d88] sm:$0xff]  ;;  %v1714_v51 = vld [vmem:[%s7478_s22 + $0x2df0] sm:$0xff] }
 0x1d0   : > { %6466 = vmatpush1.bf16.msra.mxu0 %v6465_v13  ;;  %5444 = vmatprep.subr.bf16.mxu1 %v5443_v14  ;;  %v5461_v13 = vpack.c.bf16 %v658_v4, %v656_v2  ;;  %v6485_v14 = vpack.c.bf16 %v1682_v7, %v1680_v5  ;;  %v6487_v19 = vpack.c.bf16 %v1687_v10, %v1685_v9  ;;  %v676_v4 = vld [vmem:[%s7478_s22 + $0xd80] sm:$0xff]  ;;  %v678_v5 = vld [vmem:[%s7478_s22 + $0xd90] sm:$0xff]  ;;  %v681_v52 = vld [vmem:[%s7478_s22 + $0xda8] sm:$0xff] }
 0x1d1   : > { %6468 = vmatprep.subr.bf16.mxu0 %v6467_v26  ;;  %v1684_v26 = vld [vmem:[%s7478_s22 + $0x2d00] sm:$0xff]  ;;  %v5479_v2 = vpack.c.bf16 %v679_v30, %v677_v61  ;;  %v683_v9 = vld [vmem:[%s7478_s22 + $0xdb8] sm:$0xff]  ;;  %v1705_v10 = vld [vmem:[%s7478_s22 + $0x2da8] sm:$0xff] }
 0x1d2   : > { %v689_v38 = vld [vmem:[%s7478_s22 + $0xde8] sm:$0xff]  ;;  %v1716_v61 = vld [vmem:[%s7478_s22 + $0x2e00] sm:$0xff]  ;;  %v1718_v30 = vld [vmem:[%s7478_s22 + $0x2e10] sm:$0xff] }
 0x1d3   : > { %5446 = vmatpush1.bf16.msra.mxu1 %v5445_v29  ;;  %v1691_v29 = vld [vmem:[%s7478_s22 + $0x2d38] sm:$0xff]  ;;  %v693_v53 = vld [vmem:[%s7478_s22 + $0xe08] sm:$0xff] }
 0x1d4   : > { %6470 = vmatpush1.bf16.msra.mxu0 %v6469_v24  ;;  %5448 = vmatprep.subr.bf16.mxu1 %v5447_v25  ;;  %v5465_v24 = vpack.c.bf16 %v662_v18, %v660_v17  ;;  %v6489_v25 = vpack.c.bf16 %v1686_v20, %v1684_v26  ;;  %v6491_v32 = vpack.c.bf16 %v1691_v29, %v1689_v23  ;;  %v680_v18 = vld [vmem:[%s7478_s22 + $0xda0] sm:$0xff]  ;;  %v682_v26 = vld [vmem:[%s7478_s22 + $0xdb0] sm:$0xff]  ;;  %v687_v23 = vld [vmem:[%s7478_s22 + $0xdd8] sm:$0xff] }
 0x1d5   : > { %6472 = vmatprep.subr.bf16.mxu0 %v6471_v31  ;;  %v1688_v31 = vld [vmem:[%s7478_s22 + $0x2d20] sm:$0xff]  ;;  %v5483_v17 = vpack.c.bf16 %v683_v9, %v681_v52  ;;  %v1709_v29 = vld [vmem:[%s7478_s22 + $0x2dc8] sm:$0xff] }
 0x1d6   : > { %v1720_v52 = vld [vmem:[%s7478_s22 + $0x2e20] sm:$0xff] }
 0x1d7   : > { %5450 = vmatpush1.bf16.msra.mxu1 %v5449_v40  ;;  %v1695_v40 = vld [vmem:[%s7478_s22 + $0x2d58] sm:$0xff] }
 0x1d8   : > { %6474 = vmatpush1.bf16.msra.mxu0 %v6473_v0  ;;  %5452 = vmatprep.subr.bf16.mxu1 %v5451_v41  ;;  %v5469_v0 = vpack.c.bf16 %v666_v28, %v664_v63  ;;  %v6493_v41 = vpack.c.bf16 %v1690_v34, %v1688_v31  ;;  %v6495_v48 = vpack.c.bf16 %v1695_v40, %v1693_v39  ;;  %v684_v28 = vld [vmem:[%s7478_s22 + $0xdc0] sm:$0xff]  ;;  %v686_v31 = vld [vmem:[%s7478_s22 + $0xdd0] sm:$0xff]  ;;  %v691_v39 = vld [vmem:[%s7478_s22 + $0xdf8] sm:$0xff] }
 0x1d9   : > { %6476 = vmatprep.subr.bf16.mxu0 %v6475_v45  ;;  %v1692_v45 = vld [vmem:[%s7478_s22 + $0x2d40] sm:$0xff]  ;;  %v5487_v63 = vpack.c.bf16 %v687_v23, %v685_v22  ;;  %v1713_v40 = vld [vmem:[%s7478_s22 + $0x2de8] sm:$0xff] }
 0x1da   : > { %v700_v22 = vld [vmem:[%s7478_s22 + $0xe40] sm:$0xff] }
 0x1db   : > { %5454 = vmatpush1.bf16.msra.mxu1 %v5453_v11  ;;  %v1699_v11 = vld [vmem:[%s7478_s22 + $0x2d78] sm:$0xff]  ;;  %v1724_v23 = vld [vmem:[%s7478_s22 + $0x2e40] sm:$0xff] }
 0x1dc   : > { %6478 = vmatpush1.bf16.msra.mxu0 %v6477_v55  ;;  %5456 = vmatprep.subr.bf16.mxu1 %v5455_v56  ;;  %v5473_v55 = vpack.c.bf16 %v670_v44, %v668_v43  ;;  %v6497_v56 = vpack.c.bf16 %v1694_v49, %v1692_v45  ;;  %v6499_v47 = vpack.c.bf16 %v1699_v11, %v1697_v54  ;;  %v688_v44 = vld [vmem:[%s7478_s22 + $0xde0] sm:$0xff]  ;;  %v690_v45 = vld [vmem:[%s7478_s22 + $0xdf0] sm:$0xff]  ;;  %v695_v54 = vld [vmem:[%s7478_s22 + $0xe18] sm:$0xff] }
 0x1dd   : > { %6480 = vmatprep.subr.bf16.mxu0 %v6479_v15  ;;  %v1696_v15 = vld [vmem:[%s7478_s22 + $0x2d60] sm:$0xff]  ;;  %v5491_v43 = vpack.c.bf16 %v691_v39, %v689_v38  ;;  %v2359_v11 = vcombine.high %v8381_v35, %v8381_v35 }
 0x1de   : > { %v1728_v38 = vld [vmem:[%s7478_s22 + $0x2e60] sm:$0xff] }
 0x1df   : > { %5458 = vmatpush1.bf16.msra.mxu1 %v5457_v1  ;;  %v1703_v1 = vld [vmem:[%s7478_s22 + $0x2d98] sm:$0xff] }
 0x1e0   : > { %6482 = vmatpush1.bf16.msra.mxu0 %v6481_v3  ;;  %5460 = vmatprep.subr.bf16.mxu1 %v5459_v33  ;;  %v5477_v3 = vpack.c.bf16 %v674_v59, %v672_v58  ;;  %v6501_v33 = vpack.c.bf16 %v1698_v60, %v1696_v15  ;;  %v6503_v7 = vpack.c.bf16 %v1703_v1, %v1701_v62  ;;  %v694_v60 = vld [vmem:[%s7478_s22 + $0xe10] sm:$0xff]  ;;  %v697_v62 = vld [vmem:[%s7478_s22 + $0xe28] sm:$0xff]  ;;  %v699_v1 = vld [vmem:[%s7478_s22 + $0xe38] sm:$0xff] }
 0x1e1   : > { %6484 = vmatprep.subr.bf16.mxu0 %v6483_v6  ;;  %v1700_v6 = vld [vmem:[%s7478_s22 + $0x2d80] sm:$0xff]  ;;  %v5493_v58 = vpack.c.bf16 %v690_v45, %v688_v44  ;;  %v5495_v15 = vpack.c.bf16 %v695_v54, %v693_v53 }
 0x1e2   : > { %v1732_v53 = vld [vmem:[%s7478_s22 + $0x2e80] sm:$0xff] }
 0x1e3   : > { %5462 = vmatpush1.bf16.msra.mxu1 %v5461_v13  ;;  %v1707_v13 = vld [vmem:[%s7478_s22 + $0x2db8] sm:$0xff] }
 0x1e4   : > { %6486 = vmatpush1.bf16.msra.mxu0 %v6485_v14  ;;  %5464 = vmatprep.subr.bf16.mxu1 %v5463_v16  ;;  %v5481_v14 = vpack.c.bf16 %v678_v5, %v676_v4  ;;  %v6505_v16 = vpack.c.bf16 %v1702_v8, %v1700_v6  ;;  %v6507_v20 = vpack.c.bf16 %v1707_v13, %v1705_v10  ;;  %v698_v8 = vld [vmem:[%s7478_s22 + $0xe30] sm:$0xff]  ;;  %v701_v13 = vld [vmem:[%s7478_s22 + $0xe48] sm:$0xff] }
 0x1e5   : > { %6488 = vmatprep.subr.bf16.mxu0 %v6487_v19  ;;  %v1704_v19 = vld [vmem:[%s7478_s22 + $0x2da0] sm:$0xff]  ;;  %v6521_v5 = vpack.c.bf16 %v1718_v30, %v1716_v61  ;;  %v5499_v6 = vpack.c.bf16 %v699_v1, %v697_v62  ;;  %v1722_v10 = vld [vmem:[%s7478_s22 + $0x2e30] sm:$0xff]  ;;  %v717_v1 = vld [vmem:[%s7478_s22 + $0xec8] sm:$0xff] }
 0x1e6   : > { %v714_v61 = vld [vmem:[%s7478_s22 + $0xeb0] sm:$0xff] }
 0x1e7   : > { %5466 = vmatpush1.bf16.msra.mxu1 %v5465_v24  ;;  %v1711_v24 = vld [vmem:[%s7478_s22 + $0x2dd8] sm:$0xff]  ;;  %v1738_v62 = vld [vmem:[%s7478_s22 + $0x2eb0] sm:$0xff] }
 0x1e8   : > { %6490 = vmatpush1.bf16.msra.mxu0 %v6489_v25  ;;  %5468 = vmatprep.subr.bf16.mxu1 %v5467_v27  ;;  %v5485_v25 = vpack.c.bf16 %v682_v26, %v680_v18  ;;  %v6509_v27 = vpack.c.bf16 %v1706_v21, %v1704_v19  ;;  %v6511_v34 = vpack.c.bf16 %v1711_v24, %v1709_v29  ;;  %v1727_v18 = vld [vmem:[%s7478_s22 + $0x2e58] sm:$0xff]  ;;  %v1726_v24 = vld [vmem:[%s7478_s22 + $0x2e50] sm:$0xff] }
 0x1e9   : > { %6492 = vmatprep.subr.bf16.mxu0 %v6491_v32  ;;  %v1708_v32 = vld [vmem:[%s7478_s22 + $0x2dc0] sm:$0xff] }
 0x1eb   : > { %5470 = vmatpush1.bf16.msra.mxu1 %v5469_v0  ;;  %v1715_v0 = vld [vmem:[%s7478_s22 + $0x2df8] sm:$0xff] }
 0x1ec   : > { %6494 = vmatpush1.bf16.msra.mxu0 %v6493_v41  ;;  %5472 = vmatprep.subr.bf16.mxu1 %v5471_v42  ;;  %v5489_v41 = vpack.c.bf16 %v686_v31, %v684_v28  ;;  %v6513_v42 = vpack.c.bf16 %v1710_v36, %v1708_v32  ;;  %v6515_v49 = vpack.c.bf16 %v1715_v0, %v1713_v40  ;;  %v706_v36 = vld [vmem:[%s7478_s22 + $0xe70] sm:$0xff]  ;;  %v709_v0 = vld [vmem:[%s7478_s22 + $0xe88] sm:$0xff] }
 0x1ed   : > { %6496 = vmatprep.subr.bf16.mxu0 %v6495_v48  ;;  %v1712_v48 = vld [vmem:[%s7478_s22 + $0x2de0] sm:$0xff]  ;;  %v6529_v31 = vpack.c.bf16 %v1726_v24, %v1724_v23  ;;  %v1730_v40 = vld [vmem:[%s7478_s22 + $0x2e70] sm:$0xff]  ;;  %v725_v24 = vld [vmem:[%s7478_s22 + $0xf08] sm:$0xff] }
 0x1ee   : > { %v6517_v59 = vpack.c.bf16 %v1714_v51, %v1712_v48  ;;  %v6533_v45 = vpack.c.bf16 %v1730_v40, %v1728_v38  ;;  %v710_v51 = vld [vmem:[%s7478_s22 + $0xe90] sm:$0xff]  ;;  %v729_v40 = vld [vmem:[%s7478_s22 + $0xf28] sm:$0xff] }
 0x1ef   : > { %5474 = vmatpush1.bf16.msra.mxu1 %v5473_v55  ;;  %v1717_v55 = vld [vmem:[%s7478_s22 + $0x2e08] sm:$0xff] }
 0x1f0   : > { %6498 = vmatpush1.bf16.msra.mxu0 %v6497_v56  ;;  %5476 = vmatprep.subr.bf16.mxu1 %v5475_v57  ;;  %v1719_v56 = vld [vmem:[%s7478_s22 + $0x2e18] sm:$0xff]  ;;  %v2495_v57 = vcombine.high %v8384_v37, %v8384_v37  ;;  %v8539_v37 = vrot.slane %v2359_v11, %v7592_v12  ;;  %v1734_v11 = vld [vmem:[%s7478_s22 + $0x2e90] sm:$0xff] }
 0x1f1   : > { %6500 = vmatprep.subr.bf16.mxu0 %v6499_v47  ;;  %v692_v47 = vld [vmem:[%s7478_s22 + $0xe00] sm:$0xff]  ;;  %v6519_v35 = vpack.c.bf16 %v1719_v56, %v1717_v55  ;;  %v713_v55 = vld [vmem:[%s7478_s22 + $0xea8] sm:$0xff]  ;;  %v715_v56 = vld [vmem:[%s7478_s22 + $0xeb8] sm:$0xff] }
 0x1f2   : > { %v5497_v4 = vpack.c.bf16 %v694_v60, %v692_v47  ;;  %v5515_v47 = vpack.c.bf16 %v715_v56, %v713_v55  ;;  %v712_v60 = vld [vmem:[%s7478_s22 + $0xea0] sm:$0xff]  ;;  %v735_v55 = vld [vmem:[%s7478_s22 + $0xf58] sm:$0xff]  ;;  %v1757_v56 = vld [vmem:[%s7478_s22 + $0x2f48] sm:$0xff] }
 0x1f3   : > { %5478 = vmatpush1.bf16.msra.mxu1 %v5477_v3  ;;  %v1721_v3 = vld [vmem:[%s7478_s22 + $0x2e28] sm:$0xff] }
 0x1f4   : > { %6502 = vmatpush1.bf16.msra.mxu0 %v6501_v33  ;;  %5480 = vmatprep.subr.bf16.mxu1 %v5479_v2  ;;  %v1723_v33 = vld [vmem:[%s7478_s22 + $0x2e38] sm:$0xff]  ;;  %v8544_v2 = vrot.slane %v2495_v57, %v7592_v12  ;;  %v1737_v57 = vld [vmem:[%s7478_s22 + $0x2ea8] sm:$0xff] }
 0x1f5   : > { %6504 = vmatprep.subr.bf16.mxu0 %v6503_v7  ;;  %v696_v7 = vld [vmem:[%s7478_s22 + $0xe20] sm:$0xff]  ;;  %v6523_v9 = vpack.c.bf16 %v1723_v33, %v1721_v3  ;;  %v719_v3 = vld [vmem:[%s7478_s22 + $0xed8] sm:$0xff]  ;;  %v1741_v33 = vld [vmem:[%s7478_s22 + $0x2ec8] sm:$0xff] }
 0x1f6   : > { %v2511_v26 = vcombine.high %v8544_v2, %v8544_v2  ;;  %v5501_v19 = vpack.c.bf16 %v698_v8, %v696_v7  ;;  %v5519_v7 = vpack.c.bf16 %v719_v3, %v717_v1  ;;  %v716_v8 = vld [vmem:[%s7478_s22 + $0xec0] sm:$0xff]  ;;  %v739_v1 = vld [vmem:[%s7478_s22 + $0xf78] sm:$0xff]  ;;  %v1761_v3 = vld [vmem:[%s7478_s22 + $0x2f68] sm:$0xff] }
 0x1f7   : > { %5482 = vmatpush1.bf16.msra.mxu1 %v5481_v14  ;;  %v703_v14 = vld [vmem:[%s7478_s22 + $0xe58] sm:$0xff] }
 0x1f8   : > { %6506 = vmatpush1.bf16.msra.mxu0 %v6505_v16  ;;  %5484 = vmatprep.subr.bf16.mxu1 %v5483_v17  ;;  %v2375_v16 = vcombine.high %v8539_v37, %v8539_v37  ;;  %v1725_v17 = vld [vmem:[%s7478_s22 + $0x2e48] sm:$0xff]  ;;  %v5503_v21 = vpack.c.bf16 %v703_v14, %v701_v13  ;;  %v1742_v13 = vld [vmem:[%s7478_s22 + $0x2ed0] sm:$0xff] }
 0x1f9   : > { %6508 = vmatprep.subr.bf16.mxu0 %v6507_v20  ;;  %v6525_v20 = vpack.c.bf16 %v1722_v10, %v1720_v52  ;;  %v6527_v29 = vpack.c.bf16 %v1727_v18, %v1725_v17  ;;  %v718_v52 = vld [vmem:[%s7478_s22 + $0xed0] sm:$0xff]  ;;  %v721_v14 = vld [vmem:[%s7478_s22 + $0xee8] sm:$0xff]  ;;  %v1747_v18 = vld [vmem:[%s7478_s22 + $0x2ef8] sm:$0xff] }
 0x1fa   : > { %v1745_v17 = vld [vmem:[%s7478_s22 + $0x2ee8] sm:$0xff] }
 0x1fb   : > { %5486 = vmatpush1.bf16.msra.mxu1 %v5485_v25  ;;  %v705_v25 = vld [vmem:[%s7478_s22 + $0xe68] sm:$0xff]  ;;  %v6547_v23 = vpack.c.bf16 %v1747_v18, %v1745_v17  ;;  %v1767_v17 = vld [vmem:[%s7478_s22 + $0x2f98] sm:$0xff] }
 0x1fc   : > { %6510 = vmatpush1.bf16.msra.mxu0 %v6509_v27  ;;  %5488 = vmatprep.subr.bf16.mxu1 %v5487_v63  ;;  %v707_v27 = vld [vmem:[%s7478_s22 + $0xe78] sm:$0xff] }
 0x1fd   : > { %6512 = vmatprep.subr.bf16.mxu0 %v6511_v34  ;;  %v1731_v63 = vld [vmem:[%s7478_s22 + $0x2e78] sm:$0xff]  ;;  %v5507_v32 = vpack.c.bf16 %v707_v27, %v705_v25  ;;  %v704_v34 = vld [vmem:[%s7478_s22 + $0xe60] sm:$0xff]  ;;  %v1749_v27 = vld [vmem:[%s7478_s22 + $0x2f08] sm:$0xff] }
 0x1fe   : > { %v5509_v44 = vpack.c.bf16 %v706_v36, %v704_v34  ;;  %v727_v25 = vld [vmem:[%s7478_s22 + $0xf18] sm:$0xff]  ;;  %v726_v34 = vld [vmem:[%s7478_s22 + $0xf10] sm:$0xff]  ;;  %v1748_v36 = vld [vmem:[%s7478_s22 + $0x2f00] sm:$0xff] }
 0x1ff   : > { %5490 = vmatpush1.bf16.msra.mxu1 %v5489_v41  ;;  %v711_v41 = vld [vmem:[%s7478_s22 + $0xe98] sm:$0xff] }
 0x200   : > { %6514 = vmatpush1.bf16.msra.mxu0 %v6513_v42  ;;  %5492 = vmatprep.subr.bf16.mxu1 %v5491_v43  ;;  %v1733_v42 = vld [vmem:[%s7478_s22 + $0x2e88] sm:$0xff]  ;;  %v1735_v43 = vld [vmem:[%s7478_s22 + $0x2e98] sm:$0xff]  ;;  %v5511_v48 = vpack.c.bf16 %v711_v41, %v709_v0 }
 0x201   : > { %6516 = vmatprep.subr.bf16.mxu0 %v6515_v49  ;;  %v708_v49 = vld [vmem:[%s7478_s22 + $0xe80] sm:$0xff]  ;;  %v6535_v54 = vpack.c.bf16 %v1735_v43, %v1733_v42  ;;  %v731_v0 = vld [vmem:[%s7478_s22 + $0xf38] sm:$0xff]  ;;  %v1753_v41 = vld [vmem:[%s7478_s22 + $0x2f28] sm:$0xff] }
 0x202   : > { %v1755_v42 = vld [vmem:[%s7478_s22 + $0x2f38] sm:$0xff] }
 0x203   : > { %5494 = vmatpush1.bf16.msra.mxu1 %v5493_v58  ;;  %v1739_v58 = vld [vmem:[%s7478_s22 + $0x2eb8] sm:$0xff] }
 0x204   : > { %6518 = vmatpush1.bf16.msra.mxu0 %v6517_v59  ;;  %5496 = vmatprep.subr.bf16.mxu1 %v5495_v15  ;;  %v5513_v59 = vpack.c.bf16 %v710_v51, %v708_v49  ;;  %v6537_v15 = vpack.c.bf16 %v1734_v11, %v1732_v53  ;;  %v6539_v30 = vpack.c.bf16 %v1739_v58, %v1737_v57  ;;  %v730_v49 = vld [vmem:[%s7478_s22 + $0xf30] sm:$0xff]  ;;  %v1752_v51 = vld [vmem:[%s7478_s22 + $0x2f20] sm:$0xff]  ;;  %v733_v11 = vld [vmem:[%s7478_s22 + $0xf48] sm:$0xff] }
 0x205   : > { %6520 = vmatprep.subr.bf16.mxu0 %v6519_v35  ;;  %v1736_v35 = vld [vmem:[%s7478_s22 + $0x2ea0] sm:$0xff]  ;;  %v6555_v53 = vpack.c.bf16 %v1755_v42, %v1753_v41  ;;  %v1759_v57 = vld [vmem:[%s7478_s22 + $0x2f58] sm:$0xff] }
 0x206   : > { %3135 = vmatmul.mubr.f32.vlgmr.msra.gmra.mrb[0].mxu1 %v8394_v46  ;;  %v702_v46 = vld [vmem:[%s7478_s22 + $0xe50] sm:$0xff]  ;;  %v1775_v41 = vld [vmem:[%s7478_s22 + $0x2fd8] sm:$0xff] }
 0x207   : > { %5498 = vmatpush1.bf16.msra.mxu1 %v5497_v4  ;;  %4271 = vmatmul.mubr.f32.vlgmr.msra.gmra.mrb[0].mxu0 %v8400_v50  ;;  %v1729_v50 = vld [vmem:[%s7478_s22 + $0x2e68] sm:$0xff]  ;;  %v5505_v28 = vpack.c.bf16 %v702_v46, %v700_v22  ;;  %v1743_v4 = vld [vmem:[%s7478_s22 + $0x2ed8] sm:$0xff]  ;;  %v722_v22 = vld [vmem:[%s7478_s22 + $0xef0] sm:$0xff] }
 0x208   : > { %6522 = vmatpush1.bf16.msra.mxu0 %v6521_v5  ;;  %5500 = vmatprep.subr.bf16.mxu1 %v5499_v6  ;;  %v6531_v39 = vpack.c.bf16 %v1731_v63, %v1729_v50  ;;  %v5517_v5 = vpack.c.bf16 %v714_v61, %v712_v60  ;;  %v6541_v6 = vpack.c.bf16 %v1738_v62, %v1736_v35  ;;  %v1744_v46 = vld [vmem:[%s7478_s22 + $0x2ee0] sm:$0xff]  ;;  %v1751_v50 = vld [vmem:[%s7478_s22 + $0x2f18] sm:$0xff]  ;;  %v734_v60 = vld [vmem:[%s7478_s22 + $0xf50] sm:$0xff] }
 0x209   : > { %6524 = vmatprep.subr.bf16.mxu0 %v6523_v9  ;;  %3205 = vmatprep.mubr.f32.mxu1 %v2375_v16  ;;  %v1740_v9 = vld [vmem:[%s7478_s22 + $0x2ec0] sm:$0xff]  ;;  %v6543_v10 = vpack.c.bf16 %v1743_v4, %v1741_v33  ;;  %v723_v16 = vld [vmem:[%s7478_s22 + $0xef8] sm:$0xff]  ;;  %v6551_v38 = vpack.c.bf16 %v1751_v50, %v1749_v27  ;;  %v6559_v35 = vpack.c.bf16 %v1759_v57, %v1757_v56  ;;  %v737_v62 = vld [vmem:[%s7478_s22 + $0xf68] sm:$0xff] }
 0x20a   : > { %4341 = vmatprep.mubr.f32.mxu0 %v2511_v26  ;;  %v5521_v26 = vpack.c.bf16 %v718_v52, %v716_v8  ;;  %v1756_v61 = vld [vmem:[%s7478_s22 + $0x2f40] sm:$0xff]  ;;  %v1763_v33 = vld [vmem:[%s7478_s22 + $0x2f78] sm:$0xff]  ;;  %v738_v8 = vld [vmem:[%s7478_s22 + $0xf70] sm:$0xff] }
 0x20b   : > { %5502 = vmatpush1.bf16.msra.mxu1 %v5501_v19  ;;  %v6545_v19 = vpack.c.bf16 %v1742_v13, %v1740_v9  ;;  %v1760_v52 = vld [vmem:[%s7478_s22 + $0x2f60] sm:$0xff]  ;;  %v6563_v9 = vpack.c.bf16 %v1763_v33, %v1761_v3  ;;  %v741_v13 = vld [vmem:[%s7478_s22 + $0xf88] sm:$0xff]  ;;  %v1771_v27 = vld [vmem:[%s7478_s22 + $0x2fb8] sm:$0xff] }
 0x20c   : > { %6526 = vmatpush1.bf16.msra.mxu0 %v6525_v20  ;;  %5504 = vmatprep.subr.bf16.mxu1 %v5503_v21  ;;  %v5523_v20 = vpack.c.bf16 %v723_v16, %v721_v14  ;;  %v720_v21 = vld [vmem:[%s7478_s22 + $0xee0] sm:$0xff]  ;;  %v743_v14 = vld [vmem:[%s7478_s22 + $0xf98] sm:$0xff]  ;;  %v1765_v16 = vld [vmem:[%s7478_s22 + $0x2f88] sm:$0xff] }
 0x20d   : > { %6528 = vmatprep.subr.bf16.mxu0 %v6527_v29  ;;  %v1746_v29 = vld [vmem:[%s7478_s22 + $0x2ef0] sm:$0xff]  ;;  %v5525_v63 = vpack.c.bf16 %v722_v22, %v720_v21  ;;  %v1764_v22 = vld [vmem:[%s7478_s22 + $0x2f80] sm:$0xff]  ;;  %v1779_v56 = vld [vmem:[%s7478_s22 + $0x2ff8] sm:$0xff] }
 0x20e   : > { %v742_v21 = vld [vmem:[%s7478_s22 + $0xf90] sm:$0xff]  ;;  %v1783_v3 = vld [vmem:[%s7478_s22 + $0x3018] sm:$0xff]  ;;  %v8673_v33 = vld [vmem:[%s7496_s29 + $0x20] sm:$0xff] }
 0x20f   : > { %5506 = vmatpush1.bf16.msra.mxu1 %v5505_v28  ;;  %v6549_v28 = vpack.c.bf16 %v1746_v29, %v1744_v46  ;;  %v6567_v46 = vpack.c.bf16 %v1767_v17, %v1765_v16  ;;  %v745_v29 = vld [vmem:[%s7478_s22 + $0xfa8] sm:$0xff]  ;;  %v763_v16 = vld [vmem:[%s7478_s22 + $0x1038] sm:$0xff]  ;;  %v8686_v17 = vrot.slane %v8673_v33, %v7592_v12 }
 0x210   : > { %6530 = vmatpush1.bf16.msra.mxu0 %v6529_v31  ;;  %5508 = vmatprep.subr.bf16.mxu1 %v5507_v32  ;;  %v5527_v31 = vpack.c.bf16 %v727_v25, %v725_v24  ;;  %v724_v32 = vld [vmem:[%s7478_s22 + $0xf00] sm:$0xff]  ;;  %v747_v24 = vld [vmem:[%s7478_s22 + $0xfb8] sm:$0xff]  ;;  %v1769_v25 = vld [vmem:[%s7478_s22 + $0x2fa8] sm:$0xff] }
 0x211   : > { %6532 = vmatprep.subr.bf16.mxu0 %v6531_v39  ;;  %v1750_v39 = vld [vmem:[%s7478_s22 + $0x2f10] sm:$0xff]  ;;  %v5529_v43 = vpack.c.bf16 %v726_v34, %v724_v32  ;;  %v1768_v34 = vld [vmem:[%s7478_s22 + $0x2fa0] sm:$0xff] }
 0x212   : > { %v746_v32 = vld [vmem:[%s7478_s22 + $0xfb0] sm:$0xff] }
 0x213   : > { %5510 = vmatpush1.bf16.msra.mxu1 %v5509_v44  ;;  %v6553_v44 = vpack.c.bf16 %v1750_v39, %v1748_v36  ;;  %v6571_v36 = vpack.c.bf16 %v1771_v27, %v1769_v25  ;;  %v749_v39 = vld [vmem:[%s7478_s22 + $0xfc8] sm:$0xff]  ;;  %v1786_v25 = vld [vmem:[%s7478_s22 + $0x3030] sm:$0xff] }
 0x214   : > { %6534 = vmatpush1.bf16.msra.mxu0 %v6533_v45  ;;  %5512 = vmatprep.subr.bf16.mxu1 %v5511_v48  ;;  %v5531_v45 = vpack.c.bf16 %v731_v0, %v729_v40  ;;  %v728_v48 = vld [vmem:[%s7478_s22 + $0xf20] sm:$0xff]  ;;  %v751_v40 = vld [vmem:[%s7478_s22 + $0xfd8] sm:$0xff]  ;;  %v1773_v0 = vld [vmem:[%s7478_s22 + $0x2fc8] sm:$0xff] }
 0x215   : > { %6536 = vmatprep.subr.bf16.mxu0 %v6535_v54  ;;  %v1754_v54 = vld [vmem:[%s7478_s22 + $0x2f30] sm:$0xff]  ;;  %v5533_v58 = vpack.c.bf16 %v730_v49, %v728_v48  ;;  %v1772_v49 = vld [vmem:[%s7478_s22 + $0x2fc0] sm:$0xff]  ;;  %v765_v27 = vld [vmem:[%s7478_s22 + $0x1048] sm:$0xff] }
 0x216   : > { %v750_v48 = vld [vmem:[%s7478_s22 + $0xfd0] sm:$0xff] }
 0x217   : > { %5514 = vmatpush1.bf16.msra.mxu1 %v5513_v59  ;;  %v6557_v59 = vpack.c.bf16 %v1754_v54, %v1752_v51  ;;  %v6575_v51 = vpack.c.bf16 %v1775_v41, %v1773_v0  ;;  %v753_v54 = vld [vmem:[%s7478_s22 + $0xfe8] sm:$0xff]  ;;  %v1790_v41 = vld [vmem:[%s7478_s22 + $0x3050] sm:$0xff] }
 0x218   : > { %6538 = vmatpush1.bf16.msra.mxu0 %v6537_v15  ;;  %5516 = vmatprep.subr.bf16.mxu1 %v5515_v47  ;;  %v5535_v15 = vpack.c.bf16 %v735_v55, %v733_v11  ;;  %v732_v47 = vld [vmem:[%s7478_s22 + $0xf40] sm:$0xff]  ;;  %v755_v11 = vld [vmem:[%s7478_s22 + $0xff8] sm:$0xff]  ;;  %v1777_v55 = vld [vmem:[%s7478_s22 + $0x2fe8] sm:$0xff] }
 0x219   : > { %6540 = vmatprep.subr.bf16.mxu0 %v6539_v30  ;;  %v1758_v30 = vld [vmem:[%s7478_s22 + $0x2f50] sm:$0xff]  ;;  %v5537_v4 = vpack.c.bf16 %v734_v60, %v732_v47  ;;  %v1776_v60 = vld [vmem:[%s7478_s22 + $0x2fe0] sm:$0xff] }
 0x21a   : > { %v754_v47 = vld [vmem:[%s7478_s22 + $0xff0] sm:$0xff] }
 0x21b   : > { %5518 = vmatpush1.bf16.msra.mxu1 %v5517_v5  ;;  %v6561_v5 = vpack.c.bf16 %v1758_v30, %v1756_v61  ;;  %v6579_v61 = vpack.c.bf16 %v1779_v56, %v1777_v55  ;;  %v757_v30 = vld [vmem:[%s7478_s22 + $0x1008] sm:$0xff]  ;;  %v1794_v55 = vld [vmem:[%s7478_s22 + $0x3070] sm:$0xff] }
 0x21c   : > { %6542 = vmatpush1.bf16.msra.mxu0 %v6541_v6  ;;  %5520 = vmatprep.subr.bf16.mxu1 %v5519_v7  ;;  %v5539_v6 = vpack.c.bf16 %v739_v1, %v737_v62  ;;  %v736_v7 = vld [vmem:[%s7478_s22 + $0xf60] sm:$0xff]  ;;  %v759_v62 = vld [vmem:[%s7478_s22 + $0x1018] sm:$0xff]  ;;  %v1781_v1 = vld [vmem:[%s7478_s22 + $0x3008] sm:$0xff] }
 0x21d   : > { %6544 = vmatprep.subr.bf16.mxu0 %v6543_v10  ;;  %v1762_v10 = vld [vmem:[%s7478_s22 + $0x2f70] sm:$0xff]  ;;  %v5541_v18 = vpack.c.bf16 %v738_v8, %v736_v7  ;;  %v5559_v7 = vpack.c.bf16 %v759_v62, %v757_v30  ;;  %v756_v8 = vld [vmem:[%s7478_s22 + $0x1000] sm:$0xff]  ;;  %v773_v56 = vld [vmem:[%s7478_s22 + $0x1088] sm:$0xff] }
 0x21e   : > { %v1796_v30 = vld [vmem:[%s7478_s22 + $0x3080] sm:$0xff] }
 0x21f   : > { %5522 = vmatpush1.bf16.msra.mxu1 %v5521_v26  ;;  %v6565_v26 = vpack.c.bf16 %v1762_v10, %v1760_v52  ;;  %v758_v52 = vld [vmem:[%s7478_s22 + $0x1010] sm:$0xff]  ;;  %v6583_v10 = vpack.c.bf16 %v1783_v3, %v1781_v1  ;;  %v777_v3 = vld [vmem:[%s7478_s22 + $0x10a8] sm:$0xff] }
 0x220   : > { %6546 = vmatpush1.bf16.msra.mxu0 %v6545_v19  ;;  %5524 = vmatprep.subr.bf16.mxu1 %v5523_v20  ;;  %v5543_v19 = vpack.c.bf16 %v743_v14, %v741_v13  ;;  %v740_v20 = vld [vmem:[%s7478_s22 + $0xf80] sm:$0xff]  ;;  %v1782_v13 = vld [vmem:[%s7478_s22 + $0x3010] sm:$0xff]  ;;  %v761_v14 = vld [vmem:[%s7478_s22 + $0x1028] sm:$0xff] }
 0x221   : > { %6548 = vmatprep.subr.bf16.mxu0 %v6547_v23  ;;  %v1766_v23 = vld [vmem:[%s7478_s22 + $0x2f90] sm:$0xff]  ;;  %v5545_v50 = vpack.c.bf16 %v742_v21, %v740_v20  ;;  %v5561_v20 = vpack.c.bf16 %v758_v52, %v756_v8 }
 0x222   : > { %v1798_v1 = vld [vmem:[%s7478_s22 + $0x3090] sm:$0xff] }
 0x223   : > { %5526 = vmatpush1.bf16.msra.mxu1 %v5525_v63  ;;  %v6569_v63 = vpack.c.bf16 %v1766_v23, %v1764_v22  ;;  %v5563_v22 = vpack.c.bf16 %v763_v16, %v761_v14  ;;  %v762_v23 = vld [vmem:[%s7478_s22 + $0x1030] sm:$0xff]  ;;  %v6601_v52 = vpack.c.bf16 %v1798_v1, %v1796_v30  ;;  %v1800_v14 = vld [vmem:[%s7478_s22 + $0x30a0] sm:$0xff] }
 0x224   : > { %6550 = vmatpush1.bf16.msra.mxu0 %v6549_v28  ;;  %5528 = vmatprep.subr.bf16.mxu1 %v5527_v31  ;;  %v5547_v28 = vpack.c.bf16 %v747_v24, %v745_v29  ;;  %v744_v31 = vld [vmem:[%s7478_s22 + $0xfa0] sm:$0xff]  ;;  %v794_v30 = vld [vmem:[%s7478_s22 + $0x1130] sm:$0xff] }
 0x225   : > { %6552 = vmatprep.subr.bf16.mxu0 %v6551_v38  ;;  %v1770_v38 = vld [vmem:[%s7478_s22 + $0x2fb0] sm:$0xff]  ;;  %v5549_v42 = vpack.c.bf16 %v746_v32, %v744_v31  ;;  %v1784_v29 = vld [vmem:[%s7478_s22 + $0x3020] sm:$0xff]  ;;  %v1791_v31 = vld [vmem:[%s7478_s22 + $0x3058] sm:$0xff] }
 0x227   : > { %5530 = vmatpush1.bf16.msra.mxu1 %v5529_v43  ;;  %v6573_v43 = vpack.c.bf16 %v1770_v38, %v1768_v34 }
 0x228   : > { %6554 = vmatpush1.bf16.msra.mxu0 %v6553_v44  ;;  %5532 = vmatprep.subr.bf16.mxu1 %v5531_v45  ;;  %v5551_v44 = vpack.c.bf16 %v751_v40, %v749_v39  ;;  %v748_v45 = vld [vmem:[%s7478_s22 + $0xfc0] sm:$0xff] }
 0x229   : > { %6556 = vmatprep.subr.bf16.mxu0 %v6555_v53  ;;  %v1774_v53 = vld [vmem:[%s7478_s22 + $0x2fd0] sm:$0xff]  ;;  %v5553_v57 = vpack.c.bf16 %v750_v48, %v748_v45  ;;  %v764_v39 = vld [vmem:[%s7478_s22 + $0x1040] sm:$0xff] }
 0x22a   : > { %v1788_v40 = vld [vmem:[%s7478_s22 + $0x3040] sm:$0xff] }
 0x22b   : > { %5534 = vmatpush1.bf16.msra.mxu1 %v5533_v58  ;;  %v6577_v58 = vpack.c.bf16 %v1774_v53, %v1772_v49  ;;  %v6593_v48 = vpack.c.bf16 %v1790_v41, %v1788_v40  ;;  %v770_v53 = vld [vmem:[%s7478_s22 + $0x1070] sm:$0xff] }
 0x22c   : > { %6558 = vmatpush1.bf16.msra.mxu0 %v6557_v59  ;;  %5536 = vmatprep.subr.bf16.mxu1 %v5535_v15  ;;  %v5555_v59 = vpack.c.bf16 %v755_v11, %v753_v54  ;;  %v752_v15 = vld [vmem:[%s7478_s22 + $0xfe0] sm:$0xff]  ;;  %v786_v40 = vld [vmem:[%s7478_s22 + $0x10f0] sm:$0xff] }
 0x22d   : > { %6560 = vmatprep.subr.bf16.mxu0 %v6559_v35  ;;  %v1778_v35 = vld [vmem:[%s7478_s22 + $0x2ff0] sm:$0xff]  ;;  %v1792_v54 = vld [vmem:[%s7478_s22 + $0x3060] sm:$0xff] }
 0x22f   : > { %5538 = vmatpush1.bf16.msra.mxu1 %v5537_v4  ;;  %v5557_v4 = vpack.c.bf16 %v754_v47, %v752_v15  ;;  %v6597_v47 = vpack.c.bf16 %v1794_v55, %v1792_v54  ;;  %v790_v54 = vld [vmem:[%s7478_s22 + $0x1110] sm:$0xff] }
 0x230   : > { %6562 = vmatpush1.bf16.msra.mxu0 %v6561_v5  ;;  %5540 = vmatprep.subr.bf16.mxu1 %v5539_v6  ;;  %v8676_v5 = vld [vmem:[%s7496_s29 + $0x60] sm:$0xff]  ;;  %v6581_v6 = vpack.c.bf16 %v1778_v35, %v1776_v60  ;;  %v774_v35 = vld [vmem:[%s7478_s22 + $0x1090] sm:$0xff] }
 0x231   : > { %6564 = vmatprep.subr.bf16.mxu0 %v6563_v9  ;;  %v1780_v9 = vld [vmem:[%s7478_s22 + $0x3000] sm:$0xff] }
 0x232   : > { %v6585_v21 = vpack.c.bf16 %v1782_v13, %v1780_v9  ;;  %v778_v13 = vld [vmem:[%s7478_s22 + $0x10b0] sm:$0xff] }
 0x233   : > { %5542 = vmatpush1.bf16.msra.mxu1 %v5541_v18  ;;  %v1785_v18 = vld [vmem:[%s7478_s22 + $0x3028] sm:$0xff] }
 0x234   : > { %6566 = vmatpush1.bf16.msra.mxu0 %v6565_v26  ;;  %5544 = vmatprep.subr.bf16.mxu1 %v5543_v19  ;;  %v1787_v26 = vld [vmem:[%s7478_s22 + $0x3038] sm:$0xff]  ;;  %v8692_v19 = vrot.slane %v8676_v5, %v7592_v12 }
 0x235   : > { %6568 = vmatprep.subr.bf16.mxu0 %v6567_v46  ;;  %v760_v46 = vld [vmem:[%s7478_s22 + $0x1020] sm:$0xff]  ;;  %v6587_v24 = vpack.c.bf16 %v1787_v26, %v1785_v18  ;;  %v1802_v18 = vld [vmem:[%s7478_s22 + $0x30b0] sm:$0xff]  ;;  %v781_v26 = vld [vmem:[%s7478_s22 + $0x10c8] sm:$0xff] }
 0x236   : > { %v2527_v32 = vcombine.high %v8692_v19, %v8692_v19  ;;  %v5565_v34 = vpack.c.bf16 %v762_v23, %v760_v46  ;;  %v6605_v23 = vpack.c.bf16 %v1802_v18, %v1800_v14  ;;  %v798_v14 = vld [vmem:[%s7478_s22 + $0x1150] sm:$0xff] }
 0x237   : > { %5546 = vmatpush1.bf16.msra.mxu1 %v5545_v50  ;;  %v767_v50 = vld [vmem:[%s7478_s22 + $0x1058] sm:$0xff] }
 0x238   : > { %6570 = vmatpush1.bf16.msra.mxu0 %v6569_v63  ;;  %5548 = vmatprep.subr.bf16.mxu1 %v5547_v28  ;;  %v2391_v63 = vcombine.high %v8686_v17, %v8686_v17  ;;  %v1789_v28 = vld [vmem:[%s7478_s22 + $0x3048] sm:$0xff]  ;;  %v5567_v38 = vpack.c.bf16 %v767_v50, %v765_v27  ;;  %v1804_v27 = vld [vmem:[%s7478_s22 + $0x30c0] sm:$0xff] }
 0x239   : > { %6572 = vmatprep.subr.bf16.mxu0 %v6571_v36  ;;  %v6589_v36 = vpack.c.bf16 %v1786_v25, %v1784_v29  ;;  %v6591_v0 = vpack.c.bf16 %v1791_v31, %v1789_v28  ;;  %v782_v25 = vld [vmem:[%s7478_s22 + $0x10d0] sm:$0xff]  ;;  %v785_v28 = vld [vmem:[%s7478_s22 + $0x10e8] sm:$0xff]  ;;  %v787_v31 = vld [vmem:[%s7478_s22 + $0x10f8] sm:$0xff] }
 0x23b   : > { %5550 = vmatpush1.bf16.msra.mxu1 %v5549_v42  ;;  %v769_v42 = vld [vmem:[%s7478_s22 + $0x1068] sm:$0xff] }
 0x23c   : > { %6574 = vmatpush1.bf16.msra.mxu0 %v6573_v43  ;;  %5552 = vmatprep.subr.bf16.mxu1 %v5551_v44  ;;  %v771_v43 = vld [vmem:[%s7478_s22 + $0x1078] sm:$0xff] }
 0x23d   : > { %6576 = vmatprep.subr.bf16.mxu0 %v6575_v51  ;;  %v1795_v44 = vld [vmem:[%s7478_s22 + $0x3078] sm:$0xff]  ;;  %v5571_v49 = vpack.c.bf16 %v771_v43, %v769_v42  ;;  %v768_v51 = vld [vmem:[%s7478_s22 + $0x1060] sm:$0xff]  ;;  %v1810_v42 = vld [vmem:[%s7478_s22 + $0x30f0] sm:$0xff] }
 0x23e   : > { %v5573_v15 = vpack.c.bf16 %v770_v53, %v768_v51  ;;  %v789_v43 = vld [vmem:[%s7478_s22 + $0x1108] sm:$0xff]  ;;  %v788_v53 = vld [vmem:[%s7478_s22 + $0x1100] sm:$0xff] }
 0x23f   : > { %5554 = vmatpush1.bf16.msra.mxu1 %v5553_v57  ;;  %v775_v57 = vld [vmem:[%s7478_s22 + $0x1098] sm:$0xff] }
 0x240   : > { %6578 = vmatpush1.bf16.msra.mxu0 %v6577_v58  ;;  %5556 = vmatprep.subr.bf16.mxu1 %v5555_v59  ;;  %v1797_v58 = vld [vmem:[%s7478_s22 + $0x3088] sm:$0xff]  ;;  %v1799_v59 = vld [vmem:[%s7478_s22 + $0x3098] sm:$0xff]  ;;  %v5575_v60 = vpack.c.bf16 %v775_v57, %v773_v56  ;;  %v1814_v56 = vld [vmem:[%s7478_s22 + $0x3110] sm:$0xff] }
 0x241   : > { %6580 = vmatprep.subr.bf16.mxu0 %v6579_v61  ;;  %v772_v61 = vld [vmem:[%s7478_s22 + $0x1080] sm:$0xff]  ;;  %v6599_v62 = vpack.c.bf16 %v1799_v59, %v1797_v58  ;;  %v793_v57 = vld [vmem:[%s7478_s22 + $0x1128] sm:$0xff]  ;;  %v795_v58 = vld [vmem:[%s7478_s22 + $0x1138] sm:$0xff] }
 0x242   : > { %v5577_v8 = vpack.c.bf16 %v774_v35, %v772_v61  ;;  %v1817_v59 = vld [vmem:[%s7478_s22 + $0x3128] sm:$0xff]  ;;  %v5595_v61 = vpack.c.bf16 %v795_v58, %v793_v57  ;;  %v792_v35 = vld [vmem:[%s7478_s22 + $0x1120] sm:$0xff]  ;;  %v1834_v57 = vld [vmem:[%s7478_s22 + $0x31b0] sm:$0xff] }
 0x243   : > { %5558 = vmatpush1.bf16.msra.mxu1 %v5557_v4  ;;  %v779_v4 = vld [vmem:[%s7478_s22 + $0x10b8] sm:$0xff]  ;;  %v813_v58 = vld [vmem:[%s7478_s22 + $0x11c8] sm:$0xff] }
 0x244   : > { %6582 = vmatpush1.bf16.msra.mxu0 %v6581_v6  ;;  %5560 = vmatprep.subr.bf16.mxu1 %v5559_v7  ;;  %v1801_v6 = vld [vmem:[%s7478_s22 + $0x30a8] sm:$0xff]  ;;  %v1803_v7 = vld [vmem:[%s7478_s22 + $0x30b8] sm:$0xff]  ;;  %v5579_v9 = vpack.c.bf16 %v779_v4, %v777_v3  ;;  %v1818_v3 = vld [vmem:[%s7478_s22 + $0x3130] sm:$0xff] }
 0x245   : > { %6584 = vmatprep.subr.bf16.mxu0 %v6583_v10  ;;  %v776_v10 = vld [vmem:[%s7478_s22 + $0x10a0] sm:$0xff]  ;;  %v6603_v16 = vpack.c.bf16 %v1803_v7, %v1801_v6  ;;  %v797_v4 = vld [vmem:[%s7478_s22 + $0x1148] sm:$0xff]  ;;  %v799_v6 = vld [vmem:[%s7478_s22 + $0x1158] sm:$0xff] }
 0x246   : > { %3206 = vmatmul.mubr.f32.vlgmr.msra.gmra.mrb[0].mxu1 %v8539_v37  ;;  %v766_v37 = vld [vmem:[%s7478_s22 + $0x1050] sm:$0xff]  ;;  %v5581_v46 = vpack.c.bf16 %v778_v13, %v776_v10  ;;  %v1821_v7 = vld [vmem:[%s7478_s22 + $0x3148] sm:$0xff]  ;;  %v5599_v10 = vpack.c.bf16 %v799_v6, %v797_v4  ;;  %v796_v13 = vld [vmem:[%s7478_s22 + $0x1140] sm:$0xff] }
 0x247   : > { %5562 = vmatpush1.bf16.msra.mxu1 %v5561_v20  ;;  %4342 = vmatmul.mubr.f32.vlgmr.msra.gmra.mrb[0].mxu0 %v8544_v2  ;;  %v1793_v2 = vld [vmem:[%s7478_s22 + $0x3068] sm:$0xff]  ;;  %v5569_v45 = vpack.c.bf16 %v766_v37, %v764_v39  ;;  %v783_v20 = vld [vmem:[%s7478_s22 + $0x10d8] sm:$0xff]  ;;  %v5587_v39 = vpack.c.bf16 %v787_v31, %v785_v28  ;;  %v784_v37 = vld [vmem:[%s7478_s22 + $0x10e0] sm:$0xff] }
 0x248   : > { %6586 = vmatpush1.bf16.msra.mxu0 %v6585_v21  ;;  %5564 = vmatprep.subr.bf16.mxu1 %v5563_v22  ;;  %v6595_v11 = vpack.c.bf16 %v1795_v44, %v1793_v2  ;;  %v1805_v21 = vld [vmem:[%s7478_s22 + $0x30c8] sm:$0xff]  ;;  %v1807_v22 = vld [vmem:[%s7478_s22 + $0x30d8] sm:$0xff]  ;;  %v5583_v29 = vpack.c.bf16 %v783_v20, %v781_v26  ;;  %v1822_v26 = vld [vmem:[%s7478_s22 + $0x3150] sm:$0xff] }
 0x249   : > { %6588 = vmatprep.subr.bf16.mxu0 %v6587_v24  ;;  %3276 = vmatprep.mubr.f32.mxu1 %v2391_v63  ;;  %v780_v24 = vld [vmem:[%s7478_s22 + $0x10c0] sm:$0xff]  ;;  %v6607_v50 = vpack.c.bf16 %v1807_v22, %v1805_v21  ;;  %v1806_v63 = vld [vmem:[%s7478_s22 + $0x30d0] sm:$0xff]  ;;  %v791_v2 = vld [vmem:[%s7478_s22 + $0x1118] sm:$0xff] }
 0x24a   : > { %4412 = vmatprep.mubr.f32.mxu0 %v2527_v32  ;;  %v1809_v32 = vld [vmem:[%s7478_s22 + $0x30e8] sm:$0xff]  ;;  %v5591_v51 = vpack.c.bf16 %v791_v2, %v789_v43  ;;  %v803_v21 = vld [vmem:[%s7478_s22 + $0x1178] sm:$0xff]  ;;  %v1826_v28 = vld [vmem:[%s7478_s22 + $0x3170] sm:$0xff] }
 0x24b   : > { %5566 = vmatpush1.bf16.msra.mxu1 %v5565_v34  ;;  %v1811_v34 = vld [vmem:[%s7478_s22 + $0x30f8] sm:$0xff]  ;;  %v1813_v44 = vld [vmem:[%s7478_s22 + $0x3108] sm:$0xff]  ;;  %v1830_v43 = vld [vmem:[%s7478_s22 + $0x3190] sm:$0xff] }
 0x24c   : > { %6590 = vmatpush1.bf16.msra.mxu0 %v6589_v36  ;;  %5568 = vmatprep.subr.bf16.mxu1 %v5567_v38  ;;  %v5585_v36 = vpack.c.bf16 %v782_v25, %v780_v24  ;;  %v6609_v38 = vpack.c.bf16 %v1806_v63, %v1804_v27  ;;  %v6611_v41 = vpack.c.bf16 %v1811_v34, %v1809_v32  ;;  %v801_v20 = vld [vmem:[%s7478_s22 + $0x1168] sm:$0xff]  ;;  %v800_v25 = vld [vmem:[%s7478_s22 + $0x1160] sm:$0xff]  ;;  %v802_v27 = vld [vmem:[%s7478_s22 + $0x1170] sm:$0xff] }
 0x24d   : > { %6592 = vmatprep.subr.bf16.mxu0 %v6591_v0  ;;  %v1808_v0 = vld [vmem:[%s7478_s22 + $0x30e0] sm:$0xff]  ;;  %v1825_v22 = vld [vmem:[%s7478_s22 + $0x3168] sm:$0xff]  ;;  %v5603_v24 = vpack.c.bf16 %v803_v21, %v801_v20  ;;  %v807_v32 = vld [vmem:[%s7478_s22 + $0x1198] sm:$0xff] }
 0x24e   : > { %v805_v31 = vld [vmem:[%s7478_s22 + $0x1188] sm:$0xff]  ;;  %v1838_v4 = vld [vmem:[%s7478_s22 + $0x31d0] sm:$0xff] }
 0x24f   : > { %5570 = vmatpush1.bf16.msra.mxu1 %v5569_v45  ;;  %v1815_v45 = vld [vmem:[%s7478_s22 + $0x3118] sm:$0xff]  ;;  %v1829_v34 = vld [vmem:[%s7478_s22 + $0x3188] sm:$0xff]  ;;  %v1842_v20 = vld [vmem:[%s7478_s22 + $0x31f0] sm:$0xff] }
 0x250   : > { %6594 = vmatpush1.bf16.msra.mxu0 %v6593_v48  ;;  %5572 = vmatprep.subr.bf16.mxu1 %v5571_v49  ;;  %v5589_v48 = vpack.c.bf16 %v786_v40, %v784_v37  ;;  %v6613_v49 = vpack.c.bf16 %v1810_v42, %v1808_v0  ;;  %v6615_v55 = vpack.c.bf16 %v1815_v45, %v1813_v44  ;;  %v804_v40 = vld [vmem:[%s7478_s22 + $0x1180] sm:$0xff]  ;;  %v806_v0 = vld [vmem:[%s7478_s22 + $0x1190] sm:$0xff]  ;;  %v809_v2 = vld [vmem:[%s7478_s22 + $0x11a8] sm:$0xff] }
 0x251   : > { %6596 = vmatprep.subr.bf16.mxu0 %v6595_v11  ;;  %v1812_v11 = vld [vmem:[%s7478_s22 + $0x3100] sm:$0xff]  ;;  %v5607_v37 = vpack.c.bf16 %v807_v32, %v805_v31  ;;  %v811_v44 = vld [vmem:[%s7478_s22 + $0x11b8] sm:$0xff]  ;;  %v1833_v45 = vld [vmem:[%s7478_s22 + $0x31a8] sm:$0xff] }
 0x252   : > { %v817_v6 = vld [vmem:[%s7478_s22 + $0x11e8] sm:$0xff]  ;;  %v1844_v31 = vld [vmem:[%s7478_s22 + $0x3200] sm:$0xff]  ;;  %v1846_v32 = vld [vmem:[%s7478_s22 + $0x3210] sm:$0xff] }
 0x253   : > { %5574 = vmatpush1.bf16.msra.mxu1 %v5573_v15  ;;  %v1819_v15 = vld [vmem:[%s7478_s22 + $0x3138] sm:$0xff]  ;;  %v821_v21 = vld [vmem:[%s7478_s22 + $0x1208] sm:$0xff] }
 0x254   : > { %6598 = vmatpush1.bf16.msra.mxu0 %v6597_v47  ;;  %5576 = vmatprep.subr.bf16.mxu1 %v5575_v60  ;;  %v5593_v47 = vpack.c.bf16 %v790_v54, %v788_v53  ;;  %v6617_v60 = vpack.c.bf16 %v1814_v56, %v1812_v11  ;;  %v6619_v1 = vpack.c.bf16 %v1819_v15, %v1817_v59  ;;  %v808_v54 = vld [vmem:[%s7478_s22 + $0x11a0] sm:$0xff]  ;;  %v810_v11 = vld [vmem:[%s7478_s22 + $0x11b0] sm:$0xff]  ;;  %v815_v59 = vld [vmem:[%s7478_s22 + $0x11d8] sm:$0xff] }
 0x255   : > { %6600 = vmatprep.subr.bf16.mxu0 %v6599_v62  ;;  %v1816_v62 = vld [vmem:[%s7478_s22 + $0x3120] sm:$0xff]  ;;  %v5611_v53 = vpack.c.bf16 %v811_v44, %v809_v2  ;;  %v1837_v15 = vld [vmem:[%s7478_s22 + $0x31c8] sm:$0xff] }
 0x256   : > { %v1848_v2 = vld [vmem:[%s7478_s22 + $0x3220] sm:$0xff] }
 0x257   : > { %5578 = vmatpush1.bf16.msra.mxu1 %v5577_v8  ;;  %v1823_v8 = vld [vmem:[%s7478_s22 + $0x3158] sm:$0xff] }
 0x258   : > { %6602 = vmatpush1.bf16.msra.mxu0 %v6601_v52  ;;  %5580 = vmatprep.subr.bf16.mxu1 %v5579_v9  ;;  %v5597_v52 = vpack.c.bf16 %v794_v30, %v792_v35  ;;  %v6621_v9 = vpack.c.bf16 %v1818_v3, %v1816_v62  ;;  %v6623_v18 = vpack.c.bf16 %v1823_v8, %v1821_v7  ;;  %v812_v30 = vld [vmem:[%s7478_s22 + $0x11c0] sm:$0xff]  ;;  %v814_v62 = vld [vmem:[%s7478_s22 + $0x11d0] sm:$0xff]  ;;  %v819_v7 = vld [vmem:[%s7478_s22 + $0x11f8] sm:$0xff] }
 0x259   : > { %6604 = vmatprep.subr.bf16.mxu0 %v6603_v16  ;;  %v1820_v16 = vld [vmem:[%s7478_s22 + $0x3140] sm:$0xff]  ;;  %v5615_v35 = vpack.c.bf16 %v815_v59, %v813_v58  ;;  %v1841_v8 = vld [vmem:[%s7478_s22 + $0x31e8] sm:$0xff] }
 0x25a   : > { %v828_v58 = vld [vmem:[%s7478_s22 + $0x1240] sm:$0xff] }
 0x25b   : > { %5582 = vmatpush1.bf16.msra.mxu1 %v5581_v46  ;;  %v1827_v46 = vld [vmem:[%s7478_s22 + $0x3178] sm:$0xff]  ;;  %v1852_v59 = vld [vmem:[%s7478_s22 + $0x3240] sm:$0xff] }
 0x25c   : > { %6606 = vmatpush1.bf16.msra.mxu0 %v6605_v23  ;;  %5584 = vmatprep.subr.bf16.mxu1 %v5583_v29  ;;  %v5601_v23 = vpack.c.bf16 %v798_v14, %v796_v13  ;;  %v6625_v29 = vpack.c.bf16 %v1822_v26, %v1820_v16  ;;  %v6627_v63 = vpack.c.bf16 %v1827_v46, %v1825_v22  ;;  %v816_v14 = vld [vmem:[%s7478_s22 + $0x11e0] sm:$0xff]  ;;  %v818_v16 = vld [vmem:[%s7478_s22 + $0x11f0] sm:$0xff]  ;;  %v823_v22 = vld [vmem:[%s7478_s22 + $0x1218] sm:$0xff] }
 0x25d   : > { %6608 = vmatprep.subr.bf16.mxu0 %v6607_v50  ;;  %v1824_v50 = vld [vmem:[%s7478_s22 + $0x3160] sm:$0xff]  ;;  %v5619_v13 = vpack.c.bf16 %v819_v7, %v817_v6  ;;  %v2376_v46 = vcombine.high %v8673_v33, %v8673_v33 }
 0x25e   : > { %v1856_v6 = vld [vmem:[%s7478_s22 + $0x3260] sm:$0xff] }
 0x25f   : > { %5586 = vmatpush1.bf16.msra.mxu1 %v5585_v36  ;;  %v1831_v36 = vld [vmem:[%s7478_s22 + $0x3198] sm:$0xff] }
 0x260   : > { %6610 = vmatpush1.bf16.msra.mxu0 %v6609_v38  ;;  %5588 = vmatprep.subr.bf16.mxu1 %v5587_v39  ;;  %v5605_v38 = vpack.c.bf16 %v802_v27, %v800_v25  ;;  %v6629_v39 = vpack.c.bf16 %v1826_v28, %v1824_v50  ;;  %v6631_v42 = vpack.c.bf16 %v1831_v36, %v1829_v34  ;;  %v822_v28 = vld [vmem:[%s7478_s22 + $0x1210] sm:$0xff]  ;;  %v825_v34 = vld [vmem:[%s7478_s22 + $0x1228] sm:$0xff]  ;;  %v827_v36 = vld [vmem:[%s7478_s22 + $0x1238] sm:$0xff] }
 0x261   : > { %6612 = vmatprep.subr.bf16.mxu0 %v6611_v41  ;;  %v1828_v41 = vld [vmem:[%s7478_s22 + $0x3180] sm:$0xff]  ;;  %v5621_v25 = vpack.c.bf16 %v818_v16, %v816_v14  ;;  %v5623_v50 = vpack.c.bf16 %v823_v22, %v821_v21 }
 0x262   : > { %v1860_v21 = vld [vmem:[%s7478_s22 + $0x3280] sm:$0xff] }
 0x263   : > { %5590 = vmatpush1.bf16.msra.mxu1 %v5589_v48  ;;  %v1835_v48 = vld [vmem:[%s7478_s22 + $0x31b8] sm:$0xff] }
 0x264   : > { %6614 = vmatpush1.bf16.msra.mxu0 %v6613_v49  ;;  %5592 = vmatprep.subr.bf16.mxu1 %v5591_v51  ;;  %v5609_v49 = vpack.c.bf16 %v806_v0, %v804_v40  ;;  %v6633_v51 = vpack.c.bf16 %v1830_v43, %v1828_v41  ;;  %v6635_v56 = vpack.c.bf16 %v1835_v48, %v1833_v45  ;;  %v826_v43 = vld [vmem:[%s7478_s22 + $0x1230] sm:$0xff]  ;;  %v829_v48 = vld [vmem:[%s7478_s22 + $0x1248] sm:$0xff] }
 0x265   : > { %6616 = vmatprep.subr.bf16.mxu0 %v6615_v55  ;;  %v1832_v55 = vld [vmem:[%s7478_s22 + $0x31a0] sm:$0xff]  ;;  %v6649_v0 = vpack.c.bf16 %v1846_v32, %v1844_v31  ;;  %v5627_v41 = vpack.c.bf16 %v827_v36, %v825_v34  ;;  %v1850_v45 = vld [vmem:[%s7478_s22 + $0x3230] sm:$0xff]  ;;  %v845_v36 = vld [vmem:[%s7478_s22 + $0x12c8] sm:$0xff] }
 0x266   : > { %v842_v31 = vld [vmem:[%s7478_s22 + $0x12b0] sm:$0xff] }
 0x267   : > { %5594 = vmatpush1.bf16.msra.mxu1 %v5593_v47  ;;  %v1839_v47 = vld [vmem:[%s7478_s22 + $0x31d8] sm:$0xff]  ;;  %v1866_v34 = vld [vmem:[%s7478_s22 + $0x32b0] sm:$0xff] }
 0x268   : > { %6618 = vmatpush1.bf16.msra.mxu0 %v6617_v60  ;;  %5596 = vmatprep.subr.bf16.mxu1 %v5595_v61  ;;  %v5613_v60 = vpack.c.bf16 %v810_v11, %v808_v54  ;;  %v6637_v61 = vpack.c.bf16 %v1834_v57, %v1832_v55  ;;  %v6639_v3 = vpack.c.bf16 %v1839_v47, %v1837_v15  ;;  %v1855_v54 = vld [vmem:[%s7478_s22 + $0x3258] sm:$0xff]  ;;  %v1854_v47 = vld [vmem:[%s7478_s22 + $0x3250] sm:$0xff] }
 0x269   : > { %6620 = vmatprep.subr.bf16.mxu0 %v6619_v1  ;;  %v1836_v1 = vld [vmem:[%s7478_s22 + $0x31c0] sm:$0xff] }
 0x26b   : > { %5598 = vmatpush1.bf16.msra.mxu1 %v5597_v52  ;;  %v1843_v52 = vld [vmem:[%s7478_s22 + $0x31f8] sm:$0xff] }
 0x26c   : > { %6622 = vmatpush1.bf16.msra.mxu0 %v6621_v9  ;;  %5600 = vmatprep.subr.bf16.mxu1 %v5599_v10  ;;  %v5617_v9 = vpack.c.bf16 %v814_v62, %v812_v30  ;;  %v6641_v10 = vpack.c.bf16 %v1838_v4, %v1836_v1  ;;  %v6643_v26 = vpack.c.bf16 %v1843_v52, %v1841_v8  ;;  %v834_v4 = vld [vmem:[%s7478_s22 + $0x1270] sm:$0xff]  ;;  %v837_v52 = vld [vmem:[%s7478_s22 + $0x1288] sm:$0xff] }
 0x26d   : > { %6624 = vmatprep.subr.bf16.mxu0 %v6623_v18  ;;  %v1840_v18 = vld [vmem:[%s7478_s22 + $0x31e0] sm:$0xff]  ;;  %v6657_v62 = vpack.c.bf16 %v1854_v47, %v1852_v59  ;;  %v1858_v8 = vld [vmem:[%s7478_s22 + $0x3270] sm:$0xff]  ;;  %v853_v47 = vld [vmem:[%s7478_s22 + $0x1308] sm:$0xff] }
 0x26e   : > { %v6645_v27 = vpack.c.bf16 %v1842_v20, %v1840_v18  ;;  %v6661_v16 = vpack.c.bf16 %v1858_v8, %v1856_v6  ;;  %v838_v20 = vld [vmem:[%s7478_s22 + $0x1290] sm:$0xff]  ;;  %v857_v8 = vld [vmem:[%s7478_s22 + $0x1328] sm:$0xff] }
 0x26f   : > { %5602 = vmatpush1.bf16.msra.mxu1 %v5601_v23  ;;  %v1845_v23 = vld [vmem:[%s7478_s22 + $0x3208] sm:$0xff] }
 0x270   : > { %6626 = vmatpush1.bf16.msra.mxu0 %v6625_v29  ;;  %5604 = vmatprep.subr.bf16.mxu1 %v5603_v24  ;;  %v1847_v29 = vld [vmem:[%s7478_s22 + $0x3218] sm:$0xff]  ;;  %v2512_v24 = vcombine.high %v8676_v5, %v8676_v5  ;;  %v8831_v5 = vrot.slane %v2376_v46, %v7592_v12  ;;  %v1862_v46 = vld [vmem:[%s7478_s22 + $0x3290] sm:$0xff] }
 0x271   : > { %6628 = vmatprep.subr.bf16.mxu0 %v6627_v63  ;;  %v820_v63 = vld [vmem:[%s7478_s22 + $0x1200] sm:$0xff]  ;;  %v6647_v33 = vpack.c.bf16 %v1847_v29, %v1845_v23  ;;  %v841_v23 = vld [vmem:[%s7478_s22 + $0x12a8] sm:$0xff]  ;;  %v843_v29 = vld [vmem:[%s7478_s22 + $0x12b8] sm:$0xff] }
 0x272   : > { %v5625_v40 = vpack.c.bf16 %v822_v28, %v820_v63  ;;  %v5643_v63 = vpack.c.bf16 %v843_v29, %v841_v23  ;;  %v840_v28 = vld [vmem:[%s7478_s22 + $0x12a0] sm:$0xff]  ;;  %v863_v23 = vld [vmem:[%s7478_s22 + $0x1358] sm:$0xff]  ;;  %v1885_v29 = vld [vmem:[%s7478_s22 + $0x3348] sm:$0xff] }
 0x273   : > { %5606 = vmatpush1.bf16.msra.mxu1 %v5605_v38  ;;  %v1849_v38 = vld [vmem:[%s7478_s22 + $0x3228] sm:$0xff] }
 0x274   : > { %6630 = vmatpush1.bf16.msra.mxu0 %v6629_v39  ;;  %5608 = vmatprep.subr.bf16.mxu1 %v5607_v37  ;;  %v1851_v39 = vld [vmem:[%s7478_s22 + $0x3238] sm:$0xff]  ;;  %v8836_v37 = vrot.slane %v2512_v24, %v7592_v12  ;;  %v1865_v24 = vld [vmem:[%s7478_s22 + $0x32a8] sm:$0xff] }
 0x275   : > { %6632 = vmatprep.subr.bf16.mxu0 %v6631_v42  ;;  %v824_v42 = vld [vmem:[%s7478_s22 + $0x1220] sm:$0xff]  ;;  %v6651_v44 = vpack.c.bf16 %v1851_v39, %v1849_v38  ;;  %v847_v38 = vld [vmem:[%s7478_s22 + $0x12d8] sm:$0xff]  ;;  %v1869_v39 = vld [vmem:[%s7478_s22 + $0x32c8] sm:$0xff] }
 0x276   : > { %v2528_v11 = vcombine.high %v8836_v37, %v8836_v37  ;;  %v5629_v55 = vpack.c.bf16 %v826_v43, %v824_v42  ;;  %v5647_v42 = vpack.c.bf16 %v847_v38, %v845_v36  ;;  %v844_v43 = vld [vmem:[%s7478_s22 + $0x12c0] sm:$0xff]  ;;  %v867_v36 = vld [vmem:[%s7478_s22 + $0x1378] sm:$0xff]  ;;  %v1889_v38 = vld [vmem:[%s7478_s22 + $0x3368] sm:$0xff] }
 0x277   : > { %5610 = vmatpush1.bf16.msra.mxu1 %v5609_v49  ;;  %v831_v49 = vld [vmem:[%s7478_s22 + $0x1258] sm:$0xff] }
 0x278   : > { %6634 = vmatpush1.bf16.msra.mxu0 %v6633_v51  ;;  %5612 = vmatprep.subr.bf16.mxu1 %v5611_v53  ;;  %v2392_v51 = vcombine.high %v8831_v5, %v8831_v5  ;;  %v1853_v53 = vld [vmem:[%s7478_s22 + $0x3248] sm:$0xff]  ;;  %v5631_v57 = vpack.c.bf16 %v831_v49, %v829_v48  ;;  %v1870_v48 = vld [vmem:[%s7478_s22 + $0x32d0] sm:$0xff] }
 0x279   : > { %6636 = vmatprep.subr.bf16.mxu0 %v6635_v56  ;;  %v6653_v56 = vpack.c.bf16 %v1850_v45, %v1848_v2  ;;  %v6655_v15 = vpack.c.bf16 %v1855_v54, %v1853_v53  ;;  %v846_v2 = vld [vmem:[%s7478_s22 + $0x12d0] sm:$0xff]  ;;  %v849_v49 = vld [vmem:[%s7478_s22 + $0x12e8] sm:$0xff]  ;;  %v1875_v54 = vld [vmem:[%s7478_s22 + $0x32f8] sm:$0xff] }
 0x27a   : > { %v1873_v53 = vld [vmem:[%s7478_s22 + $0x32e8] sm:$0xff] }
 0x27b   : > { %5614 = vmatpush1.bf16.msra.mxu1 %v5613_v60  ;;  %v833_v60 = vld [vmem:[%s7478_s22 + $0x1268] sm:$0xff]  ;;  %v6675_v59 = vpack.c.bf16 %v1875_v54, %v1873_v53  ;;  %v1895_v53 = vld [vmem:[%s7478_s22 + $0x3398] sm:$0xff] }
 0x27c   : > { %6638 = vmatpush1.bf16.msra.mxu0 %v6637_v61  ;;  %5616 = vmatprep.subr.bf16.mxu1 %v5615_v35  ;;  %v835_v61 = vld [vmem:[%s7478_s22 + $0x1278] sm:$0xff] }
 0x27d   : > { %6640 = vmatprep.subr.bf16.mxu0 %v6639_v3  ;;  %v1859_v35 = vld [vmem:[%s7478_s22 + $0x3278] sm:$0xff]  ;;  %v5635_v1 = vpack.c.bf16 %v835_v61, %v833_v60  ;;  %v832_v3 = vld [vmem:[%s7478_s22 + $0x1260] sm:$0xff]  ;;  %v1877_v61 = vld [vmem:[%s7478_s22 + $0x3308] sm:$0xff] }
 0x27e   : > { %v5637_v14 = vpack.c.bf16 %v834_v4, %v832_v3  ;;  %v855_v60 = vld [vmem:[%s7478_s22 + $0x1318] sm:$0xff]  ;;  %v854_v3 = vld [vmem:[%s7478_s22 + $0x1310] sm:$0xff]  ;;  %v1876_v4 = vld [vmem:[%s7478_s22 + $0x3300] sm:$0xff] }
 0x27f   : > { %5618 = vmatpush1.bf16.msra.mxu1 %v5617_v9  ;;  %v839_v9 = vld [vmem:[%s7478_s22 + $0x1298] sm:$0xff] }
 0x280   : > { %6642 = vmatpush1.bf16.msra.mxu0 %v6641_v10  ;;  %5620 = vmatprep.subr.bf16.mxu1 %v5619_v13  ;;  %v1861_v10 = vld [vmem:[%s7478_s22 + $0x3288] sm:$0xff]  ;;  %v1863_v13 = vld [vmem:[%s7478_s22 + $0x3298] sm:$0xff]  ;;  %v5639_v18 = vpack.c.bf16 %v839_v9, %v837_v52 }
 0x281   : > { %6644 = vmatprep.subr.bf16.mxu0 %v6643_v26  ;;  %v836_v26 = vld [vmem:[%s7478_s22 + $0x1280] sm:$0xff]  ;;  %v6663_v22 = vpack.c.bf16 %v1863_v13, %v1861_v10  ;;  %v859_v52 = vld [vmem:[%s7478_s22 + $0x1338] sm:$0xff]  ;;  %v1881_v9 = vld [vmem:[%s7478_s22 + $0x3328] sm:$0xff] }
 0x282   : > { %v1883_v10 = vld [vmem:[%s7478_s22 + $0x3338] sm:$0xff] }
 0x283   : > { %5622 = vmatpush1.bf16.msra.mxu1 %v5621_v25  ;;  %v1867_v25 = vld [vmem:[%s7478_s22 + $0x32b8] sm:$0xff] }
 0x284   : > { %6646 = vmatpush1.bf16.msra.mxu0 %v6645_v27  ;;  %5624 = vmatprep.subr.bf16.mxu1 %v5623_v50  ;;  %v5641_v27 = vpack.c.bf16 %v838_v20, %v836_v26  ;;  %v6665_v50 = vpack.c.bf16 %v1862_v46, %v1860_v21  ;;  %v6667_v32 = vpack.c.bf16 %v1867_v25, %v1865_v24  ;;  %v858_v26 = vld [vmem:[%s7478_s22 + $0x1330] sm:$0xff]  ;;  %v1880_v20 = vld [vmem:[%s7478_s22 + $0x3320] sm:$0xff]  ;;  %v861_v46 = vld [vmem:[%s7478_s22 + $0x1348] sm:$0xff] }
 0x285   : > { %6648 = vmatprep.subr.bf16.mxu0 %v6647_v33  ;;  %v1864_v33 = vld [vmem:[%s7478_s22 + $0x32a0] sm:$0xff]  ;;  %v6683_v21 = vpack.c.bf16 %v1883_v10, %v1881_v9  ;;  %v1887_v24 = vld [vmem:[%s7478_s22 + $0x3358] sm:$0xff] }
 0x286   : > { %3277 = vmatmul.mubr.f32.vlgmr.msra.gmra.mrb[0].mxu1 %v8686_v17  ;;  %v830_v17 = vld [vmem:[%s7478_s22 + $0x1250] sm:$0xff]  ;;  %v1903_v9 = vld [vmem:[%s7478_s22 + $0x33d8] sm:$0xff] }
 0x287   : > { %5626 = vmatpush1.bf16.msra.mxu1 %v5625_v40  ;;  %4413 = vmatmul.mubr.f32.vlgmr.msra.gmra.mrb[0].mxu0 %v8692_v19  ;;  %v1857_v19 = vld [vmem:[%s7478_s22 + $0x3268] sm:$0xff]  ;;  %v5633_v30 = vpack.c.bf16 %v830_v17, %v828_v58  ;;  %v1871_v40 = vld [vmem:[%s7478_s22 + $0x32d8] sm:$0xff]  ;;  %v850_v58 = vld [vmem:[%s7478_s22 + $0x12f0] sm:$0xff] }
 0x288   : > { %6650 = vmatpush1.bf16.msra.mxu0 %v6649_v0  ;;  %5628 = vmatprep.subr.bf16.mxu1 %v5627_v41  ;;  %v6659_v7 = vpack.c.bf16 %v1859_v35, %v1857_v19  ;;  %v5645_v0 = vpack.c.bf16 %v842_v31, %v840_v28  ;;  %v6669_v41 = vpack.c.bf16 %v1866_v34, %v1864_v33  ;;  %v1872_v17 = vld [vmem:[%s7478_s22 + $0x32e0] sm:$0xff]  ;;  %v1879_v19 = vld [vmem:[%s7478_s22 + $0x3318] sm:$0xff]  ;;  %v862_v28 = vld [vmem:[%s7478_s22 + $0x1350] sm:$0xff] }
 0x289   : > { %6652 = vmatprep.subr.bf16.mxu0 %v6651_v44  ;;  %3347 = vmatprep.mubr.f32.mxu1 %v2392_v51  ;;  %v1868_v44 = vld [vmem:[%s7478_s22 + $0x32c0] sm:$0xff]  ;;  %v6671_v45 = vpack.c.bf16 %v1871_v40, %v1869_v39  ;;  %v851_v51 = vld [vmem:[%s7478_s22 + $0x12f8] sm:$0xff]  ;;  %v6679_v6 = vpack.c.bf16 %v1879_v19, %v1877_v61  ;;  %v6687_v33 = vpack.c.bf16 %v1887_v24, %v1885_v29  ;;  %v865_v34 = vld [vmem:[%s7478_s22 + $0x1368] sm:$0xff] }
 0x28a   : > { %4483 = vmatprep.mubr.f32.mxu0 %v2528_v11  ;;  %v5649_v11 = vpack.c.bf16 %v846_v2, %v844_v43  ;;  %v1884_v31 = vld [vmem:[%s7478_s22 + $0x3340] sm:$0xff]  ;;  %v1891_v39 = vld [vmem:[%s7478_s22 + $0x3378] sm:$0xff]  ;;  %v866_v43 = vld [vmem:[%s7478_s22 + $0x1370] sm:$0xff] }
 0x28b   : > { %5630 = vmatpush1.bf16.msra.mxu1 %v5629_v55  ;;  %v6673_v55 = vpack.c.bf16 %v1870_v48, %v1868_v44  ;;  %v1888_v2 = vld [vmem:[%s7478_s22 + $0x3360] sm:$0xff]  ;;  %v6691_v44 = vpack.c.bf16 %v1891_v39, %v1889_v38  ;;  %v869_v48 = vld [vmem:[%s7478_s22 + $0x1388] sm:$0xff]  ;;  %v1899_v61 = vld [vmem:[%s7478_s22 + $0x33b8] sm:$0xff] }
 0x28c   : > { %6654 = vmatpush1.bf16.msra.mxu0 %v6653_v56  ;;  %5632 = vmatprep.subr.bf16.mxu1 %v5631_v57  ;;  %v5651_v56 = vpack.c.bf16 %v851_v51, %v849_v49  ;;  %v848_v57 = vld [vmem:[%s7478_s22 + $0x12e0] sm:$0xff]  ;;  %v871_v49 = vld [vmem:[%s7478_s22 + $0x1398] sm:$0xff]  ;;  %v1893_v51 = vld [vmem:[%s7478_s22 + $0x3388] sm:$0xff] }
 0x28d   : > { %6656 = vmatprep.subr.bf16.mxu0 %v6655_v15  ;;  %v1874_v15 = vld [vmem:[%s7478_s22 + $0x32f0] sm:$0xff]  ;;  %v5653_v35 = vpack.c.bf16 %v850_v58, %v848_v57  ;;  %v1892_v58 = vld [vmem:[%s7478_s22 + $0x3380] sm:$0xff]  ;;  %v1907_v29 = vld [vmem:[%s7478_s22 + $0x33f8] sm:$0xff] }
 0x28e   : > { %v870_v57 = vld [vmem:[%s7478_s22 + $0x1390] sm:$0xff]  ;;  %v1911_v38 = vld [vmem:[%s7478_s22 + $0x3418] sm:$0xff]  ;;  %v8965_v39 = vld [vmem:[%s7496_s29 + $0x28] sm:$0xff] }
 0x28f   : > { %5634 = vmatpush1.bf16.msra.mxu1 %v5633_v30  ;;  %v6677_v30 = vpack.c.bf16 %v1874_v15, %v1872_v17  ;;  %v6695_v17 = vpack.c.bf16 %v1895_v53, %v1893_v51  ;;  %v873_v15 = vld [vmem:[%s7478_s22 + $0x13a8] sm:$0xff]  ;;  %v891_v51 = vld [vmem:[%s7478_s22 + $0x1438] sm:$0xff]  ;;  %v8978_v53 = vrot.slane %v8965_v39, %v7592_v12 }
 0x290   : > { %6658 = vmatpush1.bf16.msra.mxu0 %v6657_v62  ;;  %5636 = vmatprep.subr.bf16.mxu1 %v5635_v1  ;;  %v5655_v62 = vpack.c.bf16 %v855_v60, %v853_v47  ;;  %v852_v1 = vld [vmem:[%s7478_s22 + $0x1300] sm:$0xff]  ;;  %v875_v47 = vld [vmem:[%s7478_s22 + $0x13b8] sm:$0xff]  ;;  %v1897_v60 = vld [vmem:[%s7478_s22 + $0x33a8] sm:$0xff] }
 0x291   : > { %6660 = vmatprep.subr.bf16.mxu0 %v6659_v7  ;;  %v1878_v7 = vld [vmem:[%s7478_s22 + $0x3310] sm:$0xff]  ;;  %v5657_v13 = vpack.c.bf16 %v854_v3, %v852_v1  ;;  %v1896_v3 = vld [vmem:[%s7478_s22 + $0x33a0] sm:$0xff] }
 0x292   : > { %v874_v1 = vld [vmem:[%s7478_s22 + $0x13b0] sm:$0xff] }
 0x293   : > { %5638 = vmatpush1.bf16.msra.mxu1 %v5637_v14  ;;  %v6681_v14 = vpack.c.bf16 %v1878_v7, %v1876_v4  ;;  %v6699_v4 = vpack.c.bf16 %v1899_v61, %v1897_v60  ;;  %v877_v7 = vld [vmem:[%s7478_s22 + $0x13c8] sm:$0xff]  ;;  %v1914_v60 = vld [vmem:[%s7478_s22 + $0x3430] sm:$0xff] }
 0x294   : > { %6662 = vmatpush1.bf16.msra.mxu0 %v6661_v16  ;;  %5640 = vmatprep.subr.bf16.mxu1 %v5639_v18  ;;  %v5659_v16 = vpack.c.bf16 %v859_v52, %v857_v8  ;;  %v856_v18 = vld [vmem:[%s7478_s22 + $0x1320] sm:$0xff]  ;;  %v879_v8 = vld [vmem:[%s7478_s22 + $0x13d8] sm:$0xff]  ;;  %v1901_v52 = vld [vmem:[%s7478_s22 + $0x33c8] sm:$0xff] }
 0x295   : > { %6664 = vmatprep.subr.bf16.mxu0 %v6663_v22  ;;  %v1882_v22 = vld [vmem:[%s7478_s22 + $0x3330] sm:$0xff]  ;;  %v5661_v25 = vpack.c.bf16 %v858_v26, %v856_v18  ;;  %v1900_v26 = vld [vmem:[%s7478_s22 + $0x33c0] sm:$0xff]  ;;  %v893_v61 = vld [vmem:[%s7478_s22 + $0x1448] sm:$0xff] }
 0x296   : > { %v878_v18 = vld [vmem:[%s7478_s22 + $0x13d0] sm:$0xff] }
 0x297   : > { %5642 = vmatpush1.bf16.msra.mxu1 %v5641_v27  ;;  %v6685_v27 = vpack.c.bf16 %v1882_v22, %v1880_v20  ;;  %v6703_v20 = vpack.c.bf16 %v1903_v9, %v1901_v52  ;;  %v881_v22 = vld [vmem:[%s7478_s22 + $0x13e8] sm:$0xff]  ;;  %v1918_v9 = vld [vmem:[%s7478_s22 + $0x3450] sm:$0xff] }
 0x298   : > { %6666 = vmatpush1.bf16.msra.mxu0 %v6665_v50  ;;  %5644 = vmatprep.subr.bf16.mxu1 %v5643_v63  ;;  %v5663_v50 = vpack.c.bf16 %v863_v23, %v861_v46  ;;  %v860_v63 = vld [vmem:[%s7478_s22 + $0x1340] sm:$0xff]  ;;  %v883_v46 = vld [vmem:[%s7478_s22 + $0x13f8] sm:$0xff]  ;;  %v1905_v23 = vld [vmem:[%s7478_s22 + $0x33e8] sm:$0xff] }
 0x299   : > { %6668 = vmatprep.subr.bf16.mxu0 %v6667_v32  ;;  %v1886_v32 = vld [vmem:[%s7478_s22 + $0x3350] sm:$0xff]  ;;  %v5665_v40 = vpack.c.bf16 %v862_v28, %v860_v63  ;;  %v1904_v28 = vld [vmem:[%s7478_s22 + $0x33e0] sm:$0xff] }
 0x29a   : > { %v882_v63 = vld [vmem:[%s7478_s22 + $0x13f0] sm:$0xff] }
 0x29b   : > { %5646 = vmatpush1.bf16.msra.mxu1 %v5645_v0  ;;  %v6689_v0 = vpack.c.bf16 %v1886_v32, %v1884_v31  ;;  %v6707_v31 = vpack.c.bf16 %v1907_v29, %v1905_v23  ;;  %v885_v32 = vld [vmem:[%s7478_s22 + $0x1408] sm:$0xff]  ;;  %v1922_v23 = vld [vmem:[%s7478_s22 + $0x3470] sm:$0xff] }
 0x29c   : > { %6670 = vmatpush1.bf16.msra.mxu0 %v6669_v41  ;;  %5648 = vmatprep.subr.bf16.mxu1 %v5647_v42  ;;  %v5667_v41 = vpack.c.bf16 %v867_v36, %v865_v34  ;;  %v864_v42 = vld [vmem:[%s7478_s22 + $0x1360] sm:$0xff]  ;;  %v887_v34 = vld [vmem:[%s7478_s22 + $0x1418] sm:$0xff]  ;;  %v1909_v36 = vld [vmem:[%s7478_s22 + $0x3408] sm:$0xff] }
 0x29d   : > { %6672 = vmatprep.subr.bf16.mxu0 %v6671_v45  ;;  %v1890_v45 = vld [vmem:[%s7478_s22 + $0x3370] sm:$0xff]  ;;  %v5669_v54 = vpack.c.bf16 %v866_v43, %v864_v42  ;;  %v5687_v42 = vpack.c.bf16 %v887_v34, %v885_v32  ;;  %v884_v43 = vld [vmem:[%s7478_s22 + $0x1400] sm:$0xff]  ;;  %v901_v29 = vld [vmem:[%s7478_s22 + $0x1488] sm:$0xff] }
 0x29e   : > { %v1924_v32 = vld [vmem:[%s7478_s22 + $0x3480] sm:$0xff] }
 0x29f   : > { %5650 = vmatpush1.bf16.msra.mxu1 %v5649_v11  ;;  %v6693_v11 = vpack.c.bf16 %v1890_v45, %v1888_v2  ;;  %v886_v2 = vld [vmem:[%s7478_s22 + $0x1410] sm:$0xff]  ;;  %v6711_v45 = vpack.c.bf16 %v1911_v38, %v1909_v36  ;;  %v905_v38 = vld [vmem:[%s7478_s22 + $0x14a8] sm:$0xff] }
 0x2a0   : > { %6674 = vmatpush1.bf16.msra.mxu0 %v6673_v55  ;;  %5652 = vmatprep.subr.bf16.mxu1 %v5651_v56  ;;  %v5671_v55 = vpack.c.bf16 %v871_v49, %v869_v48  ;;  %v868_v56 = vld [vmem:[%s7478_s22 + $0x1380] sm:$0xff]  ;;  %v1910_v48 = vld [vmem:[%s7478_s22 + $0x3410] sm:$0xff]  ;;  %v889_v49 = vld [vmem:[%s7478_s22 + $0x1428] sm:$0xff] }
 0x2a1   : > { %6676 = vmatprep.subr.bf16.mxu0 %v6675_v59  ;;  %v1894_v59 = vld [vmem:[%s7478_s22 + $0x3390] sm:$0xff]  ;;  %v5673_v19 = vpack.c.bf16 %v870_v57, %v868_v56  ;;  %v5689_v56 = vpack.c.bf16 %v886_v2, %v884_v43 }
 0x2a2   : > { %v1926_v36 = vld [vmem:[%s7478_s22 + $0x3490] sm:$0xff] }
 0x2a3   : > { %5654 = vmatpush1.bf16.msra.mxu1 %v5653_v35  ;;  %v6697_v35 = vpack.c.bf16 %v1894_v59, %v1892_v58  ;;  %v5691_v58 = vpack.c.bf16 %v891_v51, %v889_v49  ;;  %v890_v59 = vld [vmem:[%s7478_s22 + $0x1430] sm:$0xff]  ;;  %v6729_v2 = vpack.c.bf16 %v1926_v36, %v1924_v32  ;;  %v1928_v49 = vld [vmem:[%s7478_s22 + $0x34a0] sm:$0xff] }
 0x2a4   : > { %6678 = vmatpush1.bf16.msra.mxu0 %v6677_v30  ;;  %5656 = vmatprep.subr.bf16.mxu1 %v5655_v62  ;;  %v5675_v30 = vpack.c.bf16 %v875_v47, %v873_v15  ;;  %v872_v62 = vld [vmem:[%s7478_s22 + $0x13a0] sm:$0xff]  ;;  %v922_v32 = vld [vmem:[%s7478_s22 + $0x1530] sm:$0xff] }
 0x2a5   : > { %6680 = vmatprep.subr.bf16.mxu0 %v6679_v6  ;;  %v1898_v6 = vld [vmem:[%s7478_s22 + $0x33b0] sm:$0xff]  ;;  %v5677_v10 = vpack.c.bf16 %v874_v1, %v872_v62  ;;  %v1912_v15 = vld [vmem:[%s7478_s22 + $0x3420] sm:$0xff]  ;;  %v1919_v62 = vld [vmem:[%s7478_s22 + $0x3458] sm:$0xff] }
 0x2a7   : > { %5658 = vmatpush1.bf16.msra.mxu1 %v5657_v13  ;;  %v6701_v13 = vpack.c.bf16 %v1898_v6, %v1896_v3 }
 0x2a8   : > { %6682 = vmatpush1.bf16.msra.mxu0 %v6681_v14  ;;  %5660 = vmatprep.subr.bf16.mxu1 %v5659_v16  ;;  %v5679_v14 = vpack.c.bf16 %v879_v8, %v877_v7  ;;  %v876_v16 = vld [vmem:[%s7478_s22 + $0x13c0] sm:$0xff] }
 0x2a9   : > { %6684 = vmatprep.subr.bf16.mxu0 %v6683_v21  ;;  %v1902_v21 = vld [vmem:[%s7478_s22 + $0x33d0] sm:$0xff]  ;;  %v5681_v24 = vpack.c.bf16 %v878_v18, %v876_v16  ;;  %v892_v7 = vld [vmem:[%s7478_s22 + $0x1440] sm:$0xff] }
 0x2aa   : > { %v1916_v8 = vld [vmem:[%s7478_s22 + $0x3440] sm:$0xff] }
 0x2ab   : > { %5662 = vmatpush1.bf16.msra.mxu1 %v5661_v25  ;;  %v6705_v25 = vpack.c.bf16 %v1902_v21, %v1900_v26  ;;  %v6721_v18 = vpack.c.bf16 %v1918_v9, %v1916_v8  ;;  %v898_v21 = vld [vmem:[%s7478_s22 + $0x1470] sm:$0xff] }
 0x2ac   : > { %6686 = vmatpush1.bf16.msra.mxu0 %v6685_v27  ;;  %5664 = vmatprep.subr.bf16.mxu1 %v5663_v50  ;;  %v5683_v27 = vpack.c.bf16 %v883_v46, %v881_v22  ;;  %v880_v50 = vld [vmem:[%s7478_s22 + $0x13e0] sm:$0xff]  ;;  %v914_v8 = vld [vmem:[%s7478_s22 + $0x14f0] sm:$0xff] }
 0x2ad   : > { %6688 = vmatprep.subr.bf16.mxu0 %v6687_v33  ;;  %v1906_v33 = vld [vmem:[%s7478_s22 + $0x33f0] sm:$0xff]  ;;  %v1920_v22 = vld [vmem:[%s7478_s22 + $0x3460] sm:$0xff] }
 0x2af   : > { %5666 = vmatpush1.bf16.msra.mxu1 %v5665_v40  ;;  %v5685_v40 = vpack.c.bf16 %v882_v63, %v880_v50  ;;  %v6725_v63 = vpack.c.bf16 %v1922_v23, %v1920_v22  ;;  %v918_v22 = vld [vmem:[%s7478_s22 + $0x1510] sm:$0xff] }
 0x2b0   : > { %6690 = vmatpush1.bf16.msra.mxu0 %v6689_v0  ;;  %5668 = vmatprep.subr.bf16.mxu1 %v5667_v41  ;;  %v8968_v0 = vld [vmem:[%s7496_s29 + $0x68] sm:$0xff]  ;;  %v6709_v41 = vpack.c.bf16 %v1906_v33, %v1904_v28  ;;  %v902_v33 = vld [vmem:[%s7478_s22 + $0x1490] sm:$0xff] }
 0x2b1   : > { %6692 = vmatprep.subr.bf16.mxu0 %v6691_v44  ;;  %v1908_v44 = vld [vmem:[%s7478_s22 + $0x3400] sm:$0xff] }
 0x2b2   : > { %v6713_v57 = vpack.c.bf16 %v1910_v48, %v1908_v44  ;;  %v906_v48 = vld [vmem:[%s7478_s22 + $0x14b0] sm:$0xff] }
 0x2b3   : > { %5670 = vmatpush1.bf16.msra.mxu1 %v5669_v54  ;;  %v1913_v54 = vld [vmem:[%s7478_s22 + $0x3428] sm:$0xff] }
 0x2b4   : > { %6694 = vmatpush1.bf16.msra.mxu0 %v6693_v11  ;;  %5672 = vmatprep.subr.bf16.mxu1 %v5671_v55  ;;  %v1915_v11 = vld [vmem:[%s7478_s22 + $0x3438] sm:$0xff]  ;;  %v8984_v55 = vrot.slane %v8968_v0, %v7592_v12 }
 0x2b5   : > { %6696 = vmatprep.subr.bf16.mxu0 %v6695_v17  ;;  %v888_v17 = vld [vmem:[%s7478_s22 + $0x1420] sm:$0xff]  ;;  %v6715_v47 = vpack.c.bf16 %v1915_v11, %v1913_v54  ;;  %v1930_v54 = vld [vmem:[%s7478_s22 + $0x34b0] sm:$0xff]  ;;  %v909_v11 = vld [vmem:[%s7478_s22 + $0x14c8] sm:$0xff] }
 0x2b6   : > { %v2544_v1 = vcombine.high %v8984_v55, %v8984_v55  ;;  %v5693_v3 = vpack.c.bf16 %v890_v59, %v888_v17  ;;  %v6733_v59 = vpack.c.bf16 %v1930_v54, %v1928_v49  ;;  %v926_v49 = vld [vmem:[%s7478_s22 + $0x1550] sm:$0xff] }
 0x2b7   : > { %5674 = vmatpush1.bf16.msra.mxu1 %v5673_v19  ;;  %v895_v19 = vld [vmem:[%s7478_s22 + $0x1458] sm:$0xff] }
 0x2b8   : > { %6698 = vmatpush1.bf16.msra.mxu0 %v6697_v35  ;;  %5676 = vmatprep.subr.bf16.mxu1 %v5675_v30  ;;  %v2408_v35 = vcombine.high %v8978_v53, %v8978_v53  ;;  %v1917_v30 = vld [vmem:[%s7478_s22 + $0x3448] sm:$0xff]  ;;  %v5695_v6 = vpack.c.bf16 %v895_v19, %v893_v61  ;;  %v1932_v61 = vld [vmem:[%s7478_s22 + $0x34c0] sm:$0xff] }
 0x2b9   : > { %6700 = vmatprep.subr.bf16.mxu0 %v6699_v4  ;;  %v6717_v4 = vpack.c.bf16 %v1914_v60, %v1912_v15  ;;  %v6719_v52 = vpack.c.bf16 %v1919_v62, %v1917_v30  ;;  %v910_v60 = vld [vmem:[%s7478_s22 + $0x14d0] sm:$0xff]  ;;  %v913_v30 = vld [vmem:[%s7478_s22 + $0x14e8] sm:$0xff]  ;;  %v915_v62 = vld [vmem:[%s7478_s22 + $0x14f8] sm:$0xff] }
 0x2bb   : > { %5678 = vmatpush1.bf16.msra.mxu1 %v5677_v10  ;;  %v897_v10 = vld [vmem:[%s7478_s22 + $0x1468] sm:$0xff] }
 0x2bc   : > { %6702 = vmatpush1.bf16.msra.mxu0 %v6701_v13  ;;  %5680 = vmatprep.subr.bf16.mxu1 %v5679_v14  ;;  %v899_v13 = vld [vmem:[%s7478_s22 + $0x1478] sm:$0xff] }
 0x2bd   : > { %6704 = vmatprep.subr.bf16.mxu0 %v6703_v20  ;;  %v1923_v14 = vld [vmem:[%s7478_s22 + $0x3478] sm:$0xff]  ;;  %v5699_v26 = vpack.c.bf16 %v899_v13, %v897_v10  ;;  %v896_v20 = vld [vmem:[%s7478_s22 + $0x1460] sm:$0xff]  ;;  %v1938_v10 = vld [vmem:[%s7478_s22 + $0x34f0] sm:$0xff] }
 0x2be   : > { %v5701_v50 = vpack.c.bf16 %v898_v21, %v896_v20  ;;  %v917_v13 = vld [vmem:[%s7478_s22 + $0x1508] sm:$0xff]  ;;  %v916_v21 = vld [vmem:[%s7478_s22 + $0x1500] sm:$0xff] }
 0x2bf   : > { %5682 = vmatpush1.bf16.msra.mxu1 %v5681_v24  ;;  %v903_v24 = vld [vmem:[%s7478_s22 + $0x1498] sm:$0xff] }
 0x2c0   : > { %6706 = vmatpush1.bf16.msra.mxu0 %v6705_v25  ;;  %5684 = vmatprep.subr.bf16.mxu1 %v5683_v27  ;;  %v1925_v25 = vld [vmem:[%s7478_s22 + $0x3488] sm:$0xff]  ;;  %v1927_v27 = vld [vmem:[%s7478_s22 + $0x3498] sm:$0xff]  ;;  %v5703_v28 = vpack.c.bf16 %v903_v24, %v901_v29  ;;  %v1942_v29 = vld [vmem:[%s7478_s22 + $0x3510] sm:$0xff] }
 0x2c1   : > { %6708 = vmatprep.subr.bf16.mxu0 %v6707_v31  ;;  %v900_v31 = vld [vmem:[%s7478_s22 + $0x1480] sm:$0xff]  ;;  %v6727_v34 = vpack.c.bf16 %v1927_v27, %v1925_v25  ;;  %v921_v24 = vld [vmem:[%s7478_s22 + $0x1528] sm:$0xff]  ;;  %v923_v25 = vld [vmem:[%s7478_s22 + $0x1538] sm:$0xff] }
 0x2c2   : > { %v5705_v43 = vpack.c.bf16 %v902_v33, %v900_v31  ;;  %v1945_v27 = vld [vmem:[%s7478_s22 + $0x3528] sm:$0xff]  ;;  %v5723_v31 = vpack.c.bf16 %v923_v25, %v921_v24  ;;  %v920_v33 = vld [vmem:[%s7478_s22 + $0x1520] sm:$0xff]  ;;  %v1962_v24 = vld [vmem:[%s7478_s22 + $0x35b0] sm:$0xff] }
 0x2c3   : > { %5686 = vmatpush1.bf16.msra.mxu1 %v5685_v40  ;;  %v907_v40 = vld [vmem:[%s7478_s22 + $0x14b8] sm:$0xff]  ;;  %v941_v25 = vld [vmem:[%s7478_s22 + $0x15c8] sm:$0xff] }
 0x2c4   : > { %6710 = vmatpush1.bf16.msra.mxu0 %v6709_v41  ;;  %5688 = vmatprep.subr.bf16.mxu1 %v5687_v42  ;;  %v1929_v41 = vld [vmem:[%s7478_s22 + $0x34a8] sm:$0xff]  ;;  %v1931_v42 = vld [vmem:[%s7478_s22 + $0x34b8] sm:$0xff]  ;;  %v5707_v44 = vpack.c.bf16 %v907_v40, %v905_v38  ;;  %v1946_v38 = vld [vmem:[%s7478_s22 + $0x3530] sm:$0xff] }
 0x2c5   : > { %6712 = vmatprep.subr.bf16.mxu0 %v6711_v45  ;;  %v904_v45 = vld [vmem:[%s7478_s22 + $0x14a0] sm:$0xff]  ;;  %v6731_v51 = vpack.c.bf16 %v1931_v42, %v1929_v41  ;;  %v925_v40 = vld [vmem:[%s7478_s22 + $0x1548] sm:$0xff]  ;;  %v927_v41 = vld [vmem:[%s7478_s22 + $0x1558] sm:$0xff] }
 0x2c6   : > { %3348 = vmatmul.mubr.f32.vlgmr.msra.gmra.mrb[0].mxu1 %v8831_v5  ;;  %v894_v5 = vld [vmem:[%s7478_s22 + $0x1450] sm:$0xff]  ;;  %v5709_v17 = vpack.c.bf16 %v906_v48, %v904_v45  ;;  %v1949_v42 = vld [vmem:[%s7478_s22 + $0x3548] sm:$0xff]  ;;  %v5727_v45 = vpack.c.bf16 %v927_v41, %v925_v40  ;;  %v924_v48 = vld [vmem:[%s7478_s22 + $0x1540] sm:$0xff] }
 0x2c7   : > { %5690 = vmatpush1.bf16.msra.mxu1 %v5689_v56  ;;  %4484 = vmatmul.mubr.f32.vlgmr.msra.gmra.mrb[0].mxu0 %v8836_v37  ;;  %v1921_v37 = vld [vmem:[%s7478_s22 + $0x3468] sm:$0xff]  ;;  %v5697_v16 = vpack.c.bf16 %v894_v5, %v892_v7  ;;  %v911_v56 = vld [vmem:[%s7478_s22 + $0x14d8] sm:$0xff]  ;;  %v5715_v7 = vpack.c.bf16 %v915_v62, %v913_v30  ;;  %v912_v5 = vld [vmem:[%s7478_s22 + $0x14e0] sm:$0xff] }
 0x2c8   : > { %6714 = vmatpush1.bf16.msra.mxu0 %v6713_v57  ;;  %5692 = vmatprep.subr.bf16.mxu1 %v5691_v58  ;;  %v6723_v46 = vpack.c.bf16 %v1923_v14, %v1921_v37  ;;  %v1933_v57 = vld [vmem:[%s7478_s22 + $0x34c8] sm:$0xff]  ;;  %v1935_v58 = vld [vmem:[%s7478_s22 + $0x34d8] sm:$0xff]  ;;  %v5711_v15 = vpack.c.bf16 %v911_v56, %v909_v11  ;;  %v1950_v11 = vld [vmem:[%s7478_s22 + $0x3550] sm:$0xff] }
 0x2c9   : > { %6716 = vmatprep.subr.bf16.mxu0 %v6715_v47  ;;  %3418 = vmatprep.mubr.f32.mxu1 %v2408_v35  ;;  %v908_v47 = vld [vmem:[%s7478_s22 + $0x14c0] sm:$0xff]  ;;  %v6735_v19 = vpack.c.bf16 %v1935_v58, %v1933_v57  ;;  %v1934_v35 = vld [vmem:[%s7478_s22 + $0x34d0] sm:$0xff]  ;;  %v919_v37 = vld [vmem:[%s7478_s22 + $0x1518] sm:$0xff] }
 0x2ca   : > { %4554 = vmatprep.mubr.f32.mxu0 %v2544_v1  ;;  %v1937_v1 = vld [vmem:[%s7478_s22 + $0x34e8] sm:$0xff]  ;;  %v5719_v20 = vpack.c.bf16 %v919_v37, %v917_v13  ;;  %v931_v57 = vld [vmem:[%s7478_s22 + $0x1578] sm:$0xff]  ;;  %v1954_v30 = vld [vmem:[%s7478_s22 + $0x3570] sm:$0xff] }
 0x2cb   : > { %5694 = vmatpush1.bf16.msra.mxu1 %v5693_v3  ;;  %v1939_v3 = vld [vmem:[%s7478_s22 + $0x34f8] sm:$0xff]  ;;  %v1941_v14 = vld [vmem:[%s7478_s22 + $0x3508] sm:$0xff]  ;;  %v1958_v13 = vld [vmem:[%s7478_s22 + $0x3590] sm:$0xff] }
 0x2cc   : > { %6718 = vmatpush1.bf16.msra.mxu0 %v6717_v4  ;;  %5696 = vmatprep.subr.bf16.mxu1 %v5695_v6  ;;  %v5713_v4 = vpack.c.bf16 %v910_v60, %v908_v47  ;;  %v6737_v6 = vpack.c.bf16 %v1934_v35, %v1932_v61  ;;  %v6739_v9 = vpack.c.bf16 %v1939_v3, %v1937_v1  ;;  %v929_v56 = vld [vmem:[%s7478_s22 + $0x1568] sm:$0xff]  ;;  %v928_v60 = vld [vmem:[%s7478_s22 + $0x1560] sm:$0xff]  ;;  %v930_v61 = vld [vmem:[%s7478_s22 + $0x1570] sm:$0xff] }
 0x2cd   : > { %6720 = vmatprep.subr.bf16.mxu0 %v6719_v52  ;;  %v1936_v52 = vld [vmem:[%s7478_s22 + $0x34e0] sm:$0xff]  ;;  %v1953_v58 = vld [vmem:[%s7478_s22 + $0x3568] sm:$0xff]  ;;  %v5731_v47 = vpack.c.bf16 %v931_v57, %v929_v56  ;;  %v935_v1 = vld [vmem:[%s7478_s22 + $0x1598] sm:$0xff] }
 0x2ce   : > { %v933_v62 = vld [vmem:[%s7478_s22 + $0x1588] sm:$0xff]  ;;  %v1966_v40 = vld [vmem:[%s7478_s22 + $0x35d0] sm:$0xff] }
 0x2cf   : > { %5698 = vmatpush1.bf16.msra.mxu1 %v5697_v16  ;;  %v1943_v16 = vld [vmem:[%s7478_s22 + $0x3518] sm:$0xff]  ;;  %v1957_v3 = vld [vmem:[%s7478_s22 + $0x3588] sm:$0xff]  ;;  %v1970_v56 = vld [vmem:[%s7478_s22 + $0x35f0] sm:$0xff] }
 0x2d0   : > { %6722 = vmatpush1.bf16.msra.mxu0 %v6721_v18  ;;  %5700 = vmatprep.subr.bf16.mxu1 %v5699_v26  ;;  %v5717_v18 = vpack.c.bf16 %v914_v8, %v912_v5  ;;  %v6741_v26 = vpack.c.bf16 %v1938_v10, %v1936_v52  ;;  %v6743_v23 = vpack.c.bf16 %v1943_v16, %v1941_v14  ;;  %v932_v8 = vld [vmem:[%s7478_s22 + $0x1580] sm:$0xff]  ;;  %v934_v52 = vld [vmem:[%s7478_s22 + $0x1590] sm:$0xff]  ;;  %v937_v37 = vld [vmem:[%s7478_s22 + $0x15a8] sm:$0xff] }
 0x2d1   : > { %6724 = vmatprep.subr.bf16.mxu0 %v6723_v46  ;;  %v1940_v46 = vld [vmem:[%s7478_s22 + $0x3500] sm:$0xff]  ;;  %v5735_v5 = vpack.c.bf16 %v935_v1, %v933_v62  ;;  %v939_v14 = vld [vmem:[%s7478_s22 + $0x15b8] sm:$0xff]  ;;  %v1961_v16 = vld [vmem:[%s7478_s22 + $0x35a8] sm:$0xff] }
 0x2d2   : > { %v945_v41 = vld [vmem:[%s7478_s22 + $0x15e8] sm:$0xff]  ;;  %v1972_v62 = vld [vmem:[%s7478_s22 + $0x3600] sm:$0xff]  ;;  %v1974_v1 = vld [vmem:[%s7478_s22 + $0x3610] sm:$0xff] }
 0x2d3   : > { %5702 = vmatpush1.bf16.msra.mxu1 %v5701_v50  ;;  %v1947_v50 = vld [vmem:[%s7478_s22 + $0x3538] sm:$0xff]  ;;  %v949_v57 = vld [vmem:[%s7478_s22 + $0x1608] sm:$0xff] }
 0x2d4   : > { %6726 = vmatpush1.bf16.msra.mxu0 %v6725_v63  ;;  %5704 = vmatprep.subr.bf16.mxu1 %v5703_v28  ;;  %v5721_v63 = vpack.c.bf16 %v918_v22, %v916_v21  ;;  %v6745_v28 = vpack.c.bf16 %v1942_v29, %v1940_v46  ;;  %v6747_v36 = vpack.c.bf16 %v1947_v50, %v1945_v27  ;;  %v936_v22 = vld [vmem:[%s7478_s22 + $0x15a0] sm:$0xff]  ;;  %v938_v46 = vld [vmem:[%s7478_s22 + $0x15b0] sm:$0xff]  ;;  %v943_v27 = vld [vmem:[%s7478_s22 + $0x15d8] sm:$0xff] }
 0x2d5   : > { %6728 = vmatprep.subr.bf16.mxu0 %v6727_v34  ;;  %v1944_v34 = vld [vmem:[%s7478_s22 + $0x3520] sm:$0xff]  ;;  %v5739_v21 = vpack.c.bf16 %v939_v14, %v937_v37  ;;  %v1965_v50 = vld [vmem:[%s7478_s22 + $0x35c8] sm:$0xff] }
 0x2d6   : > { %v1976_v37 = vld [vmem:[%s7478_s22 + $0x3620] sm:$0xff] }
 0x2d7   : > { %5706 = vmatpush1.bf16.msra.mxu1 %v5705_v43  ;;  %v1951_v43 = vld [vmem:[%s7478_s22 + $0x3558] sm:$0xff] }
 0x2d8   : > { %6730 = vmatpush1.bf16.msra.mxu0 %v6729_v2  ;;  %5708 = vmatprep.subr.bf16.mxu1 %v5707_v44  ;;  %v5725_v2 = vpack.c.bf16 %v922_v32, %v920_v33  ;;  %v6749_v44 = vpack.c.bf16 %v1946_v38, %v1944_v34  ;;  %v6751_v54 = vpack.c.bf16 %v1951_v43, %v1949_v42  ;;  %v940_v32 = vld [vmem:[%s7478_s22 + $0x15c0] sm:$0xff]  ;;  %v942_v34 = vld [vmem:[%s7478_s22 + $0x15d0] sm:$0xff]  ;;  %v947_v42 = vld [vmem:[%s7478_s22 + $0x15f8] sm:$0xff] }
 0x2d9   : > { %6732 = vmatprep.subr.bf16.mxu0 %v6731_v51  ;;  %v1948_v51 = vld [vmem:[%s7478_s22 + $0x3540] sm:$0xff]  ;;  %v5743_v33 = vpack.c.bf16 %v943_v27, %v941_v25  ;;  %v1969_v43 = vld [vmem:[%s7478_s22 + $0x35e8] sm:$0xff] }
 0x2da   : > { %v956_v25 = vld [vmem:[%s7478_s22 + $0x1640] sm:$0xff] }
 0x2db   : > { %5710 = vmatpush1.bf16.msra.mxu1 %v5709_v17  ;;  %v1955_v17 = vld [vmem:[%s7478_s22 + $0x3578] sm:$0xff]  ;;  %v1980_v27 = vld [vmem:[%s7478_s22 + $0x3640] sm:$0xff] }
 0x2dc   : > { %6734 = vmatpush1.bf16.msra.mxu0 %v6733_v59  ;;  %5712 = vmatprep.subr.bf16.mxu1 %v5711_v15  ;;  %v5729_v59 = vpack.c.bf16 %v926_v49, %v924_v48  ;;  %v6753_v15 = vpack.c.bf16 %v1950_v11, %v1948_v51  ;;  %v6755_v35 = vpack.c.bf16 %v1955_v17, %v1953_v58  ;;  %v944_v49 = vld [vmem:[%s7478_s22 + $0x15e0] sm:$0xff]  ;;  %v946_v51 = vld [vmem:[%s7478_s22 + $0x15f0] sm:$0xff]  ;;  %v951_v58 = vld [vmem:[%s7478_s22 + $0x1618] sm:$0xff] }
 0x2dd   : > { %6736 = vmatprep.subr.bf16.mxu0 %v6735_v19  ;;  %v1952_v19 = vld [vmem:[%s7478_s22 + $0x3560] sm:$0xff]  ;;  %v5747_v48 = vpack.c.bf16 %v947_v42, %v945_v41  ;;  %v2393_v17 = vcombine.high %v8965_v39, %v8965_v39 }
 0x2de   : > { %v1984_v41 = vld [vmem:[%s7478_s22 + $0x3660] sm:$0xff] }
 0x2df   : > { %5714 = vmatpush1.bf16.msra.mxu1 %v5713_v4  ;;  %v1959_v4 = vld [vmem:[%s7478_s22 + $0x3598] sm:$0xff] }
 0x2e0   : > { %6738 = vmatpush1.bf16.msra.mxu0 %v6737_v6  ;;  %5716 = vmatprep.subr.bf16.mxu1 %v5715_v7  ;;  %v5733_v6 = vpack.c.bf16 %v930_v61, %v928_v60  ;;  %v6757_v7 = vpack.c.bf16 %v1954_v30, %v1952_v19  ;;  %v6759_v10 = vpack.c.bf16 %v1959_v4, %v1957_v3  ;;  %v950_v30 = vld [vmem:[%s7478_s22 + $0x1610] sm:$0xff]  ;;  %v953_v3 = vld [vmem:[%s7478_s22 + $0x1628] sm:$0xff]  ;;  %v955_v4 = vld [vmem:[%s7478_s22 + $0x1638] sm:$0xff] }
 0x2e1   : > { %6740 = vmatprep.subr.bf16.mxu0 %v6739_v9  ;;  %v1956_v9 = vld [vmem:[%s7478_s22 + $0x3580] sm:$0xff]  ;;  %v5749_v60 = vpack.c.bf16 %v946_v51, %v944_v49  ;;  %v5751_v19 = vpack.c.bf16 %v951_v58, %v949_v57 }
 0x2e2   : > { %v1988_v57 = vld [vmem:[%s7478_s22 + $0x3680] sm:$0xff] }
 0x2e3   : > { %5718 = vmatpush1.bf16.msra.mxu1 %v5717_v18  ;;  %v1963_v18 = vld [vmem:[%s7478_s22 + $0x35b8] sm:$0xff] }
 0x2e4   : > { %6742 = vmatpush1.bf16.msra.mxu0 %v6741_v26  ;;  %5720 = vmatprep.subr.bf16.mxu1 %v5719_v20  ;;  %v5737_v26 = vpack.c.bf16 %v934_v52, %v932_v8  ;;  %v6761_v20 = vpack.c.bf16 %v1958_v13, %v1956_v9  ;;  %v6763_v29 = vpack.c.bf16 %v1963_v18, %v1961_v16  ;;  %v954_v13 = vld [vmem:[%s7478_s22 + $0x1630] sm:$0xff]  ;;  %v957_v18 = vld [vmem:[%s7478_s22 + $0x1648] sm:$0xff] }
 0x2e5   : > { %6744 = vmatprep.subr.bf16.mxu0 %v6743_v23  ;;  %v1960_v23 = vld [vmem:[%s7478_s22 + $0x35a0] sm:$0xff]  ;;  %v6777_v52 = vpack.c.bf16 %v1974_v1, %v1972_v62  ;;  %v5755_v9 = vpack.c.bf16 %v955_v4, %v953_v3  ;;  %v1978_v16 = vld [vmem:[%s7478_s22 + $0x3630] sm:$0xff]  ;;  %v973_v4 = vld [vmem:[%s7478_s22 + $0x16c8] sm:$0xff] }
 0x2e6   : > { %v970_v62 = vld [vmem:[%s7478_s22 + $0x16b0] sm:$0xff] }
 0x2e7   : > { %5722 = vmatpush1.bf16.msra.mxu1 %v5721_v63  ;;  %v1967_v63 = vld [vmem:[%s7478_s22 + $0x35d8] sm:$0xff]  ;;  %v1994_v3 = vld [vmem:[%s7478_s22 + $0x36b0] sm:$0xff] }
 0x2e8   : > { %6746 = vmatpush1.bf16.msra.mxu0 %v6745_v28  ;;  %5724 = vmatprep.subr.bf16.mxu1 %v5723_v31  ;;  %v5741_v28 = vpack.c.bf16 %v938_v46, %v936_v22  ;;  %v6765_v31 = vpack.c.bf16 %v1962_v24, %v1960_v23  ;;  %v6767_v38 = vpack.c.bf16 %v1967_v63, %v1965_v50  ;;  %v1983_v22 = vld [vmem:[%s7478_s22 + $0x3658] sm:$0xff]  ;;  %v1982_v63 = vld [vmem:[%s7478_s22 + $0x3650] sm:$0xff] }
 0x2e9   : > { %6748 = vmatprep.subr.bf16.mxu0 %v6747_v36  ;;  %v1964_v36 = vld [vmem:[%s7478_s22 + $0x35c0] sm:$0xff] }
 0x2eb   : > { %5726 = vmatpush1.bf16.msra.mxu1 %v5725_v2  ;;  %v1971_v2 = vld [vmem:[%s7478_s22 + $0x35f8] sm:$0xff] }
 0x2ec   : > { %6750 = vmatpush1.bf16.msra.mxu0 %v6749_v44  ;;  %5728 = vmatprep.subr.bf16.mxu1 %v5727_v45  ;;  %v5745_v44 = vpack.c.bf16 %v942_v34, %v940_v32  ;;  %v6769_v45 = vpack.c.bf16 %v1966_v40, %v1964_v36  ;;  %v6771_v11 = vpack.c.bf16 %v1971_v2, %v1969_v43  ;;  %v962_v40 = vld [vmem:[%s7478_s22 + $0x1670] sm:$0xff]  ;;  %v965_v2 = vld [vmem:[%s7478_s22 + $0x1688] sm:$0xff] }
 0x2ed   : > { %6752 = vmatprep.subr.bf16.mxu0 %v6751_v54  ;;  %v1968_v54 = vld [vmem:[%s7478_s22 + $0x35e0] sm:$0xff]  ;;  %v6785_v34 = vpack.c.bf16 %v1982_v63, %v1980_v27  ;;  %v1986_v43 = vld [vmem:[%s7478_s22 + $0x3670] sm:$0xff]  ;;  %v981_v63 = vld [vmem:[%s7478_s22 + $0x1708] sm:$0xff] }
 0x2ee   : > { %v6773_v61 = vpack.c.bf16 %v1970_v56, %v1968_v54  ;;  %v6789_v51 = vpack.c.bf16 %v1986_v43, %v1984_v41  ;;  %v966_v56 = vld [vmem:[%s7478_s22 + $0x1690] sm:$0xff]  ;;  %v985_v43 = vld [vmem:[%s7478_s22 + $0x1728] sm:$0xff] }
 0x2ef   : > { %5730 = vmatpush1.bf16.msra.mxu1 %v5729_v59  ;;  %v1973_v59 = vld [vmem:[%s7478_s22 + $0x3608] sm:$0xff] }
 0x2f0   : > { %6754 = vmatpush1.bf16.msra.mxu0 %v6753_v15  ;;  %5732 = vmatprep.subr.bf16.mxu1 %v5731_v47  ;;  %v1975_v15 = vld [vmem:[%s7478_s22 + $0x3618] sm:$0xff]  ;;  %v2529_v47 = vcombine.high %v8968_v0, %v8968_v0  ;;  %v9123_v0 = vrot.slane %v2393_v17, %v7592_v12  ;;  %v1990_v17 = vld [vmem:[%s7478_s22 + $0x3690] sm:$0xff] }
 0x2f1   : > { %6756 = vmatprep.subr.bf16.mxu0 %v6755_v35  ;;  %v948_v35 = vld [vmem:[%s7478_s22 + $0x1600] sm:$0xff]  ;;  %v6775_v39 = vpack.c.bf16 %v1975_v15, %v1973_v59  ;;  %v969_v59 = vld [vmem:[%s7478_s22 + $0x16a8] sm:$0xff]  ;;  %v971_v15 = vld [vmem:[%s7478_s22 + $0x16b8] sm:$0xff] }
 0x2f2   : > { %v5753_v8 = vpack.c.bf16 %v950_v30, %v948_v35  ;;  %v5771_v35 = vpack.c.bf16 %v971_v15, %v969_v59  ;;  %v968_v30 = vld [vmem:[%s7478_s22 + $0x16a0] sm:$0xff]  ;;  %v991_v59 = vld [vmem:[%s7478_s22 + $0x1758] sm:$0xff]  ;;  %v2013_v15 = vld [vmem:[%s7478_s22 + $0x3748] sm:$0xff] }
 0x2f3   : > { %5734 = vmatpush1.bf16.msra.mxu1 %v5733_v6  ;;  %v1977_v6 = vld [vmem:[%s7478_s22 + $0x3628] sm:$0xff] }
 0x2f4   : > { %6758 = vmatpush1.bf16.msra.mxu0 %v6757_v7  ;;  %5736 = vmatprep.subr.bf16.mxu1 %v5735_v5  ;;  %v1979_v7 = vld [vmem:[%s7478_s22 + $0x3638] sm:$0xff]  ;;  %v9128_v5 = vrot.slane %v2529_v47, %v7592_v12  ;;  %v1993_v47 = vld [vmem:[%s7478_s22 + $0x36a8] sm:$0xff] }
 0x2f5   : > { %6760 = vmatprep.subr.bf16.mxu0 %v6759_v10  ;;  %v952_v10 = vld [vmem:[%s7478_s22 + $0x1620] sm:$0xff]  ;;  %v6779_v14 = vpack.c.bf16 %v1979_v7, %v1977_v6  ;;  %v975_v6 = vld [vmem:[%s7478_s22 + $0x16d8] sm:$0xff]  ;;  %v1997_v7 = vld [vmem:[%s7478_s22 + $0x36c8] sm:$0xff] }
 0x2f6   : > { %v2545_v46 = vcombine.high %v9128_v5, %v9128_v5  ;;  %v5757_v23 = vpack.c.bf16 %v954_v13, %v952_v10  ;;  %v5775_v10 = vpack.c.bf16 %v975_v6, %v973_v4  ;;  %v972_v13 = vld [vmem:[%s7478_s22 + $0x16c0] sm:$0xff]  ;;  %v995_v4 = vld [vmem:[%s7478_s22 + $0x1778] sm:$0xff]  ;;  %v2017_v6 = vld [vmem:[%s7478_s22 + $0x3768] sm:$0xff] }
 0x2f7   : > { %5738 = vmatpush1.bf16.msra.mxu1 %v5737_v26  ;;  %v959_v26 = vld [vmem:[%s7478_s22 + $0x1658] sm:$0xff] }
 0x2f8   : > { %6762 = vmatpush1.bf16.msra.mxu0 %v6761_v20  ;;  %5740 = vmatprep.subr.bf16.mxu1 %v5739_v21  ;;  %v2409_v20 = vcombine.high %v9123_v0, %v9123_v0  ;;  %v1981_v21 = vld [vmem:[%s7478_s22 + $0x3648] sm:$0xff]  ;;  %v5759_v24 = vpack.c.bf16 %v959_v26, %v957_v18  ;;  %v1998_v18 = vld [vmem:[%s7478_s22 + $0x36d0] sm:$0xff] }
 0x2f9   : > { %6764 = vmatprep.subr.bf16.mxu0 %v6763_v29  ;;  %v6781_v29 = vpack.c.bf16 %v1978_v16, %v1976_v37  ;;  %v6783_v50 = vpack.c.bf16 %v1983_v22, %v1981_v21  ;;  %v974_v37 = vld [vmem:[%s7478_s22 + $0x16d0] sm:$0xff]  ;;  %v977_v26 = vld [vmem:[%s7478_s22 + $0x16e8] sm:$0xff]  ;;  %v2003_v22 = vld [vmem:[%s7478_s22 + $0x36f8] sm:$0xff] }
 0x2fa   : > { %v2001_v21 = vld [vmem:[%s7478_s22 + $0x36e8] sm:$0xff] }
 0x2fb   : > { %5742 = vmatpush1.bf16.msra.mxu1 %v5741_v28  ;;  %v961_v28 = vld [vmem:[%s7478_s22 + $0x1668] sm:$0xff]  ;;  %v6803_v27 = vpack.c.bf16 %v2003_v22, %v2001_v21  ;;  %v2023_v21 = vld [vmem:[%s7478_s22 + $0x3798] sm:$0xff] }
 0x2fc   : > { %6766 = vmatpush1.bf16.msra.mxu0 %v6765_v31  ;;  %5744 = vmatprep.subr.bf16.mxu1 %v5743_v33  ;;  %v963_v31 = vld [vmem:[%s7478_s22 + $0x1678] sm:$0xff] }
 0x2fd   : > { %6768 = vmatprep.subr.bf16.mxu0 %v6767_v38  ;;  %v1987_v33 = vld [vmem:[%s7478_s22 + $0x3678] sm:$0xff]  ;;  %v5763_v36 = vpack.c.bf16 %v963_v31, %v961_v28  ;;  %v960_v38 = vld [vmem:[%s7478_s22 + $0x1660] sm:$0xff]  ;;  %v2005_v31 = vld [vmem:[%s7478_s22 + $0x3708] sm:$0xff] }
 0x2fe   : > { %v5765_v49 = vpack.c.bf16 %v962_v40, %v960_v38  ;;  %v983_v28 = vld [vmem:[%s7478_s22 + $0x1718] sm:$0xff]  ;;  %v982_v38 = vld [vmem:[%s7478_s22 + $0x1710] sm:$0xff]  ;;  %v2004_v40 = vld [vmem:[%s7478_s22 + $0x3700] sm:$0xff] }
 0x2ff   : > { %5746 = vmatpush1.bf16.msra.mxu1 %v5745_v44  ;;  %v967_v44 = vld [vmem:[%s7478_s22 + $0x1698] sm:$0xff] }
 0x300   : > { %6770 = vmatpush1.bf16.msra.mxu0 %v6769_v45  ;;  %5748 = vmatprep.subr.bf16.mxu1 %v5747_v48  ;;  %v1989_v45 = vld [vmem:[%s7478_s22 + $0x3688] sm:$0xff]  ;;  %v1991_v48 = vld [vmem:[%s7478_s22 + $0x3698] sm:$0xff]  ;;  %v5767_v54 = vpack.c.bf16 %v967_v44, %v965_v2 }
 0x301   : > { %6772 = vmatprep.subr.bf16.mxu0 %v6771_v11  ;;  %v964_v11 = vld [vmem:[%s7478_s22 + $0x1680] sm:$0xff]  ;;  %v6791_v58 = vpack.c.bf16 %v1991_v48, %v1989_v45  ;;  %v987_v2 = vld [vmem:[%s7478_s22 + $0x1738] sm:$0xff]  ;;  %v2009_v44 = vld [vmem:[%s7478_s22 + $0x3728] sm:$0xff] }
 0x302   : > { %v2011_v45 = vld [vmem:[%s7478_s22 + $0x3738] sm:$0xff] }
 0x303   : > { %5750 = vmatpush1.bf16.msra.mxu1 %v5749_v60  ;;  %v1995_v60 = vld [vmem:[%s7478_s22 + $0x36b8] sm:$0xff] }
 0x304   : > { %6774 = vmatpush1.bf16.msra.mxu0 %v6773_v61  ;;  %5752 = vmatprep.subr.bf16.mxu1 %v5751_v19  ;;  %v5769_v61 = vpack.c.bf16 %v966_v56, %v964_v11  ;;  %v6793_v19 = vpack.c.bf16 %v1990_v17, %v1988_v57  ;;  %v6795_v1 = vpack.c.bf16 %v1995_v60, %v1993_v47  ;;  %v986_v11 = vld [vmem:[%s7478_s22 + $0x1730] sm:$0xff]  ;;  %v2008_v56 = vld [vmem:[%s7478_s22 + $0x3720] sm:$0xff]  ;;  %v989_v17 = vld [vmem:[%s7478_s22 + $0x1748] sm:$0xff] }
 0x305   : > { %6776 = vmatprep.subr.bf16.mxu0 %v6775_v39  ;;  %v1992_v39 = vld [vmem:[%s7478_s22 + $0x36a0] sm:$0xff]  ;;  %v6811_v57 = vpack.c.bf16 %v2011_v45, %v2009_v44  ;;  %v2015_v47 = vld [vmem:[%s7478_s22 + $0x3758] sm:$0xff] }
 0x306   : > { %3419 = vmatmul.mubr.f32.vlgmr.msra.gmra.mrb[0].mxu1 %v8978_v53  ;;  %v958_v53 = vld [vmem:[%s7478_s22 + $0x1650] sm:$0xff]  ;;  %v2031_v44 = vld [vmem:[%s7478_s22 + $0x37d8] sm:$0xff] }
 0x307   : > { %5754 = vmatpush1.bf16.msra.mxu1 %v5753_v8  ;;  %4555 = vmatmul.mubr.f32.vlgmr.msra.gmra.mrb[0].mxu0 %v8984_v55  ;;  %v1985_v55 = vld [vmem:[%s7478_s22 + $0x3668] sm:$0xff]  ;;  %v5761_v32 = vpack.c.bf16 %v958_v53, %v956_v25  ;;  %v1999_v8 = vld [vmem:[%s7478_s22 + $0x36d8] sm:$0xff]  ;;  %v978_v25 = vld [vmem:[%s7478_s22 + $0x16f0] sm:$0xff] }
 0x308   : > { %6778 = vmatpush1.bf16.msra.mxu0 %v6777_v52  ;;  %5756 = vmatprep.subr.bf16.mxu1 %v5755_v9  ;;  %v6787_v42 = vpack.c.bf16 %v1987_v33, %v1985_v55  ;;  %v5773_v52 = vpack.c.bf16 %v970_v62, %v968_v30  ;;  %v6797_v9 = vpack.c.bf16 %v1994_v3, %v1992_v39  ;;  %v2000_v53 = vld [vmem:[%s7478_s22 + $0x36e0] sm:$0xff]  ;;  %v2007_v55 = vld [vmem:[%s7478_s22 + $0x3718] sm:$0xff]  ;;  %v990_v30 = vld [vmem:[%s7478_s22 + $0x1750] sm:$0xff] }
 0x309   : > { %6780 = vmatprep.subr.bf16.mxu0 %v6779_v14  ;;  %3489 = vmatprep.mubr.f32.mxu1 %v2409_v20  ;;  %v1996_v14 = vld [vmem:[%s7478_s22 + $0x36c0] sm:$0xff]  ;;  %v6799_v16 = vpack.c.bf16 %v1999_v8, %v1997_v7  ;;  %v979_v20 = vld [vmem:[%s7478_s22 + $0x16f8] sm:$0xff]  ;;  %v6807_v41 = vpack.c.bf16 %v2007_v55, %v2005_v31  ;;  %v6815_v39 = vpack.c.bf16 %v2015_v47, %v2013_v15  ;;  %v993_v3 = vld [vmem:[%s7478_s22 + $0x1768] sm:$0xff] }
 0x30a   : > { %4625 = vmatprep.mubr.f32.mxu0 %v2545_v46  ;;  %v5777_v46 = vpack.c.bf16 %v974_v37, %v972_v13  ;;  %v2012_v62 = vld [vmem:[%s7478_s22 + $0x3740] sm:$0xff]  ;;  %v2019_v7 = vld [vmem:[%s7478_s22 + $0x3778] sm:$0xff]  ;;  %v994_v13 = vld [vmem:[%s7478_s22 + $0x1770] sm:$0xff] }
 0x30b   : > { %5758 = vmatpush1.bf16.msra.mxu1 %v5757_v23  ;;  %v6801_v23 = vpack.c.bf16 %v1998_v18, %v1996_v14  ;;  %v2016_v37 = vld [vmem:[%s7478_s22 + $0x3760] sm:$0xff]  ;;  %v6819_v14 = vpack.c.bf16 %v2019_v7, %v2017_v6  ;;  %v997_v18 = vld [vmem:[%s7478_s22 + $0x1788] sm:$0xff]  ;;  %v2027_v31 = vld [vmem:[%s7478_s22 + $0x37b8] sm:$0xff] }
 0x30c   : > { %6782 = vmatpush1.bf16.msra.mxu0 %v6781_v29  ;;  %5760 = vmatprep.subr.bf16.mxu1 %v5759_v24  ;;  %v5779_v29 = vpack.c.bf16 %v979_v20, %v977_v26  ;;  %v976_v24 = vld [vmem:[%s7478_s22 + $0x16e0] sm:$0xff]  ;;  %v999_v26 = vld [vmem:[%s7478_s22 + $0x1798] sm:$0xff]  ;;  %v2021_v20 = vld [vmem:[%s7478_s22 + $0x3788] sm:$0xff] }
 0x30d   : > { %6784 = vmatprep.subr.bf16.mxu0 %v6783_v50  ;;  %v2002_v50 = vld [vmem:[%s7478_s22 + $0x36f0] sm:$0xff]  ;;  %v5781_v33 = vpack.c.bf16 %v978_v25, %v976_v24  ;;  %v2020_v25 = vld [vmem:[%s7478_s22 + $0x3780] sm:$0xff]  ;;  %v2035_v15 = vld [vmem:[%s7478_s22 + $0x37f8] sm:$0xff] }
 0x30e   : > { %v998_v24 = vld [vmem:[%s7478_s22 + $0x1790] sm:$0xff]  ;;  %v2039_v6 = vld [vmem:[%s7478_s22 + $0x3818] sm:$0xff] }
 0x30f   : > { %5762 = vmatpush1.bf16.msra.mxu1 %v5761_v32  ;;  %v6805_v32 = vpack.c.bf16 %v2002_v50, %v2000_v53  ;;  %v6823_v53 = vpack.c.bf16 %v2023_v21, %v2021_v20  ;;  %v1001_v50 = vld [vmem:[%s7478_s22 + $0x17a8] sm:$0xff]  ;;  %v9257_v7 = vld [vmem:[%s7496_s29 + $0x30] sm:$0xff]  ;;  %v1019_v20 = vld [vmem:[%s7478_s22 + $0x1838] sm:$0xff] }
 0x310   : > { %6786 = vmatpush1.bf16.msra.mxu0 %v6785_v34  ;;  %5764 = vmatprep.subr.bf16.mxu1 %v5763_v36  ;;  %v5783_v34 = vpack.c.bf16 %v983_v28, %v981_v63  ;;  %v980_v36 = vld [vmem:[%s7478_s22 + $0x1700] sm:$0xff]  ;;  %v1003_v63 = vld [vmem:[%s7478_s22 + $0x17b8] sm:$0xff]  ;;  %v2025_v28 = vld [vmem:[%s7478_s22 + $0x37a8] sm:$0xff]  ;;  %v9270_v21 = vrot.slane %v9257_v7, %v7592_v12 }
 0x311   : > { %6788 = vmatprep.subr.bf16.mxu0 %v6787_v42  ;;  %v2006_v42 = vld [vmem:[%s7478_s22 + $0x3710] sm:$0xff]  ;;  %v5785_v48 = vpack.c.bf16 %v982_v38, %v980_v36  ;;  %v2024_v38 = vld [vmem:[%s7478_s22 + $0x37a0] sm:$0xff] }
 0x312   : > { %v1002_v36 = vld [vmem:[%s7478_s22 + $0x17b0] sm:$0xff] }
 0x313   : > { %5766 = vmatpush1.bf16.msra.mxu1 %v5765_v49  ;;  %v6809_v49 = vpack.c.bf16 %v2006_v42, %v2004_v40  ;;  %v6827_v40 = vpack.c.bf16 %v2027_v31, %v2025_v28  ;;  %v1005_v42 = vld [vmem:[%s7478_s22 + $0x17c8] sm:$0xff]  ;;  %v2042_v28 = vld [vmem:[%s7478_s22 + $0x3830] sm:$0xff] }
 0x314   : > { %6790 = vmatpush1.bf16.msra.mxu0 %v6789_v51  ;;  %5768 = vmatprep.subr.bf16.mxu1 %v5767_v54  ;;  %v5787_v51 = vpack.c.bf16 %v987_v2, %v985_v43  ;;  %v984_v54 = vld [vmem:[%s7478_s22 + $0x1720] sm:$0xff]  ;;  %v1007_v43 = vld [vmem:[%s7478_s22 + $0x17d8] sm:$0xff]  ;;  %v2029_v2 = vld [vmem:[%s7478_s22 + $0x37c8] sm:$0xff] }
 0x315   : > { %6792 = vmatprep.subr.bf16.mxu0 %v6791_v58  ;;  %v2010_v58 = vld [vmem:[%s7478_s22 + $0x3730] sm:$0xff]  ;;  %v5789_v60 = vpack.c.bf16 %v986_v11, %v984_v54  ;;  %v2028_v11 = vld [vmem:[%s7478_s22 + $0x37c0] sm:$0xff]  ;;  %v1021_v31 = vld [vmem:[%s7478_s22 + $0x1848] sm:$0xff] }
 0x316   : > { %v1006_v54 = vld [vmem:[%s7478_s22 + $0x17d0] sm:$0xff] }
 0x317   : > { %5770 = vmatpush1.bf16.msra.mxu1 %v5769_v61  ;;  %v6813_v61 = vpack.c.bf16 %v2010_v58, %v2008_v56  ;;  %v6831_v56 = vpack.c.bf16 %v2031_v44, %v2029_v2  ;;  %v1009_v58 = vld [vmem:[%s7478_s22 + $0x17e8] sm:$0xff]  ;;  %v2046_v44 = vld [vmem:[%s7478_s22 + $0x3850] sm:$0xff] }
 0x318   : > { %6794 = vmatpush1.bf16.msra.mxu0 %v6793_v19  ;;  %5772 = vmatprep.subr.bf16.mxu1 %v5771_v35  ;;  %v5791_v19 = vpack.c.bf16 %v991_v59, %v989_v17  ;;  %v988_v35 = vld [vmem:[%s7478_s22 + $0x1740] sm:$0xff]  ;;  %v1011_v17 = vld [vmem:[%s7478_s22 + $0x17f8] sm:$0xff]  ;;  %v2033_v59 = vld [vmem:[%s7478_s22 + $0x37e8] sm:$0xff] }
 0x319   : > { %6796 = vmatprep.subr.bf16.mxu0 %v6795_v1  ;;  %v2014_v1 = vld [vmem:[%s7478_s22 + $0x3750] sm:$0xff]  ;;  %v5793_v8 = vpack.c.bf16 %v990_v30, %v988_v35  ;;  %v2032_v30 = vld [vmem:[%s7478_s22 + $0x37e0] sm:$0xff] }
 0x31a   : > { %v1010_v35 = vld [vmem:[%s7478_s22 + $0x17f0] sm:$0xff] }
 0x31b   : > { %5774 = vmatpush1.bf16.msra.mxu1 %v5773_v52  ;;  %v6817_v52 = vpack.c.bf16 %v2014_v1, %v2012_v62  ;;  %v6835_v62 = vpack.c.bf16 %v2035_v15, %v2033_v59  ;;  %v1013_v1 = vld [vmem:[%s7478_s22 + $0x1808] sm:$0xff]  ;;  %v2050_v59 = vld [vmem:[%s7478_s22 + $0x3870] sm:$0xff] }
 0x31c   : > { %6798 = vmatpush1.bf16.msra.mxu0 %v6797_v9  ;;  %5776 = vmatprep.subr.bf16.mxu1 %v5775_v10  ;;  %v5795_v9 = vpack.c.bf16 %v995_v4, %v993_v3  ;;  %v992_v10 = vld [vmem:[%s7478_s22 + $0x1760] sm:$0xff]  ;;  %v1015_v3 = vld [vmem:[%s7478_s22 + $0x1818] sm:$0xff]  ;;  %v2037_v4 = vld [vmem:[%s7478_s22 + $0x3808] sm:$0xff] }
 0x31d   : > { %6800 = vmatprep.subr.bf16.mxu0 %v6799_v16  ;;  %v2018_v16 = vld [vmem:[%s7478_s22 + $0x3770] sm:$0xff]  ;;  %v5797_v22 = vpack.c.bf16 %v994_v13, %v992_v10  ;;  %v5815_v10 = vpack.c.bf16 %v1015_v3, %v1013_v1  ;;  %v1012_v13 = vld [vmem:[%s7478_s22 + $0x1800] sm:$0xff]  ;;  %v1029_v15 = vld [vmem:[%s7478_s22 + $0x1888] sm:$0xff] }
 0x31e   : > { %v2052_v1 = vld [vmem:[%s7478_s22 + $0x3880] sm:$0xff] }
 0x31f   : > { %5778 = vmatpush1.bf16.msra.mxu1 %v5777_v46  ;;  %v6821_v46 = vpack.c.bf16 %v2018_v16, %v2016_v37  ;;  %v1014_v37 = vld [vmem:[%s7478_s22 + $0x1810] sm:$0xff]  ;;  %v6839_v16 = vpack.c.bf16 %v2039_v6, %v2037_v4  ;;  %v1033_v6 = vld [vmem:[%s7478_s22 + $0x18a8] sm:$0xff] }
 0x320   : > { %6802 = vmatpush1.bf16.msra.mxu0 %v6801_v23  ;;  %5780 = vmatprep.subr.bf16.mxu1 %v5779_v29  ;;  %v5799_v23 = vpack.c.bf16 %v999_v26, %v997_v18  ;;  %v996_v29 = vld [vmem:[%s7478_s22 + $0x1780] sm:$0xff]  ;;  %v2038_v18 = vld [vmem:[%s7478_s22 + $0x3810] sm:$0xff]  ;;  %v1017_v26 = vld [vmem:[%s7478_s22 + $0x1828] sm:$0xff] }
 0x321   : > { %6804 = vmatprep.subr.bf16.mxu0 %v6803_v27  ;;  %v2022_v27 = vld [vmem:[%s7478_s22 + $0x3790] sm:$0xff]  ;;  %v5801_v55 = vpack.c.bf16 %v998_v24, %v996_v29  ;;  %v5817_v29 = vpack.c.bf16 %v1014_v37, %v1012_v13 }
 0x322   : > { %v2054_v4 = vld [vmem:[%s7478_s22 + $0x3890] sm:$0xff] }
 0x323   : > { %5782 = vmatpush1.bf16.msra.mxu1 %v5781_v33  ;;  %v6825_v33 = vpack.c.bf16 %v2022_v27, %v2020_v25  ;;  %v5819_v25 = vpack.c.bf16 %v1019_v20, %v1017_v26  ;;  %v1018_v27 = vld [vmem:[%s7478_s22 + $0x1830] sm:$0xff]  ;;  %v6857_v37 = vpack.c.bf16 %v2054_v4, %v2052_v1  ;;  %v2056_v26 = vld [vmem:[%s7478_s22 + $0x38a0] sm:$0xff] }
 0x324   : > { %6806 = vmatpush1.bf16.msra.mxu0 %v6805_v32  ;;  %5784 = vmatprep.subr.bf16.mxu1 %v5783_v34  ;;  %v5803_v32 = vpack.c.bf16 %v1003_v63, %v1001_v50  ;;  %v1000_v34 = vld [vmem:[%s7478_s22 + $0x17a0] sm:$0xff]  ;;  %v1050_v1 = vld [vmem:[%s7478_s22 + $0x1930] sm:$0xff] }
 0x325   : > { %6808 = vmatprep.subr.bf16.mxu0 %v6807_v41  ;;  %v2026_v41 = vld [vmem:[%s7478_s22 + $0x37b0] sm:$0xff]  ;;  %v5805_v45 = vpack.c.bf16 %v1002_v36, %v1000_v34  ;;  %v2040_v50 = vld [vmem:[%s7478_s22 + $0x3820] sm:$0xff]  ;;  %v2047_v34 = vld [vmem:[%s7478_s22 + $0x3858] sm:$0xff] }
 0x327   : > { %5786 = vmatpush1.bf16.msra.mxu1 %v5785_v48  ;;  %v6829_v48 = vpack.c.bf16 %v2026_v41, %v2024_v38 }
 0x328   : > { %6810 = vmatpush1.bf16.msra.mxu0 %v6809_v49  ;;  %5788 = vmatprep.subr.bf16.mxu1 %v5787_v51  ;;  %v5807_v49 = vpack.c.bf16 %v1007_v43, %v1005_v42  ;;  %v1004_v51 = vld [vmem:[%s7478_s22 + $0x17c0] sm:$0xff] }
 0x329   : > { %6812 = vmatprep.subr.bf16.mxu0 %v6811_v57  ;;  %v2030_v57 = vld [vmem:[%s7478_s22 + $0x37d0] sm:$0xff]  ;;  %v5809_v47 = vpack.c.bf16 %v1006_v54, %v1004_v51  ;;  %v1020_v42 = vld [vmem:[%s7478_s22 + $0x1840] sm:$0xff] }
 0x32a   : > { %v2044_v43 = vld [vmem:[%s7478_s22 + $0x3840] sm:$0xff] }
 0x32b   : > { %5790 = vmatpush1.bf16.msra.mxu1 %v5789_v60  ;;  %v6833_v60 = vpack.c.bf16 %v2030_v57, %v2028_v11  ;;  %v6849_v54 = vpack.c.bf16 %v2046_v44, %v2044_v43  ;;  %v1026_v57 = vld [vmem:[%s7478_s22 + $0x1870] sm:$0xff] }
 0x32c   : > { %6814 = vmatpush1.bf16.msra.mxu0 %v6813_v61  ;;  %5792 = vmatprep.subr.bf16.mxu1 %v5791_v19  ;;  %v5811_v61 = vpack.c.bf16 %v1011_v17, %v1009_v58  ;;  %v1008_v19 = vld [vmem:[%s7478_s22 + $0x17e0] sm:$0xff]  ;;  %v1042_v43 = vld [vmem:[%s7478_s22 + $0x18f0] sm:$0xff] }
 0x32d   : > { %6816 = vmatprep.subr.bf16.mxu0 %v6815_v39  ;;  %v2034_v39 = vld [vmem:[%s7478_s22 + $0x37f0] sm:$0xff]  ;;  %v2048_v58 = vld [vmem:[%s7478_s22 + $0x3860] sm:$0xff] }
 0x32f   : > { %5794 = vmatpush1.bf16.msra.mxu1 %v5793_v8  ;;  %v5813_v8 = vpack.c.bf16 %v1010_v35, %v1008_v19  ;;  %v6853_v35 = vpack.c.bf16 %v2050_v59, %v2048_v58  ;;  %v1046_v58 = vld [vmem:[%s7478_s22 + $0x1910] sm:$0xff] }
 0x330   : > { %6818 = vmatpush1.bf16.msra.mxu0 %v6817_v52  ;;  %5796 = vmatprep.subr.bf16.mxu1 %v5795_v9  ;;  %v9260_v52 = vld [vmem:[%s7496_s29 + $0x70] sm:$0xff]  ;;  %v6837_v9 = vpack.c.bf16 %v2034_v39, %v2032_v30 }
 0x331   : > { %6820 = vmatprep.subr.bf16.mxu0 %v6819_v14  ;;  %v2036_v14 = vld [vmem:[%s7478_s22 + $0x3800] sm:$0xff]  ;;  %v1030_v39 = vld [vmem:[%s7478_s22 + $0x1890] sm:$0xff] }
 0x332   : > { %v6841_v24 = vpack.c.bf16 %v2038_v18, %v2036_v14  ;;  %v1034_v18 = vld [vmem:[%s7478_s22 + $0x18b0] sm:$0xff] }
 0x333   : > { %5798 = vmatpush1.bf16.msra.mxu1 %v5797_v22  ;;  %v2041_v22 = vld [vmem:[%s7478_s22 + $0x3828] sm:$0xff] }
 0x334   : > { %6822 = vmatpush1.bf16.msra.mxu0 %v6821_v46  ;;  %5800 = vmatprep.subr.bf16.mxu1 %v5799_v23  ;;  %v2043_v46 = vld [vmem:[%s7478_s22 + $0x3838] sm:$0xff]  ;;  %v9276_v23 = vrot.slane %v9260_v52, %v7592_v12 }
 0x335   : > { %6824 = vmatprep.subr.bf16.mxu0 %v6823_v53  ;;  %v1016_v53 = vld [vmem:[%s7478_s22 + $0x1820] sm:$0xff]  ;;  %v6843_v63 = vpack.c.bf16 %v2043_v46, %v2041_v22  ;;  %v2058_v22 = vld [vmem:[%s7478_s22 + $0x38b0] sm:$0xff]  ;;  %v1037_v46 = vld [vmem:[%s7478_s22 + $0x18c8] sm:$0xff] }
 0x336   : > { %v2561_v36 = vcombine.high %v9276_v23, %v9276_v23  ;;  %v5821_v38 = vpack.c.bf16 %v1018_v27, %v1016_v53  ;;  %v6861_v27 = vpack.c.bf16 %v2058_v22, %v2056_v26  ;;  %v1054_v26 = vld [vmem:[%s7478_s22 + $0x1950] sm:$0xff] }
 0x337   : > { %5802 = vmatpush1.bf16.msra.mxu1 %v5801_v55  ;;  %v1023_v55 = vld [vmem:[%s7478_s22 + $0x1858] sm:$0xff] }
 0x338   : > { %6826 = vmatpush1.bf16.msra.mxu0 %v6825_v33  ;;  %5804 = vmatprep.subr.bf16.mxu1 %v5803_v32  ;;  %v2425_v33 = vcombine.high %v9270_v21, %v9270_v21  ;;  %v2045_v32 = vld [vmem:[%s7478_s22 + $0x3848] sm:$0xff]  ;;  %v5823_v41 = vpack.c.bf16 %v1023_v55, %v1021_v31  ;;  %v2060_v31 = vld [vmem:[%s7478_s22 + $0x38c0] sm:$0xff] }
 0x339   : > { %6828 = vmatprep.subr.bf16.mxu0 %v6827_v40  ;;  %v6845_v40 = vpack.c.bf16 %v2042_v28, %v2040_v50  ;;  %v6847_v2 = vpack.c.bf16 %v2047_v34, %v2045_v32  ;;  %v1038_v28 = vld [vmem:[%s7478_s22 + $0x18d0] sm:$0xff]  ;;  %v1041_v32 = vld [vmem:[%s7478_s22 + $0x18e8] sm:$0xff]  ;;  %v1043_v34 = vld [vmem:[%s7478_s22 + $0x18f8] sm:$0xff] }
 0x33b   : > { %5806 = vmatpush1.bf16.msra.mxu1 %v5805_v45  ;;  %v1025_v45 = vld [vmem:[%s7478_s22 + $0x1868] sm:$0xff] }
 0x33c   : > { %6830 = vmatpush1.bf16.msra.mxu0 %v6829_v48  ;;  %5808 = vmatprep.subr.bf16.mxu1 %v5807_v49  ;;  %v1027_v48 = vld [vmem:[%s7478_s22 + $0x1878] sm:$0xff] }
 0x33d   : > { %6832 = vmatprep.subr.bf16.mxu0 %v6831_v56  ;;  %v2051_v49 = vld [vmem:[%s7478_s22 + $0x3878] sm:$0xff]  ;;  %v5827_v11 = vpack.c.bf16 %v1027_v48, %v1025_v45  ;;  %v1024_v56 = vld [vmem:[%s7478_s22 + $0x1860] sm:$0xff]  ;;  %v2066_v45 = vld [vmem:[%s7478_s22 + $0x38f0] sm:$0xff] }
 0x33e   : > { %v5829_v19 = vpack.c.bf16 %v1026_v57, %v1024_v56  ;;  %v1045_v48 = vld [vmem:[%s7478_s22 + $0x1908] sm:$0xff]  ;;  %v1044_v57 = vld [vmem:[%s7478_s22 + $0x1900] sm:$0xff] }
 0x33f   : > { %5810 = vmatpush1.bf16.msra.mxu1 %v5809_v47  ;;  %v1031_v47 = vld [vmem:[%s7478_s22 + $0x1898] sm:$0xff] }
 0x340   : > { %6834 = vmatpush1.bf16.msra.mxu0 %v6833_v60  ;;  %5812 = vmatprep.subr.bf16.mxu1 %v5811_v61  ;;  %v2053_v60 = vld [vmem:[%s7478_s22 + $0x3888] sm:$0xff]  ;;  %v2055_v61 = vld [vmem:[%s7478_s22 + $0x3898] sm:$0xff]  ;;  %v5831_v30 = vpack.c.bf16 %v1031_v47, %v1029_v15  ;;  %v2070_v15 = vld [vmem:[%s7478_s22 + $0x3910] sm:$0xff] }
 0x341   : > { %6836 = vmatprep.subr.bf16.mxu0 %v6835_v62  ;;  %v1028_v62 = vld [vmem:[%s7478_s22 + $0x1880] sm:$0xff]  ;;  %v6855_v3 = vpack.c.bf16 %v2055_v61, %v2053_v60  ;;  %v1049_v47 = vld [vmem:[%s7478_s22 + $0x1928] sm:$0xff]  ;;  %v1051_v60 = vld [vmem:[%s7478_s22 + $0x1938] sm:$0xff] }
 0x342   : > { %v5833_v13 = vpack.c.bf16 %v1030_v39, %v1028_v62  ;;  %v2073_v61 = vld [vmem:[%s7478_s22 + $0x3928] sm:$0xff]  ;;  %v5851_v62 = vpack.c.bf16 %v1051_v60, %v1049_v47  ;;  %v1048_v39 = vld [vmem:[%s7478_s22 + $0x1920] sm:$0xff]  ;;  %v2090_v47 = vld [vmem:[%s7478_s22 + $0x39b0] sm:$0xff] }
 0x343   : > { %5814 = vmatpush1.bf16.msra.mxu1 %v5813_v8  ;;  %v1035_v8 = vld [vmem:[%s7478_s22 + $0x18b8] sm:$0xff]  ;;  %v1069_v60 = vld [vmem:[%s7478_s22 + $0x19c8] sm:$0xff] }
 0x344   : > { %6838 = vmatpush1.bf16.msra.mxu0 %v6837_v9  ;;  %5816 = vmatprep.subr.bf16.mxu1 %v5815_v10  ;;  %v2057_v9 = vld [vmem:[%s7478_s22 + $0x38a8] sm:$0xff]  ;;  %v2059_v10 = vld [vmem:[%s7478_s22 + $0x38b8] sm:$0xff]  ;;  %v5835_v14 = vpack.c.bf16 %v1035_v8, %v1033_v6  ;;  %v2074_v6 = vld [vmem:[%s7478_s22 + $0x3930] sm:$0xff] }
 0x345   : > { %6840 = vmatprep.subr.bf16.mxu0 %v6839_v16  ;;  %v1032_v16 = vld [vmem:[%s7478_s22 + $0x18a0] sm:$0xff]  ;;  %v6859_v20 = vpack.c.bf16 %v2059_v10, %v2057_v9  ;;  %v1053_v8 = vld [vmem:[%s7478_s22 + $0x1948] sm:$0xff]  ;;  %v1055_v9 = vld [vmem:[%s7478_s22 + $0x1958] sm:$0xff] }
 0x346   : > { %3490 = vmatmul.mubr.f32.vlgmr.msra.gmra.mrb[0].mxu1 %v9123_v0  ;;  %v1022_v0 = vld [vmem:[%s7478_s22 + $0x1850] sm:$0xff]  ;;  %v5837_v53 = vpack.c.bf16 %v1034_v18, %v1032_v16  ;;  %v2077_v10 = vld [vmem:[%s7478_s22 + $0x3948] sm:$0xff]  ;;  %v5855_v16 = vpack.c.bf16 %v1055_v9, %v1053_v8  ;;  %v1052_v18 = vld [vmem:[%s7478_s22 + $0x1940] sm:$0xff] }
 0x347   : > { %5818 = vmatpush1.bf16.msra.mxu1 %v5817_v29  ;;  %4626 = vmatmul.mubr.f32.vlgmr.msra.gmra.mrb[0].mxu0 %v9128_v5  ;;  %v2049_v5 = vld [vmem:[%s7478_s22 + $0x3868] sm:$0xff]  ;;  %v5825_v51 = vpack.c.bf16 %v1022_v0, %v1020_v42  ;;  %v1039_v29 = vld [vmem:[%s7478_s22 + $0x18d8] sm:$0xff]  ;;  %v5843_v42 = vpack.c.bf16 %v1043_v34, %v1041_v32  ;;  %v1040_v0 = vld [vmem:[%s7478_s22 + $0x18e0] sm:$0xff] }
 0x348   : > { %6842 = vmatpush1.bf16.msra.mxu0 %v6841_v24  ;;  %5820 = vmatprep.subr.bf16.mxu1 %v5819_v25  ;;  %v6851_v17 = vpack.c.bf16 %v2051_v49, %v2049_v5  ;;  %v2061_v24 = vld [vmem:[%s7478_s22 + $0x38c8] sm:$0xff]  ;;  %v2063_v25 = vld [vmem:[%s7478_s22 + $0x38d8] sm:$0xff]  ;;  %v5839_v50 = vpack.c.bf16 %v1039_v29, %v1037_v46  ;;  %v2078_v46 = vld [vmem:[%s7478_s22 + $0x3950] sm:$0xff] }
 0x349   : > { %6844 = vmatprep.subr.bf16.mxu0 %v6843_v63  ;;  %3560 = vmatprep.mubr.f32.mxu1 %v2425_v33  ;;  %v1036_v63 = vld [vmem:[%s7478_s22 + $0x18c0] sm:$0xff]  ;;  %v6863_v55 = vpack.c.bf16 %v2063_v25, %v2061_v24  ;;  %v2062_v33 = vld [vmem:[%s7478_s22 + $0x38d0] sm:$0xff]  ;;  %v1047_v5 = vld [vmem:[%s7478_s22 + $0x1918] sm:$0xff] }
 0x34a   : > { %4696 = vmatprep.mubr.f32.mxu0 %v2561_v36  ;;  %v2065_v36 = vld [vmem:[%s7478_s22 + $0x38e8] sm:$0xff]  ;;  %v5847_v56 = vpack.c.bf16 %v1047_v5, %v1045_v48  ;;  %v1059_v24 = vld [vmem:[%s7478_s22 + $0x1978] sm:$0xff]  ;;  %v2082_v32 = vld [vmem:[%s7478_s22 + $0x3970] sm:$0xff] }
 0x34b   : > { %5822 = vmatpush1.bf16.msra.mxu1 %v5821_v38  ;;  %v2067_v38 = vld [vmem:[%s7478_s22 + $0x38f8] sm:$0xff]  ;;  %v2069_v49 = vld [vmem:[%s7478_s22 + $0x3908] sm:$0xff]  ;;  %v2086_v48 = vld [vmem:[%s7478_s22 + $0x3990] sm:$0xff] }
 0x34c   : > { %6846 = vmatpush1.bf16.msra.mxu0 %v6845_v40  ;;  %5824 = vmatprep.subr.bf16.mxu1 %v5823_v41  ;;  %v5841_v40 = vpack.c.bf16 %v1038_v28, %v1036_v63  ;;  %v6865_v41 = vpack.c.bf16 %v2062_v33, %v2060_v31  ;;  %v6867_v44 = vpack.c.bf16 %v2067_v38, %v2065_v36  ;;  %v1057_v29 = vld [vmem:[%s7478_s22 + $0x1968] sm:$0xff]  ;;  %v1056_v28 = vld [vmem:[%s7478_s22 + $0x1960] sm:$0xff]  ;;  %v1058_v31 = vld [vmem:[%s7478_s22 + $0x1970] sm:$0xff] }
 0x34d   : > { %6848 = vmatprep.subr.bf16.mxu0 %v6847_v2  ;;  %v2064_v2 = vld [vmem:[%s7478_s22 + $0x38e0] sm:$0xff]  ;;  %v2081_v25 = vld [vmem:[%s7478_s22 + $0x3968] sm:$0xff]  ;;  %v5859_v63 = vpack.c.bf16 %v1059_v24, %v1057_v29  ;;  %v1063_v36 = vld [vmem:[%s7478_s22 + $0x1998] sm:$0xff] }
 0x34e   : > { %v1061_v34 = vld [vmem:[%s7478_s22 + $0x1988] sm:$0xff]  ;;  %v2094_v8 = vld [vmem:[%s7478_s22 + $0x39d0] sm:$0xff] }
 0x34f   : > { %5826 = vmatpush1.bf16.msra.mxu1 %v5825_v51  ;;  %v2071_v51 = vld [vmem:[%s7478_s22 + $0x3918] sm:$0xff]  ;;  %v2085_v38 = vld [vmem:[%s7478_s22 + $0x3988] sm:$0xff]  ;;  %v2098_v29 = vld [vmem:[%s7478_s22 + $0x39f0] sm:$0xff] }
 0x350   : > { %6850 = vmatpush1.bf16.msra.mxu0 %v6849_v54  ;;  %5828 = vmatprep.subr.bf16.mxu1 %v5827_v11  ;;  %v5845_v54 = vpack.c.bf16 %v1042_v43, %v1040_v0  ;;  %v6869_v11 = vpack.c.bf16 %v2066_v45, %v2064_v2  ;;  %v6871_v59 = vpack.c.bf16 %v2071_v51, %v2069_v49  ;;  %v1060_v43 = vld [vmem:[%s7478_s22 + $0x1980] sm:$0xff]  ;;  %v1062_v2 = vld [vmem:[%s7478_s22 + $0x1990] sm:$0xff]  ;;  %v1065_v5 = vld [vmem:[%s7478_s22 + $0x19a8] sm:$0xff] }
 0x351   : > { %6852 = vmatprep.subr.bf16.mxu0 %v6851_v17  ;;  %v2068_v17 = vld [vmem:[%s7478_s22 + $0x3900] sm:$0xff]  ;;  %v5863_v0 = vpack.c.bf16 %v1063_v36, %v1061_v34  ;;  %v1067_v49 = vld [vmem:[%s7478_s22 + $0x19b8] sm:$0xff]  ;;  %v2089_v51 = vld [vmem:[%s7478_s22 + $0x39a8] sm:$0xff] }
 0x352   : > { %v1073_v9 = vld [vmem:[%s7478_s22 + $0x19e8] sm:$0xff]  ;;  %v2100_v34 = vld [vmem:[%s7478_s22 + $0x3a00] sm:$0xff]  ;;  %v2102_v36 = vld [vmem:[%s7478_s22 + $0x3a10] sm:$0xff] }
 0x353   : > { %5830 = vmatpush1.bf16.msra.mxu1 %v5829_v19  ;;  %v2075_v19 = vld [vmem:[%s7478_s22 + $0x3938] sm:$0xff]  ;;  %v1077_v24 = vld [vmem:[%s7478_s22 + $0x1a08] sm:$0xff] }
 0x354   : > { %6854 = vmatpush1.bf16.msra.mxu0 %v6853_v35  ;;  %5832 = vmatprep.subr.bf16.mxu1 %v5831_v30  ;;  %v5849_v35 = vpack.c.bf16 %v1046_v58, %v1044_v57  ;;  %v6873_v30 = vpack.c.bf16 %v2070_v15, %v2068_v17  ;;  %v6875_v4 = vpack.c.bf16 %v2075_v19, %v2073_v61  ;;  %v1064_v58 = vld [vmem:[%s7478_s22 + $0x19a0] sm:$0xff]  ;;  %v1066_v17 = vld [vmem:[%s7478_s22 + $0x19b0] sm:$0xff]  ;;  %v1071_v61 = vld [vmem:[%s7478_s22 + $0x19d8] sm:$0xff] }
 0x355   : > { %6856 = vmatprep.subr.bf16.mxu0 %v6855_v3  ;;  %v2072_v3 = vld [vmem:[%s7478_s22 + $0x3920] sm:$0xff]  ;;  %v5867_v57 = vpack.c.bf16 %v1067_v49, %v1065_v5  ;;  %v2093_v19 = vld [vmem:[%s7478_s22 + $0x39c8] sm:$0xff] }
 0x356   : > { %v2104_v5 = vld [vmem:[%s7478_s22 + $0x3a20] sm:$0xff] }
 0x357   : > { %5834 = vmatpush1.bf16.msra.mxu1 %v5833_v13  ;;  %v2079_v13 = vld [vmem:[%s7478_s22 + $0x3958] sm:$0xff] }
 0x358   : > { %6858 = vmatpush1.bf16.msra.mxu0 %v6857_v37  ;;  %5836 = vmatprep.subr.bf16.mxu1 %v5835_v14  ;;  %v5853_v37 = vpack.c.bf16 %v1050_v1, %v1048_v39  ;;  %v6877_v14 = vpack.c.bf16 %v2074_v6, %v2072_v3  ;;  %v6879_v22 = vpack.c.bf16 %v2079_v13, %v2077_v10  ;;  %v1068_v1 = vld [vmem:[%s7478_s22 + $0x19c0] sm:$0xff]  ;;  %v1070_v3 = vld [vmem:[%s7478_s22 + $0x19d0] sm:$0xff]  ;;  %v1075_v10 = vld [vmem:[%s7478_s22 + $0x19f8] sm:$0xff] }
 0x359   : > { %6860 = vmatprep.subr.bf16.mxu0 %v6859_v20  ;;  %v2076_v20 = vld [vmem:[%s7478_s22 + $0x3940] sm:$0xff]  ;;  %v5871_v39 = vpack.c.bf16 %v1071_v61, %v1069_v60  ;;  %v2097_v13 = vld [vmem:[%s7478_s22 + $0x39e8] sm:$0xff] }
 0x35a   : > { %v1084_v60 = vld [vmem:[%s7478_s22 + $0x1a40] sm:$0xff] }
 0x35b   : > { %5838 = vmatpush1.bf16.msra.mxu1 %v5837_v53  ;;  %v2083_v53 = vld [vmem:[%s7478_s22 + $0x3978] sm:$0xff]  ;;  %v2108_v61 = vld [vmem:[%s7478_s22 + $0x3a40] sm:$0xff] }
 0x35c   : > { %6862 = vmatpush1.bf16.msra.mxu0 %v6861_v27  ;;  %5840 = vmatprep.subr.bf16.mxu1 %v5839_v50  ;;  %v5857_v27 = vpack.c.bf16 %v1054_v26, %v1052_v18  ;;  %v6881_v50 = vpack.c.bf16 %v2078_v46, %v2076_v20  ;;  %v6883_v33 = vpack.c.bf16 %v2083_v53, %v2081_v25  ;;  %v1072_v26 = vld [vmem:[%s7478_s22 + $0x19e0] sm:$0xff]  ;;  %v1074_v20 = vld [vmem:[%s7478_s22 + $0x19f0] sm:$0xff]  ;;  %v1079_v25 = vld [vmem:[%s7478_s22 + $0x1a18] sm:$0xff] }
 0x35d   : > { %6864 = vmatprep.subr.bf16.mxu0 %v6863_v55  ;;  %v2080_v55 = vld [vmem:[%s7478_s22 + $0x3960] sm:$0xff]  ;;  %v5875_v18 = vpack.c.bf16 %v1075_v10, %v1073_v9  ;;  %v2410_v53 = vcombine.high %v9257_v7, %v9257_v7 }
 0x35e   : > { %v2112_v9 = vld [vmem:[%s7478_s22 + $0x3a60] sm:$0xff] }
 0x35f   : > { %5842 = vmatpush1.bf16.msra.mxu1 %v5841_v40  ;;  %v2087_v40 = vld [vmem:[%s7478_s22 + $0x3998] sm:$0xff] }
 0x360   : > { %6866 = vmatpush1.bf16.msra.mxu0 %v6865_v41  ;;  %5844 = vmatprep.subr.bf16.mxu1 %v5843_v42  ;;  %v5861_v41 = vpack.c.bf16 %v1058_v31, %v1056_v28  ;;  %v6885_v42 = vpack.c.bf16 %v2082_v32, %v2080_v55  ;;  %v6887_v45 = vpack.c.bf16 %v2087_v40, %v2085_v38  ;;  %v1078_v32 = vld [vmem:[%s7478_s22 + $0x1a10] sm:$0xff]  ;;  %v1081_v38 = vld [vmem:[%s7478_s22 + $0x1a28] sm:$0xff]  ;;  %v1083_v40 = vld [vmem:[%s7478_s22 + $0x1a38] sm:$0xff] }
 0x361   : > { %6868 = vmatprep.subr.bf16.mxu0 %v6867_v44  ;;  %v2084_v44 = vld [vmem:[%s7478_s22 + $0x3980] sm:$0xff]  ;;  %v5877_v28 = vpack.c.bf16 %v1074_v20, %v1072_v26  ;;  %v5879_v55 = vpack.c.bf16 %v1079_v25, %v1077_v24 }
 0x362   : > { %v2116_v24 = vld [vmem:[%s7478_s22 + $0x3a80] sm:$0xff] }
 0x363   : > { %5846 = vmatpush1.bf16.msra.mxu1 %v5845_v54  ;;  %v2091_v54 = vld [vmem:[%s7478_s22 + $0x39b8] sm:$0xff] }
 0x364   : > { %6870 = vmatpush1.bf16.msra.mxu0 %v6869_v11  ;;  %5848 = vmatprep.subr.bf16.mxu1 %v5847_v56  ;;  %v5865_v11 = vpack.c.bf16 %v1062_v2, %v1060_v43  ;;  %v6889_v56 = vpack.c.bf16 %v2086_v48, %v2084_v44  ;;  %v6891_v15 = vpack.c.bf16 %v2091_v54, %v2089_v51  ;;  %v1082_v48 = vld [vmem:[%s7478_s22 + $0x1a30] sm:$0xff]  ;;  %v1085_v54 = vld [vmem:[%s7478_s22 + $0x1a48] sm:$0xff] }
 0x365   : > { %6872 = vmatprep.subr.bf16.mxu0 %v6871_v59  ;;  %v2088_v59 = vld [vmem:[%s7478_s22 + $0x39a0] sm:$0xff]  ;;  %v6905_v2 = vpack.c.bf16 %v2102_v36, %v2100_v34  ;;  %v5883_v44 = vpack.c.bf16 %v1083_v40, %v1081_v38  ;;  %v2106_v51 = vld [vmem:[%s7478_s22 + $0x3a30] sm:$0xff]  ;;  %v1101_v40 = vld [vmem:[%s7478_s22 + $0x1ac8] sm:$0xff] }
 0x366   : > { %v1098_v34 = vld [vmem:[%s7478_s22 + $0x1ab0] sm:$0xff] }
 0x367   : > { %5850 = vmatpush1.bf16.msra.mxu1 %v5849_v35  ;;  %v2095_v35 = vld [vmem:[%s7478_s22 + $0x39d8] sm:$0xff]  ;;  %v2122_v38 = vld [vmem:[%s7478_s22 + $0x3ab0] sm:$0xff] }
 0x368   : > { %6874 = vmatpush1.bf16.msra.mxu0 %v6873_v30  ;;  %5852 = vmatprep.subr.bf16.mxu1 %v5851_v62  ;;  %v5869_v30 = vpack.c.bf16 %v1066_v17, %v1064_v58  ;;  %v6893_v62 = vpack.c.bf16 %v2090_v47, %v2088_v59  ;;  %v6895_v6 = vpack.c.bf16 %v2095_v35, %v2093_v19  ;;  %v2111_v58 = vld [vmem:[%s7478_s22 + $0x3a58] sm:$0xff]  ;;  %v2110_v35 = vld [vmem:[%s7478_s22 + $0x3a50] sm:$0xff] }
 0x369   : > { %6876 = vmatprep.subr.bf16.mxu0 %v6875_v4  ;;  %v2092_v4 = vld [vmem:[%s7478_s22 + $0x39c0] sm:$0xff] }
 0x36b   : > { %5854 = vmatpush1.bf16.msra.mxu1 %v5853_v37  ;;  %v2099_v37 = vld [vmem:[%s7478_s22 + $0x39f8] sm:$0xff] }
 0x36c   : > { %6878 = vmatpush1.bf16.msra.mxu0 %v6877_v14  ;;  %5856 = vmatprep.subr.bf16.mxu1 %v5855_v16  ;;  %v5873_v14 = vpack.c.bf16 %v1070_v3, %v1068_v1  ;;  %v6897_v16 = vpack.c.bf16 %v2094_v8, %v2092_v4  ;;  %v6899_v46 = vpack.c.bf16 %v2099_v37, %v2097_v13  ;;  %v1090_v8 = vld [vmem:[%s7478_s22 + $0x1a70] sm:$0xff]  ;;  %v1093_v37 = vld [vmem:[%s7478_s22 + $0x1a88] sm:$0xff] }
 0x36d   : > { %6880 = vmatprep.subr.bf16.mxu0 %v6879_v22  ;;  %v2096_v22 = vld [vmem:[%s7478_s22 + $0x39e0] sm:$0xff]  ;;  %v6913_v3 = vpack.c.bf16 %v2110_v35, %v2108_v61  ;;  %v2114_v13 = vld [vmem:[%s7478_s22 + $0x3a70] sm:$0xff]  ;;  %v1109_v35 = vld [vmem:[%s7478_s22 + $0x1b08] sm:$0xff] }
 0x36e   : > { %v6901_v31 = vpack.c.bf16 %v2098_v29, %v2096_v22  ;;  %v6917_v20 = vpack.c.bf16 %v2114_v13, %v2112_v9  ;;  %v1094_v29 = vld [vmem:[%s7478_s22 + $0x1a90] sm:$0xff]  ;;  %v1113_v13 = vld [vmem:[%s7478_s22 + $0x1b28] sm:$0xff] }
 0x36f   : > { %5858 = vmatpush1.bf16.msra.mxu1 %v5857_v27  ;;  %v2101_v27 = vld [vmem:[%s7478_s22 + $0x3a08] sm:$0xff] }
 0x370   : > { %6882 = vmatpush1.bf16.msra.mxu0 %v6881_v50  ;;  %5860 = vmatprep.subr.bf16.mxu1 %v5859_v63  ;;  %v2103_v50 = vld [vmem:[%s7478_s22 + $0x3a18] sm:$0xff]  ;;  %v2546_v63 = vcombine.high %v9260_v52, %v9260_v52  ;;  %v9415_v52 = vrot.slane %v2410_v53, %v7592_v12  ;;  %v2118_v53 = vld [vmem:[%s7478_s22 + $0x3a90] sm:$0xff] }
 0x371   : > { %6884 = vmatprep.subr.bf16.mxu0 %v6883_v33  ;;  %v1076_v33 = vld [vmem:[%s7478_s22 + $0x1a00] sm:$0xff]  ;;  %v6903_v7 = vpack.c.bf16 %v2103_v50, %v2101_v27  ;;  %v1097_v27 = vld [vmem:[%s7478_s22 + $0x1aa8] sm:$0xff]  ;;  %v1099_v50 = vld [vmem:[%s7478_s22 + $0x1ab8] sm:$0xff] }
 0x372   : > { %v5881_v43 = vpack.c.bf16 %v1078_v32, %v1076_v33  ;;  %v5899_v33 = vpack.c.bf16 %v1099_v50, %v1097_v27  ;;  %v1096_v32 = vld [vmem:[%s7478_s22 + $0x1aa0] sm:$0xff]  ;;  %v1119_v27 = vld [vmem:[%s7478_s22 + $0x1b58] sm:$0xff]  ;;  %v2141_v50 = vld [vmem:[%s7478_s22 + $0x3b48] sm:$0xff] }
 0x373   : > { %5862 = vmatpush1.bf16.msra.mxu1 %v5861_v41  ;;  %v2105_v41 = vld [vmem:[%s7478_s22 + $0x3a28] sm:$0xff] }
 0x374   : > { %6886 = vmatpush1.bf16.msra.mxu0 %v6885_v42  ;;  %5864 = vmatprep.subr.bf16.mxu1 %v5863_v0  ;;  %v2107_v42 = vld [vmem:[%s7478_s22 + $0x3a38] sm:$0xff]  ;;  %v9420_v0 = vrot.slane %v2546_v63, %v7592_v12  ;;  %v2121_v63 = vld [vmem:[%s7478_s22 + $0x3aa8] sm:$0xff] }
 0x375   : > { %6888 = vmatprep.subr.bf16.mxu0 %v6887_v45  ;;  %v1080_v45 = vld [vmem:[%s7478_s22 + $0x1a20] sm:$0xff]  ;;  %v6907_v49 = vpack.c.bf16 %v2107_v42, %v2105_v41  ;;  %v1103_v41 = vld [vmem:[%s7478_s22 + $0x1ad8] sm:$0xff]  ;;  %v2125_v42 = vld [vmem:[%s7478_s22 + $0x3ac8] sm:$0xff] }
 0x376   : > { %v2562_v17 = vcombine.high %v9420_v0, %v9420_v0  ;;  %v5885_v59 = vpack.c.bf16 %v1082_v48, %v1080_v45  ;;  %v5903_v45 = vpack.c.bf16 %v1103_v41, %v1101_v40  ;;  %v1100_v48 = vld [vmem:[%s7478_s22 + $0x1ac0] sm:$0xff]  ;;  %v1123_v40 = vld [vmem:[%s7478_s22 + $0x1b78] sm:$0xff]  ;;  %v2145_v41 = vld [vmem:[%s7478_s22 + $0x3b68] sm:$0xff] }
 0x377   : > { %5866 = vmatpush1.bf16.msra.mxu1 %v5865_v11  ;;  %v1087_v11 = vld [vmem:[%s7478_s22 + $0x1a58] sm:$0xff] }
 0x378   : > { %6890 = vmatpush1.bf16.msra.mxu0 %v6889_v56  ;;  %5868 = vmatprep.subr.bf16.mxu1 %v5867_v57  ;;  %v2426_v56 = vcombine.high %v9415_v52, %v9415_v52  ;;  %v2109_v57 = vld [vmem:[%s7478_s22 + $0x3a48] sm:$0xff]  ;;  %v5887_v47 = vpack.c.bf16 %v1087_v11, %v1085_v54  ;;  %v2126_v54 = vld [vmem:[%s7478_s22 + $0x3ad0] sm:$0xff] }
 0x379   : > { %6892 = vmatprep.subr.bf16.mxu0 %v6891_v15  ;;  %v6909_v15 = vpack.c.bf16 %v2106_v51, %v2104_v5  ;;  %v6911_v19 = vpack.c.bf16 %v2111_v58, %v2109_v57  ;;  %v1102_v5 = vld [vmem:[%s7478_s22 + $0x1ad0] sm:$0xff]  ;;  %v1105_v11 = vld [vmem:[%s7478_s22 + $0x1ae8] sm:$0xff]  ;;  %v2131_v58 = vld [vmem:[%s7478_s22 + $0x3af8] sm:$0xff] }
 0x37a   : > { %v2129_v57 = vld [vmem:[%s7478_s22 + $0x3ae8] sm:$0xff] }
 0x37b   : > { %5870 = vmatpush1.bf16.msra.mxu1 %v5869_v30  ;;  %v1089_v30 = vld [vmem:[%s7478_s22 + $0x1a68] sm:$0xff]  ;;  %v6931_v61 = vpack.c.bf16 %v2131_v58, %v2129_v57  ;;  %v2151_v57 = vld [vmem:[%s7478_s22 + $0x3b98] sm:$0xff] }
 0x37c   : > { %6894 = vmatpush1.bf16.msra.mxu0 %v6893_v62  ;;  %5872 = vmatprep.subr.bf16.mxu1 %v5871_v39  ;;  %v1091_v62 = vld [vmem:[%s7478_s22 + $0x1a78] sm:$0xff] }
 0x37d   : > { %6896 = vmatprep.subr.bf16.mxu0 %v6895_v6  ;;  %v2115_v39 = vld [vmem:[%s7478_s22 + $0x3a78] sm:$0xff]  ;;  %v5891_v4 = vpack.c.bf16 %v1091_v62, %v1089_v30  ;;  %v1088_v6 = vld [vmem:[%s7478_s22 + $0x1a60] sm:$0xff]  ;;  %v2133_v62 = vld [vmem:[%s7478_s22 + $0x3b08] sm:$0xff] }
 0x37e   : > { %v5893_v26 = vpack.c.bf16 %v1090_v8, %v1088_v6  ;;  %v1111_v30 = vld [vmem:[%s7478_s22 + $0x1b18] sm:$0xff]  ;;  %v1110_v6 = vld [vmem:[%s7478_s22 + $0x1b10] sm:$0xff]  ;;  %v2132_v8 = vld [vmem:[%s7478_s22 + $0x3b00] sm:$0xff] }
 0x37f   : > { %5874 = vmatpush1.bf16.msra.mxu1 %v5873_v14  ;;  %v1095_v14 = vld [vmem:[%s7478_s22 + $0x1a98] sm:$0xff] }
 0x380   : > { %6898 = vmatpush1.bf16.msra.mxu0 %v6897_v16  ;;  %5876 = vmatprep.subr.bf16.mxu1 %v5875_v18  ;;  %v2117_v16 = vld [vmem:[%s7478_s22 + $0x3a88] sm:$0xff]  ;;  %v2119_v18 = vld [vmem:[%s7478_s22 + $0x3a98] sm:$0xff]  ;;  %v5895_v22 = vpack.c.bf16 %v1095_v14, %v1093_v37 }
 0x381   : > { %6900 = vmatprep.subr.bf16.mxu0 %v6899_v46  ;;  %v1092_v46 = vld [vmem:[%s7478_s22 + $0x1a80] sm:$0xff]  ;;  %v6919_v25 = vpack.c.bf16 %v2119_v18, %v2117_v16  ;;  %v1115_v37 = vld [vmem:[%s7478_s22 + $0x1b38] sm:$0xff]  ;;  %v2137_v14 = vld [vmem:[%s7478_s22 + $0x3b28] sm:$0xff] }
 0x382   : > { %v2139_v16 = vld [vmem:[%s7478_s22 + $0x3b38] sm:$0xff] }
 0x383   : > { %5878 = vmatpush1.bf16.msra.mxu1 %v5877_v28  ;;  %v2123_v28 = vld [vmem:[%s7478_s22 + $0x3ab8] sm:$0xff] }
 0x384   : > { %6902 = vmatpush1.bf16.msra.mxu0 %v6901_v31  ;;  %5880 = vmatprep.subr.bf16.mxu1 %v5879_v55  ;;  %v5897_v31 = vpack.c.bf16 %v1094_v29, %v1092_v46  ;;  %v6921_v55 = vpack.c.bf16 %v2118_v53, %v2116_v24  ;;  %v6923_v36 = vpack.c.bf16 %v2123_v28, %v2121_v63  ;;  %v1114_v46 = vld [vmem:[%s7478_s22 + $0x1b30] sm:$0xff]  ;;  %v2136_v29 = vld [vmem:[%s7478_s22 + $0x3b20] sm:$0xff]  ;;  %v1117_v53 = vld [vmem:[%s7478_s22 + $0x1b48] sm:$0xff] }
 0x385   : > { %6904 = vmatprep.subr.bf16.mxu0 %v6903_v7  ;;  %v2120_v7 = vld [vmem:[%s7478_s22 + $0x3aa0] sm:$0xff]  ;;  %v6939_v24 = vpack.c.bf16 %v2139_v16, %v2137_v14  ;;  %v2143_v63 = vld [vmem:[%s7478_s22 + $0x3b58] sm:$0xff] }
 0x386   : > { %3561 = vmatmul.mubr.f32.vlgmr.msra.gmra.mrb[0].mxu1 %v9270_v21  ;;  %v1086_v21 = vld [vmem:[%s7478_s22 + $0x1a50] sm:$0xff]  ;;  %v2159_v14 = vld [vmem:[%s7478_s22 + $0x3bd8] sm:$0xff] }
 0x387   : > { %5882 = vmatpush1.bf16.msra.mxu1 %v5881_v43  ;;  %4697 = vmatmul.mubr.f32.vlgmr.msra.gmra.mrb[0].mxu0 %v9276_v23  ;;  %v2113_v23 = vld [vmem:[%s7478_s22 + $0x3a68] sm:$0xff]  ;;  %v5889_v1 = vpack.c.bf16 %v1086_v21, %v1084_v60  ;;  %v2127_v43 = vld [vmem:[%s7478_s22 + $0x3ad8] sm:$0xff]  ;;  %v1106_v60 = vld [vmem:[%s7478_s22 + $0x1af0] sm:$0xff] }
 0x388   : > { %6906 = vmatpush1.bf16.msra.mxu0 %v6905_v2  ;;  %5884 = vmatprep.subr.bf16.mxu1 %v5883_v44  ;;  %v6915_v10 = vpack.c.bf16 %v2115_v39, %v2113_v23  ;;  %v5901_v2 = vpack.c.bf16 %v1098_v34, %v1096_v32  ;;  %v6925_v44 = vpack.c.bf16 %v2122_v38, %v2120_v7  ;;  %v2128_v21 = vld [vmem:[%s7478_s22 + $0x3ae0] sm:$0xff]  ;;  %v2135_v23 = vld [vmem:[%s7478_s22 + $0x3b18] sm:$0xff]  ;;  %v1118_v32 = vld [vmem:[%s7478_s22 + $0x1b50] sm:$0xff] }
 0x389   : > { %6908 = vmatprep.subr.bf16.mxu0 %v6907_v49  ;;  %3631 = vmatprep.mubr.f32.mxu1 %v2426_v56  ;;  %v2124_v49 = vld [vmem:[%s7478_s22 + $0x3ac0] sm:$0xff]  ;;  %v6927_v51 = vpack.c.bf16 %v2127_v43, %v2125_v42  ;;  %v1107_v56 = vld [vmem:[%s7478_s22 + $0x1af8] sm:$0xff]  ;;  %v6935_v9 = vpack.c.bf16 %v2135_v23, %v2133_v62  ;;  %v6943_v7 = vpack.c.bf16 %v2143_v63, %v2141_v50  ;;  %v1121_v38 = vld [vmem:[%s7478_s22 + $0x1b68] sm:$0xff] }
 0x38a   : > { %4767 = vmatprep.mubr.f32.mxu0 %v2562_v17  ;;  %v5905_v17 = vpack.c.bf16 %v1102_v5, %v1100_v48  ;;  %v2140_v34 = vld [vmem:[%s7478_s22 + $0x3b40] sm:$0xff]  ;;  %v2147_v42 = vld [vmem:[%s7478_s22 + $0x3b78] sm:$0xff]  ;;  %v1122_v48 = vld [vmem:[%s7478_s22 + $0x1b70] sm:$0xff] }
 0x38b   : > { %5886 = vmatpush1.bf16.msra.mxu1 %v5885_v59  ;;  %v6929_v59 = vpack.c.bf16 %v2126_v54, %v2124_v49  ;;  %v2144_v5 = vld [vmem:[%s7478_s22 + $0x3b60] sm:$0xff]  ;;  %v6947_v49 = vpack.c.bf16 %v2147_v42, %v2145_v41  ;;  %v1125_v54 = vld [vmem:[%s7478_s22 + $0x1b88] sm:$0xff]  ;;  %v2155_v62 = vld [vmem:[%s7478_s22 + $0x3bb8] sm:$0xff] }
 0x38c   : > { %6910 = vmatpush1.bf16.msra.mxu0 %v6909_v15  ;;  %5888 = vmatprep.subr.bf16.mxu1 %v5887_v47  ;;  %v5907_v15 = vpack.c.bf16 %v1107_v56, %v1105_v11  ;;  %v1104_v47 = vld [vmem:[%s7478_s22 + $0x1ae0] sm:$0xff]  ;;  %v1127_v11 = vld [vmem:[%s7478_s22 + $0x1b98] sm:$0xff]  ;;  %v2149_v56 = vld [vmem:[%s7478_s22 + $0x3b88] sm:$0xff] }
 0x38d   : > { %6912 = vmatprep.subr.bf16.mxu0 %v6911_v19  ;;  %v2130_v19 = vld [vmem:[%s7478_s22 + $0x3af0] sm:$0xff]  ;;  %v5909_v39 = vpack.c.bf16 %v1106_v60, %v1104_v47  ;;  %v2148_v60 = vld [vmem:[%s7478_s22 + $0x3b80] sm:$0xff]  ;;  %v2163_v50 = vld [vmem:[%s7478_s22 + $0x3bf8] sm:$0xff] }
 0x38e   : > { %v1126_v47 = vld [vmem:[%s7478_s22 + $0x1b90] sm:$0xff]  ;;  %v2167_v41 = vld [vmem:[%s7478_s22 + $0x3c18] sm:$0xff] }
 0x38f   : > { %5890 = vmatpush1.bf16.msra.mxu1 %v5889_v1  ;;  %v6933_v1 = vpack.c.bf16 %v2130_v19, %v2128_v21  ;;  %v6951_v21 = vpack.c.bf16 %v2151_v57, %v2149_v56  ;;  %v1129_v19 = vld [vmem:[%s7478_s22 + $0x1ba8] sm:$0xff]  ;;  %v9549_v42 = vld [vmem:[%s7496_s29 + $0x38] sm:$0xff] }
 0x390   : > { %6914 = vmatpush1.bf16.msra.mxu0 %v6913_v3  ;;  %5892 = vmatprep.subr.bf16.mxu1 %v5891_v4  ;;  %v5911_v3 = vpack.c.bf16 %v1111_v30, %v1109_v35  ;;  %v1108_v4 = vld [vmem:[%s7478_s22 + $0x1b00] sm:$0xff]  ;;  %v1131_v35 = vld [vmem:[%s7478_s22 + $0x1bb8] sm:$0xff]  ;;  %v2153_v30 = vld [vmem:[%s7478_s22 + $0x3ba8] sm:$0xff]  ;;  %v9562_v57 = vrot.slane %v9549_v42, %v7592_v12 }
 0x391   : > { %6916 = vmatprep.subr.bf16.mxu0 %v6915_v10  ;;  %v2134_v10 = vld [vmem:[%s7478_s22 + $0x3b10] sm:$0xff]  ;;  %v5913_v18 = vpack.c.bf16 %v1110_v6, %v1108_v4  ;;  %v2152_v6 = vld [vmem:[%s7478_s22 + $0x3ba0] sm:$0xff]  ;;  %v1147_v56 = vld [vmem:[%s7478_s22 + $0x1c38] sm:$0xff] }
 0x392   : > { %v1130_v4 = vld [vmem:[%s7478_s22 + $0x1bb0] sm:$0xff] }
 0x393   : > { %5894 = vmatpush1.bf16.msra.mxu1 %v5893_v26  ;;  %v6937_v26 = vpack.c.bf16 %v2134_v10, %v2132_v8  ;;  %v6955_v8 = vpack.c.bf16 %v2155_v62, %v2153_v30  ;;  %v1133_v10 = vld [vmem:[%s7478_s22 + $0x1bc8] sm:$0xff]  ;;  %v2170_v30 = vld [vmem:[%s7478_s22 + $0x3c30] sm:$0xff] }
 0x394   : > { %6918 = vmatpush1.bf16.msra.mxu0 %v6917_v20  ;;  %5896 = vmatprep.subr.bf16.mxu1 %v5895_v22  ;;  %v5915_v20 = vpack.c.bf16 %v1115_v37, %v1113_v13  ;;  %v1112_v22 = vld [vmem:[%s7478_s22 + $0x1b20] sm:$0xff]  ;;  %v1135_v13 = vld [vmem:[%s7478_s22 + $0x1bd8] sm:$0xff]  ;;  %v2157_v37 = vld [vmem:[%s7478_s22 + $0x3bc8] sm:$0xff] }
 0x395   : > { %6920 = vmatprep.subr.bf16.mxu0 %v6919_v25  ;;  %v2138_v25 = vld [vmem:[%s7478_s22 + $0x3b30] sm:$0xff]  ;;  %v5917_v28 = vpack.c.bf16 %v1114_v46, %v1112_v22  ;;  %v2156_v46 = vld [vmem:[%s7478_s22 + $0x3bc0] sm:$0xff]  ;;  %v1149_v62 = vld [vmem:[%s7478_s22 + $0x1c48] sm:$0xff] }
 0x396   : > { %v1134_v22 = vld [vmem:[%s7478_s22 + $0x1bd0] sm:$0xff] }
 0x397   : > { %5898 = vmatpush1.bf16.msra.mxu1 %v5897_v31  ;;  %v6941_v31 = vpack.c.bf16 %v2138_v25, %v2136_v29  ;;  %v6959_v29 = vpack.c.bf16 %v2159_v14, %v2157_v37  ;;  %v1137_v25 = vld [vmem:[%s7478_s22 + $0x1be8] sm:$0xff]  ;;  %v2174_v14 = vld [vmem:[%s7478_s22 + $0x3c50] sm:$0xff] }
 0x398   : > { %6922 = vmatpush1.bf16.msra.mxu0 %v6921_v55  ;;  %5900 = vmatprep.subr.bf16.mxu1 %v5899_v33  ;;  %v5919_v55 = vpack.c.bf16 %v1119_v27, %v1117_v53  ;;  %v1116_v33 = vld [vmem:[%s7478_s22 + $0x1b40] sm:$0xff]  ;;  %v1139_v53 = vld [vmem:[%s7478_s22 + $0x1bf8] sm:$0xff]  ;;  %v2161_v27 = vld [vmem:[%s7478_s22 + $0x3be8] sm:$0xff] }
 0x399   : > { %6924 = vmatprep.subr.bf16.mxu0 %v6923_v36  ;;  %v2142_v36 = vld [vmem:[%s7478_s22 + $0x3b50] sm:$0xff]  ;;  %v5921_v43 = vpack.c.bf16 %v1118_v32, %v1116_v33  ;;  %v2160_v32 = vld [vmem:[%s7478_s22 + $0x3be0] sm:$0xff] }
 0x39a   : > { %v1138_v33 = vld [vmem:[%s7478_s22 + $0x1bf0] sm:$0xff] }
 0x39b   : > { %5902 = vmatpush1.bf16.msra.mxu1 %v5901_v2  ;;  %v6945_v2 = vpack.c.bf16 %v2142_v36, %v2140_v34  ;;  %v6963_v34 = vpack.c.bf16 %v2163_v50, %v2161_v27  ;;  %v1141_v36 = vld [vmem:[%s7478_s22 + $0x1c08] sm:$0xff]  ;;  %v2178_v27 = vld [vmem:[%s7478_s22 + $0x3c70] sm:$0xff] }
 0x39c   : > { %6926 = vmatpush1.bf16.msra.mxu0 %v6925_v44  ;;  %5904 = vmatprep.subr.bf16.mxu1 %v5903_v45  ;;  %v5923_v44 = vpack.c.bf16 %v1123_v40, %v1121_v38  ;;  %v1120_v45 = vld [vmem:[%s7478_s22 + $0x1b60] sm:$0xff]  ;;  %v1143_v38 = vld [vmem:[%s7478_s22 + $0x1c18] sm:$0xff]  ;;  %v2165_v40 = vld [vmem:[%s7478_s22 + $0x3c08] sm:$0xff] }
 0x39d   : > { %6928 = vmatprep.subr.bf16.mxu0 %v6927_v51  ;;  %v2146_v51 = vld [vmem:[%s7478_s22 + $0x3b70] sm:$0xff]  ;;  %v5925_v58 = vpack.c.bf16 %v1122_v48, %v1120_v45  ;;  %v5943_v45 = vpack.c.bf16 %v1143_v38, %v1141_v36  ;;  %v1140_v48 = vld [vmem:[%s7478_s22 + $0x1c00] sm:$0xff]  ;;  %v1157_v50 = vld [vmem:[%s7478_s22 + $0x1c88] sm:$0xff] }
 0x39e   : > { %v2180_v36 = vld [vmem:[%s7478_s22 + $0x3c80] sm:$0xff] }
 0x39f   : > { %5906 = vmatpush1.bf16.msra.mxu1 %v5905_v17  ;;  %v6949_v17 = vpack.c.bf16 %v2146_v51, %v2144_v5  ;;  %v1142_v5 = vld [vmem:[%s7478_s22 + $0x1c10] sm:$0xff]  ;;  %v6967_v51 = vpack.c.bf16 %v2167_v41, %v2165_v40  ;;  %v1161_v41 = vld [vmem:[%s7478_s22 + $0x1ca8] sm:$0xff] }
 0x3a0   : > { %6930 = vmatpush1.bf16.msra.mxu0 %v6929_v59  ;;  %5908 = vmatprep.subr.bf16.mxu1 %v5907_v15  ;;  %v5927_v59 = vpack.c.bf16 %v1127_v11, %v1125_v54  ;;  %v1124_v15 = vld [vmem:[%s7478_s22 + $0x1b80] sm:$0xff]  ;;  %v2166_v54 = vld [vmem:[%s7478_s22 + $0x3c10] sm:$0xff]  ;;  %v1145_v11 = vld [vmem:[%s7478_s22 + $0x1c28] sm:$0xff] }
 0x3a1   : > { %6932 = vmatprep.subr.bf16.mxu0 %v6931_v61  ;;  %v2150_v61 = vld [vmem:[%s7478_s22 + $0x3b90] sm:$0xff]  ;;  %v5929_v23 = vpack.c.bf16 %v1126_v47, %v1124_v15  ;;  %v5945_v15 = vpack.c.bf16 %v1142_v5, %v1140_v48 }
 0x3a2   : > { %v2182_v40 = vld [vmem:[%s7478_s22 + $0x3c90] sm:$0xff] }
 0x3a3   : > { %5910 = vmatpush1.bf16.msra.mxu1 %v5909_v39  ;;  %v6953_v39 = vpack.c.bf16 %v2150_v61, %v2148_v60  ;;  %v5947_v60 = vpack.c.bf16 %v1147_v56, %v1145_v11  ;;  %v1146_v61 = vld [vmem:[%s7478_s22 + $0x1c30] sm:$0xff]  ;;  %v6985_v5 = vpack.c.bf16 %v2182_v40, %v2180_v36  ;;  %v2184_v11 = vld [vmem:[%s7478_s22 + $0x3ca0] sm:$0xff] }
 0x3a4   : > { %6934 = vmatpush1.bf16.msra.mxu0 %v6933_v1  ;;  %5912 = vmatprep.subr.bf16.mxu1 %v5911_v3  ;;  %v5931_v1 = vpack.c.bf16 %v1131_v35, %v1129_v19  ;;  %v1128_v3 = vld [vmem:[%s7478_s22 + $0x1ba0] sm:$0xff]  ;;  %v1178_v36 = vld [vmem:[%s7478_s22 + $0x1d30] sm:$0xff] }
 0x3a5   : > { %6936 = vmatprep.subr.bf16.mxu0 %v6935_v9  ;;  %v2154_v9 = vld [vmem:[%s7478_s22 + $0x3bb0] sm:$0xff]  ;;  %v5933_v16 = vpack.c.bf16 %v1130_v4, %v1128_v3  ;;  %v2168_v19 = vld [vmem:[%s7478_s22 + $0x3c20] sm:$0xff]  ;;  %v2175_v3 = vld [vmem:[%s7478_s22 + $0x3c58] sm:$0xff] }
 0x3a7   : > { %5914 = vmatpush1.bf16.msra.mxu1 %v5913_v18  ;;  %v6957_v18 = vpack.c.bf16 %v2154_v9, %v2152_v6 }
 0x3a8   : > { %6938 = vmatpush1.bf16.msra.mxu0 %v6937_v26  ;;  %5916 = vmatprep.subr.bf16.mxu1 %v5915_v20  ;;  %v5935_v26 = vpack.c.bf16 %v1135_v13, %v1133_v10  ;;  %v1132_v20 = vld [vmem:[%s7478_s22 + $0x1bc0] sm:$0xff] }
 0x3a9   : > { %6940 = vmatprep.subr.bf16.mxu0 %v6939_v24  ;;  %v2158_v24 = vld [vmem:[%s7478_s22 + $0x3bd0] sm:$0xff]  ;;  %v5937_v63 = vpack.c.bf16 %v1134_v22, %v1132_v20  ;;  %v1148_v10 = vld [vmem:[%s7478_s22 + $0x1c40] sm:$0xff] }
 0x3aa   : > { %v2172_v13 = vld [vmem:[%s7478_s22 + $0x3c40] sm:$0xff] }
 0x3ab   : > { %5918 = vmatpush1.bf16.msra.mxu1 %v5917_v28  ;;  %v6961_v28 = vpack.c.bf16 %v2158_v24, %v2156_v46  ;;  %v6977_v22 = vpack.c.bf16 %v2174_v14, %v2172_v13  ;;  %v1154_v24 = vld [vmem:[%s7478_s22 + $0x1c70] sm:$0xff] }
 0x3ac   : > { %6942 = vmatpush1.bf16.msra.mxu0 %v6941_v31  ;;  %5920 = vmatprep.subr.bf16.mxu1 %v5919_v55  ;;  %v5939_v31 = vpack.c.bf16 %v1139_v53, %v1137_v25  ;;  %v1136_v55 = vld [vmem:[%s7478_s22 + $0x1be0] sm:$0xff]  ;;  %v1170_v13 = vld [vmem:[%s7478_s22 + $0x1cf0] sm:$0xff] }
 0x3ad   : > { %6944 = vmatprep.subr.bf16.mxu0 %v6943_v7  ;;  %v2162_v7 = vld [vmem:[%s7478_s22 + $0x3bf0] sm:$0xff]  ;;  %v2176_v25 = vld [vmem:[%s7478_s22 + $0x3c60] sm:$0xff] }
 0x3af   : > { %5922 = vmatpush1.bf16.msra.mxu1 %v5921_v43  ;;  %v5941_v43 = vpack.c.bf16 %v1138_v33, %v1136_v55  ;;  %v6981_v33 = vpack.c.bf16 %v2178_v27, %v2176_v25  ;;  %v1174_v25 = vld [vmem:[%s7478_s22 + $0x1d10] sm:$0xff] }
 0x3b0   : > { %6946 = vmatpush1.bf16.msra.mxu0 %v6945_v2  ;;  %5924 = vmatprep.subr.bf16.mxu1 %v5923_v44  ;;  %v9552_v2 = vld [vmem:[%s7496_s29 + $0x78] sm:$0xff]  ;;  %v6965_v44 = vpack.c.bf16 %v2162_v7, %v2160_v32  ;;  %v1158_v7 = vld [vmem:[%s7478_s22 + $0x1c90] sm:$0xff] }
 0x3b1   : > { %6948 = vmatprep.subr.bf16.mxu0 %v6947_v49  ;;  %v2164_v49 = vld [vmem:[%s7478_s22 + $0x3c00] sm:$0xff] }
 0x3b2   : > { %v6969_v47 = vpack.c.bf16 %v2166_v54, %v2164_v49  ;;  %v1162_v54 = vld [vmem:[%s7478_s22 + $0x1cb0] sm:$0xff] }
 0x3b3   : > { %5926 = vmatpush1.bf16.msra.mxu1 %v5925_v58  ;;  %v2169_v58 = vld [vmem:[%s7478_s22 + $0x3c28] sm:$0xff] }
 0x3b4   : > { %6950 = vmatpush1.bf16.msra.mxu0 %v6949_v17  ;;  %5928 = vmatprep.subr.bf16.mxu1 %v5927_v59  ;;  %v2171_v17 = vld [vmem:[%s7478_s22 + $0x3c38] sm:$0xff]  ;;  %v9568_v59 = vrot.slane %v9552_v2, %v7592_v12 }
 0x3b5   : > { %6952 = vmatprep.subr.bf16.mxu0 %v6951_v21  ;;  %v1144_v21 = vld [vmem:[%s7478_s22 + $0x1c20] sm:$0xff]  ;;  %v6971_v35 = vpack.c.bf16 %v2171_v17, %v2169_v58  ;;  %v2186_v58 = vld [vmem:[%s7478_s22 + $0x3cb0] sm:$0xff]  ;;  %v1165_v17 = vld [vmem:[%s7478_s22 + $0x1cc8] sm:$0xff] }
 0x3b6   : > { %v2578_v4 = vcombine.high %v9568_v59, %v9568_v59  ;;  %v5949_v6 = vpack.c.bf16 %v1146_v61, %v1144_v21  ;;  %v6989_v61 = vpack.c.bf16 %v2186_v58, %v2184_v11  ;;  %v1182_v11 = vld [vmem:[%s7478_s22 + $0x1d50] sm:$0xff] }
 0x3b7   : > { %5930 = vmatpush1.bf16.msra.mxu1 %v5929_v23  ;;  %v1151_v23 = vld [vmem:[%s7478_s22 + $0x1c58] sm:$0xff] }
 0x3b8   : > { %6954 = vmatpush1.bf16.msra.mxu0 %v6953_v39  ;;  %5932 = vmatprep.subr.bf16.mxu1 %v5931_v1  ;;  %v2442_v39 = vcombine.high %v9562_v57, %v9562_v57  ;;  %v2173_v1 = vld [vmem:[%s7478_s22 + $0x3c48] sm:$0xff]  ;;  %v5951_v9 = vpack.c.bf16 %v1151_v23, %v1149_v62  ;;  %v2188_v62 = vld [vmem:[%s7478_s22 + $0x3cc0] sm:$0xff] }
 0x3b9   : > { %6956 = vmatprep.subr.bf16.mxu0 %v6955_v8  ;;  %v6973_v8 = vpack.c.bf16 %v2170_v30, %v2168_v19  ;;  %v6975_v37 = vpack.c.bf16 %v2175_v3, %v2173_v1  ;;  %v1166_v30 = vld [vmem:[%s7478_s22 + $0x1cd0] sm:$0xff]  ;;  %v1169_v1 = vld [vmem:[%s7478_s22 + $0x1ce8] sm:$0xff]  ;;  %v1171_v3 = vld [vmem:[%s7478_s22 + $0x1cf8] sm:$0xff] }
 0x3bb   : > { %5934 = vmatpush1.bf16.msra.mxu1 %v5933_v16  ;;  %v1153_v16 = vld [vmem:[%s7478_s22 + $0x1c68] sm:$0xff] }
 0x3bc   : > { %6958 = vmatpush1.bf16.msra.mxu0 %v6957_v18  ;;  %5936 = vmatprep.subr.bf16.mxu1 %v5935_v26  ;;  %v1155_v18 = vld [vmem:[%s7478_s22 + $0x1c78] sm:$0xff] }
 0x3bd   : > { %6960 = vmatprep.subr.bf16.mxu0 %v6959_v29  ;;  %v2179_v26 = vld [vmem:[%s7478_s22 + $0x3c78] sm:$0xff]  ;;  %v5955_v46 = vpack.c.bf16 %v1155_v18, %v1153_v16  ;;  %v1152_v29 = vld [vmem:[%s7478_s22 + $0x1c60] sm:$0xff]  ;;  %v2194_v16 = vld [vmem:[%s7478_s22 + $0x3cf0] sm:$0xff] }
 0x3be   : > { %v5957_v55 = vpack.c.bf16 %v1154_v24, %v1152_v29  ;;  %v1173_v18 = vld [vmem:[%s7478_s22 + $0x1d08] sm:$0xff]  ;;  %v1172_v24 = vld [vmem:[%s7478_s22 + $0x1d00] sm:$0xff] }
 0x3bf   : > { %5938 = vmatpush1.bf16.msra.mxu1 %v5937_v63  ;;  %v1159_v63 = vld [vmem:[%s7478_s22 + $0x1c98] sm:$0xff] }
 0x3c0   : > { %6962 = vmatpush1.bf16.msra.mxu0 %v6961_v28  ;;  %5940 = vmatprep.subr.bf16.mxu1 %v5939_v31  ;;  %v2181_v28 = vld [vmem:[%s7478_s22 + $0x3c88] sm:$0xff]  ;;  %v2183_v31 = vld [vmem:[%s7478_s22 + $0x3c98] sm:$0xff]  ;;  %v5959_v32 = vpack.c.bf16 %v1159_v63, %v1157_v50  ;;  %v2198_v50 = vld [vmem:[%s7478_s22 + $0x3d10] sm:$0xff] }
 0x3c1   : > { %6964 = vmatprep.subr.bf16.mxu0 %v6963_v34  ;;  %v1156_v34 = vld [vmem:[%s7478_s22 + $0x1c80] sm:$0xff]  ;;  %v6983_v38 = vpack.c.bf16 %v2183_v31, %v2181_v28  ;;  %v1177_v63 = vld [vmem:[%s7478_s22 + $0x1d28] sm:$0xff]  ;;  %v1179_v28 = vld [vmem:[%s7478_s22 + $0x1d38] sm:$0xff] }
 0x3c2   : > { %v5961_v48 = vpack.c.bf16 %v1158_v7, %v1156_v34  ;;  %v2201_v31 = vld [vmem:[%s7478_s22 + $0x3d28] sm:$0xff]  ;;  %v5979_v34 = vpack.c.bf16 %v1179_v28, %v1177_v63  ;;  %v1176_v7 = vld [vmem:[%s7478_s22 + $0x1d20] sm:$0xff]  ;;  %v2218_v63 = vld [vmem:[%s7478_s22 + $0x3db0] sm:$0xff] }
 0x3c3   : > { %5942 = vmatpush1.bf16.msra.mxu1 %v5941_v43  ;;  %v1163_v43 = vld [vmem:[%s7478_s22 + $0x1cb8] sm:$0xff]  ;;  %v1197_v28 = vld [vmem:[%s7478_s22 + $0x1dc8] sm:$0xff] }
 0x3c4   : > { %6966 = vmatpush1.bf16.msra.mxu0 %v6965_v44  ;;  %5944 = vmatprep.subr.bf16.mxu1 %v5943_v45  ;;  %v2185_v44 = vld [vmem:[%s7478_s22 + $0x3ca8] sm:$0xff]  ;;  %v2187_v45 = vld [vmem:[%s7478_s22 + $0x3cb8] sm:$0xff]  ;;  %v5963_v49 = vpack.c.bf16 %v1163_v43, %v1161_v41  ;;  %v2202_v41 = vld [vmem:[%s7478_s22 + $0x3d30] sm:$0xff] }
 0x3c5   : > { %6968 = vmatprep.subr.bf16.mxu0 %v6967_v51  ;;  %v1160_v51 = vld [vmem:[%s7478_s22 + $0x1ca0] sm:$0xff]  ;;  %v6987_v56 = vpack.c.bf16 %v2187_v45, %v2185_v44  ;;  %v1181_v43 = vld [vmem:[%s7478_s22 + $0x1d48] sm:$0xff]  ;;  %v1183_v44 = vld [vmem:[%s7478_s22 + $0x1d58] sm:$0xff] }
 0x3c6   : > { %3632 = vmatmul.mubr.f32.vlgmr.msra.gmra.mrb[0].mxu1 %v9415_v52  ;;  %v1150_v52 = vld [vmem:[%s7478_s22 + $0x1c50] sm:$0xff]  ;;  %v5965_v21 = vpack.c.bf16 %v1162_v54, %v1160_v51  ;;  %v2205_v45 = vld [vmem:[%s7478_s22 + $0x3d48] sm:$0xff]  ;;  %v5983_v51 = vpack.c.bf16 %v1183_v44, %v1181_v43  ;;  %v1180_v54 = vld [vmem:[%s7478_s22 + $0x1d40] sm:$0xff] }
 0x3c7   : > { %5946 = vmatpush1.bf16.msra.mxu1 %v5945_v15  ;;  %4768 = vmatmul.mubr.f32.vlgmr.msra.gmra.mrb[0].mxu0 %v9420_v0  ;;  %v2177_v0 = vld [vmem:[%s7478_s22 + $0x3c68] sm:$0xff]  ;;  %v5953_v20 = vpack.c.bf16 %v1150_v52, %v1148_v10  ;;  %v1167_v15 = vld [vmem:[%s7478_s22 + $0x1cd8] sm:$0xff]  ;;  %v5971_v10 = vpack.c.bf16 %v1171_v3, %v1169_v1  ;;  %v1168_v52 = vld [vmem:[%s7478_s22 + $0x1ce0] sm:$0xff] }
 0x3c8   : > { %6970 = vmatpush1.bf16.msra.mxu0 %v6969_v47  ;;  %5948 = vmatprep.subr.bf16.mxu1 %v5947_v60  ;;  %v6979_v53 = vpack.c.bf16 %v2179_v26, %v2177_v0  ;;  %v2189_v47 = vld [vmem:[%s7478_s22 + $0x3cc8] sm:$0xff]  ;;  %v2191_v60 = vld [vmem:[%s7478_s22 + $0x3cd8] sm:$0xff]  ;;  %v5967_v19 = vpack.c.bf16 %v1167_v15, %v1165_v17  ;;  %v2206_v17 = vld [vmem:[%s7478_s22 + $0x3d50] sm:$0xff] }
 0x3c9   : > { %6972 = vmatprep.subr.bf16.mxu0 %v6971_v35  ;;  %3702 = vmatprep.mubr.f32.mxu1 %v2442_v39  ;;  %v1164_v35 = vld [vmem:[%s7478_s22 + $0x1cc0] sm:$0xff]  ;;  %v6991_v23 = vpack.c.bf16 %v2191_v60, %v2189_v47  ;;  %v2190_v39 = vld [vmem:[%s7478_s22 + $0x3cd0] sm:$0xff]  ;;  %v1175_v0 = vld [vmem:[%s7478_s22 + $0x1d18] sm:$0xff] }
 0x3ca   : > { %4838 = vmatprep.mubr.f32.mxu0 %v2578_v4  ;;  %v2193_v4 = vld [vmem:[%s7478_s22 + $0x3ce8] sm:$0xff]  ;;  %v5975_v29 = vpack.c.bf16 %v1175_v0, %v1173_v18  ;;  %v1187_v47 = vld [vmem:[%s7478_s22 + $0x1d78] sm:$0xff]  ;;  %v2210_v1 = vld [vmem:[%s7478_s22 + $0x3d70] sm:$0xff] }
 0x3cb   : > { %5950 = vmatpush1.bf16.msra.mxu1 %v5949_v6  ;;  %v2195_v6 = vld [vmem:[%s7478_s22 + $0x3cf8] sm:$0xff]  ;;  %v2197_v26 = vld [vmem:[%s7478_s22 + $0x3d08] sm:$0xff]  ;;  %v2214_v18 = vld [vmem:[%s7478_s22 + $0x3d90] sm:$0xff] }
 0x3cc   : > { %6974 = vmatpush1.bf16.msra.mxu0 %v6973_v8  ;;  %5952 = vmatprep.subr.bf16.mxu1 %v5951_v9  ;;  %v5969_v8 = vpack.c.bf16 %v1166_v30, %v1164_v35  ;;  %v6993_v9 = vpack.c.bf16 %v2190_v39, %v2188_v62  ;;  %v6995_v14 = vpack.c.bf16 %v2195_v6, %v2193_v4  ;;  %v1185_v15 = vld [vmem:[%s7478_s22 + $0x1d68] sm:$0xff]  ;;  %v1184_v30 = vld [vmem:[%s7478_s22 + $0x1d60] sm:$0xff]  ;;  %v1186_v62 = vld [vmem:[%s7478_s22 + $0x1d70] sm:$0xff] }
 0x3cd   : > { %6976 = vmatprep.subr.bf16.mxu0 %v6975_v37  ;;  %v2192_v37 = vld [vmem:[%s7478_s22 + $0x3ce0] sm:$0xff]  ;;  %v2209_v60 = vld [vmem:[%s7478_s22 + $0x3d68] sm:$0xff]  ;;  %v5987_v35 = vpack.c.bf16 %v1187_v47, %v1185_v15  ;;  %v1191_v4 = vld [vmem:[%s7478_s22 + $0x1d98] sm:$0xff] }
 0x3ce   : > { %v1189_v3 = vld [vmem:[%s7478_s22 + $0x1d88] sm:$0xff]  ;;  %v2222_v43 = vld [vmem:[%s7478_s22 + $0x3dd0] sm:$0xff] }
 0x3cf   : > { %5954 = vmatpush1.bf16.msra.mxu1 %v5953_v20  ;;  %v2199_v20 = vld [vmem:[%s7478_s22 + $0x3d18] sm:$0xff]  ;;  %v2213_v6 = vld [vmem:[%s7478_s22 + $0x3d88] sm:$0xff]  ;;  %v2226_v15 = vld [vmem:[%s7478_s22 + $0x3df0] sm:$0xff] }
 0x3d0   : > { %6978 = vmatpush1.bf16.msra.mxu0 %v6977_v22  ;;  %5956 = vmatprep.subr.bf16.mxu1 %v5955_v46  ;;  %v5973_v22 = vpack.c.bf16 %v1170_v13, %v1168_v52  ;;  %v6997_v46 = vpack.c.bf16 %v2194_v16, %v2192_v37  ;;  %v6999_v27 = vpack.c.bf16 %v2199_v20, %v2197_v26  ;;  %v1188_v13 = vld [vmem:[%s7478_s22 + $0x1d80] sm:$0xff]  ;;  %v1190_v37 = vld [vmem:[%s7478_s22 + $0x1d90] sm:$0xff]  ;;  %v1193_v0 = vld [vmem:[%s7478_s22 + $0x1da8] sm:$0xff] }
 0x3d1   : > { %6980 = vmatprep.subr.bf16.mxu0 %v6979_v53  ;;  %v2196_v53 = vld [vmem:[%s7478_s22 + $0x3d00] sm:$0xff]  ;;  %v5991_v52 = vpack.c.bf16 %v1191_v4, %v1189_v3  ;;  %v1195_v26 = vld [vmem:[%s7478_s22 + $0x1db8] sm:$0xff]  ;;  %v2217_v20 = vld [vmem:[%s7478_s22 + $0x3da8] sm:$0xff] }
 0x3d2   : > { %v1201_v44 = vld [vmem:[%s7478_s22 + $0x1de8] sm:$0xff]  ;;  %v2228_v3 = vld [vmem:[%s7478_s22 + $0x3e00] sm:$0xff]  ;;  %v2230_v4 = vld [vmem:[%s7478_s22 + $0x3e10] sm:$0xff] }
 0x3d3   : > { %5958 = vmatpush1.bf16.msra.mxu1 %v5957_v55  ;;  %v2203_v55 = vld [vmem:[%s7478_s22 + $0x3d38] sm:$0xff]  ;;  %v1205_v47 = vld [vmem:[%s7478_s22 + $0x1e08] sm:$0xff] }
 0x3d4   : > { %6982 = vmatpush1.bf16.msra.mxu0 %v6981_v33  ;;  %5960 = vmatprep.subr.bf16.mxu1 %v5959_v32  ;;  %v5977_v33 = vpack.c.bf16 %v1174_v25, %v1172_v24  ;;  %v7001_v32 = vpack.c.bf16 %v2198_v50, %v2196_v53  ;;  %v7003_v40 = vpack.c.bf16 %v2203_v55, %v2201_v31  ;;  %v1192_v25 = vld [vmem:[%s7478_s22 + $0x1da0] sm:$0xff]  ;;  %v1194_v53 = vld [vmem:[%s7478_s22 + $0x1db0] sm:$0xff]  ;;  %v1199_v31 = vld [vmem:[%s7478_s22 + $0x1dd8] sm:$0xff] }
 0x3d5   : > { %6984 = vmatprep.subr.bf16.mxu0 %v6983_v38  ;;  %v2200_v38 = vld [vmem:[%s7478_s22 + $0x3d20] sm:$0xff]  ;;  %v5995_v24 = vpack.c.bf16 %v1195_v26, %v1193_v0  ;;  %v2221_v55 = vld [vmem:[%s7478_s22 + $0x3dc8] sm:$0xff] }
 0x3d6   : > { %v2232_v0 = vld [vmem:[%s7478_s22 + $0x3e20] sm:$0xff] }
 0x3d7   : > { %5962 = vmatpush1.bf16.msra.mxu1 %v5961_v48  ;;  %v2207_v48 = vld [vmem:[%s7478_s22 + $0x3d58] sm:$0xff] }
 0x3d8   : > { %6986 = vmatpush1.bf16.msra.mxu0 %v6985_v5  ;;  %5964 = vmatprep.subr.bf16.mxu1 %v5963_v49  ;;  %v5981_v5 = vpack.c.bf16 %v1178_v36, %v1176_v7  ;;  %v7005_v49 = vpack.c.bf16 %v2202_v41, %v2200_v38  ;;  %v7007_v58 = vpack.c.bf16 %v2207_v48, %v2205_v45  ;;  %v1196_v36 = vld [vmem:[%s7478_s22 + $0x1dc0] sm:$0xff]  ;;  %v1198_v38 = vld [vmem:[%s7478_s22 + $0x1dd0] sm:$0xff]  ;;  %v1203_v45 = vld [vmem:[%s7478_s22 + $0x1df8] sm:$0xff] }
 0x3d9   : > { %6988 = vmatprep.subr.bf16.mxu0 %v6987_v56  ;;  %v2204_v56 = vld [vmem:[%s7478_s22 + $0x3d40] sm:$0xff]  ;;  %v5999_v7 = vpack.c.bf16 %v1199_v31, %v1197_v28  ;;  %v2225_v48 = vld [vmem:[%s7478_s22 + $0x3de8] sm:$0xff] }
 0x3da   : > { %v1212_v28 = vld [vmem:[%s7478_s22 + $0x1e40] sm:$0xff] }
 0x3db   : > { %5966 = vmatpush1.bf16.msra.mxu1 %v5965_v21  ;;  %v2211_v21 = vld [vmem:[%s7478_s22 + $0x3d78] sm:$0xff]  ;;  %v2236_v31 = vld [vmem:[%s7478_s22 + $0x3e40] sm:$0xff] }
 0x3dc   : > { %6990 = vmatpush1.bf16.msra.mxu0 %v6989_v61  ;;  %5968 = vmatprep.subr.bf16.mxu1 %v5967_v19  ;;  %v5985_v61 = vpack.c.bf16 %v1182_v11, %v1180_v54  ;;  %v7009_v19 = vpack.c.bf16 %v2206_v17, %v2204_v56  ;;  %v7011_v39 = vpack.c.bf16 %v2211_v21, %v2209_v60  ;;  %v1200_v11 = vld [vmem:[%s7478_s22 + $0x1de0] sm:$0xff]  ;;  %v1202_v56 = vld [vmem:[%s7478_s22 + $0x1df0] sm:$0xff]  ;;  %v1207_v60 = vld [vmem:[%s7478_s22 + $0x1e18] sm:$0xff] }
 0x3dd   : > { %6992 = vmatprep.subr.bf16.mxu0 %v6991_v23  ;;  %v2208_v23 = vld [vmem:[%s7478_s22 + $0x3d60] sm:$0xff]  ;;  %v6003_v54 = vpack.c.bf16 %v1203_v45, %v1201_v44  ;;  %v2427_v21 = vcombine.high %v9549_v42, %v9549_v42 }
 0x3de   : > { %v2240_v44 = vld [vmem:[%s7478_s22 + $0x3e60] sm:$0xff] }
 0x3df   : > { %5970 = vmatpush1.bf16.msra.mxu1 %v5969_v8  ;;  %v2215_v8 = vld [vmem:[%s7478_s22 + $0x3d98] sm:$0xff] }
 0x3e0   : > { %6994 = vmatpush1.bf16.msra.mxu0 %v6993_v9  ;;  %5972 = vmatprep.subr.bf16.mxu1 %v5971_v10  ;;  %v5989_v9 = vpack.c.bf16 %v1186_v62, %v1184_v30  ;;  %v7013_v10 = vpack.c.bf16 %v2210_v1, %v2208_v23  ;;  %v7015_v16 = vpack.c.bf16 %v2215_v8, %v2213_v6  ;;  %v1206_v1 = vld [vmem:[%s7478_s22 + $0x1e10] sm:$0xff]  ;;  %v1209_v6 = vld [vmem:[%s7478_s22 + $0x1e28] sm:$0xff]  ;;  %v1211_v8 = vld [vmem:[%s7478_s22 + $0x1e38] sm:$0xff] }
 0x3e1   : > { %6996 = vmatprep.subr.bf16.mxu0 %v6995_v14  ;;  %v2212_v14 = vld [vmem:[%s7478_s22 + $0x3d80] sm:$0xff]  ;;  %v6005_v30 = vpack.c.bf16 %v1202_v56, %v1200_v11  ;;  %v6007_v23 = vpack.c.bf16 %v1207_v60, %v1205_v47 }
 0x3e2   : > { %v2244_v47 = vld [vmem:[%s7478_s22 + $0x3e80] sm:$0xff] }
 0x3e3   : > { %5974 = vmatpush1.bf16.msra.mxu1 %v5973_v22  ;;  %v2219_v22 = vld [vmem:[%s7478_s22 + $0x3db8] sm:$0xff] }
 0x3e4   : > { %6998 = vmatpush1.bf16.msra.mxu0 %v6997_v46  ;;  %5976 = vmatprep.subr.bf16.mxu1 %v5975_v29  ;;  %v5993_v46 = vpack.c.bf16 %v1190_v37, %v1188_v13  ;;  %v7017_v29 = vpack.c.bf16 %v2214_v18, %v2212_v14  ;;  %v7019_v50 = vpack.c.bf16 %v2219_v22, %v2217_v20  ;;  %v1210_v18 = vld [vmem:[%s7478_s22 + $0x1e30] sm:$0xff]  ;;  %v1213_v22 = vld [vmem:[%s7478_s22 + $0x1e48] sm:$0xff] }
 0x3e5   : > { %7000 = vmatprep.subr.bf16.mxu0 %v6999_v27  ;;  %v2216_v27 = vld [vmem:[%s7478_s22 + $0x3da0] sm:$0xff]  ;;  %v7033_v37 = vpack.c.bf16 %v2230_v4, %v2228_v3  ;;  %v6011_v14 = vpack.c.bf16 %v1211_v8, %v1209_v6  ;;  %v2234_v20 = vld [vmem:[%s7478_s22 + $0x3e30] sm:$0xff]  ;;  %v1229_v8 = vld [vmem:[%s7478_s22 + $0x1ec8] sm:$0xff] }
 0x3e6   : > { %v1226_v3 = vld [vmem:[%s7478_s22 + $0x1eb0] sm:$0xff] }
 0x3e7   : > { %5978 = vmatpush1.bf16.msra.mxu1 %v5977_v33  ;;  %v2223_v33 = vld [vmem:[%s7478_s22 + $0x3dd8] sm:$0xff]  ;;  %v2250_v6 = vld [vmem:[%s7478_s22 + $0x3eb0] sm:$0xff] }
 0x3e8   : > { %7002 = vmatpush1.bf16.msra.mxu0 %v7001_v32  ;;  %5980 = vmatprep.subr.bf16.mxu1 %v5979_v34  ;;  %v5997_v32 = vpack.c.bf16 %v1194_v53, %v1192_v25  ;;  %v7021_v34 = vpack.c.bf16 %v2218_v63, %v2216_v27  ;;  %v7023_v41 = vpack.c.bf16 %v2223_v33, %v2221_v55  ;;  %v2239_v25 = vld [vmem:[%s7478_s22 + $0x3e58] sm:$0xff]  ;;  %v2238_v33 = vld [vmem:[%s7478_s22 + $0x3e50] sm:$0xff] }
 0x3e9   : > { %7004 = vmatprep.subr.bf16.mxu0 %v7003_v40  ;;  %v2220_v40 = vld [vmem:[%s7478_s22 + $0x3dc0] sm:$0xff] }
 0x3eb   : > { %5982 = vmatpush1.bf16.msra.mxu1 %v5981_v5  ;;  %v2227_v5 = vld [vmem:[%s7478_s22 + $0x3df8] sm:$0xff] }
 0x3ec   : > { %7006 = vmatpush1.bf16.msra.mxu0 %v7005_v49  ;;  %5984 = vmatprep.subr.bf16.mxu1 %v5983_v51  ;;  %v6001_v49 = vpack.c.bf16 %v1198_v38, %v1196_v36  ;;  %v7025_v51 = vpack.c.bf16 %v2222_v43, %v2220_v40  ;;  %v7027_v17 = vpack.c.bf16 %v2227_v5, %v2225_v48  ;;  %v1218_v43 = vld [vmem:[%s7478_s22 + $0x1e70] sm:$0xff]  ;;  %v1221_v5 = vld [vmem:[%s7478_s22 + $0x1e88] sm:$0xff] }
 0x3ed   : > { %7008 = vmatprep.subr.bf16.mxu0 %v7007_v58  ;;  %v2224_v58 = vld [vmem:[%s7478_s22 + $0x3de0] sm:$0xff]  ;;  %v7041_v38 = vpack.c.bf16 %v2238_v33, %v2236_v31  ;;  %v2242_v48 = vld [vmem:[%s7478_s22 + $0x3e70] sm:$0xff]  ;;  %v1237_v33 = vld [vmem:[%s7478_s22 + $0x1f08] sm:$0xff] }
 0x3ee   : > { %v7029_v62 = vpack.c.bf16 %v2226_v15, %v2224_v58  ;;  %v7045_v56 = vpack.c.bf16 %v2242_v48, %v2240_v44  ;;  %v1222_v15 = vld [vmem:[%s7478_s22 + $0x1e90] sm:$0xff]  ;;  %v1241_v48 = vld [vmem:[%s7478_s22 + $0x1f28] sm:$0xff] }
 0x3ef   : > { %5986 = vmatpush1.bf16.msra.mxu1 %v5985_v61  ;;  %v2229_v61 = vld [vmem:[%s7478_s22 + $0x3e08] sm:$0xff] }
 0x3f0   : > { %7010 = vmatpush1.bf16.msra.mxu0 %v7009_v19  ;;  %5988 = vmatprep.subr.bf16.mxu1 %v5987_v35  ;;  %v2231_v19 = vld [vmem:[%s7478_s22 + $0x3e18] sm:$0xff]  ;;  %v2563_v35 = vcombine.high %v9552_v2, %v9552_v2  ;;  %v9707_v2 = vrot.slane %v2427_v21, %v7592_v12  ;;  %v2246_v21 = vld [vmem:[%s7478_s22 + $0x3e90] sm:$0xff] }
 0x3f1   : > { %7012 = vmatprep.subr.bf16.mxu0 %v7011_v39  ;;  %v1204_v39 = vld [vmem:[%s7478_s22 + $0x1e00] sm:$0xff]  ;;  %v7031_v42 = vpack.c.bf16 %v2231_v19, %v2229_v61  ;;  %v1225_v61 = vld [vmem:[%s7478_s22 + $0x1ea8] sm:$0xff]  ;;  %v1227_v19 = vld [vmem:[%s7478_s22 + $0x1eb8] sm:$0xff] }
 0x3f2   : > { %v6009_v13 = vpack.c.bf16 %v1206_v1, %v1204_v39  ;;  %v6027_v39 = vpack.c.bf16 %v1227_v19, %v1225_v61  ;;  %v1224_v1 = vld [vmem:[%s7478_s22 + $0x1ea0] sm:$0xff]  ;;  %v1247_v61 = vld [vmem:[%s7478_s22 + $0x1f58] sm:$0xff]  ;;  %v2269_v19 = vld [vmem:[%s7478_s22 + $0x3f48] sm:$0xff] }
 0x3f3   : > { %5990 = vmatpush1.bf16.msra.mxu1 %v5989_v9  ;;  %v2233_v9 = vld [vmem:[%s7478_s22 + $0x3e28] sm:$0xff] }
 0x3f4   : > { %7014 = vmatpush1.bf16.msra.mxu0 %v7013_v10  ;;  %5992 = vmatprep.subr.bf16.mxu1 %v5991_v52  ;;  %v2235_v10 = vld [vmem:[%s7478_s22 + $0x3e38] sm:$0xff]  ;;  %v9712_v52 = vrot.slane %v2563_v35, %v7592_v12  ;;  %v2249_v35 = vld [vmem:[%s7478_s22 + $0x3ea8] sm:$0xff] }
 0x3f5   : > { %7016 = vmatprep.subr.bf16.mxu0 %v7015_v16  ;;  %v1208_v16 = vld [vmem:[%s7478_s22 + $0x1e20] sm:$0xff]  ;;  %v7035_v26 = vpack.c.bf16 %v2235_v10, %v2233_v9  ;;  %v1231_v9 = vld [vmem:[%s7478_s22 + $0x1ed8] sm:$0xff]  ;;  %v2253_v10 = vld [vmem:[%s7478_s22 + $0x3ec8] sm:$0xff] }
 0x3f6   : > { %v2579_v53 = vcombine.high %v9712_v52, %v9712_v52  ;;  %v6013_v27 = vpack.c.bf16 %v1210_v18, %v1208_v16  ;;  %v6031_v16 = vpack.c.bf16 %v1231_v9, %v1229_v8  ;;  %v1228_v18 = vld [vmem:[%s7478_s22 + $0x1ec0] sm:$0xff]  ;;  %v1251_v8 = vld [vmem:[%s7478_s22 + $0x1f78] sm:$0xff]  ;;  %v2273_v9 = vld [vmem:[%s7478_s22 + $0x3f68] sm:$0xff] }
 0x3f7   : > { %5994 = vmatpush1.bf16.msra.mxu1 %v5993_v46  ;;  %v1215_v46 = vld [vmem:[%s7478_s22 + $0x1e58] sm:$0xff] }
 0x3f8   : > { %7018 = vmatpush1.bf16.msra.mxu0 %v7017_v29  ;;  %5996 = vmatprep.subr.bf16.mxu1 %v5995_v24  ;;  %v2443_v29 = vcombine.high %v9707_v2, %v9707_v2  ;;  %v2237_v24 = vld [vmem:[%s7478_s22 + $0x3e48] sm:$0xff]  ;;  %v6015_v63 = vpack.c.bf16 %v1215_v46, %v1213_v22  ;;  %v2254_v22 = vld [vmem:[%s7478_s22 + $0x3ed0] sm:$0xff] }
 0x3f9   : > { %7020 = vmatprep.subr.bf16.mxu0 %v7019_v50  ;;  %v7037_v50 = vpack.c.bf16 %v2234_v20, %v2232_v0  ;;  %v7039_v55 = vpack.c.bf16 %v2239_v25, %v2237_v24  ;;  %v1230_v0 = vld [vmem:[%s7478_s22 + $0x1ed0] sm:$0xff]  ;;  %v1233_v46 = vld [vmem:[%s7478_s22 + $0x1ee8] sm:$0xff]  ;;  %v2259_v25 = vld [vmem:[%s7478_s22 + $0x3ef8] sm:$0xff] }
 0x3fa   : > { %v2257_v24 = vld [vmem:[%s7478_s22 + $0x3ee8] sm:$0xff] }
 0x3fb   : > { %5998 = vmatpush1.bf16.msra.mxu1 %v5997_v32  ;;  %v1217_v32 = vld [vmem:[%s7478_s22 + $0x1e68] sm:$0xff]  ;;  %v7059_v31 = vpack.c.bf16 %v2259_v25, %v2257_v24  ;;  %v2279_v24 = vld [vmem:[%s7478_s22 + $0x3f98] sm:$0xff] }
 0x3fc   : > { %7022 = vmatpush1.bf16.msra.mxu0 %v7021_v34  ;;  %6000 = vmatprep.subr.bf16.mxu1 %v5999_v7  ;;  %v1219_v34 = vld [vmem:[%s7478_s22 + $0x1e78] sm:$0xff] }
 0x3fd   : > { %7024 = vmatprep.subr.bf16.mxu0 %v7023_v41  ;;  %v2243_v7 = vld [vmem:[%s7478_s22 + $0x3e78] sm:$0xff]  ;;  %v6019_v40 = vpack.c.bf16 %v1219_v34, %v1217_v32  ;;  %v1216_v41 = vld [vmem:[%s7478_s22 + $0x1e60] sm:$0xff]  ;;  %v2261_v34 = vld [vmem:[%s7478_s22 + $0x3f08] sm:$0xff] }
 0x3fe   : > { %v6021_v11 = vpack.c.bf16 %v1218_v43, %v1216_v41  ;;  %v1239_v32 = vld [vmem:[%s7478_s22 + $0x1f18] sm:$0xff]  ;;  %v1238_v41 = vld [vmem:[%s7478_s22 + $0x1f10] sm:$0xff]  ;;  %v2260_v43 = vld [vmem:[%s7478_s22 + $0x3f00] sm:$0xff] }
 0x3ff   : > { %6002 = vmatpush1.bf16.msra.mxu1 %v6001_v49  ;;  %v1223_v49 = vld [vmem:[%s7478_s22 + $0x1e98] sm:$0xff] }
 0x400   : > { %7026 = vmatpush1.bf16.msra.mxu0 %v7025_v51  ;;  %6004 = vmatprep.subr.bf16.mxu1 %v6003_v54  ;;  %v2245_v51 = vld [vmem:[%s7478_s22 + $0x3e88] sm:$0xff]  ;;  %v2247_v54 = vld [vmem:[%s7478_s22 + $0x3e98] sm:$0xff]  ;;  %v6023_v58 = vpack.c.bf16 %v1223_v49, %v1221_v5 }
 0x401   : > { %7028 = vmatprep.subr.bf16.mxu0 %v7027_v17  ;;  %v1220_v17 = vld [vmem:[%s7478_s22 + $0x1e80] sm:$0xff]  ;;  %v7047_v60 = vpack.c.bf16 %v2247_v54, %v2245_v51  ;;  %v1243_v5 = vld [vmem:[%s7478_s22 + $0x1f38] sm:$0xff]  ;;  %v2265_v49 = vld [vmem:[%s7478_s22 + $0x3f28] sm:$0xff] }
 0x402   : > { %v2267_v51 = vld [vmem:[%s7478_s22 + $0x3f38] sm:$0xff] }
 0x403   : > { %6006 = vmatpush1.bf16.msra.mxu1 %v6005_v30  ;;  %v2251_v30 = vld [vmem:[%s7478_s22 + $0x3eb8] sm:$0xff] }
 0x404   : > { %7030 = vmatpush1.bf16.msra.mxu0 %v7029_v62  ;;  %6008 = vmatprep.subr.bf16.mxu1 %v6007_v23  ;;  %v6025_v62 = vpack.c.bf16 %v1222_v15, %v1220_v17  ;;  %v7049_v23 = vpack.c.bf16 %v2246_v21, %v2244_v47  ;;  %v7051_v4 = vpack.c.bf16 %v2251_v30, %v2249_v35  ;;  %v1242_v17 = vld [vmem:[%s7478_s22 + $0x1f30] sm:$0xff]  ;;  %v2264_v15 = vld [vmem:[%s7478_s22 + $0x3f20] sm:$0xff]  ;;  %v1245_v21 = vld [vmem:[%s7478_s22 + $0x1f48] sm:$0xff] }
 0x405   : > { %7032 = vmatprep.subr.bf16.mxu0 %v7031_v42  ;;  %v2248_v42 = vld [vmem:[%s7478_s22 + $0x3ea0] sm:$0xff]  ;;  %v7067_v47 = vpack.c.bf16 %v2267_v51, %v2265_v49  ;;  %v2271_v35 = vld [vmem:[%s7478_s22 + $0x3f58] sm:$0xff] }
 0x406   : > { %3703 = vmatmul.mubr.f32.vlgmr.msra.gmra.mrb[0].mxu1 %v9562_v57  ;;  %v1214_v57 = vld [vmem:[%s7478_s22 + $0x1e50] sm:$0xff]  ;;  %v2287_v49 = vld [vmem:[%s7478_s22 + $0x3fd8] sm:$0xff] }
 0x407   : > { %6010 = vmatpush1.bf16.msra.mxu1 %v6009_v13  ;;  %4839 = vmatmul.mubr.f32.vlgmr.msra.gmra.mrb[0].mxu0 %v9568_v59  ;;  %v2241_v59 = vld [vmem:[%s7478_s22 + $0x3e68] sm:$0xff]  ;;  %v6017_v36 = vpack.c.bf16 %v1214_v57, %v1212_v28  ;;  %v2255_v13 = vld [vmem:[%s7478_s22 + $0x3ed8] sm:$0xff]  ;;  %v1234_v28 = vld [vmem:[%s7478_s22 + $0x1ef0] sm:$0xff] }
 0x408   : > { %7034 = vmatpush1.bf16.msra.mxu0 %v7033_v37  ;;  %6012 = vmatprep.subr.bf16.mxu1 %v6011_v14  ;;  %v7043_v45 = vpack.c.bf16 %v2243_v7, %v2241_v59  ;;  %v6029_v37 = vpack.c.bf16 %v1226_v3, %v1224_v1  ;;  %v7053_v14 = vpack.c.bf16 %v2250_v6, %v2248_v42  ;;  %v2256_v57 = vld [vmem:[%s7478_s22 + $0x3ee0] sm:$0xff]  ;;  %v2263_v59 = vld [vmem:[%s7478_s22 + $0x3f18] sm:$0xff]  ;;  %v1246_v1 = vld [vmem:[%s7478_s22 + $0x1f50] sm:$0xff] }
 0x409   : > { %7036 = vmatprep.subr.bf16.mxu0 %v7035_v26  ;;  %3773 = vmatprep.mubr.f32.mxu1 %v2443_v29  ;;  %v2252_v26 = vld [vmem:[%s7478_s22 + $0x3ec0] sm:$0xff]  ;;  %v7055_v20 = vpack.c.bf16 %v2255_v13, %v2253_v10  ;;  %v1235_v29 = vld [vmem:[%s7478_s22 + $0x1ef8] sm:$0xff]  ;;  %v7063_v44 = vpack.c.bf16 %v2263_v59, %v2261_v34  ;;  %v7071_v42 = vpack.c.bf16 %v2271_v35, %v2269_v19  ;;  %v1249_v6 = vld [vmem:[%s7478_s22 + $0x1f68] sm:$0xff] }
 0x40a   : > { %4909 = vmatprep.mubr.f32.mxu0 %v2579_v53  ;;  %v6033_v53 = vpack.c.bf16 %v1230_v0, %v1228_v18  ;;  %v2268_v3 = vld [vmem:[%s7478_s22 + $0x3f40] sm:$0xff]  ;;  %v2275_v10 = vld [vmem:[%s7478_s22 + $0x3f78] sm:$0xff]  ;;  %v1250_v18 = vld [vmem:[%s7478_s22 + $0x1f70] sm:$0xff] }
 0x40b   : > { %6014 = vmatpush1.bf16.msra.mxu1 %v6013_v27  ;;  %v7057_v27 = vpack.c.bf16 %v2254_v22, %v2252_v26  ;;  %v2272_v0 = vld [vmem:[%s7478_s22 + $0x3f60] sm:$0xff]  ;;  %v7075_v26 = vpack.c.bf16 %v2275_v10, %v2273_v9  ;;  %v1253_v22 = vld [vmem:[%s7478_s22 + $0x1f88] sm:$0xff]  ;;  %v2283_v34 = vld [vmem:[%s7478_s22 + $0x3fb8] sm:$0xff] }
 0x40c   : > { %7038 = vmatpush1.bf16.msra.mxu0 %v7037_v50  ;;  %6016 = vmatprep.subr.bf16.mxu1 %v6015_v63  ;;  %v6035_v50 = vpack.c.bf16 %v1235_v29, %v1233_v46  ;;  %v1232_v63 = vld [vmem:[%s7478_s22 + $0x1ee0] sm:$0xff]  ;;  %v1255_v46 = vld [vmem:[%s7478_s22 + $0x1f98] sm:$0xff]  ;;  %v2277_v29 = vld [vmem:[%s7478_s22 + $0x3f88] sm:$0xff] }
 0x40d   : > { %7040 = vmatprep.subr.bf16.mxu0 %v7039_v55  ;;  %v2258_v55 = vld [vmem:[%s7478_s22 + $0x3ef0] sm:$0xff]  ;;  %v6037_v7 = vpack.c.bf16 %v1234_v28, %v1232_v63  ;;  %v2276_v28 = vld [vmem:[%s7478_s22 + $0x3f80] sm:$0xff]  ;;  %v2291_v19 = vld [vmem:[%s7478_s22 + $0x3ff8] sm:$0xff] }
 0x40e   : > { %v1254_v63 = vld [vmem:[%s7478_s22 + $0x1f90] sm:$0xff] }
 0x40f   : > { %6018 = vmatpush1.bf16.msra.mxu1 %v6017_v36  ;;  %v7061_v36 = vpack.c.bf16 %v2258_v55, %v2256_v57  ;;  %v7079_v57 = vpack.c.bf16 %v2279_v24, %v2277_v29  ;;  %v1257_v55 = vld [vmem:[%s7478_s22 + $0x1fa8] sm:$0xff] }
 0x410   : > { %7042 = vmatpush1.bf16.msra.mxu0 %v7041_v38  ;;  %6020 = vmatprep.subr.bf16.mxu1 %v6019_v40  ;;  %v6039_v38 = vpack.c.bf16 %v1239_v32, %v1237_v33  ;;  %v1236_v40 = vld [vmem:[%s7478_s22 + $0x1f00] sm:$0xff]  ;;  %v1259_v33 = vld [vmem:[%s7478_s22 + $0x1fb8] sm:$0xff]  ;;  %v2281_v32 = vld [vmem:[%s7478_s22 + $0x3fa8] sm:$0xff] }
 0x411   : > { %7044 = vmatprep.subr.bf16.mxu0 %v7043_v45  ;;  %v2262_v45 = vld [vmem:[%s7478_s22 + $0x3f10] sm:$0xff]  ;;  %v6041_v54 = vpack.c.bf16 %v1238_v41, %v1236_v40  ;;  %v2280_v41 = vld [vmem:[%s7478_s22 + $0x3fa0] sm:$0xff] }
 0x412   : > { %v1258_v40 = vld [vmem:[%s7478_s22 + $0x1fb0] sm:$0xff] }
 0x413   : > { %6022 = vmatpush1.bf16.msra.mxu1 %v6021_v11  ;;  %v7065_v11 = vpack.c.bf16 %v2262_v45, %v2260_v43  ;;  %v7083_v43 = vpack.c.bf16 %v2283_v34, %v2281_v32  ;;  %v1261_v45 = vld [vmem:[%s7478_s22 + $0x1fc8] sm:$0xff] }
 0x414   : > { %7046 = vmatpush1.bf16.msra.mxu0 %v7045_v56  ;;  %6024 = vmatprep.subr.bf16.mxu1 %v6023_v58  ;;  %v6043_v56 = vpack.c.bf16 %v1243_v5, %v1241_v48  ;;  %v1240_v58 = vld [vmem:[%s7478_s22 + $0x1f20] sm:$0xff]  ;;  %v1263_v48 = vld [vmem:[%s7478_s22 + $0x1fd8] sm:$0xff]  ;;  %v2285_v5 = vld [vmem:[%s7478_s22 + $0x3fc8] sm:$0xff] }
 0x415   : > { %7048 = vmatprep.subr.bf16.mxu0 %v7047_v60  ;;  %v2266_v60 = vld [vmem:[%s7478_s22 + $0x3f30] sm:$0xff]  ;;  %v6045_v30 = vpack.c.bf16 %v1242_v17, %v1240_v58  ;;  %v2284_v17 = vld [vmem:[%s7478_s22 + $0x3fc0] sm:$0xff] }
 0x416   : > { %v1262_v58 = vld [vmem:[%s7478_s22 + $0x1fd0] sm:$0xff] }
 0x417   : > { %6026 = vmatpush1.bf16.msra.mxu1 %v6025_v62  ;;  %v7069_v62 = vpack.c.bf16 %v2266_v60, %v2264_v15  ;;  %v7087_v15 = vpack.c.bf16 %v2287_v49, %v2285_v5  ;;  %v1265_v60 = vld [vmem:[%s7478_s22 + $0x1fe8] sm:$0xff] }
 0x418   : > { %7050 = vmatpush1.bf16.msra.mxu0 %v7049_v23  ;;  %6028 = vmatprep.subr.bf16.mxu1 %v6027_v39  ;;  %v6047_v23 = vpack.c.bf16 %v1247_v61, %v1245_v21  ;;  %v1244_v39 = vld [vmem:[%s7478_s22 + $0x1f40] sm:$0xff]  ;;  %v1267_v21 = vld [vmem:[%s7478_s22 + $0x1ff8] sm:$0xff]  ;;  %v2289_v61 = vld [vmem:[%s7478_s22 + $0x3fe8] sm:$0xff] }
 0x419   : > { %7052 = vmatprep.subr.bf16.mxu0 %v7051_v4  ;;  %v2270_v4 = vld [vmem:[%s7478_s22 + $0x3f50] sm:$0xff]  ;;  %v6049_v13 = vpack.c.bf16 %v1246_v1, %v1244_v39  ;;  %v7091_v1 = vpack.c.bf16 %v2291_v19, %v2289_v61 }
 0x41a   : > { %v1266_v39 = vld [vmem:[%s7478_s22 + $0x1ff0] sm:$0xff] }
 0x41b   : > { %6030 = vmatpush1.bf16.msra.mxu1 %v6029_v37  ;;  %v7073_v37 = vpack.c.bf16 %v2270_v4, %v2268_v3  ;;  %v2288_v3 = vld [vmem:[%s7478_s22 + $0x3fe0] sm:$0xff] }
 0x41c   : > { %7054 = vmatpush1.bf16.msra.mxu0 %v7053_v14  ;;  %6032 = vmatprep.subr.bf16.mxu1 %v6031_v16  ;;  %v6051_v14 = vpack.c.bf16 %v1251_v8, %v1249_v6  ;;  %v1248_v16 = vld [vmem:[%s7478_s22 + $0x1f60] sm:$0xff] }
 0x41d   : > { %7056 = vmatprep.subr.bf16.mxu0 %v7055_v20  ;;  %v2274_v20 = vld [vmem:[%s7478_s22 + $0x3f70] sm:$0xff]  ;;  %v6053_v25 = vpack.c.bf16 %v1250_v18, %v1248_v16  ;;  %v227_v18 = vld [vmem:[%s7491_s27] sm:$0xf] }
 0x41f   : > { %6034 = vmatpush1.bf16.msra.mxu1 %v6033_v53  ;;  %v7077_v53 = vpack.c.bf16 %v2274_v20, %v2272_v0 }
 0x420   : > { %7058 = vmatpush1.bf16.msra.mxu0 %v7057_v27  ;;  %6036 = vmatprep.subr.bf16.mxu1 %v6035_v50  ;;  %v6055_v27 = vpack.c.bf16 %v1255_v46, %v1253_v22  ;;  %v1252_v50 = vld [vmem:[%s7478_s22 + $0x1f80] sm:$0xff] }
 0x421   : > { %7060 = vmatprep.subr.bf16.mxu0 %v7059_v31  ;;  %v2278_v31 = vld [vmem:[%s7478_s22 + $0x3f90] sm:$0xff]  ;;  %v6057_v59 = vpack.c.bf16 %v1254_v63, %v1252_v50 }
 0x423   : > { %6038 = vmatpush1.bf16.msra.mxu1 %v6037_v7  ;;  %v7081_v7 = vpack.c.bf16 %v2278_v31, %v2276_v28 }
 0x424   : > { %7062 = vmatpush1.bf16.msra.mxu0 %v7061_v36  ;;  %6040 = vmatprep.subr.bf16.mxu1 %v6039_v38  ;;  %v6059_v36 = vpack.c.bf16 %v1259_v33, %v1257_v55  ;;  %v1256_v38 = vld [vmem:[%s7478_s22 + $0x1fa0] sm:$0xff] }
 0x425   : > { %7064 = vmatprep.subr.bf16.mxu0 %v7063_v44  ;;  %v2282_v44 = vld [vmem:[%s7478_s22 + $0x3fb0] sm:$0xff]  ;;  %v6061_v51 = vpack.c.bf16 %v1258_v40, %v1256_v38 }
 0x427   : > { %6042 = vmatpush1.bf16.msra.mxu1 %v6041_v54  ;;  %v7085_v54 = vpack.c.bf16 %v2282_v44, %v2280_v41 }
 0x428   : > { %7066 = vmatpush1.bf16.msra.mxu0 %v7065_v11  ;;  %6044 = vmatprep.subr.bf16.mxu1 %v6043_v56  ;;  %v6063_v11 = vpack.c.bf16 %v1263_v48, %v1261_v45  ;;  %v1260_v56 = vld [vmem:[%s7478_s22 + $0x1fc0] sm:$0xff] }
 0x429   : > { %7068 = vmatprep.subr.bf16.mxu0 %v7067_v47  ;;  %v2286_v47 = vld [vmem:[%s7478_s22 + $0x3fd0] sm:$0xff]  ;;  %v6065_v35 = vpack.c.bf16 %v1262_v58, %v1260_v56 }
 0x42b   : > { %6046 = vmatpush1.bf16.msra.mxu1 %v6045_v30  ;;  %v7089_v30 = vpack.c.bf16 %v2286_v47, %v2284_v17 }
 0x42c   : > { %7070 = vmatpush1.bf16.msra.mxu0 %v7069_v62  ;;  %6048 = vmatprep.subr.bf16.mxu1 %v6047_v23  ;;  %v6067_v62 = vpack.c.bf16 %v1267_v21, %v1265_v60  ;;  %v1264_v23 = vld [vmem:[%s7478_s22 + $0x1fe0] sm:$0xff] }
 0x42d   : > { %7072 = vmatprep.subr.bf16.mxu0 %v7071_v42  ;;  %v2290_v42 = vld [vmem:[%s7478_s22 + $0x3ff0] sm:$0xff]  ;;  %v6069_v4 = vpack.c.bf16 %v1266_v39, %v1264_v23 }
 0x42e   : > { %v7093_v6 = vpack.c.bf16 %v2290_v42, %v2288_v3 }
 0x42f   : > { %6050 = vmatpush1.bf16.msra.mxu1 %v6049_v13 }
 0x430   : > { %7074 = vmatpush1.bf16.msra.mxu0 %v7073_v37  ;;  %6052 = vmatprep.subr.bf16.mxu1 %v6051_v14 }
 0x431   : > { %7076 = vmatprep.subr.bf16.mxu0 %v7075_v26 }
 0x433   : > { %6054 = vmatpush1.bf16.msra.mxu1 %v6053_v25 }
 0x434   : > { %7078 = vmatpush1.bf16.msra.mxu0 %v7077_v53  ;;  %6056 = vmatprep.subr.bf16.mxu1 %v6055_v27 }
 0x435   : > { %7080 = vmatprep.subr.bf16.mxu0 %v7079_v57 }
 0x437   : > { %6058 = vmatpush1.bf16.msra.mxu1 %v6057_v59 }
 0x438   : > { %7082 = vmatpush1.bf16.msra.mxu0 %v7081_v7  ;;  %6060 = vmatprep.subr.bf16.mxu1 %v6059_v36 }
 0x439   : > { %7084 = vmatprep.subr.bf16.mxu0 %v7083_v43 }
 0x43b   : > { %6062 = vmatpush1.bf16.msra.mxu1 %v6061_v51 }
 0x43c   : > { %7086 = vmatpush1.bf16.msra.mxu0 %v7085_v54  ;;  %6064 = vmatprep.subr.bf16.mxu1 %v6063_v11 }
 0x43d   : > { %7088 = vmatprep.subr.bf16.mxu0 %v7087_v15 }
 0x43f   : > { %6066 = vmatpush1.bf16.msra.mxu1 %v6065_v35 }
 0x440   : > { %7090 = vmatpush1.bf16.msra.mxu0 %v7089_v30  ;;  %6068 = vmatprep.subr.bf16.mxu1 %v6067_v62 }
 0x441   : > { %7092 = vmatprep.subr.bf16.mxu0 %v7091_v1 }
 0x443   : > { %6070 = vmatpush1.bf16.msra.mxu1 %v6069_v4 }
 0x444   : > { %7094 = vmatpush1.bf16.msra.mxu0 %v7093_v6 }
 0x446   : > { %3774 = vmatmul.mubr.f32.vlgmr.msra.gmra.mrb[0].mxu1 %v9707_v2 }
 0x447   : > { %4910 = vmatmul.mubr.f32.vlgmr.msra.gmra.mrb[0].mxu0 %v9712_v52 }
 0x519   : > { %v3775_v8 = vpop.f32.mrb[0].mxu1 }
 0x51a   : > { %v4911_v9 = vpop.f32.mrb[0].mxu0  ;;  %v3777_v10 = vpop.f32.mrb[1].mxu1 }
 0x51b   : > { %v7095_v13 = vadd.f32 %v4911_v9, %v3775_v8  ;;  %v4913_v37 = vpop.f32.mrb[1].mxu0 }
 0x51c   : > { %v7096_v14 = vadd.f32 %v4913_v37, %v3777_v10 }
 0x51e   : > { %v4918_v16 = vcombine.low %v7095_v13, %v7096_v14 }
 0x520   : > { %v4925_v0 = vrot.slane %v4918_v16, %v7592_v12 }
 0x522   : > { %v4927_v26 = vadd.f32 %v4925_v0, %v227_v18 }
 0x524   : > { %4928 = vst [vmem:[%s7491_s27] sm:$0xf] %v4927_v26 }
 0x525 PF: > { %s15_s16 = sadd.s32 1, %s7344_s16   ;;  %s9871_s9 = smov %s7320_s10 }
 0x526   : > { %p12_p6 = scmp.ge.s32.totalorder %s15_s16, 10   ;;  %s9872_s10 = smov %s7324_s11 }
 0x527   : > { %s9873_s11 = smov %s7432_s3  ;;  %s9874_s12 = smov %s7336_s14 }
 0x528   : > { %s9875_s13 = smov %s7340_s15  ;;  %s9876_s14 = smov %s9879_s18 }
 0x529   : > { %s9877_s15 = smov %s9883_s19  ;;  %14 = sbr.rel (!%p12_p6) target bundleno = 5 (0x5), region = 75 }
 0x530   :  { %4950 = vsyncpa [#allocation3], 1 }
 0x531   :  { %4952 = vsyncpa [#allocation3 + $0x1], 1 }

</bundles_post_ra>
